<compile_context>
chip_gen: v5e
topology: v5e:2x2
jax: 0.10.0
libtpu: 0.0.40
codegen_flags: <defaults>
</compile_context>

<pallas_src>
import functools

import jax
import jax.numpy as jnp
from jax.experimental import pallas as pl
from jax.experimental.pallas import tpu as pltpu


# ----------------------------- Pallas kernels ------------------------------ #

def _fused_matmul_kernel(*refs, relu, has_res):
    """out = [relu]( (x @ w) * scale + shift [+ residual] ), K-tiled, f32 accumulate."""
    if has_res:
        x_ref, w_ref, sc_ref, sh_ref, res_ref, o_ref, acc_ref = refs
    else:
        x_ref, w_ref, sc_ref, sh_ref, o_ref, acc_ref = refs
        res_ref = None

    k = pl.program_id(2)

    @pl.when(k == 0)
    def _init():
        acc_ref[...] = jnp.zeros_like(acc_ref)

    # bf16 x bf16 -> f32 accumulation on the MXU.
    acc_ref[...] += jnp.dot(x_ref[...], w_ref[...],
                            preferred_element_type=jnp.float32)

    @pl.when(k == pl.num_programs(2) - 1)
    def _finalize():
        y = acc_ref[...] * sc_ref[...] + sh_ref[...]   # folded eval-mode BatchNorm
        if has_res:
            y = y + res_ref[...]                        # fused residual add
        if relu:
            y = jnp.maximum(y, 0.0)                     # fused ReLU
        o_ref[...] = y


def _round_up(x, m):
    return (x + m - 1) // m * m


def fused_conv_matmul(x, w, scale, shift, residual=None, relu=True):
    """Tiled fused (x @ w) * scale + shift [+ residual] [-> relu].

    x: (M, K), w: (K, N) bf16, scale/shift: (N,) f32, residual: optional (M, N) f32.
    Returns (M, N) f32.  N/K are padded to 128-multiples (lane-dense, MXU-aligned),
    M to a multiple of 8; padding is zero so it does not change results.
    """
    M, K = x.shape
    N = w.shape[1]

    tm = min(256, _round_up(M, 8))
    tn = min(256, _round_up(N, 128))
    tk = min(512, _round_up(K, 128))
    Mp, Kp, Np = _round_up(M, tm), _round_up(K, tk), _round_up(N, tn)

    xp = jnp.pad(x, ((0, Mp - M), (0, Kp - K))).astype(jnp.bfloat16)
    wp = jnp.pad(w, ((0, Kp - K), (0, Np - N))).astype(jnp.bfloat16)
    scp = jnp.pad(scale.reshape(1, N).astype(jnp.float32), ((0, 0), (0, Np - N)))
    shp = jnp.pad(shift.reshape(1, N).astype(jnp.float32), ((0, 0), (0, Np - N)))

    inputs = [xp, wp, scp, shp]
    in_specs = [
        pl.BlockSpec((tm, tk), lambda i, j, k: (i, k)),
        pl.BlockSpec((tk, tn), lambda i, j, k: (k, j)),
        pl.BlockSpec((1, tn), lambda i, j, k: (0, j)),
        pl.BlockSpec((1, tn), lambda i, j, k: (0, j)),
    ]
    has_res = residual is not None
    if has_res:
        rp = jnp.pad(residual.astype(jnp.float32), ((0, Mp - M), (0, Np - N)))
        inputs.append(rp)
        in_specs.append(pl.BlockSpec((tm, tn), lambda i, j, k: (i, j)))

    out = pl.pallas_call(
        functools.partial(_fused_matmul_kernel, relu=relu, has_res=has_res),
        grid=(Mp // tm, Np // tn, Kp // tk),
        in_specs=in_specs,
        out_specs=pl.BlockSpec((tm, tn), lambda i, j, k: (i, j)),
        out_shape=jax.ShapeDtypeStruct((Mp, Np), jnp.float32),
        scratch_shapes=[pltpu.VMEM((tm, tn), jnp.float32)],
        compiler_params=pltpu.CompilerParams(
            dimension_semantics=("parallel", "parallel", "arbitrary"),
            vmem_limit_bytes=32 * 1024 * 1024,
        ),
    )(*inputs)
    return out[:M, :N]


def _maxpool9_kernel(t_ref, o_ref):
    # elementwise max over the 9 window taps (leading axis); channels stay on lanes
    o_ref[...] = jnp.max(t_ref[...], axis=0)


def maxpool_3x3_s2_p1(x_nhwc):
    """PyTorch MaxPool2d(kernel_size=3, stride=2, padding=1), channels-last."""
    B, H, W, C = x_nhwc.shape
    neg = jnp.finfo(jnp.float32).min          # max-pool padding behaves like -inf
    xp = jnp.pad(x_nhwc, ((0, 0), (1, 1), (1, 1), (0, 0)), constant_values=neg)
    Ho = (H + 2 - 3) // 2 + 1
    Wo = (W + 2 - 3) // 2 + 1
    taps = [xp[:, di:di + 2 * Ho:2, dj:dj + 2 * Wo:2, :]
            for di in range(3) for dj in range(3)]
    M = B * Ho * Wo
    t = jnp.stack(taps, axis=0).reshape(9, M, C)
    tm = 256 if M % 256 == 0 else M
    out = pl.pallas_call(
        _maxpool9_kernel,
        grid=(M // tm,),
        in_specs=[pl.BlockSpec((9, tm, C), lambda i: (0, i, 0))],
        out_specs=pl.BlockSpec((tm, C), lambda i: (i, 0)),
        out_shape=jax.ShapeDtypeStruct((M, C), jnp.float32),
        compiler_params=pltpu.CompilerParams(dimension_semantics=("parallel",)),
    )(t)
    return out.reshape(B, Ho, Wo, C)


def _global_avgpool_kernel(x_ref, o_ref):
    o_ref[...] = jnp.mean(x_ref[...], axis=1)


def global_avg_pool(x_nhwc):
    """AdaptiveAvgPool2d(1) + flatten -> (B, C)."""
    B, H, W, C = x_nhwc.shape
    x = x_nhwc.reshape(B, H * W, C)
    return pl.pallas_call(
        _global_avgpool_kernel,
        out_shape=jax.ShapeDtypeStruct((B, C), jnp.float32),
    )(x)


# ----------------------------- conv plumbing ------------------------------- #

def _im2col(x_nhwc, kh, kw, stride, pad):
    """Extract (kh,kw) patches -> (B*Ho*Wo, kh*kw*C) rows (XLA side; matmul is Pallas)."""
    # TODO(synk): implicit im2col inside the kernel (tap axis on the K grid) would
    # remove this XLA materialization; kept in the wrapper for this scaled demo.
    if pad:
        x_nhwc = jnp.pad(x_nhwc, ((0, 0), (pad, pad), (pad, pad), (0, 0)))
    B, H, W, C = x_nhwc.shape
    Ho = (H - kh) // stride + 1
    Wo = (W - kw) // stride + 1
    taps = [x_nhwc[:, di:di + stride * Ho:stride, dj:dj + stride * Wo:stride, :]
            for di in range(kh) for dj in range(kw)]
    p = jnp.stack(taps, axis=3)                        # (B, Ho, Wo, kh*kw, C)
    return p.reshape(B * Ho * Wo, kh * kw * C), Ho, Wo


# --------------------------- model (glue in JAX) ---------------------------- #

CFG = dict(
    in_chans=3,
    stem_width=16,                    # ResNet-50: 64
    stage_widths=(16, 32, 64, 128),   # ResNet-50: (64, 128, 256, 512)
    layers=(2, 2, 2, 2),              # ResNet-50: (3, 4, 6, 3) — scaled for the demo
    expansion=4,
    bn_eps=1e-5,
)


def init_params(key):
    cfg = CFG
    exp = cfg["expansion"]

    def conv_mat(k, fan_in, fan_out):
        # He init; stored as bf16 matmul matrices (f32 accumulation in the kernel).
        w = (2.0 / fan_in) ** 0.5 * jax.random.normal(k, (fan_in, fan_out), jnp.float32)
        return w.astype(jnp.bfloat16)

    def bn_fold(k, n):
        # eval-mode BatchNorm folded to per-channel scale/shift.
        kg, kb, km, kv = jax.random.split(k, 4)
        gamma = 1.0 + 0.1 * jax.random.normal(kg, (n,), jnp.float32)
        beta = 0.1 * jax.random.normal(kb, (n,), jnp.float32)
        mean = 0.1 * jax.random.normal(km, (n,), jnp.float32)
        var = 1.0 + 0.1 * jax.random.uniform(kv, (n,), jnp.float32)
        scale = gamma * jax.lax.rsqrt(var + cfg["bn_eps"])
        shift = beta - mean * scale
        return scale, shift

    keys = iter(jax.random.split(key, 256))
    params = {"stem_w": conv_mat(next(keys), cfg["in_chans"] * 7 * 7, cfg["stem_width"])}
    params["stem_s"], params["stem_b"] = bn_fold(next(keys), cfg["stem_width"])

    stages = []
    in_ch = cfg["stem_width"]
    for width, n_blocks in zip(cfg["stage_widths"], cfg["layers"]):
        out_ch = width * exp
        blocks = []
        for bi in range(n_blocks):
            blk = {
                "w1": conv_mat(next(keys), in_ch, width),        # 1x1
                "w2": conv_mat(next(keys), width * 9, width),    # 3x3 (im2col rows)
                "w3": conv_mat(next(keys), width, out_ch),       # 1x1
            }
            blk["s1"], blk["b1"] = bn_fold(next(keys), width)
            blk["s2"], blk["b2"] = bn_fold(next(keys), width)
            blk["s3"], blk["b3"] = bn_fold(next(keys), out_ch)
            if bi == 0:  # downsample branch (1x1 strided conv + BN) on stage's 1st block
                blk["wd"] = conv_mat(next(keys), in_ch, out_ch)
                blk["sd"], blk["bd"] = bn_fold(next(keys), out_ch)
            blocks.append(blk)
            in_ch = out_ch
        stages.append(blocks)
    params["stages"] = stages
    return params


def bottleneck(x_nhwc, p, stride):
    """torchvision Bottleneck: 1x1-BN-ReLU, 3x3(s)-BN-ReLU, 1x1-BN, +shortcut, ReLU.

    Each conv is ONE fused Pallas kernel (BN / residual / ReLU in the epilogue):
    3-4 pallas_calls per block instead of ~10 separate conv/BN/ReLU/add passes.
    """
    B, H, W, cin = x_nhwc.shape
    width = p["w1"].shape[1]
    cout = p["w3"].shape[1]

    # conv1 1x1 + BN + ReLU  (1x1 conv == row-wise matmul in channels-last layout)
    h = fused_conv_matmul(x_nhwc.reshape(B * H * W, cin),
                          p["w1"], p["s1"], p["b1"], relu=True)
    h = h.reshape(B, H, W, width)

    # conv2 3x3 (stride) + BN + ReLU
    cols, Ho, Wo = _im2col(h, 3, 3, stride, 1)
    h = fused_conv_matmul(cols, p["w2"], p["s2"], p["b2"], relu=True)

    # shortcut branch
    if "wd" in p:
        xs = x_nhwc[:, ::stride, ::stride, :] if stride > 1 else x_nhwc
        shortcut = fused_conv_matmul(xs.reshape(B * Ho * Wo, cin),
                                     p["wd"], p["sd"], p["bd"], relu=False)
    else:
        shortcut = x_nhwc.reshape(B * Ho * Wo, cout)

    # conv3 1x1 + BN + residual add + ReLU, all fused into one kernel epilogue
    out = fused_conv_matmul(h, p["w3"], p["s3"], p["b3"],
                            residual=shortcut, relu=True)
    return out.reshape(B, Ho, Wo, cout)


def swav_resnet_forward(x_nchw, params):
    """SwAV.forward: x -> resnet50 backbone (fc=Identity) -> (B, feat_dim) features."""
    x = jnp.transpose(x_nchw, (0, 2, 3, 1))            # NCHW -> NHWC (channels on lanes)
    B = x.shape[0]

    # stem: 7x7/s2/p3 conv + BN + ReLU (one fused kernel), then 3x3/s2/p1 max-pool.
    cols, Ho, Wo = _im2col(x, 7, 7, 2, 3)
    h = fused_conv_matmul(cols, params["stem_w"], params["stem_s"], params["stem_b"],
                          relu=True).reshape(B, Ho, Wo, -1)
    h = maxpool_3x3_s2_p1(h)

    for si, stage in enumerate(params["stages"]):
        for bi, blk in enumerate(stage):
            stride = 2 if (si > 0 and bi == 0) else 1
            h = bottleneck(h, blk, stride)

    # AdaptiveAvgPool2d(1) + flatten; fc is Identity -> pooled features.
    return global_avg_pool(h)


# ---------------------------------- main ------------------------------------ #

if __name__ == "__main__":
    key = jax.random.PRNGKey(0)
    k_in, k_par = jax.random.split(key)

    # Small NCHW image batch; 64x64 keeps every stage's spatial extent >= 2.
    x = jax.random.normal(k_in, (2, 3, 64, 64), jnp.float32)
    params = init_params(k_par)

    fwd = jax.jit(swav_resnet_forward)
    feats = fwd(x, params)
    jax.block_until_ready(feats)

    feat_dim = CFG["stage_widths"][-1] * CFG["expansion"]   # 512 in the scaled model
    assert feats.shape == (2, feat_dim) and feats.dtype == jnp.float32
    print("KERNEL_OK")
</pallas_src>

<mosaic_0001>
module attributes {stable_mosaic.version = 11 : i64} {
  func.func @_fused_matmul_kernel(%arg0: i32, %arg1: i32, %arg2: i32, %arg3: memref<256x256xbf16, #tpu.memory_space<vmem>>, %arg4: memref<256x128xbf16, #tpu.memory_space<vmem>>, %arg5: memref<1x128xf32, #tpu.memory_space<vmem>>, %arg6: memref<1x128xf32, #tpu.memory_space<vmem>>, %arg7: memref<256x128xf32, #tpu.memory_space<vmem>>, %arg8: memref<256x128xf32, #tpu.memory_space<vmem>>) attributes {dimension_semantics = [#tpu.dimension_semantics<parallel>, #tpu.dimension_semantics<parallel>, #tpu.dimension_semantics<arbitrary>], iteration_bounds = array<i64: 8, 1, 1>, scalar_prefetch = 0 : i64, scratch_operands = 1 : i64, tpu.core_type = #tpu.core_type<tc>, window_params = [{transform_indices = @transform_0, window_bounds = array<i64: 256, 256>}, {transform_indices = @transform_1, window_bounds = array<i64: 256, 128>}, {transform_indices = @transform_2, window_bounds = array<i64: 1, 128>}, {transform_indices = @transform_3, window_bounds = array<i64: 1, 128>}, {transform_indices = @transform_4, window_bounds = array<i64: 256, 128>}]} {
    %c0_i32 = arith.constant 0 : i32
    %0 = arith.cmpi eq, %arg2, %c0_i32 : i32
    %1 = arith.extui %0 : i1 to i32
    %c0_i32_0 = arith.constant 0 : i32
    %2 = arith.cmpi ne, %1, %c0_i32_0 : i32
    scf.if %2 {
      %cst_10 = arith.constant 0.000000e+00 : f32
      %12 = vector.broadcast %cst_10 : f32 to vector<256x128xf32>
      %c0_11 = arith.constant 0 : index
      %c0_12 = arith.constant 0 : index
      %13 = vector.load %arg8[%c0_11, %c0_12] : memref<256x128xf32, #tpu.memory_space<vmem>>, vector<256x128xf32>
      tpu.vector_store %arg8[%c0_11, %c0_12], %12 {strides = array<i32>} : memref<256x128xf32, #tpu.memory_space<vmem>>, vector<256x128xf32>,
    } else {
    }
    %c0 = arith.constant 0 : index
    %c0_1 = arith.constant 0 : index
    %3 = vector.load %arg8[%c0, %c0_1] : memref<256x128xf32, #tpu.memory_space<vmem>>, vector<256x128xf32>
    %c0_2 = arith.constant 0 : index
    %c0_3 = arith.constant 0 : index
    %4 = vector.load %arg3[%c0_2, %c0_3] : memref<256x256xbf16, #tpu.memory_space<vmem>>, vector<256x256xbf16>
    %c0_4 = arith.constant 0 : index
    %c0_5 = arith.constant 0 : index
    %5 = vector.load %arg4[%c0_4, %c0_5] : memref<256x128xbf16, #tpu.memory_space<vmem>>, vector<256x128xbf16>
    %cst = arith.constant dense<0.000000e+00> : vector<256x128xf32>
    %6 = tpu.matmul %4, %5, %cst {dimension_numbers = #tpu.dot_dimension_numbers<[1], [0], [0], [1], [0, 0, 1, 1], [], []>} : vector<256x256xbf16>, vector<256x128xbf16>, vector<256x128xf32> -> vector<256x128xf32>
    %7 = arith.addf %3, %6 : vector<256x128xf32>
    %c0_6 = arith.constant 0 : index
    %c0_7 = arith.constant 0 : index
    %8 = vector.load %arg8[%c0_6, %c0_7] : memref<256x128xf32, #tpu.memory_space<vmem>>, vector<256x128xf32>
    tpu.vector_store %arg8[%c0_6, %c0_7], %7 {strides = array<i32>} : memref<256x128xf32, #tpu.memory_space<vmem>>, vector<256x128xf32>,
    %c0_i32_8 = arith.constant 0 : i32
    %9 = arith.cmpi eq, %arg2, %c0_i32_8 : i32
    %10 = arith.extui %9 : i1 to i32
    %c0_i32_9 = arith.constant 0 : i32
    %11 = arith.cmpi ne, %10, %c0_i32_9 : i32
    scf.if %11 {
      %c0_10 = arith.constant 0 : index
      %c0_11 = arith.constant 0 : index
      %12 = vector.load %arg8[%c0_10, %c0_11] : memref<256x128xf32, #tpu.memory_space<vmem>>, vector<256x128xf32>
      %c0_12 = arith.constant 0 : index
      %c0_13 = arith.constant 0 : index
      %13 = vector.load %arg5[%c0_12, %c0_13] : memref<1x128xf32, #tpu.memory_space<vmem>>, vector<1x128xf32>
      %14 = vector.broadcast %13 : vector<1x128xf32> to vector<256x128xf32>
      %15 = arith.mulf %12, %14 : vector<256x128xf32>
      %c0_14 = arith.constant 0 : index
      %c0_15 = arith.constant 0 : index
      %16 = vector.load %arg6[%c0_14, %c0_15] : memref<1x128xf32, #tpu.memory_space<vmem>>, vector<1x128xf32>
      %17 = vector.broadcast %16 : vector<1x128xf32> to vector<256x128xf32>
      %18 = arith.addf %15, %17 : vector<256x128xf32>
      %cst_16 = arith.constant 0.000000e+00 : f32
      %19 = vector.broadcast %cst_16 : f32 to vector<256x128xf32>
      %20 = arith.maximumf %18, %19 : vector<256x128xf32>
      %c0_17 = arith.constant 0 : index
      %c0_18 = arith.constant 0 : index
      %21 = vector.load %arg7[%c0_17, %c0_18] : memref<256x128xf32, #tpu.memory_space<vmem>>, vector<256x128xf32>
      tpu.vector_store %arg7[%c0_17, %c0_18], %20 {strides = array<i32>} : memref<256x128xf32, #tpu.memory_space<vmem>>, vector<256x128xf32>,
    } else {
    }
    return
  }
  func.func @transform_0(%arg0: i32, %arg1: i32, %arg2: i32) -> (i32, i32) {
    %c0_i32 = arith.constant 0 : i32
    return %arg0, %arg2 : i32, i32
  }
  func.func @transform_1(%arg0: i32, %arg1: i32, %arg2: i32) -> (i32, i32) {
    %c0_i32 = arith.constant 0 : i32
    return %arg2, %arg1 : i32, i32
  }
  func.func @transform_2(%arg0: i32, %arg1: i32, %arg2: i32) -> (i32, i32) {
    %c0_i32 = arith.constant 0 : i32
    %c0_i32_0 = arith.constant 0 : i32
    return %c0_i32, %arg1 : i32, i32
  }
  func.func @transform_3(%arg0: i32, %arg1: i32, %arg2: i32) -> (i32, i32) {
    %c0_i32 = arith.constant 0 : i32
    %c0_i32_0 = arith.constant 0 : i32
    return %c0_i32, %arg1 : i32, i32
  }
  func.func @transform_4(%arg0: i32, %arg1: i32, %arg2: i32) -> (i32, i32) {
    %c0_i32 = arith.constant 0 : i32
    return %arg0, %arg1 : i32, i32
  }
}

module attributes {stable_mosaic.version = 11 : i64} {
  func.func @_maxpool9_kernel(%arg0: i32, %arg1: memref<9x256x16xf32, #tpu.memory_space<vmem>>, %arg2: memref<256x16xf32, #tpu.memory_space<vmem>>) attributes {dimension_semantics = [#tpu.dimension_semantics<parallel>], iteration_bounds = array<i64: 2>, scalar_prefetch = 0 : i64, scratch_operands = 0 : i64, tpu.core_type = #tpu.core_type<tc>, window_params = [{transform_indices = @transform_0, window_bounds = array<i64: 9, 256, 16>}, {transform_indices = @transform_1, window_bounds = array<i64: 256, 16>}]} {
    %c0 = arith.constant 0 : index
    %c0_0 = arith.constant 0 : index
    %c0_1 = arith.constant 0 : index
    %0 = vector.load %arg1[%c0, %c0_0, %c0_1] : memref<9x256x16xf32, #tpu.memory_space<vmem>>, vector<9x256x16xf32>
    %cst = arith.constant dense<0xFF800000> : vector<256x16xf32>
    %1 = vector.multi_reduction <maximumf>, %0, %cst [0] : vector<9x256x16xf32> to vector<256x16xf32>
    %c0_2 = arith.constant 0 : index
    %c0_3 = arith.constant 0 : index
    %2 = vector.load %arg2[%c0_2, %c0_3] : memref<256x16xf32, #tpu.memory_space<vmem>>, vector<256x16xf32>
    tpu.vector_store %arg2[%c0_2, %c0_3], %1 {strides = array<i32>} : memref<256x16xf32, #tpu.memory_space<vmem>>, vector<256x16xf32>,
    return
  }
  func.func @transform_0(%arg0: i32) -> (i32, i32, i32) {
    %c0_i32 = arith.constant 0 : i32
    %c0_i32_0 = arith.constant 0 : i32
    %c0_i32_1 = arith.constant 0 : i32
    return %c0_i32, %arg0, %c0_i32_0 : i32, i32, i32
  }
  func.func @transform_1(%arg0: i32) -> (i32, i32) {
    %c0_i32 = arith.constant 0 : i32
    %c0_i32_0 = arith.constant 0 : i32
    return %arg0, %c0_i32 : i32, i32
  }
}

module attributes {stable_mosaic.version = 11 : i64} {
  func.func @_fused_matmul_kernel(%arg0: i32, %arg1: i32, %arg2: i32, %arg3: memref<256x128xbf16, #tpu.memory_space<vmem>>, %arg4: memref<128x128xbf16, #tpu.memory_space<vmem>>, %arg5: memref<1x128xf32, #tpu.memory_space<vmem>>, %arg6: memref<1x128xf32, #tpu.memory_space<vmem>>, %arg7: memref<256x128xf32, #tpu.memory_space<vmem>>, %arg8: memref<256x128xf32, #tpu.memory_space<vmem>>) attributes {dimension_semantics = [#tpu.dimension_semantics<parallel>, #tpu.dimension_semantics<parallel>, #tpu.dimension_semantics<arbitrary>], iteration_bounds = array<i64: 2, 1, 1>, scalar_prefetch = 0 : i64, scratch_operands = 1 : i64, tpu.core_type = #tpu.core_type<tc>, window_params = [{transform_indices = @transform_0, window_bounds = array<i64: 256, 128>}, {transform_indices = @transform_1, window_bounds = array<i64: 128, 128>}, {transform_indices = @transform_2, window_bounds = array<i64: 1, 128>}, {transform_indices = @transform_3, window_bounds = array<i64: 1, 128>}, {transform_indices = @transform_4, window_bounds = array<i64: 256, 128>}]} {
    %c0_i32 = arith.constant 0 : i32
    %0 = arith.cmpi eq, %arg2, %c0_i32 : i32
    %1 = arith.extui %0 : i1 to i32
    %c0_i32_0 = arith.constant 0 : i32
    %2 = arith.cmpi ne, %1, %c0_i32_0 : i32
    scf.if %2 {
      %cst_10 = arith.constant 0.000000e+00 : f32
      %12 = vector.broadcast %cst_10 : f32 to vector<256x128xf32>
      %c0_11 = arith.constant 0 : index
      %c0_12 = arith.constant 0 : index
      %13 = vector.load %arg8[%c0_11, %c0_12] : memref<256x128xf32, #tpu.memory_space<vmem>>, vector<256x128xf32>
      tpu.vector_store %arg8[%c0_11, %c0_12], %12 {strides = array<i32>} : memref<256x128xf32, #tpu.memory_space<vmem>>, vector<256x128xf32>,
    } else {
    }
    %c0 = arith.constant 0 : index
    %c0_1 = arith.constant 0 : index
    %3 = vector.load %arg8[%c0, %c0_1] : memref<256x128xf32, #tpu.memory_space<vmem>>, vector<256x128xf32>
    %c0_2 = arith.constant 0 : index
    %c0_3 = arith.constant 0 : index
    %4 = vector.load %arg3[%c0_2, %c0_3] : memref<256x128xbf16, #tpu.memory_space<vmem>>, vector<256x128xbf16>
    %c0_4 = arith.constant 0 : index
    %c0_5 = arith.constant 0 : index
    %5 = vector.load %arg4[%c0_4, %c0_5] : memref<128x128xbf16, #tpu.memory_space<vmem>>, vector<128x128xbf16>
    %cst = arith.constant dense<0.000000e+00> : vector<256x128xf32>
    %6 = tpu.matmul %4, %5, %cst {dimension_numbers = #tpu.dot_dimension_numbers<[1], [0], [0], [1], [0, 0, 1, 1], [], []>} : vector<256x128xbf16>, vector<128x128xbf16>, vector<256x128xf32> -> vector<256x128xf32>
    %7 = arith.addf %3, %6 : vector<256x128xf32>
    %c0_6 = arith.constant 0 : index
    %c0_7 = arith.constant 0 : index
    %8 = vector.load %arg8[%c0_6, %c0_7] : memref<256x128xf32, #tpu.memory_space<vmem>>, vector<256x128xf32>
    tpu.vector_store %arg8[%c0_6, %c0_7], %7 {strides = array<i32>} : memref<256x128xf32, #tpu.memory_space<vmem>>, vector<256x128xf32>,
    %c0_i32_8 = arith.constant 0 : i32
    %9 = arith.cmpi eq, %arg2, %c0_i32_8 : i32
    %10 = arith.extui %9 : i1 to i32
    %c0_i32_9 = arith.constant 0 : i32
    %11 = arith.cmpi ne, %10, %c0_i32_9 : i32
    scf.if %11 {
      %c0_10 = arith.constant 0 : index
      %c0_11 = arith.constant 0 : index
      %12 = vector.load %arg8[%c0_10, %c0_11] : memref<256x128xf32, #tpu.memory_space<vmem>>, vector<256x128xf32>
      %c0_12 = arith.constant 0 : index
      %c0_13 = arith.constant 0 : index
      %13 = vector.load %arg5[%c0_12, %c0_13] : memref<1x128xf32, #tpu.memory_space<vmem>>, vector<1x128xf32>
      %14 = vector.broadcast %13 : vector<1x128xf32> to vector<256x128xf32>
      %15 = arith.mulf %12, %14 : vector<256x128xf32>
      %c0_14 = arith.constant 0 : index
      %c0_15 = arith.constant 0 : index
      %16 = vector.load %arg6[%c0_14, %c0_15] : memref<1x128xf32, #tpu.memory_space<vmem>>, vector<1x128xf32>
      %17 = vector.broadcast %16 : vector<1x128xf32> to vector<256x128xf32>
      %18 = arith.addf %15, %17 : vector<256x128xf32>
      %cst_16 = arith.constant 0.000000e+00 : f32
      %19 = vector.broadcast %cst_16 : f32 to vector<256x128xf32>
      %20 = arith.maximumf %18, %19 : vector<256x128xf32>
      %c0_17 = arith.constant 0 : index
      %c0_18 = arith.constant 0 : index
      %21 = vector.load %arg7[%c0_17, %c0_18] : memref<256x128xf32, #tpu.memory_space<vmem>>, vector<256x128xf32>
      tpu.vector_store %arg7[%c0_17, %c0_18], %20 {strides = array<i32>} : memref<256x128xf32, #tpu.memory_space<vmem>>, vector<256x128xf32>,
    } else {
    }
    return
  }
  func.func @transform_0(%arg0: i32, %arg1: i32, %arg2: i32) -> (i32, i32) {
    %c0_i32 = arith.constant 0 : i32
    return %arg0, %arg2 : i32, i32
  }
  func.func @transform_1(%arg0: i32, %arg1: i32, %arg2: i32) -> (i32, i32) {
    %c0_i32 = arith.constant 0 : i32
    return %arg2, %arg1 : i32, i32
  }
  func.func @transform_2(%arg0: i32, %arg1: i32, %arg2: i32) -> (i32, i32) {
    %c0_i32 = arith.constant 0 : i32
    %c0_i32_0 = arith.constant 0 : i32
    return %c0_i32, %arg1 : i32, i32
  }
  func.func @transform_3(%arg0: i32, %arg1: i32, %arg2: i32) -> (i32, i32) {
    %c0_i32 = arith.constant 0 : i32
    %c0_i32_0 = arith.constant 0 : i32
    return %c0_i32, %arg1 : i32, i32
  }
  func.func @transform_4(%arg0: i32, %arg1: i32, %arg2: i32) -> (i32, i32) {
    %c0_i32 = arith.constant 0 : i32
    return %arg0, %arg1 : i32, i32
  }
}

module attributes {stable_mosaic.version = 11 : i64} {
  func.func @_fused_matmul_kernel(%arg0: i32, %arg1: i32, %arg2: i32, %arg3: memref<256x256xbf16, #tpu.memory_space<vmem>>, %arg4: memref<256x128xbf16, #tpu.memory_space<vmem>>, %arg5: memref<1x128xf32, #tpu.memory_space<vmem>>, %arg6: memref<1x128xf32, #tpu.memory_space<vmem>>, %arg7: memref<256x128xf32, #tpu.memory_space<vmem>>, %arg8: memref<256x128xf32, #tpu.memory_space<vmem>>) attributes {dimension_semantics = [#tpu.dimension_semantics<parallel>, #tpu.dimension_semantics<parallel>, #tpu.dimension_semantics<arbitrary>], iteration_bounds = array<i64: 2, 1, 1>, scalar_prefetch = 0 : i64, scratch_operands = 1 : i64, tpu.core_type = #tpu.core_type<tc>, window_params = [{transform_indices = @transform_0, window_bounds = array<i64: 256, 256>}, {transform_indices = @transform_1, window_bounds = array<i64: 256, 128>}, {transform_indices = @transform_2, window_bounds = array<i64: 1, 128>}, {transform_indices = @transform_3, window_bounds = array<i64: 1, 128>}, {transform_indices = @transform_4, window_bounds = array<i64: 256, 128>}]} {
    %c0_i32 = arith.constant 0 : i32
    %0 = arith.cmpi eq, %arg2, %c0_i32 : i32
    %1 = arith.extui %0 : i1 to i32
    %c0_i32_0 = arith.constant 0 : i32
    %2 = arith.cmpi ne, %1, %c0_i32_0 : i32
    scf.if %2 {
      %cst_10 = arith.constant 0.000000e+00 : f32
      %12 = vector.broadcast %cst_10 : f32 to vector<256x128xf32>
      %c0_11 = arith.constant 0 : index
      %c0_12 = arith.constant 0 : index
      %13 = vector.load %arg8[%c0_11, %c0_12] : memref<256x128xf32, #tpu.memory_space<vmem>>, vector<256x128xf32>
      tpu.vector_store %arg8[%c0_11, %c0_12], %12 {strides = array<i32>} : memref<256x128xf32, #tpu.memory_space<vmem>>, vector<256x128xf32>,
    } else {
    }
    %c0 = arith.constant 0 : index
    %c0_1 = arith.constant 0 : index
    %3 = vector.load %arg8[%c0, %c0_1] : memref<256x128xf32, #tpu.memory_space<vmem>>, vector<256x128xf32>
    %c0_2 = arith.constant 0 : index
    %c0_3 = arith.constant 0 : index
    %4 = vector.load %arg3[%c0_2, %c0_3] : memref<256x256xbf16, #tpu.memory_space<vmem>>, vector<256x256xbf16>
    %c0_4 = arith.constant 0 : index
    %c0_5 = arith.constant 0 : index
    %5 = vector.load %arg4[%c0_4, %c0_5] : memref<256x128xbf16, #tpu.memory_space<vmem>>, vector<256x128xbf16>
    %cst = arith.constant dense<0.000000e+00> : vector<256x128xf32>
    %6 = tpu.matmul %4, %5, %cst {dimension_numbers = #tpu.dot_dimension_numbers<[1], [0], [0], [1], [0, 0, 1, 1], [], []>} : vector<256x256xbf16>, vector<256x128xbf16>, vector<256x128xf32> -> vector<256x128xf32>
    %7 = arith.addf %3, %6 : vector<256x128xf32>
    %c0_6 = arith.constant 0 : index
    %c0_7 = arith.constant 0 : index
    %8 = vector.load %arg8[%c0_6, %c0_7] : memref<256x128xf32, #tpu.memory_space<vmem>>, vector<256x128xf32>
    tpu.vector_store %arg8[%c0_6, %c0_7], %7 {strides = array<i32>} : memref<256x128xf32, #tpu.memory_space<vmem>>, vector<256x128xf32>,
    %c0_i32_8 = arith.constant 0 : i32
    %9 = arith.cmpi eq, %arg2, %c0_i32_8 : i32
    %10 = arith.extui %9 : i1 to i32
    %c0_i32_9 = arith.constant 0 : i32
    %11 = arith.cmpi ne, %10, %c0_i32_9 : i32
    scf.if %11 {
      %c0_10 = arith.constant 0 : index
      %c0_11 = arith.constant 0 : index
      %12 = vector.load %arg8[%c0_10, %c0_11] : memref<256x128xf32, #tpu.memory_space<vmem>>, vector<256x128xf32>
      %c0_12 = arith.constant 0 : index
      %c0_13 = arith.constant 0 : index
      %13 = vector.load %arg5[%c0_12, %c0_13] : memref<1x128xf32, #tpu.memory_space<vmem>>, vector<1x128xf32>
      %14 = vector.broadcast %13 : vector<1x128xf32> to vector<256x128xf32>
      %15 = arith.mulf %12, %14 : vector<256x128xf32>
      %c0_14 = arith.constant 0 : index
      %c0_15 = arith.constant 0 : index
      %16 = vector.load %arg6[%c0_14, %c0_15] : memref<1x128xf32, #tpu.memory_space<vmem>>, vector<1x128xf32>
      %17 = vector.broadcast %16 : vector<1x128xf32> to vector<256x128xf32>
      %18 = arith.addf %15, %17 : vector<256x128xf32>
      %cst_16 = arith.constant 0.000000e+00 : f32
      %19 = vector.broadcast %cst_16 : f32 to vector<256x128xf32>
      %20 = arith.maximumf %18, %19 : vector<256x128xf32>
      %c0_17 = arith.constant 0 : index
      %c0_18 = arith.constant 0 : index
      %21 = vector.load %arg7[%c0_17, %c0_18] : memref<256x128xf32, #tpu.memory_space<vmem>>, vector<256x128xf32>
      tpu.vector_store %arg7[%c0_17, %c0_18], %20 {strides = array<i32>} : memref<256x128xf32, #tpu.memory_space<vmem>>, vector<256x128xf32>,
    } else {
    }
    return
  }
  func.func @transform_0(%arg0: i32, %arg1: i32, %arg2: i32) -> (i32, i32) {
    %c0_i32 = arith.constant 0 : i32
    return %arg0, %arg2 : i32, i32
  }
  func.func @transform_1(%arg0: i32, %arg1: i32, %arg2: i32) -> (i32, i32) {
    %c0_i32 = arith.constant 0 : i32
    return %arg2, %arg1 : i32, i32
  }
  func.func @transform_2(%arg0: i32, %arg1: i32, %arg2: i32) -> (i32, i32) {
    %c0_i32 = arith.constant 0 : i32
    %c0_i32_0 = arith.constant 0 : i32
    return %c0_i32, %arg1 : i32, i32
  }
  func.func @transform_3(%arg0: i32, %arg1: i32, %arg2: i32) -> (i32, i32) {
    %c0_i32 = arith.constant 0 : i32
    %c0_i32_0 = arith.constant 0 : i32
    return %c0_i32, %arg1 : i32, i32
  }
  func.func @transform_4(%arg0: i32, %arg1: i32, %arg2: i32) -> (i32, i32) {
    %c0_i32 = arith.constant 0 : i32
    return %arg0, %arg1 : i32, i32
  }
}

module attributes {stable_mosaic.version = 11 : i64} {
  func.func @_fused_matmul_kernel(%arg0: i32, %arg1: i32, %arg2: i32, %arg3: memref<256x128xbf16, #tpu.memory_space<vmem>>, %arg4: memref<128x128xbf16, #tpu.memory_space<vmem>>, %arg5: memref<1x128xf32, #tpu.memory_space<vmem>>, %arg6: memref<1x128xf32, #tpu.memory_space<vmem>>, %arg7: memref<256x128xf32, #tpu.memory_space<vmem>>, %arg8: memref<256x128xf32, #tpu.memory_space<vmem>>) attributes {dimension_semantics = [#tpu.dimension_semantics<parallel>, #tpu.dimension_semantics<parallel>, #tpu.dimension_semantics<arbitrary>], iteration_bounds = array<i64: 2, 1, 1>, scalar_prefetch = 0 : i64, scratch_operands = 1 : i64, tpu.core_type = #tpu.core_type<tc>, window_params = [{transform_indices = @transform_0, window_bounds = array<i64: 256, 128>}, {transform_indices = @transform_1, window_bounds = array<i64: 128, 128>}, {transform_indices = @transform_2, window_bounds = array<i64: 1, 128>}, {transform_indices = @transform_3, window_bounds = array<i64: 1, 128>}, {transform_indices = @transform_4, window_bounds = array<i64: 256, 128>}]} {
    %c0_i32 = arith.constant 0 : i32
    %0 = arith.cmpi eq, %arg2, %c0_i32 : i32
    %1 = arith.extui %0 : i1 to i32
    %c0_i32_0 = arith.constant 0 : i32
    %2 = arith.cmpi ne, %1, %c0_i32_0 : i32
    scf.if %2 {
      %cst_10 = arith.constant 0.000000e+00 : f32
      %12 = vector.broadcast %cst_10 : f32 to vector<256x128xf32>
      %c0_11 = arith.constant 0 : index
      %c0_12 = arith.constant 0 : index
      %13 = vector.load %arg8[%c0_11, %c0_12] : memref<256x128xf32, #tpu.memory_space<vmem>>, vector<256x128xf32>
      tpu.vector_store %arg8[%c0_11, %c0_12], %12 {strides = array<i32>} : memref<256x128xf32, #tpu.memory_space<vmem>>, vector<256x128xf32>,
    } else {
    }
    %c0 = arith.constant 0 : index
    %c0_1 = arith.constant 0 : index
    %3 = vector.load %arg8[%c0, %c0_1] : memref<256x128xf32, #tpu.memory_space<vmem>>, vector<256x128xf32>
    %c0_2 = arith.constant 0 : index
    %c0_3 = arith.constant 0 : index
    %4 = vector.load %arg3[%c0_2, %c0_3] : memref<256x128xbf16, #tpu.memory_space<vmem>>, vector<256x128xbf16>
    %c0_4 = arith.constant 0 : index
    %c0_5 = arith.constant 0 : index
    %5 = vector.load %arg4[%c0_4, %c0_5] : memref<128x128xbf16, #tpu.memory_space<vmem>>, vector<128x128xbf16>
    %cst = arith.constant dense<0.000000e+00> : vector<256x128xf32>
    %6 = tpu.matmul %4, %5, %cst {dimension_numbers = #tpu.dot_dimension_numbers<[1], [0], [0], [1], [0, 0, 1, 1], [], []>} : vector<256x128xbf16>, vector<128x128xbf16>, vector<256x128xf32> -> vector<256x128xf32>
    %7 = arith.addf %3, %6 : vector<256x128xf32>
    %c0_6 = arith.constant 0 : index
    %c0_7 = arith.constant 0 : index
    %8 = vector.load %arg8[%c0_6, %c0_7] : memref<256x128xf32, #tpu.memory_space<vmem>>, vector<256x128xf32>
    tpu.vector_store %arg8[%c0_6, %c0_7], %7 {strides = array<i32>} : memref<256x128xf32, #tpu.memory_space<vmem>>, vector<256x128xf32>,
    %c0_i32_8 = arith.constant 0 : i32
    %9 = arith.cmpi eq, %arg2, %c0_i32_8 : i32
    %10 = arith.extui %9 : i1 to i32
    %c0_i32_9 = arith.constant 0 : i32
    %11 = arith.cmpi ne, %10, %c0_i32_9 : i32
    scf.if %11 {
      %c0_10 = arith.constant 0 : index
      %c0_11 = arith.constant 0 : index
      %12 = vector.load %arg8[%c0_10, %c0_11] : memref<256x128xf32, #tpu.memory_space<vmem>>, vector<256x128xf32>
      %c0_12 = arith.constant 0 : index
      %c0_13 = arith.constant 0 : index
      %13 = vector.load %arg5[%c0_12, %c0_13] : memref<1x128xf32, #tpu.memory_space<vmem>>, vector<1x128xf32>
      %14 = vector.broadcast %13 : vector<1x128xf32> to vector<256x128xf32>
      %15 = arith.mulf %12, %14 : vector<256x128xf32>
      %c0_14 = arith.constant 0 : index
      %c0_15 = arith.constant 0 : index
      %16 = vector.load %arg6[%c0_14, %c0_15] : memref<1x128xf32, #tpu.memory_space<vmem>>, vector<1x128xf32>
      %17 = vector.broadcast %16 : vector<1x128xf32> to vector<256x128xf32>
      %18 = arith.addf %15, %17 : vector<256x128xf32>
      %c0_16 = arith.constant 0 : index
      %c0_17 = arith.constant 0 : index
      %19 = vector.load %arg7[%c0_16, %c0_17] : memref<256x128xf32, #tpu.memory_space<vmem>>, vector<256x128xf32>
      tpu.vector_store %arg7[%c0_16, %c0_17], %18 {strides = array<i32>} : memref<256x128xf32, #tpu.memory_space<vmem>>, vector<256x128xf32>,
    } else {
    }
    return
  }
  func.func @transform_0(%arg0: i32, %arg1: i32, %arg2: i32) -> (i32, i32) {
    %c0_i32 = arith.constant 0 : i32
    return %arg0, %arg2 : i32, i32
  }
  func.func @transform_1(%arg0: i32, %arg1: i32, %arg2: i32) -> (i32, i32) {
    %c0_i32 = arith.constant 0 : i32
    return %arg2, %arg1 : i32, i32
  }
  func.func @transform_2(%arg0: i32, %arg1: i32, %arg2: i32) -> (i32, i32) {
    %c0_i32 = arith.constant 0 : i32
    %c0_i32_0 = arith.constant 0 : i32
    return %c0_i32, %arg1 : i32, i32
  }
  func.func @transform_3(%arg0: i32, %arg1: i32, %arg2: i32) -> (i32, i32) {
    %c0_i32 = arith.constant 0 : i32
    %c0_i32_0 = arith.constant 0 : i32
    return %c0_i32, %arg1 : i32, i32
  }
  func.func @transform_4(%arg0: i32, %arg1: i32, %arg2: i32) -> (i32, i32) {
    %c0_i32 = arith.constant 0 : i32
    return %arg0, %arg1 : i32, i32
  }
}

module attributes {stable_mosaic.version = 11 : i64} {
  func.func @_fused_matmul_kernel(%arg0: i32, %arg1: i32, %arg2: i32, %arg3: memref<256x128xbf16, #tpu.memory_space<vmem>>, %arg4: memref<128x128xbf16, #tpu.memory_space<vmem>>, %arg5: memref<1x128xf32, #tpu.memory_space<vmem>>, %arg6: memref<1x128xf32, #tpu.memory_space<vmem>>, %arg7: memref<256x128xf32, #tpu.memory_space<vmem>>, %arg8: memref<256x128xf32, #tpu.memory_space<vmem>>, %arg9: memref<256x128xf32, #tpu.memory_space<vmem>>) attributes {dimension_semantics = [#tpu.dimension_semantics<parallel>, #tpu.dimension_semantics<parallel>, #tpu.dimension_semantics<arbitrary>], iteration_bounds = array<i64: 2, 1, 1>, scalar_prefetch = 0 : i64, scratch_operands = 1 : i64, tpu.core_type = #tpu.core_type<tc>, window_params = [{transform_indices = @transform_0, window_bounds = array<i64: 256, 128>}, {transform_indices = @transform_1, window_bounds = array<i64: 128, 128>}, {transform_indices = @transform_2, window_bounds = array<i64: 1, 128>}, {transform_indices = @transform_3, window_bounds = array<i64: 1, 128>}, {transform_indices = @transform_4, window_bounds = array<i64: 256, 128>}, {transform_indices = @transform_5, window_bounds = array<i64: 256, 128>}]} {
    %c0_i32 = arith.constant 0 : i32
    %0 = arith.cmpi eq, %arg2, %c0_i32 : i32
    %1 = arith.extui %0 : i1 to i32
    %c0_i32_0 = arith.constant 0 : i32
    %2 = arith.cmpi ne, %1, %c0_i32_0 : i32
    scf.if %2 {
      %cst_10 = arith.constant 0.000000e+00 : f32
      %12 = vector.broadcast %cst_10 : f32 to vector<256x128xf32>
      %c0_11 = arith.constant 0 : index
      %c0_12 = arith.constant 0 : index
      %13 = vector.load %arg9[%c0_11, %c0_12] : memref<256x128xf32, #tpu.memory_space<vmem>>, vector<256x128xf32>
      tpu.vector_store %arg9[%c0_11, %c0_12], %12 {strides = array<i32>} : memref<256x128xf32, #tpu.memory_space<vmem>>, vector<256x128xf32>,
    } else {
    }
    %c0 = arith.constant 0 : index
    %c0_1 = arith.constant 0 : index
    %3 = vector.load %arg9[%c0, %c0_1] : memref<256x128xf32, #tpu.memory_space<vmem>>, vector<256x128xf32>
    %c0_2 = arith.constant 0 : index
    %c0_3 = arith.constant 0 : index
    %4 = vector.load %arg3[%c0_2, %c0_3] : memref<256x128xbf16, #tpu.memory_space<vmem>>, vector<256x128xbf16>
    %c0_4 = arith.constant 0 : index
    %c0_5 = arith.constant 0 : index
    %5 = vector.load %arg4[%c0_4, %c0_5] : memref<128x128xbf16, #tpu.memory_space<vmem>>, vector<128x128xbf16>
    %cst = arith.constant dense<0.000000e+00> : vector<256x128xf32>
    %6 = tpu.matmul %4, %5, %cst {dimension_numbers = #tpu.dot_dimension_numbers<[1], [0], [0], [1], [0, 0, 1, 1], [], []>} : vector<256x128xbf16>, vector<128x128xbf16>, vector<256x128xf32> -> vector<256x128xf32>
    %7 = arith.addf %3, %6 : vector<256x128xf32>
    %c0_6 = arith.constant 0 : index
    %c0_7 = arith.constant 0 : index
    %8 = vector.load %arg9[%c0_6, %c0_7] : memref<256x128xf32, #tpu.memory_space<vmem>>, vector<256x128xf32>
    tpu.vector_store %arg9[%c0_6, %c0_7], %7 {strides = array<i32>} : memref<256x128xf32, #tpu.memory_space<vmem>>, vector<256x128xf32>,
    %c0_i32_8 = arith.constant 0 : i32
    %9 = arith.cmpi eq, %arg2, %c0_i32_8 : i32
    %10 = arith.extui %9 : i1 to i32
    %c0_i32_9 = arith.constant 0 : i32
    %11 = arith.cmpi ne, %10, %c0_i32_9 : i32
    scf.if %11 {
      %c0_10 = arith.constant 0 : index
      %c0_11 = arith.constant 0 : index
      %12 = vector.load %arg9[%c0_10, %c0_11] : memref<256x128xf32, #tpu.memory_space<vmem>>, vector<256x128xf32>
      %c0_12 = arith.constant 0 : index
      %c0_13 = arith.constant 0 : index
      %13 = vector.load %arg5[%c0_12, %c0_13] : memref<1x128xf32, #tpu.memory_space<vmem>>, vector<1x128xf32>
      %14 = vector.broadcast %13 : vector<1x128xf32> to vector<256x128xf32>
      %15 = arith.mulf %12, %14 : vector<256x128xf32>
      %c0_14 = arith.constant 0 : index
      %c0_15 = arith.constant 0 : index
      %16 = vector.load %arg6[%c0_14, %c0_15] : memref<1x128xf32, #tpu.memory_space<vmem>>, vector<1x128xf32>
      %17 = vector.broadcast %16 : vector<1x128xf32> to vector<256x128xf32>
      %18 = arith.addf %15, %17 : vector<256x128xf32>
      %c0_16 = arith.constant 0 : index
      %c0_17 = arith.constant 0 : index
      %19 = vector.load %arg7[%c0_16, %c0_17] : memref<256x128xf32, #tpu.memory_space<vmem>>, vector<256x128xf32>
      %20 = arith.addf %18, %19 : vector<256x128xf32>
      %cst_18 = arith.constant 0.000000e+00 : f32
      %21 = vector.broadcast %cst_18 : f32 to vector<256x128xf32>
      %22 = arith.maximumf %20, %21 : vector<256x128xf32>
      %c0_19 = arith.constant 0 : index
      %c0_20 = arith.constant 0 : index
      %23 = vector.load %arg8[%c0_19, %c0_20] : memref<256x128xf32, #tpu.memory_space<vmem>>, vector<256x128xf32>
      tpu.vector_store %arg8[%c0_19, %c0_20], %22 {strides = array<i32>} : memref<256x128xf32, #tpu.memory_space<vmem>>, vector<256x128xf32>,
    } else {
    }
    return
  }
  func.func @transform_0(%arg0: i32, %arg1: i32, %arg2: i32) -> (i32, i32) {
    %c0_i32 = arith.constant 0 : i32
    return %arg0, %arg2 : i32, i32
  }
  func.func @transform_1(%arg0: i32, %arg1: i32, %arg2: i32) -> (i32, i32) {
    %c0_i32 = arith.constant 0 : i32
    return %arg2, %arg1 : i32, i32
  }
  func.func @transform_2(%arg0: i32, %arg1: i32, %arg2: i32) -> (i32, i32) {
    %c0_i32 = arith.constant 0 : i32
    %c0_i32_0 = arith.constant 0 : i32
    return %c0_i32, %arg1 : i32, i32
  }
  func.func @transform_3(%arg0: i32, %arg1: i32, %arg2: i32) -> (i32, i32) {
    %c0_i32 = arith.constant 0 : i32
    %c0_i32_0 = arith.constant 0 : i32
    return %c0_i32, %arg1 : i32, i32
  }
  func.func @transform_4(%arg0: i32, %arg1: i32, %arg2: i32) -> (i32, i32) {
    %c0_i32 = arith.constant 0 : i32
    return %arg0, %arg1 : i32, i32
  }
  func.func @transform_5(%arg0: i32, %arg1: i32, %arg2: i32) -> (i32, i32) {
    %c0_i32 = arith.constant 0 : i32
    return %arg0, %arg1 : i32, i32
  }
}

module attributes {stable_mosaic.version = 11 : i64} {
  func.func @_fused_matmul_kernel(%arg0: i32, %arg1: i32, %arg2: i32, %arg3: memref<128x384xbf16, #tpu.memory_space<vmem>>, %arg4: memref<384x128xbf16, #tpu.memory_space<vmem>>, %arg5: memref<1x128xf32, #tpu.memory_space<vmem>>, %arg6: memref<1x128xf32, #tpu.memory_space<vmem>>, %arg7: memref<128x128xf32, #tpu.memory_space<vmem>>, %arg8: memref<128x128xf32, #tpu.memory_space<vmem>>) attributes {dimension_semantics = [#tpu.dimension_semantics<parallel>, #tpu.dimension_semantics<parallel>, #tpu.dimension_semantics<arbitrary>], iteration_bounds = array<i64: 1, 1, 1>, scalar_prefetch = 0 : i64, scratch_operands = 1 : i64, tpu.core_type = #tpu.core_type<tc>, window_params = [{transform_indices = @transform_0, window_bounds = array<i64: 128, 384>}, {transform_indices = @transform_1, window_bounds = array<i64: 384, 128>}, {transform_indices = @transform_2, window_bounds = array<i64: 1, 128>}, {transform_indices = @transform_3, window_bounds = array<i64: 1, 128>}, {transform_indices = @transform_4, window_bounds = array<i64: 128, 128>}]} {
    %c0_i32 = arith.constant 0 : i32
    %0 = arith.cmpi eq, %arg2, %c0_i32 : i32
    %1 = arith.extui %0 : i1 to i32
    %c0_i32_0 = arith.constant 0 : i32
    %2 = arith.cmpi ne, %1, %c0_i32_0 : i32
    scf.if %2 {
      %cst_10 = arith.constant 0.000000e+00 : f32
      %12 = vector.broadcast %cst_10 : f32 to vector<128x128xf32>
      %c0_11 = arith.constant 0 : index
      %c0_12 = arith.constant 0 : index
      %13 = vector.load %arg8[%c0_11, %c0_12] : memref<128x128xf32, #tpu.memory_space<vmem>>, vector<128x128xf32>
      tpu.vector_store %arg8[%c0_11, %c0_12], %12 {strides = array<i32>} : memref<128x128xf32, #tpu.memory_space<vmem>>, vector<128x128xf32>,
    } else {
    }
    %c0 = arith.constant 0 : index
    %c0_1 = arith.constant 0 : index
    %3 = vector.load %arg8[%c0, %c0_1] : memref<128x128xf32, #tpu.memory_space<vmem>>, vector<128x128xf32>
    %c0_2 = arith.constant 0 : index
    %c0_3 = arith.constant 0 : index
    %4 = vector.load %arg3[%c0_2, %c0_3] : memref<128x384xbf16, #tpu.memory_space<vmem>>, vector<128x384xbf16>
    %c0_4 = arith.constant 0 : index
    %c0_5 = arith.constant 0 : index
    %5 = vector.load %arg4[%c0_4, %c0_5] : memref<384x128xbf16, #tpu.memory_space<vmem>>, vector<384x128xbf16>
    %cst = arith.constant dense<0.000000e+00> : vector<128x128xf32>
    %6 = tpu.matmul %4, %5, %cst {dimension_numbers = #tpu.dot_dimension_numbers<[1], [0], [0], [1], [0, 0, 1, 1], [], []>} : vector<128x384xbf16>, vector<384x128xbf16>, vector<128x128xf32> -> vector<128x128xf32>
    %7 = arith.addf %3, %6 : vector<128x128xf32>
    %c0_6 = arith.constant 0 : index
    %c0_7 = arith.constant 0 : index
    %8 = vector.load %arg8[%c0_6, %c0_7] : memref<128x128xf32, #tpu.memory_space<vmem>>, vector<128x128xf32>
    tpu.vector_store %arg8[%c0_6, %c0_7], %7 {strides = array<i32>} : memref<128x128xf32, #tpu.memory_space<vmem>>, vector<128x128xf32>,
    %c0_i32_8 = arith.constant 0 : i32
    %9 = arith.cmpi eq, %arg2, %c0_i32_8 : i32
    %10 = arith.extui %9 : i1 to i32
    %c0_i32_9 = arith.constant 0 : i32
    %11 = arith.cmpi ne, %10, %c0_i32_9 : i32
    scf.if %11 {
      %c0_10 = arith.constant 0 : index
      %c0_11 = arith.constant 0 : index
      %12 = vector.load %arg8[%c0_10, %c0_11] : memref<128x128xf32, #tpu.memory_space<vmem>>, vector<128x128xf32>
      %c0_12 = arith.constant 0 : index
      %c0_13 = arith.constant 0 : index
      %13 = vector.load %arg5[%c0_12, %c0_13] : memref<1x128xf32, #tpu.memory_space<vmem>>, vector<1x128xf32>
      %14 = vector.broadcast %13 : vector<1x128xf32> to vector<128x128xf32>
      %15 = arith.mulf %12, %14 : vector<128x128xf32>
      %c0_14 = arith.constant 0 : index
      %c0_15 = arith.constant 0 : index
      %16 = vector.load %arg6[%c0_14, %c0_15] : memref<1x128xf32, #tpu.memory_space<vmem>>, vector<1x128xf32>
      %17 = vector.broadcast %16 : vector<1x128xf32> to vector<128x128xf32>
      %18 = arith.addf %15, %17 : vector<128x128xf32>
      %cst_16 = arith.constant 0.000000e+00 : f32
      %19 = vector.broadcast %cst_16 : f32 to vector<128x128xf32>
      %20 = arith.maximumf %18, %19 : vector<128x128xf32>
      %c0_17 = arith.constant 0 : index
      %c0_18 = arith.constant 0 : index
      %21 = vector.load %arg7[%c0_17, %c0_18] : memref<128x128xf32, #tpu.memory_space<vmem>>, vector<128x128xf32>
      tpu.vector_store %arg7[%c0_17, %c0_18], %20 {strides = array<i32>} : memref<128x128xf32, #tpu.memory_space<vmem>>, vector<128x128xf32>,
    } else {
    }
    return
  }
  func.func @transform_0(%arg0: i32, %arg1: i32, %arg2: i32) -> (i32, i32) {
    %c0_i32 = arith.constant 0 : i32
    return %arg0, %arg2 : i32, i32
  }
  func.func @transform_1(%arg0: i32, %arg1: i32, %arg2: i32) -> (i32, i32) {
    %c0_i32 = arith.constant 0 : i32
    return %arg2, %arg1 : i32, i32
  }
  func.func @transform_2(%arg0: i32, %arg1: i32, %arg2: i32) -> (i32, i32) {
    %c0_i32 = arith.constant 0 : i32
    %c0_i32_0 = arith.constant 0 : i32
    return %c0_i32, %arg1 : i32, i32
  }
  func.func @transform_3(%arg0: i32, %arg1: i32, %arg2: i32) -> (i32, i32) {
    %c0_i32 = arith.constant 0 : i32
    %c0_i32_0 = arith.constant 0 : i32
    return %c0_i32, %arg1 : i32, i32
  }
  func.func @transform_4(%arg0: i32, %arg1: i32, %arg2: i32) -> (i32, i32) {
    %c0_i32 = arith.constant 0 : i32
    return %arg0, %arg1 : i32, i32
  }
}

module attributes {stable_mosaic.version = 11 : i64} {
  func.func @_fused_matmul_kernel(%arg0: i32, %arg1: i32, %arg2: i32, %arg3: memref<128x128xbf16, #tpu.memory_space<vmem>>, %arg4: memref<128x128xbf16, #tpu.memory_space<vmem>>, %arg5: memref<1x128xf32, #tpu.memory_space<vmem>>, %arg6: memref<1x128xf32, #tpu.memory_space<vmem>>, %arg7: memref<128x128xf32, #tpu.memory_space<vmem>>, %arg8: memref<128x128xf32, #tpu.memory_space<vmem>>) attributes {dimension_semantics = [#tpu.dimension_semantics<parallel>, #tpu.dimension_semantics<parallel>, #tpu.dimension_semantics<arbitrary>], iteration_bounds = array<i64: 1, 1, 1>, scalar_prefetch = 0 : i64, scratch_operands = 1 : i64, tpu.core_type = #tpu.core_type<tc>, window_params = [{transform_indices = @transform_0, window_bounds = array<i64: 128, 128>}, {transform_indices = @transform_1, window_bounds = array<i64: 128, 128>}, {transform_indices = @transform_2, window_bounds = array<i64: 1, 128>}, {transform_indices = @transform_3, window_bounds = array<i64: 1, 128>}, {transform_indices = @transform_4, window_bounds = array<i64: 128, 128>}]} {
    %c0_i32 = arith.constant 0 : i32
    %0 = arith.cmpi eq, %arg2, %c0_i32 : i32
    %1 = arith.extui %0 : i1 to i32
    %c0_i32_0 = arith.constant 0 : i32
    %2 = arith.cmpi ne, %1, %c0_i32_0 : i32
    scf.if %2 {
      %cst_10 = arith.constant 0.000000e+00 : f32
      %12 = vector.broadcast %cst_10 : f32 to vector<128x128xf32>
      %c0_11 = arith.constant 0 : index
      %c0_12 = arith.constant 0 : index
      %13 = vector.load %arg8[%c0_11, %c0_12] : memref<128x128xf32, #tpu.memory_space<vmem>>, vector<128x128xf32>
      tpu.vector_store %arg8[%c0_11, %c0_12], %12 {strides = array<i32>} : memref<128x128xf32, #tpu.memory_space<vmem>>, vector<128x128xf32>,
    } else {
    }
    %c0 = arith.constant 0 : index
    %c0_1 = arith.constant 0 : index
    %3 = vector.load %arg8[%c0, %c0_1] : memref<128x128xf32, #tpu.memory_space<vmem>>, vector<128x128xf32>
    %c0_2 = arith.constant 0 : index
    %c0_3 = arith.constant 0 : index
    %4 = vector.load %arg3[%c0_2, %c0_3] : memref<128x128xbf16, #tpu.memory_space<vmem>>, vector<128x128xbf16>
    %c0_4 = arith.constant 0 : index
    %c0_5 = arith.constant 0 : index
    %5 = vector.load %arg4[%c0_4, %c0_5] : memref<128x128xbf16, #tpu.memory_space<vmem>>, vector<128x128xbf16>
    %cst = arith.constant dense<0.000000e+00> : vector<128x128xf32>
    %6 = tpu.matmul %4, %5, %cst {dimension_numbers = #tpu.dot_dimension_numbers<[1], [0], [0], [1], [0, 0, 1, 1], [], []>} : vector<128x128xbf16>, vector<128x128xbf16>, vector<128x128xf32> -> vector<128x128xf32>
    %7 = arith.addf %3, %6 : vector<128x128xf32>
    %c0_6 = arith.constant 0 : index
    %c0_7 = arith.constant 0 : index
    %8 = vector.load %arg8[%c0_6, %c0_7] : memref<128x128xf32, #tpu.memory_space<vmem>>, vector<128x128xf32>
    tpu.vector_store %arg8[%c0_6, %c0_7], %7 {strides = array<i32>} : memref<128x128xf32, #tpu.memory_space<vmem>>, vector<128x128xf32>,
    %c0_i32_8 = arith.constant 0 : i32
    %9 = arith.cmpi eq, %arg2, %c0_i32_8 : i32
    %10 = arith.extui %9 : i1 to i32
    %c0_i32_9 = arith.constant 0 : i32
    %11 = arith.cmpi ne, %10, %c0_i32_9 : i32
    scf.if %11 {
      %c0_10 = arith.constant 0 : index
      %c0_11 = arith.constant 0 : index
      %12 = vector.load %arg8[%c0_10, %c0_11] : memref<128x128xf32, #tpu.memory_space<vmem>>, vector<128x128xf32>
      %c0_12 = arith.constant 0 : index
      %c0_13 = arith.constant 0 : index
      %13 = vector.load %arg5[%c0_12, %c0_13] : memref<1x128xf32, #tpu.memory_space<vmem>>, vector<1x128xf32>
      %14 = vector.broadcast %13 : vector<1x128xf32> to vector<128x128xf32>
      %15 = arith.mulf %12, %14 : vector<128x128xf32>
      %c0_14 = arith.constant 0 : index
      %c0_15 = arith.constant 0 : index
      %16 = vector.load %arg6[%c0_14, %c0_15] : memref<1x128xf32, #tpu.memory_space<vmem>>, vector<1x128xf32>
      %17 = vector.broadcast %16 : vector<1x128xf32> to vector<128x128xf32>
      %18 = arith.addf %15, %17 : vector<128x128xf32>
      %c0_16 = arith.constant 0 : index
      %c0_17 = arith.constant 0 : index
      %19 = vector.load %arg7[%c0_16, %c0_17] : memref<128x128xf32, #tpu.memory_space<vmem>>, vector<128x128xf32>
      tpu.vector_store %arg7[%c0_16, %c0_17], %18 {strides = array<i32>} : memref<128x128xf32, #tpu.memory_space<vmem>>, vector<128x128xf32>,
    } else {
    }
    return
  }
  func.func @transform_0(%arg0: i32, %arg1: i32, %arg2: i32) -> (i32, i32) {
    %c0_i32 = arith.constant 0 : i32
    return %arg0, %arg2 : i32, i32
  }
  func.func @transform_1(%arg0: i32, %arg1: i32, %arg2: i32) -> (i32, i32) {
    %c0_i32 = arith.constant 0 : i32
    return %arg2, %arg1 : i32, i32
  }
  func.func @transform_2(%arg0: i32, %arg1: i32, %arg2: i32) -> (i32, i32) {
    %c0_i32 = arith.constant 0 : i32
    %c0_i32_0 = arith.constant 0 : i32
    return %c0_i32, %arg1 : i32, i32
  }
  func.func @transform_3(%arg0: i32, %arg1: i32, %arg2: i32) -> (i32, i32) {
    %c0_i32 = arith.constant 0 : i32
    %c0_i32_0 = arith.constant 0 : i32
    return %c0_i32, %arg1 : i32, i32
  }
  func.func @transform_4(%arg0: i32, %arg1: i32, %arg2: i32) -> (i32, i32) {
    %c0_i32 = arith.constant 0 : i32
    return %arg0, %arg1 : i32, i32
  }
}

module attributes {stable_mosaic.version = 11 : i64} {
  func.func @_fused_matmul_kernel(%arg0: i32, %arg1: i32, %arg2: i32, %arg3: memref<128x128xbf16, #tpu.memory_space<vmem>>, %arg4: memref<128x128xbf16, #tpu.memory_space<vmem>>, %arg5: memref<1x128xf32, #tpu.memory_space<vmem>>, %arg6: memref<1x128xf32, #tpu.memory_space<vmem>>, %arg7: memref<128x128xf32, #tpu.memory_space<vmem>>, %arg8: memref<128x128xf32, #tpu.memory_space<vmem>>, %arg9: memref<128x128xf32, #tpu.memory_space<vmem>>) attributes {dimension_semantics = [#tpu.dimension_semantics<parallel>, #tpu.dimension_semantics<parallel>, #tpu.dimension_semantics<arbitrary>], iteration_bounds = array<i64: 1, 1, 1>, scalar_prefetch = 0 : i64, scratch_operands = 1 : i64, tpu.core_type = #tpu.core_type<tc>, window_params = [{transform_indices = @transform_0, window_bounds = array<i64: 128, 128>}, {transform_indices = @transform_1, window_bounds = array<i64: 128, 128>}, {transform_indices = @transform_2, window_bounds = array<i64: 1, 128>}, {transform_indices = @transform_3, window_bounds = array<i64: 1, 128>}, {transform_indices = @transform_4, window_bounds = array<i64: 128, 128>}, {transform_indices = @transform_5, window_bounds = array<i64: 128, 128>}]} {
    %c0_i32 = arith.constant 0 : i32
    %0 = arith.cmpi eq, %arg2, %c0_i32 : i32
    %1 = arith.extui %0 : i1 to i32
    %c0_i32_0 = arith.constant 0 : i32
    %2 = arith.cmpi ne, %1, %c0_i32_0 : i32
    scf.if %2 {
      %cst_10 = arith.constant 0.000000e+00 : f32
      %12 = vector.broadcast %cst_10 : f32 to vector<128x128xf32>
      %c0_11 = arith.constant 0 : index
      %c0_12 = arith.constant 0 : index
      %13 = vector.load %arg9[%c0_11, %c0_12] : memref<128x128xf32, #tpu.memory_space<vmem>>, vector<128x128xf32>
      tpu.vector_store %arg9[%c0_11, %c0_12], %12 {strides = array<i32>} : memref<128x128xf32, #tpu.memory_space<vmem>>, vector<128x128xf32>,
    } else {
    }
    %c0 = arith.constant 0 : index
    %c0_1 = arith.constant 0 : index
    %3 = vector.load %arg9[%c0, %c0_1] : memref<128x128xf32, #tpu.memory_space<vmem>>, vector<128x128xf32>
    %c0_2 = arith.constant 0 : index
    %c0_3 = arith.constant 0 : index
    %4 = vector.load %arg3[%c0_2, %c0_3] : memref<128x128xbf16, #tpu.memory_space<vmem>>, vector<128x128xbf16>
    %c0_4 = arith.constant 0 : index
    %c0_5 = arith.constant 0 : index
    %5 = vector.load %arg4[%c0_4, %c0_5] : memref<128x128xbf16, #tpu.memory_space<vmem>>, vector<128x128xbf16>
    %cst = arith.constant dense<0.000000e+00> : vector<128x128xf32>
    %6 = tpu.matmul %4, %5, %cst {dimension_numbers = #tpu.dot_dimension_numbers<[1], [0], [0], [1], [0, 0, 1, 1], [], []>} : vector<128x128xbf16>, vector<128x128xbf16>, vector<128x128xf32> -> vector<128x128xf32>
    %7 = arith.addf %3, %6 : vector<128x128xf32>
    %c0_6 = arith.constant 0 : index
    %c0_7 = arith.constant 0 : index
    %8 = vector.load %arg9[%c0_6, %c0_7] : memref<128x128xf32, #tpu.memory_space<vmem>>, vector<128x128xf32>
    tpu.vector_store %arg9[%c0_6, %c0_7], %7 {strides = array<i32>} : memref<128x128xf32, #tpu.memory_space<vmem>>, vector<128x128xf32>,
    %c0_i32_8 = arith.constant 0 : i32
    %9 = arith.cmpi eq, %arg2, %c0_i32_8 : i32
    %10 = arith.extui %9 : i1 to i32
    %c0_i32_9 = arith.constant 0 : i32
    %11 = arith.cmpi ne, %10, %c0_i32_9 : i32
    scf.if %11 {
      %c0_10 = arith.constant 0 : index
      %c0_11 = arith.constant 0 : index
      %12 = vector.load %arg9[%c0_10, %c0_11] : memref<128x128xf32, #tpu.memory_space<vmem>>, vector<128x128xf32>
      %c0_12 = arith.constant 0 : index
      %c0_13 = arith.constant 0 : index
      %13 = vector.load %arg5[%c0_12, %c0_13] : memref<1x128xf32, #tpu.memory_space<vmem>>, vector<1x128xf32>
      %14 = vector.broadcast %13 : vector<1x128xf32> to vector<128x128xf32>
      %15 = arith.mulf %12, %14 : vector<128x128xf32>
      %c0_14 = arith.constant 0 : index
      %c0_15 = arith.constant 0 : index
      %16 = vector.load %arg6[%c0_14, %c0_15] : memref<1x128xf32, #tpu.memory_space<vmem>>, vector<1x128xf32>
      %17 = vector.broadcast %16 : vector<1x128xf32> to vector<128x128xf32>
      %18 = arith.addf %15, %17 : vector<128x128xf32>
      %c0_16 = arith.constant 0 : index
      %c0_17 = arith.constant 0 : index
      %19 = vector.load %arg7[%c0_16, %c0_17] : memref<128x128xf32, #tpu.memory_space<vmem>>, vector<128x128xf32>
      %20 = arith.addf %18, %19 : vector<128x128xf32>
      %cst_18 = arith.constant 0.000000e+00 : f32
      %21 = vector.broadcast %cst_18 : f32 to vector<128x128xf32>
      %22 = arith.maximumf %20, %21 : vector<128x128xf32>
      %c0_19 = arith.constant 0 : index
      %c0_20 = arith.constant 0 : index
      %23 = vector.load %arg8[%c0_19, %c0_20] : memref<128x128xf32, #tpu.memory_space<vmem>>, vector<128x128xf32>
      tpu.vector_store %arg8[%c0_19, %c0_20], %22 {strides = array<i32>} : memref<128x128xf32, #tpu.memory_space<vmem>>, vector<128x128xf32>,
    } else {
    }
    return
  }
  func.func @transform_0(%arg0: i32, %arg1: i32, %arg2: i32) -> (i32, i32) {
    %c0_i32 = arith.constant 0 : i32
    return %arg0, %arg2 : i32, i32
  }
  func.func @transform_1(%arg0: i32, %arg1: i32, %arg2: i32) -> (i32, i32) {
    %c0_i32 = arith.constant 0 : i32
    return %arg2, %arg1 : i32, i32
  }
  func.func @transform_2(%arg0: i32, %arg1: i32, %arg2: i32) -> (i32, i32) {
    %c0_i32 = arith.constant 0 : i32
    %c0_i32_0 = arith.constant 0 : i32
    return %c0_i32, %arg1 : i32, i32
  }
  func.func @transform_3(%arg0: i32, %arg1: i32, %arg2: i32) -> (i32, i32) {
    %c0_i32 = arith.constant 0 : i32
    %c0_i32_0 = arith.constant 0 : i32
    return %c0_i32, %arg1 : i32, i32
  }
  func.func @transform_4(%arg0: i32, %arg1: i32, %arg2: i32) -> (i32, i32) {
    %c0_i32 = arith.constant 0 : i32
    return %arg0, %arg1 : i32, i32
  }
  func.func @transform_5(%arg0: i32, %arg1: i32, %arg2: i32) -> (i32, i32) {
    %c0_i32 = arith.constant 0 : i32
    return %arg0, %arg1 : i32, i32
  }
}

module attributes {stable_mosaic.version = 11 : i64} {
  func.func @_fused_matmul_kernel(%arg0: i32, %arg1: i32, %arg2: i32, %arg3: memref<128x128xbf16, #tpu.memory_space<vmem>>, %arg4: memref<128x128xbf16, #tpu.memory_space<vmem>>, %arg5: memref<1x128xf32, #tpu.memory_space<vmem>>, %arg6: memref<1x128xf32, #tpu.memory_space<vmem>>, %arg7: memref<128x128xf32, #tpu.memory_space<vmem>>, %arg8: memref<128x128xf32, #tpu.memory_space<vmem>>) attributes {dimension_semantics = [#tpu.dimension_semantics<parallel>, #tpu.dimension_semantics<parallel>, #tpu.dimension_semantics<arbitrary>], iteration_bounds = array<i64: 1, 1, 1>, scalar_prefetch = 0 : i64, scratch_operands = 1 : i64, tpu.core_type = #tpu.core_type<tc>, window_params = [{transform_indices = @transform_0, window_bounds = array<i64: 128, 128>}, {transform_indices = @transform_1, window_bounds = array<i64: 128, 128>}, {transform_indices = @transform_2, window_bounds = array<i64: 1, 128>}, {transform_indices = @transform_3, window_bounds = array<i64: 1, 128>}, {transform_indices = @transform_4, window_bounds = array<i64: 128, 128>}]} {
    %c0_i32 = arith.constant 0 : i32
    %0 = arith.cmpi eq, %arg2, %c0_i32 : i32
    %1 = arith.extui %0 : i1 to i32
    %c0_i32_0 = arith.constant 0 : i32
    %2 = arith.cmpi ne, %1, %c0_i32_0 : i32
    scf.if %2 {
      %cst_10 = arith.constant 0.000000e+00 : f32
      %12 = vector.broadcast %cst_10 : f32 to vector<128x128xf32>
      %c0_11 = arith.constant 0 : index
      %c0_12 = arith.constant 0 : index
      %13 = vector.load %arg8[%c0_11, %c0_12] : memref<128x128xf32, #tpu.memory_space<vmem>>, vector<128x128xf32>
      tpu.vector_store %arg8[%c0_11, %c0_12], %12 {strides = array<i32>} : memref<128x128xf32, #tpu.memory_space<vmem>>, vector<128x128xf32>,
    } else {
    }
    %c0 = arith.constant 0 : index
    %c0_1 = arith.constant 0 : index
    %3 = vector.load %arg8[%c0, %c0_1] : memref<128x128xf32, #tpu.memory_space<vmem>>, vector<128x128xf32>
    %c0_2 = arith.constant 0 : index
    %c0_3 = arith.constant 0 : index
    %4 = vector.load %arg3[%c0_2, %c0_3] : memref<128x128xbf16, #tpu.memory_space<vmem>>, vector<128x128xbf16>
    %c0_4 = arith.constant 0 : index
    %c0_5 = arith.constant 0 : index
    %5 = vector.load %arg4[%c0_4, %c0_5] : memref<128x128xbf16, #tpu.memory_space<vmem>>, vector<128x128xbf16>
    %cst = arith.constant dense<0.000000e+00> : vector<128x128xf32>
    %6 = tpu.matmul %4, %5, %cst {dimension_numbers = #tpu.dot_dimension_numbers<[1], [0], [0], [1], [0, 0, 1, 1], [], []>} : vector<128x128xbf16>, vector<128x128xbf16>, vector<128x128xf32> -> vector<128x128xf32>
    %7 = arith.addf %3, %6 : vector<128x128xf32>
    %c0_6 = arith.constant 0 : index
    %c0_7 = arith.constant 0 : index
    %8 = vector.load %arg8[%c0_6, %c0_7] : memref<128x128xf32, #tpu.memory_space<vmem>>, vector<128x128xf32>
    tpu.vector_store %arg8[%c0_6, %c0_7], %7 {strides = array<i32>} : memref<128x128xf32, #tpu.memory_space<vmem>>, vector<128x128xf32>,
    %c0_i32_8 = arith.constant 0 : i32
    %9 = arith.cmpi eq, %arg2, %c0_i32_8 : i32
    %10 = arith.extui %9 : i1 to i32
    %c0_i32_9 = arith.constant 0 : i32
    %11 = arith.cmpi ne, %10, %c0_i32_9 : i32
    scf.if %11 {
      %c0_10 = arith.constant 0 : index
      %c0_11 = arith.constant 0 : index
      %12 = vector.load %arg8[%c0_10, %c0_11] : memref<128x128xf32, #tpu.memory_space<vmem>>, vector<128x128xf32>
      %c0_12 = arith.constant 0 : index
      %c0_13 = arith.constant 0 : index
      %13 = vector.load %arg5[%c0_12, %c0_13] : memref<1x128xf32, #tpu.memory_space<vmem>>, vector<1x128xf32>
      %14 = vector.broadcast %13 : vector<1x128xf32> to vector<128x128xf32>
      %15 = arith.mulf %12, %14 : vector<128x128xf32>
      %c0_14 = arith.constant 0 : index
      %c0_15 = arith.constant 0 : index
      %16 = vector.load %arg6[%c0_14, %c0_15] : memref<1x128xf32, #tpu.memory_space<vmem>>, vector<1x128xf32>
      %17 = vector.broadcast %16 : vector<1x128xf32> to vector<128x128xf32>
      %18 = arith.addf %15, %17 : vector<128x128xf32>
      %cst_16 = arith.constant 0.000000e+00 : f32
      %19 = vector.broadcast %cst_16 : f32 to vector<128x128xf32>
      %20 = arith.maximumf %18, %19 : vector<128x128xf32>
      %c0_17 = arith.constant 0 : index
      %c0_18 = arith.constant 0 : index
      %21 = vector.load %arg7[%c0_17, %c0_18] : memref<128x128xf32, #tpu.memory_space<vmem>>, vector<128x128xf32>
      tpu.vector_store %arg7[%c0_17, %c0_18], %20 {strides = array<i32>} : memref<128x128xf32, #tpu.memory_space<vmem>>, vector<128x128xf32>,
    } else {
    }
    return
  }
  func.func @transform_0(%arg0: i32, %arg1: i32, %arg2: i32) -> (i32, i32) {
    %c0_i32 = arith.constant 0 : i32
    return %arg0, %arg2 : i32, i32
  }
  func.func @transform_1(%arg0: i32, %arg1: i32, %arg2: i32) -> (i32, i32) {
    %c0_i32 = arith.constant 0 : i32
    return %arg2, %arg1 : i32, i32
  }
  func.func @transform_2(%arg0: i32, %arg1: i32, %arg2: i32) -> (i32, i32) {
    %c0_i32 = arith.constant 0 : i32
    %c0_i32_0 = arith.constant 0 : i32
    return %c0_i32, %arg1 : i32, i32
  }
  func.func @transform_3(%arg0: i32, %arg1: i32, %arg2: i32) -> (i32, i32) {
    %c0_i32 = arith.constant 0 : i32
    %c0_i32_0 = arith.constant 0 : i32
    return %c0_i32, %arg1 : i32, i32
  }
  func.func @transform_4(%arg0: i32, %arg1: i32, %arg2: i32) -> (i32, i32) {
    %c0_i32 = arith.constant 0 : i32
    return %arg0, %arg1 : i32, i32
  }
}

module attributes {stable_mosaic.version = 11 : i64} {
  func.func @_fused_matmul_kernel(%arg0: i32, %arg1: i32, %arg2: i32, %arg3: memref<32x512xbf16, #tpu.memory_space<vmem>>, %arg4: memref<512x128xbf16, #tpu.memory_space<vmem>>, %arg5: memref<1x128xf32, #tpu.memory_space<vmem>>, %arg6: memref<1x128xf32, #tpu.memory_space<vmem>>, %arg7: memref<32x128xf32, #tpu.memory_space<vmem>>, %arg8: memref<32x128xf32, #tpu.memory_space<vmem>>) attributes {dimension_semantics = [#tpu.dimension_semantics<parallel>, #tpu.dimension_semantics<parallel>, #tpu.dimension_semantics<arbitrary>], iteration_bounds = array<i64: 1, 1, 2>, scalar_prefetch = 0 : i64, scratch_operands = 1 : i64, tpu.core_type = #tpu.core_type<tc>, window_params = [{transform_indices = @transform_0, window_bounds = array<i64: 32, 512>}, {transform_indices = @transform_1, window_bounds = array<i64: 512, 128>}, {transform_indices = @transform_2, window_bounds = array<i64: 1, 128>}, {transform_indices = @transform_3, window_bounds = array<i64: 1, 128>}, {transform_indices = @transform_4, window_bounds = array<i64: 32, 128>}]} {
    %c0_i32 = arith.constant 0 : i32
    %0 = arith.cmpi eq, %arg2, %c0_i32 : i32
    %1 = arith.extui %0 : i1 to i32
    %c0_i32_0 = arith.constant 0 : i32
    %2 = arith.cmpi ne, %1, %c0_i32_0 : i32
    scf.if %2 {
      %cst_9 = arith.constant 0.000000e+00 : f32
      %12 = vector.broadcast %cst_9 : f32 to vector<32x128xf32>
      %c0_10 = arith.constant 0 : index
      %c0_11 = arith.constant 0 : index
      %13 = vector.load %arg8[%c0_10, %c0_11] : memref<32x128xf32, #tpu.memory_space<vmem>>, vector<32x128xf32>
      tpu.vector_store %arg8[%c0_10, %c0_11], %12 {strides = array<i32>} : memref<32x128xf32, #tpu.memory_space<vmem>>, vector<32x128xf32>,
    } else {
    }
    %c0 = arith.constant 0 : index
    %c0_1 = arith.constant 0 : index
    %3 = vector.load %arg8[%c0, %c0_1] : memref<32x128xf32, #tpu.memory_space<vmem>>, vector<32x128xf32>
    %c0_2 = arith.constant 0 : index
    %c0_3 = arith.constant 0 : index
    %4 = vector.load %arg3[%c0_2, %c0_3] : memref<32x512xbf16, #tpu.memory_space<vmem>>, vector<32x512xbf16>
    %c0_4 = arith.constant 0 : index
    %c0_5 = arith.constant 0 : index
    %5 = vector.load %arg4[%c0_4, %c0_5] : memref<512x128xbf16, #tpu.memory_space<vmem>>, vector<512x128xbf16>
    %cst = arith.constant dense<0.000000e+00> : vector<32x128xf32>
    %6 = tpu.matmul %4, %5, %cst {dimension_numbers = #tpu.dot_dimension_numbers<[1], [0], [0], [1], [0, 0, 1, 1], [], []>} : vector<32x512xbf16>, vector<512x128xbf16>, vector<32x128xf32> -> vector<32x128xf32>
    %7 = arith.addf %3, %6 : vector<32x128xf32>
    %c0_6 = arith.constant 0 : index
    %c0_7 = arith.constant 0 : index
    %8 = vector.load %arg8[%c0_6, %c0_7] : memref<32x128xf32, #tpu.memory_space<vmem>>, vector<32x128xf32>
    tpu.vector_store %arg8[%c0_6, %c0_7], %7 {strides = array<i32>} : memref<32x128xf32, #tpu.memory_space<vmem>>, vector<32x128xf32>,
    %c1_i32 = arith.constant 1 : i32
    %9 = arith.cmpi eq, %arg2, %c1_i32 : i32
    %10 = arith.extui %9 : i1 to i32
    %c0_i32_8 = arith.constant 0 : i32
    %11 = arith.cmpi ne, %10, %c0_i32_8 : i32
    scf.if %11 {
      %c0_9 = arith.constant 0 : index
      %c0_10 = arith.constant 0 : index
      %12 = vector.load %arg8[%c0_9, %c0_10] : memref<32x128xf32, #tpu.memory_space<vmem>>, vector<32x128xf32>
      %c0_11 = arith.constant 0 : index
      %c0_12 = arith.constant 0 : index
      %13 = vector.load %arg5[%c0_11, %c0_12] : memref<1x128xf32, #tpu.memory_space<vmem>>, vector<1x128xf32>
      %14 = vector.broadcast %13 : vector<1x128xf32> to vector<32x128xf32>
      %15 = arith.mulf %12, %14 : vector<32x128xf32>
      %c0_13 = arith.constant 0 : index
      %c0_14 = arith.constant 0 : index
      %16 = vector.load %arg6[%c0_13, %c0_14] : memref<1x128xf32, #tpu.memory_space<vmem>>, vector<1x128xf32>
      %17 = vector.broadcast %16 : vector<1x128xf32> to vector<32x128xf32>
      %18 = arith.addf %15, %17 : vector<32x128xf32>
      %cst_15 = arith.constant 0.000000e+00 : f32
      %19 = vector.broadcast %cst_15 : f32 to vector<32x128xf32>
      %20 = arith.maximumf %18, %19 : vector<32x128xf32>
      %c0_16 = arith.constant 0 : index
      %c0_17 = arith.constant 0 : index
      %21 = vector.load %arg7[%c0_16, %c0_17] : memref<32x128xf32, #tpu.memory_space<vmem>>, vector<32x128xf32>
      tpu.vector_store %arg7[%c0_16, %c0_17], %20 {strides = array<i32>} : memref<32x128xf32, #tpu.memory_space<vmem>>, vector<32x128xf32>,
    } else {
    }
    return
  }
  func.func @transform_0(%arg0: i32, %arg1: i32, %arg2: i32) -> (i32, i32) {
    %c0_i32 = arith.constant 0 : i32
    return %arg0, %arg2 : i32, i32
  }
  func.func @transform_1(%arg0: i32, %arg1: i32, %arg2: i32) -> (i32, i32) {
    %c0_i32 = arith.constant 0 : i32
    return %arg2, %arg1 : i32, i32
  }
  func.func @transform_2(%arg0: i32, %arg1: i32, %arg2: i32) -> (i32, i32) {
    %c0_i32 = arith.constant 0 : i32
    %c0_i32_0 = arith.constant 0 : i32
    return %c0_i32, %arg1 : i32, i32
  }
  func.func @transform_3(%arg0: i32, %arg1: i32, %arg2: i32) -> (i32, i32) {
    %c0_i32 = arith.constant 0 : i32
    %c0_i32_0 = arith.constant 0 : i32
    return %c0_i32, %arg1 : i32, i32
  }
  func.func @transform_4(%arg0: i32, %arg1: i32, %arg2: i32) -> (i32, i32) {
    %c0_i32 = arith.constant 0 : i32
    return %arg0, %arg1 : i32, i32
  }
}

module attributes {stable_mosaic.version = 11 : i64} {
  func.func @_fused_matmul_kernel(%arg0: i32, %arg1: i32, %arg2: i32, %arg3: memref<32x128xbf16, #tpu.memory_space<vmem>>, %arg4: memref<128x256xbf16, #tpu.memory_space<vmem>>, %arg5: memref<1x256xf32, #tpu.memory_space<vmem>>, %arg6: memref<1x256xf32, #tpu.memory_space<vmem>>, %arg7: memref<32x256xf32, #tpu.memory_space<vmem>>, %arg8: memref<32x256xf32, #tpu.memory_space<vmem>>) attributes {dimension_semantics = [#tpu.dimension_semantics<parallel>, #tpu.dimension_semantics<parallel>, #tpu.dimension_semantics<arbitrary>], iteration_bounds = array<i64: 1, 1, 1>, scalar_prefetch = 0 : i64, scratch_operands = 1 : i64, tpu.core_type = #tpu.core_type<tc>, window_params = [{transform_indices = @transform_0, window_bounds = array<i64: 32, 128>}, {transform_indices = @transform_1, window_bounds = array<i64: 128, 256>}, {transform_indices = @transform_2, window_bounds = array<i64: 1, 256>}, {transform_indices = @transform_3, window_bounds = array<i64: 1, 256>}, {transform_indices = @transform_4, window_bounds = array<i64: 32, 256>}]} {
    %c0_i32 = arith.constant 0 : i32
    %0 = arith.cmpi eq, %arg2, %c0_i32 : i32
    %1 = arith.extui %0 : i1 to i32
    %c0_i32_0 = arith.constant 0 : i32
    %2 = arith.cmpi ne, %1, %c0_i32_0 : i32
    scf.if %2 {
      %cst_10 = arith.constant 0.000000e+00 : f32
      %12 = vector.broadcast %cst_10 : f32 to vector<32x256xf32>
      %c0_11 = arith.constant 0 : index
      %c0_12 = arith.constant 0 : index
      %13 = vector.load %arg8[%c0_11, %c0_12] : memref<32x256xf32, #tpu.memory_space<vmem>>, vector<32x256xf32>
      tpu.vector_store %arg8[%c0_11, %c0_12], %12 {strides = array<i32>} : memref<32x256xf32, #tpu.memory_space<vmem>>, vector<32x256xf32>,
    } else {
    }
    %c0 = arith.constant 0 : index
    %c0_1 = arith.constant 0 : index
    %3 = vector.load %arg8[%c0, %c0_1] : memref<32x256xf32, #tpu.memory_space<vmem>>, vector<32x256xf32>
    %c0_2 = arith.constant 0 : index
    %c0_3 = arith.constant 0 : index
    %4 = vector.load %arg3[%c0_2, %c0_3] : memref<32x128xbf16, #tpu.memory_space<vmem>>, vector<32x128xbf16>
    %c0_4 = arith.constant 0 : index
    %c0_5 = arith.constant 0 : index
    %5 = vector.load %arg4[%c0_4, %c0_5] : memref<128x256xbf16, #tpu.memory_space<vmem>>, vector<128x256xbf16>
    %cst = arith.constant dense<0.000000e+00> : vector<32x256xf32>
    %6 = tpu.matmul %4, %5, %cst {dimension_numbers = #tpu.dot_dimension_numbers<[1], [0], [0], [1], [0, 0, 1, 1], [], []>} : vector<32x128xbf16>, vector<128x256xbf16>, vector<32x256xf32> -> vector<32x256xf32>
    %7 = arith.addf %3, %6 : vector<32x256xf32>
    %c0_6 = arith.constant 0 : index
    %c0_7 = arith.constant 0 : index
    %8 = vector.load %arg8[%c0_6, %c0_7] : memref<32x256xf32, #tpu.memory_space<vmem>>, vector<32x256xf32>
    tpu.vector_store %arg8[%c0_6, %c0_7], %7 {strides = array<i32>} : memref<32x256xf32, #tpu.memory_space<vmem>>, vector<32x256xf32>,
    %c0_i32_8 = arith.constant 0 : i32
    %9 = arith.cmpi eq, %arg2, %c0_i32_8 : i32
    %10 = arith.extui %9 : i1 to i32
    %c0_i32_9 = arith.constant 0 : i32
    %11 = arith.cmpi ne, %10, %c0_i32_9 : i32
    scf.if %11 {
      %c0_10 = arith.constant 0 : index
      %c0_11 = arith.constant 0 : index
      %12 = vector.load %arg8[%c0_10, %c0_11] : memref<32x256xf32, #tpu.memory_space<vmem>>, vector<32x256xf32>
      %c0_12 = arith.constant 0 : index
      %c0_13 = arith.constant 0 : index
      %13 = vector.load %arg5[%c0_12, %c0_13] : memref<1x256xf32, #tpu.memory_space<vmem>>, vector<1x256xf32>
      %14 = vector.broadcast %13 : vector<1x256xf32> to vector<32x256xf32>
      %15 = arith.mulf %12, %14 : vector<32x256xf32>
      %c0_14 = arith.constant 0 : index
      %c0_15 = arith.constant 0 : index
      %16 = vector.load %arg6[%c0_14, %c0_15] : memref<1x256xf32, #tpu.memory_space<vmem>>, vector<1x256xf32>
      %17 = vector.broadcast %16 : vector<1x256xf32> to vector<32x256xf32>
      %18 = arith.addf %15, %17 : vector<32x256xf32>
      %c0_16 = arith.constant 0 : index
      %c0_17 = arith.constant 0 : index
      %19 = vector.load %arg7[%c0_16, %c0_17] : memref<32x256xf32, #tpu.memory_space<vmem>>, vector<32x256xf32>
      tpu.vector_store %arg7[%c0_16, %c0_17], %18 {strides = array<i32>} : memref<32x256xf32, #tpu.memory_space<vmem>>, vector<32x256xf32>,
    } else {
    }
    return
  }
  func.func @transform_0(%arg0: i32, %arg1: i32, %arg2: i32) -> (i32, i32) {
    %c0_i32 = arith.constant 0 : i32
    return %arg0, %arg2 : i32, i32
  }
  func.func @transform_1(%arg0: i32, %arg1: i32, %arg2: i32) -> (i32, i32) {
    %c0_i32 = arith.constant 0 : i32
    return %arg2, %arg1 : i32, i32
  }
  func.func @transform_2(%arg0: i32, %arg1: i32, %arg2: i32) -> (i32, i32) {
    %c0_i32 = arith.constant 0 : i32
    %c0_i32_0 = arith.constant 0 : i32
    return %c0_i32, %arg1 : i32, i32
  }
  func.func @transform_3(%arg0: i32, %arg1: i32, %arg2: i32) -> (i32, i32) {
    %c0_i32 = arith.constant 0 : i32
    %c0_i32_0 = arith.constant 0 : i32
    return %c0_i32, %arg1 : i32, i32
  }
  func.func @transform_4(%arg0: i32, %arg1: i32, %arg2: i32) -> (i32, i32) {
    %c0_i32 = arith.constant 0 : i32
    return %arg0, %arg1 : i32, i32
  }
}

module attributes {stable_mosaic.version = 11 : i64} {
  func.func @_fused_matmul_kernel(%arg0: i32, %arg1: i32, %arg2: i32, %arg3: memref<32x128xbf16, #tpu.memory_space<vmem>>, %arg4: memref<128x256xbf16, #tpu.memory_space<vmem>>, %arg5: memref<1x256xf32, #tpu.memory_space<vmem>>, %arg6: memref<1x256xf32, #tpu.memory_space<vmem>>, %arg7: memref<32x256xf32, #tpu.memory_space<vmem>>, %arg8: memref<32x256xf32, #tpu.memory_space<vmem>>, %arg9: memref<32x256xf32, #tpu.memory_space<vmem>>) attributes {dimension_semantics = [#tpu.dimension_semantics<parallel>, #tpu.dimension_semantics<parallel>, #tpu.dimension_semantics<arbitrary>], iteration_bounds = array<i64: 1, 1, 1>, scalar_prefetch = 0 : i64, scratch_operands = 1 : i64, tpu.core_type = #tpu.core_type<tc>, window_params = [{transform_indices = @transform_0, window_bounds = array<i64: 32, 128>}, {transform_indices = @transform_1, window_bounds = array<i64: 128, 256>}, {transform_indices = @transform_2, window_bounds = array<i64: 1, 256>}, {transform_indices = @transform_3, window_bounds = array<i64: 1, 256>}, {transform_indices = @transform_4, window_bounds = array<i64: 32, 256>}, {transform_indices = @transform_5, window_bounds = array<i64: 32, 256>}]} {
    %c0_i32 = arith.constant 0 : i32
    %0 = arith.cmpi eq, %arg2, %c0_i32 : i32
    %1 = arith.extui %0 : i1 to i32
    %c0_i32_0 = arith.constant 0 : i32
    %2 = arith.cmpi ne, %1, %c0_i32_0 : i32
    scf.if %2 {
      %cst_10 = arith.constant 0.000000e+00 : f32
      %12 = vector.broadcast %cst_10 : f32 to vector<32x256xf32>
      %c0_11 = arith.constant 0 : index
      %c0_12 = arith.constant 0 : index
      %13 = vector.load %arg9[%c0_11, %c0_12] : memref<32x256xf32, #tpu.memory_space<vmem>>, vector<32x256xf32>
      tpu.vector_store %arg9[%c0_11, %c0_12], %12 {strides = array<i32>} : memref<32x256xf32, #tpu.memory_space<vmem>>, vector<32x256xf32>,
    } else {
    }
    %c0 = arith.constant 0 : index
    %c0_1 = arith.constant 0 : index
    %3 = vector.load %arg9[%c0, %c0_1] : memref<32x256xf32, #tpu.memory_space<vmem>>, vector<32x256xf32>
    %c0_2 = arith.constant 0 : index
    %c0_3 = arith.constant 0 : index
    %4 = vector.load %arg3[%c0_2, %c0_3] : memref<32x128xbf16, #tpu.memory_space<vmem>>, vector<32x128xbf16>
    %c0_4 = arith.constant 0 : index
    %c0_5 = arith.constant 0 : index
    %5 = vector.load %arg4[%c0_4, %c0_5] : memref<128x256xbf16, #tpu.memory_space<vmem>>, vector<128x256xbf16>
    %cst = arith.constant dense<0.000000e+00> : vector<32x256xf32>
    %6 = tpu.matmul %4, %5, %cst {dimension_numbers = #tpu.dot_dimension_numbers<[1], [0], [0], [1], [0, 0, 1, 1], [], []>} : vector<32x128xbf16>, vector<128x256xbf16>, vector<32x256xf32> -> vector<32x256xf32>
    %7 = arith.addf %3, %6 : vector<32x256xf32>
    %c0_6 = arith.constant 0 : index
    %c0_7 = arith.constant 0 : index
    %8 = vector.load %arg9[%c0_6, %c0_7] : memref<32x256xf32, #tpu.memory_space<vmem>>, vector<32x256xf32>
    tpu.vector_store %arg9[%c0_6, %c0_7], %7 {strides = array<i32>} : memref<32x256xf32, #tpu.memory_space<vmem>>, vector<32x256xf32>,
    %c0_i32_8 = arith.constant 0 : i32
    %9 = arith.cmpi eq, %arg2, %c0_i32_8 : i32
    %10 = arith.extui %9 : i1 to i32
    %c0_i32_9 = arith.constant 0 : i32
    %11 = arith.cmpi ne, %10, %c0_i32_9 : i32
    scf.if %11 {
      %c0_10 = arith.constant 0 : index
      %c0_11 = arith.constant 0 : index
      %12 = vector.load %arg9[%c0_10, %c0_11] : memref<32x256xf32, #tpu.memory_space<vmem>>, vector<32x256xf32>
      %c0_12 = arith.constant 0 : index
      %c0_13 = arith.constant 0 : index
      %13 = vector.load %arg5[%c0_12, %c0_13] : memref<1x256xf32, #tpu.memory_space<vmem>>, vector<1x256xf32>
      %14 = vector.broadcast %13 : vector<1x256xf32> to vector<32x256xf32>
      %15 = arith.mulf %12, %14 : vector<32x256xf32>
      %c0_14 = arith.constant 0 : index
      %c0_15 = arith.constant 0 : index
      %16 = vector.load %arg6[%c0_14, %c0_15] : memref<1x256xf32, #tpu.memory_space<vmem>>, vector<1x256xf32>
      %17 = vector.broadcast %16 : vector<1x256xf32> to vector<32x256xf32>
      %18 = arith.addf %15, %17 : vector<32x256xf32>
      %c0_16 = arith.constant 0 : index
      %c0_17 = arith.constant 0 : index
      %19 = vector.load %arg7[%c0_16, %c0_17] : memref<32x256xf32, #tpu.memory_space<vmem>>, vector<32x256xf32>
      %20 = arith.addf %18, %19 : vector<32x256xf32>
      %cst_18 = arith.constant 0.000000e+00 : f32
      %21 = vector.broadcast %cst_18 : f32 to vector<32x256xf32>
      %22 = arith.maximumf %20, %21 : vector<32x256xf32>
      %c0_19 = arith.constant 0 : index
      %c0_20 = arith.constant 0 : index
      %23 = vector.load %arg8[%c0_19, %c0_20] : memref<32x256xf32, #tpu.memory_space<vmem>>, vector<32x256xf32>
      tpu.vector_store %arg8[%c0_19, %c0_20], %22 {strides = array<i32>} : memref<32x256xf32, #tpu.memory_space<vmem>>, vector<32x256xf32>,
    } else {
    }
    return
  }
  func.func @transform_0(%arg0: i32, %arg1: i32, %arg2: i32) -> (i32, i32) {
    %c0_i32 = arith.constant 0 : i32
    return %arg0, %arg2 : i32, i32
  }
  func.func @transform_1(%arg0: i32, %arg1: i32, %arg2: i32) -> (i32, i32) {
    %c0_i32 = arith.constant 0 : i32
    return %arg2, %arg1 : i32, i32
  }
  func.func @transform_2(%arg0: i32, %arg1: i32, %arg2: i32) -> (i32, i32) {
    %c0_i32 = arith.constant 0 : i32
    %c0_i32_0 = arith.constant 0 : i32
    return %c0_i32, %arg1 : i32, i32
  }
  func.func @transform_3(%arg0: i32, %arg1: i32, %arg2: i32) -> (i32, i32) {
    %c0_i32 = arith.constant 0 : i32
    %c0_i32_0 = arith.constant 0 : i32
    return %c0_i32, %arg1 : i32, i32
  }
  func.func @transform_4(%arg0: i32, %arg1: i32, %arg2: i32) -> (i32, i32) {
    %c0_i32 = arith.constant 0 : i32
    return %arg0, %arg1 : i32, i32
  }
  func.func @transform_5(%arg0: i32, %arg1: i32, %arg2: i32) -> (i32, i32) {
    %c0_i32 = arith.constant 0 : i32
    return %arg0, %arg1 : i32, i32
  }
}

module attributes {stable_mosaic.version = 11 : i64} {
  func.func @_fused_matmul_kernel(%arg0: i32, %arg1: i32, %arg2: i32, %arg3: memref<32x256xbf16, #tpu.memory_space<vmem>>, %arg4: memref<256x128xbf16, #tpu.memory_space<vmem>>, %arg5: memref<1x128xf32, #tpu.memory_space<vmem>>, %arg6: memref<1x128xf32, #tpu.memory_space<vmem>>, %arg7: memref<32x128xf32, #tpu.memory_space<vmem>>, %arg8: memref<32x128xf32, #tpu.memory_space<vmem>>) attributes {dimension_semantics = [#tpu.dimension_semantics<parallel>, #tpu.dimension_semantics<parallel>, #tpu.dimension_semantics<arbitrary>], iteration_bounds = array<i64: 1, 1, 1>, scalar_prefetch = 0 : i64, scratch_operands = 1 : i64, tpu.core_type = #tpu.core_type<tc>, window_params = [{transform_indices = @transform_0, window_bounds = array<i64: 32, 256>}, {transform_indices = @transform_1, window_bounds = array<i64: 256, 128>}, {transform_indices = @transform_2, window_bounds = array<i64: 1, 128>}, {transform_indices = @transform_3, window_bounds = array<i64: 1, 128>}, {transform_indices = @transform_4, window_bounds = array<i64: 32, 128>}]} {
    %c0_i32 = arith.constant 0 : i32
    %0 = arith.cmpi eq, %arg2, %c0_i32 : i32
    %1 = arith.extui %0 : i1 to i32
    %c0_i32_0 = arith.constant 0 : i32
    %2 = arith.cmpi ne, %1, %c0_i32_0 : i32
    scf.if %2 {
      %cst_10 = arith.constant 0.000000e+00 : f32
      %12 = vector.broadcast %cst_10 : f32 to vector<32x128xf32>
      %c0_11 = arith.constant 0 : index
      %c0_12 = arith.constant 0 : index
      %13 = vector.load %arg8[%c0_11, %c0_12] : memref<32x128xf32, #tpu.memory_space<vmem>>, vector<32x128xf32>
      tpu.vector_store %arg8[%c0_11, %c0_12], %12 {strides = array<i32>} : memref<32x128xf32, #tpu.memory_space<vmem>>, vector<32x128xf32>,
    } else {
    }
    %c0 = arith.constant 0 : index
    %c0_1 = arith.constant 0 : index
    %3 = vector.load %arg8[%c0, %c0_1] : memref<32x128xf32, #tpu.memory_space<vmem>>, vector<32x128xf32>
    %c0_2 = arith.constant 0 : index
    %c0_3 = arith.constant 0 : index
    %4 = vector.load %arg3[%c0_2, %c0_3] : memref<32x256xbf16, #tpu.memory_space<vmem>>, vector<32x256xbf16>
    %c0_4 = arith.constant 0 : index
    %c0_5 = arith.constant 0 : index
    %5 = vector.load %arg4[%c0_4, %c0_5] : memref<256x128xbf16, #tpu.memory_space<vmem>>, vector<256x128xbf16>
    %cst = arith.constant dense<0.000000e+00> : vector<32x128xf32>
    %6 = tpu.matmul %4, %5, %cst {dimension_numbers = #tpu.dot_dimension_numbers<[1], [0], [0], [1], [0, 0, 1, 1], [], []>} : vector<32x256xbf16>, vector<256x128xbf16>, vector<32x128xf32> -> vector<32x128xf32>
    %7 = arith.addf %3, %6 : vector<32x128xf32>
    %c0_6 = arith.constant 0 : index
    %c0_7 = arith.constant 0 : index
    %8 = vector.load %arg8[%c0_6, %c0_7] : memref<32x128xf32, #tpu.memory_space<vmem>>, vector<32x128xf32>
    tpu.vector_store %arg8[%c0_6, %c0_7], %7 {strides = array<i32>} : memref<32x128xf32, #tpu.memory_space<vmem>>, vector<32x128xf32>,
    %c0_i32_8 = arith.constant 0 : i32
    %9 = arith.cmpi eq, %arg2, %c0_i32_8 : i32
    %10 = arith.extui %9 : i1 to i32
    %c0_i32_9 = arith.constant 0 : i32
    %11 = arith.cmpi ne, %10, %c0_i32_9 : i32
    scf.if %11 {
      %c0_10 = arith.constant 0 : index
      %c0_11 = arith.constant 0 : index
      %12 = vector.load %arg8[%c0_10, %c0_11] : memref<32x128xf32, #tpu.memory_space<vmem>>, vector<32x128xf32>
      %c0_12 = arith.constant 0 : index
      %c0_13 = arith.constant 0 : index
      %13 = vector.load %arg5[%c0_12, %c0_13] : memref<1x128xf32, #tpu.memory_space<vmem>>, vector<1x128xf32>
      %14 = vector.broadcast %13 : vector<1x128xf32> to vector<32x128xf32>
      %15 = arith.mulf %12, %14 : vector<32x128xf32>
      %c0_14 = arith.constant 0 : index
      %c0_15 = arith.constant 0 : index
      %16 = vector.load %arg6[%c0_14, %c0_15] : memref<1x128xf32, #tpu.memory_space<vmem>>, vector<1x128xf32>
      %17 = vector.broadcast %16 : vector<1x128xf32> to vector<32x128xf32>
      %18 = arith.addf %15, %17 : vector<32x128xf32>
      %cst_16 = arith.constant 0.000000e+00 : f32
      %19 = vector.broadcast %cst_16 : f32 to vector<32x128xf32>
      %20 = arith.maximumf %18, %19 : vector<32x128xf32>
      %c0_17 = arith.constant 0 : index
      %c0_18 = arith.constant 0 : index
      %21 = vector.load %arg7[%c0_17, %c0_18] : memref<32x128xf32, #tpu.memory_space<vmem>>, vector<32x128xf32>
      tpu.vector_store %arg7[%c0_17, %c0_18], %20 {strides = array<i32>} : memref<32x128xf32, #tpu.memory_space<vmem>>, vector<32x128xf32>,
    } else {
    }
    return
  }
  func.func @transform_0(%arg0: i32, %arg1: i32, %arg2: i32) -> (i32, i32) {
    %c0_i32 = arith.constant 0 : i32
    return %arg0, %arg2 : i32, i32
  }
  func.func @transform_1(%arg0: i32, %arg1: i32, %arg2: i32) -> (i32, i32) {
    %c0_i32 = arith.constant 0 : i32
    return %arg2, %arg1 : i32, i32
  }
  func.func @transform_2(%arg0: i32, %arg1: i32, %arg2: i32) -> (i32, i32) {
    %c0_i32 = arith.constant 0 : i32
    %c0_i32_0 = arith.constant 0 : i32
    return %c0_i32, %arg1 : i32, i32
  }
  func.func @transform_3(%arg0: i32, %arg1: i32, %arg2: i32) -> (i32, i32) {
    %c0_i32 = arith.constant 0 : i32
    %c0_i32_0 = arith.constant 0 : i32
    return %c0_i32, %arg1 : i32, i32
  }
  func.func @transform_4(%arg0: i32, %arg1: i32, %arg2: i32) -> (i32, i32) {
    %c0_i32 = arith.constant 0 : i32
    return %arg0, %arg1 : i32, i32
  }
}

module attributes {stable_mosaic.version = 11 : i64} {
  func.func @_fused_matmul_kernel(%arg0: i32, %arg1: i32, %arg2: i32, %arg3: memref<8x512xbf16, #tpu.memory_space<vmem>>, %arg4: memref<512x128xbf16, #tpu.memory_space<vmem>>, %arg5: memref<1x128xf32, #tpu.memory_space<vmem>>, %arg6: memref<1x128xf32, #tpu.memory_space<vmem>>, %arg7: memref<8x128xf32, #tpu.memory_space<vmem>>, %arg8: memref<8x128xf32, #tpu.memory_space<vmem>>) attributes {dimension_semantics = [#tpu.dimension_semantics<parallel>, #tpu.dimension_semantics<parallel>, #tpu.dimension_semantics<arbitrary>], iteration_bounds = array<i64: 1, 1, 3>, scalar_prefetch = 0 : i64, scratch_operands = 1 : i64, tpu.core_type = #tpu.core_type<tc>, window_params = [{transform_indices = @transform_0, window_bounds = array<i64: 8, 512>}, {transform_indices = @transform_1, window_bounds = array<i64: 512, 128>}, {transform_indices = @transform_2, window_bounds = array<i64: 1, 128>}, {transform_indices = @transform_3, window_bounds = array<i64: 1, 128>}, {transform_indices = @transform_4, window_bounds = array<i64: 8, 128>}]} {
    %c0_i32 = arith.constant 0 : i32
    %0 = arith.cmpi eq, %arg2, %c0_i32 : i32
    %1 = arith.extui %0 : i1 to i32
    %c0_i32_0 = arith.constant 0 : i32
    %2 = arith.cmpi ne, %1, %c0_i32_0 : i32
    scf.if %2 {
      %cst_9 = arith.constant 0.000000e+00 : f32
      %12 = vector.broadcast %cst_9 : f32 to vector<8x128xf32>
      %c0_10 = arith.constant 0 : index
      %c0_11 = arith.constant 0 : index
      %13 = vector.load %arg8[%c0_10, %c0_11] : memref<8x128xf32, #tpu.memory_space<vmem>>, vector<8x128xf32>
      tpu.vector_store %arg8[%c0_10, %c0_11], %12 {strides = array<i32>} : memref<8x128xf32, #tpu.memory_space<vmem>>, vector<8x128xf32>,
    } else {
    }
    %c0 = arith.constant 0 : index
    %c0_1 = arith.constant 0 : index
    %3 = vector.load %arg8[%c0, %c0_1] : memref<8x128xf32, #tpu.memory_space<vmem>>, vector<8x128xf32>
    %c0_2 = arith.constant 0 : index
    %c0_3 = arith.constant 0 : index
    %4 = vector.load %arg3[%c0_2, %c0_3] : memref<8x512xbf16, #tpu.memory_space<vmem>>, vector<8x512xbf16>
    %c0_4 = arith.constant 0 : index
    %c0_5 = arith.constant 0 : index
    %5 = vector.load %arg4[%c0_4, %c0_5] : memref<512x128xbf16, #tpu.memory_space<vmem>>, vector<512x128xbf16>
    %cst = arith.constant dense<0.000000e+00> : vector<8x128xf32>
    %6 = tpu.matmul %4, %5, %cst {dimension_numbers = #tpu.dot_dimension_numbers<[1], [0], [0], [1], [0, 0, 1, 1], [], []>} : vector<8x512xbf16>, vector<512x128xbf16>, vector<8x128xf32> -> vector<8x128xf32>
    %7 = arith.addf %3, %6 : vector<8x128xf32>
    %c0_6 = arith.constant 0 : index
    %c0_7 = arith.constant 0 : index
    %8 = vector.load %arg8[%c0_6, %c0_7] : memref<8x128xf32, #tpu.memory_space<vmem>>, vector<8x128xf32>
    tpu.vector_store %arg8[%c0_6, %c0_7], %7 {strides = array<i32>} : memref<8x128xf32, #tpu.memory_space<vmem>>, vector<8x128xf32>,
    %c2_i32 = arith.constant 2 : i32
    %9 = arith.cmpi eq, %arg2, %c2_i32 : i32
    %10 = arith.extui %9 : i1 to i32
    %c0_i32_8 = arith.constant 0 : i32
    %11 = arith.cmpi ne, %10, %c0_i32_8 : i32
    scf.if %11 {
      %c0_9 = arith.constant 0 : index
      %c0_10 = arith.constant 0 : index
      %12 = vector.load %arg8[%c0_9, %c0_10] : memref<8x128xf32, #tpu.memory_space<vmem>>, vector<8x128xf32>
      %c0_11 = arith.constant 0 : index
      %c0_12 = arith.constant 0 : index
      %13 = vector.load %arg5[%c0_11, %c0_12] : memref<1x128xf32, #tpu.memory_space<vmem>>, vector<1x128xf32>
      %14 = vector.broadcast %13 : vector<1x128xf32> to vector<8x128xf32>
      %15 = arith.mulf %12, %14 : vector<8x128xf32>
      %c0_13 = arith.constant 0 : index
      %c0_14 = arith.constant 0 : index
      %16 = vector.load %arg6[%c0_13, %c0_14] : memref<1x128xf32, #tpu.memory_space<vmem>>, vector<1x128xf32>
      %17 = vector.broadcast %16 : vector<1x128xf32> to vector<8x128xf32>
      %18 = arith.addf %15, %17 : vector<8x128xf32>
      %cst_15 = arith.constant 0.000000e+00 : f32
      %19 = vector.broadcast %cst_15 : f32 to vector<8x128xf32>
      %20 = arith.maximumf %18, %19 : vector<8x128xf32>
      %c0_16 = arith.constant 0 : index
      %c0_17 = arith.constant 0 : index
      %21 = vector.load %arg7[%c0_16, %c0_17] : memref<8x128xf32, #tpu.memory_space<vmem>>, vector<8x128xf32>
      tpu.vector_store %arg7[%c0_16, %c0_17], %20 {strides = array<i32>} : memref<8x128xf32, #tpu.memory_space<vmem>>, vector<8x128xf32>,
    } else {
    }
    return
  }
  func.func @transform_0(%arg0: i32, %arg1: i32, %arg2: i32) -> (i32, i32) {
    %c0_i32 = arith.constant 0 : i32
    return %arg0, %arg2 : i32, i32
  }
  func.func @transform_1(%arg0: i32, %arg1: i32, %arg2: i32) -> (i32, i32) {
    %c0_i32 = arith.constant 0 : i32
    return %arg2, %arg1 : i32, i32
  }
  func.func @transform_2(%arg0: i32, %arg1: i32, %arg2: i32) -> (i32, i32) {
    %c0_i32 = arith.constant 0 : i32
    %c0_i32_0 = arith.constant 0 : i32
    return %c0_i32, %arg1 : i32, i32
  }
  func.func @transform_3(%arg0: i32, %arg1: i32, %arg2: i32) -> (i32, i32) {
    %c0_i32 = arith.constant 0 : i32
    %c0_i32_0 = arith.constant 0 : i32
    return %c0_i32, %arg1 : i32, i32
  }
  func.func @transform_4(%arg0: i32, %arg1: i32, %arg2: i32) -> (i32, i32) {
    %c0_i32 = arith.constant 0 : i32
    return %arg0, %arg1 : i32, i32
  }
}

module attributes {stable_mosaic.version = 11 : i64} {
  func.func @_fused_matmul_kernel(%arg0: i32, %arg1: i32, %arg2: i32, %arg3: memref<8x256xbf16, #tpu.memory_space<vmem>>, %arg4: memref<256x256xbf16, #tpu.memory_space<vmem>>, %arg5: memref<1x256xf32, #tpu.memory_space<vmem>>, %arg6: memref<1x256xf32, #tpu.memory_space<vmem>>, %arg7: memref<8x256xf32, #tpu.memory_space<vmem>>, %arg8: memref<8x256xf32, #tpu.memory_space<vmem>>) attributes {dimension_semantics = [#tpu.dimension_semantics<parallel>, #tpu.dimension_semantics<parallel>, #tpu.dimension_semantics<arbitrary>], iteration_bounds = array<i64: 1, 2, 1>, scalar_prefetch = 0 : i64, scratch_operands = 1 : i64, tpu.core_type = #tpu.core_type<tc>, window_params = [{transform_indices = @transform_0, window_bounds = array<i64: 8, 256>}, {transform_indices = @transform_1, window_bounds = array<i64: 256, 256>}, {transform_indices = @transform_2, window_bounds = array<i64: 1, 256>}, {transform_indices = @transform_3, window_bounds = array<i64: 1, 256>}, {transform_indices = @transform_4, window_bounds = array<i64: 8, 256>}]} {
    %c0_i32 = arith.constant 0 : i32
    %0 = arith.cmpi eq, %arg2, %c0_i32 : i32
    %1 = arith.extui %0 : i1 to i32
    %c0_i32_0 = arith.constant 0 : i32
    %2 = arith.cmpi ne, %1, %c0_i32_0 : i32
    scf.if %2 {
      %cst_10 = arith.constant 0.000000e+00 : f32
      %12 = vector.broadcast %cst_10 : f32 to vector<8x256xf32>
      %c0_11 = arith.constant 0 : index
      %c0_12 = arith.constant 0 : index
      %13 = vector.load %arg8[%c0_11, %c0_12] : memref<8x256xf32, #tpu.memory_space<vmem>>, vector<8x256xf32>
      tpu.vector_store %arg8[%c0_11, %c0_12], %12 {strides = array<i32>} : memref<8x256xf32, #tpu.memory_space<vmem>>, vector<8x256xf32>,
    } else {
    }
    %c0 = arith.constant 0 : index
    %c0_1 = arith.constant 0 : index
    %3 = vector.load %arg8[%c0, %c0_1] : memref<8x256xf32, #tpu.memory_space<vmem>>, vector<8x256xf32>
    %c0_2 = arith.constant 0 : index
    %c0_3 = arith.constant 0 : index
    %4 = vector.load %arg3[%c0_2, %c0_3] : memref<8x256xbf16, #tpu.memory_space<vmem>>, vector<8x256xbf16>
    %c0_4 = arith.constant 0 : index
    %c0_5 = arith.constant 0 : index
    %5 = vector.load %arg4[%c0_4, %c0_5] : memref<256x256xbf16, #tpu.memory_space<vmem>>, vector<256x256xbf16>
    %cst = arith.constant dense<0.000000e+00> : vector<8x256xf32>
    %6 = tpu.matmul %4, %5, %cst {dimension_numbers = #tpu.dot_dimension_numbers<[1], [0], [0], [1], [0, 0, 1, 1], [], []>} : vector<8x256xbf16>, vector<256x256xbf16>, vector<8x256xf32> -> vector<8x256xf32>
    %7 = arith.addf %3, %6 : vector<8x256xf32>
    %c0_6 = arith.constant 0 : index
    %c0_7 = arith.constant 0 : index
    %8 = vector.load %arg8[%c0_6, %c0_7] : memref<8x256xf32, #tpu.memory_space<vmem>>, vector<8x256xf32>
    tpu.vector_store %arg8[%c0_6, %c0_7], %7 {strides = array<i32>} : memref<8x256xf32, #tpu.memory_space<vmem>>, vector<8x256xf32>,
    %c0_i32_8 = arith.constant 0 : i32
    %9 = arith.cmpi eq, %arg2, %c0_i32_8 : i32
    %10 = arith.extui %9 : i1 to i32
    %c0_i32_9 = arith.constant 0 : i32
    %11 = arith.cmpi ne, %10, %c0_i32_9 : i32
    scf.if %11 {
      %c0_10 = arith.constant 0 : index
      %c0_11 = arith.constant 0 : index
      %12 = vector.load %arg8[%c0_10, %c0_11] : memref<8x256xf32, #tpu.memory_space<vmem>>, vector<8x256xf32>
      %c0_12 = arith.constant 0 : index
      %c0_13 = arith.constant 0 : index
      %13 = vector.load %arg5[%c0_12, %c0_13] : memref<1x256xf32, #tpu.memory_space<vmem>>, vector<1x256xf32>
      %14 = vector.broadcast %13 : vector<1x256xf32> to vector<8x256xf32>
      %15 = arith.mulf %12, %14 : vector<8x256xf32>
      %c0_14 = arith.constant 0 : index
      %c0_15 = arith.constant 0 : index
      %16 = vector.load %arg6[%c0_14, %c0_15] : memref<1x256xf32, #tpu.memory_space<vmem>>, vector<1x256xf32>
      %17 = vector.broadcast %16 : vector<1x256xf32> to vector<8x256xf32>
      %18 = arith.addf %15, %17 : vector<8x256xf32>
      %c0_16 = arith.constant 0 : index
      %c0_17 = arith.constant 0 : index
      %19 = vector.load %arg7[%c0_16, %c0_17] : memref<8x256xf32, #tpu.memory_space<vmem>>, vector<8x256xf32>
      tpu.vector_store %arg7[%c0_16, %c0_17], %18 {strides = array<i32>} : memref<8x256xf32, #tpu.memory_space<vmem>>, vector<8x256xf32>,
    } else {
    }
    return
  }
  func.func @transform_0(%arg0: i32, %arg1: i32, %arg2: i32) -> (i32, i32) {
    %c0_i32 = arith.constant 0 : i32
    return %arg0, %arg2 : i32, i32
  }
  func.func @transform_1(%arg0: i32, %arg1: i32, %arg2: i32) -> (i32, i32) {
    %c0_i32 = arith.constant 0 : i32
    return %arg2, %arg1 : i32, i32
  }
  func.func @transform_2(%arg0: i32, %arg1: i32, %arg2: i32) -> (i32, i32) {
    %c0_i32 = arith.constant 0 : i32
    %c0_i32_0 = arith.constant 0 : i32
    return %c0_i32, %arg1 : i32, i32
  }
  func.func @transform_3(%arg0: i32, %arg1: i32, %arg2: i32) -> (i32, i32) {
    %c0_i32 = arith.constant 0 : i32
    %c0_i32_0 = arith.constant 0 : i32
    return %c0_i32, %arg1 : i32, i32
  }
  func.func @transform_4(%arg0: i32, %arg1: i32, %arg2: i32) -> (i32, i32) {
    %c0_i32 = arith.constant 0 : i32
    return %arg0, %arg1 : i32, i32
  }
}

module attributes {stable_mosaic.version = 11 : i64} {
  func.func @_fused_matmul_kernel(%arg0: i32, %arg1: i32, %arg2: i32, %arg3: memref<8x128xbf16, #tpu.memory_space<vmem>>, %arg4: memref<128x256xbf16, #tpu.memory_space<vmem>>, %arg5: memref<1x256xf32, #tpu.memory_space<vmem>>, %arg6: memref<1x256xf32, #tpu.memory_space<vmem>>, %arg7: memref<8x256xf32, #tpu.memory_space<vmem>>, %arg8: memref<8x256xf32, #tpu.memory_space<vmem>>, %arg9: memref<8x256xf32, #tpu.memory_space<vmem>>) attributes {dimension_semantics = [#tpu.dimension_semantics<parallel>, #tpu.dimension_semantics<parallel>, #tpu.dimension_semantics<arbitrary>], iteration_bounds = array<i64: 1, 2, 1>, scalar_prefetch = 0 : i64, scratch_operands = 1 : i64, tpu.core_type = #tpu.core_type<tc>, window_params = [{transform_indices = @transform_0, window_bounds = array<i64: 8, 128>}, {transform_indices = @transform_1, window_bounds = array<i64: 128, 256>}, {transform_indices = @transform_2, window_bounds = array<i64: 1, 256>}, {transform_indices = @transform_3, window_bounds = array<i64: 1, 256>}, {transform_indices = @transform_4, window_bounds = array<i64: 8, 256>}, {transform_indices = @transform_5, window_bounds = array<i64: 8, 256>}]} {
    %c0_i32 = arith.constant 0 : i32
    %0 = arith.cmpi eq, %arg2, %c0_i32 : i32
    %1 = arith.extui %0 : i1 to i32
    %c0_i32_0 = arith.constant 0 : i32
    %2 = arith.cmpi ne, %1, %c0_i32_0 : i32
    scf.if %2 {
      %cst_10 = arith.constant 0.000000e+00 : f32
      %12 = vector.broadcast %cst_10 : f32 to vector<8x256xf32>
      %c0_11 = arith.constant 0 : index
      %c0_12 = arith.constant 0 : index
      %13 = vector.load %arg9[%c0_11, %c0_12] : memref<8x256xf32, #tpu.memory_space<vmem>>, vector<8x256xf32>
      tpu.vector_store %arg9[%c0_11, %c0_12], %12 {strides = array<i32>} : memref<8x256xf32, #tpu.memory_space<vmem>>, vector<8x256xf32>,
    } else {
    }
    %c0 = arith.constant 0 : index
    %c0_1 = arith.constant 0 : index
    %3 = vector.load %arg9[%c0, %c0_1] : memref<8x256xf32, #tpu.memory_space<vmem>>, vector<8x256xf32>
    %c0_2 = arith.constant 0 : index
    %c0_3 = arith.constant 0 : index
    %4 = vector.load %arg3[%c0_2, %c0_3] : memref<8x128xbf16, #tpu.memory_space<vmem>>, vector<8x128xbf16>
    %c0_4 = arith.constant 0 : index
    %c0_5 = arith.constant 0 : index
    %5 = vector.load %arg4[%c0_4, %c0_5] : memref<128x256xbf16, #tpu.memory_space<vmem>>, vector<128x256xbf16>
    %cst = arith.constant dense<0.000000e+00> : vector<8x256xf32>
    %6 = tpu.matmul %4, %5, %cst {dimension_numbers = #tpu.dot_dimension_numbers<[1], [0], [0], [1], [0, 0, 1, 1], [], []>} : vector<8x128xbf16>, vector<128x256xbf16>, vector<8x256xf32> -> vector<8x256xf32>
    %7 = arith.addf %3, %6 : vector<8x256xf32>
    %c0_6 = arith.constant 0 : index
    %c0_7 = arith.constant 0 : index
    %8 = vector.load %arg9[%c0_6, %c0_7] : memref<8x256xf32, #tpu.memory_space<vmem>>, vector<8x256xf32>
    tpu.vector_store %arg9[%c0_6, %c0_7], %7 {strides = array<i32>} : memref<8x256xf32, #tpu.memory_space<vmem>>, vector<8x256xf32>,
    %c0_i32_8 = arith.constant 0 : i32
    %9 = arith.cmpi eq, %arg2, %c0_i32_8 : i32
    %10 = arith.extui %9 : i1 to i32
    %c0_i32_9 = arith.constant 0 : i32
    %11 = arith.cmpi ne, %10, %c0_i32_9 : i32
    scf.if %11 {
      %c0_10 = arith.constant 0 : index
      %c0_11 = arith.constant 0 : index
      %12 = vector.load %arg9[%c0_10, %c0_11] : memref<8x256xf32, #tpu.memory_space<vmem>>, vector<8x256xf32>
      %c0_12 = arith.constant 0 : index
      %c0_13 = arith.constant 0 : index
      %13 = vector.load %arg5[%c0_12, %c0_13] : memref<1x256xf32, #tpu.memory_space<vmem>>, vector<1x256xf32>
      %14 = vector.broadcast %13 : vector<1x256xf32> to vector<8x256xf32>
      %15 = arith.mulf %12, %14 : vector<8x256xf32>
      %c0_14 = arith.constant 0 : index
      %c0_15 = arith.constant 0 : index
      %16 = vector.load %arg6[%c0_14, %c0_15] : memref<1x256xf32, #tpu.memory_space<vmem>>, vector<1x256xf32>
      %17 = vector.broadcast %16 : vector<1x256xf32> to vector<8x256xf32>
      %18 = arith.addf %15, %17 : vector<8x256xf32>
      %c0_16 = arith.constant 0 : index
      %c0_17 = arith.constant 0 : index
      %19 = vector.load %arg7[%c0_16, %c0_17] : memref<8x256xf32, #tpu.memory_space<vmem>>, vector<8x256xf32>
      %20 = arith.addf %18, %19 : vector<8x256xf32>
      %cst_18 = arith.constant 0.000000e+00 : f32
      %21 = vector.broadcast %cst_18 : f32 to vector<8x256xf32>
      %22 = arith.maximumf %20, %21 : vector<8x256xf32>
      %c0_19 = arith.constant 0 : index
      %c0_20 = arith.constant 0 : index
      %23 = vector.load %arg8[%c0_19, %c0_20] : memref<8x256xf32, #tpu.memory_space<vmem>>, vector<8x256xf32>
      tpu.vector_store %arg8[%c0_19, %c0_20], %22 {strides = array<i32>} : memref<8x256xf32, #tpu.memory_space<vmem>>, vector<8x256xf32>,
    } else {
    }
    return
  }
  func.func @transform_0(%arg0: i32, %arg1: i32, %arg2: i32) -> (i32, i32) {
    %c0_i32 = arith.constant 0 : i32
    return %arg0, %arg2 : i32, i32
  }
  func.func @transform_1(%arg0: i32, %arg1: i32, %arg2: i32) -> (i32, i32) {
    %c0_i32 = arith.constant 0 : i32
    return %arg2, %arg1 : i32, i32
  }
  func.func @transform_2(%arg0: i32, %arg1: i32, %arg2: i32) -> (i32, i32) {
    %c0_i32 = arith.constant 0 : i32
    %c0_i32_0 = arith.constant 0 : i32
    return %c0_i32, %arg1 : i32, i32
  }
  func.func @transform_3(%arg0: i32, %arg1: i32, %arg2: i32) -> (i32, i32) {
    %c0_i32 = arith.constant 0 : i32
    %c0_i32_0 = arith.constant 0 : i32
    return %c0_i32, %arg1 : i32, i32
  }
  func.func @transform_4(%arg0: i32, %arg1: i32, %arg2: i32) -> (i32, i32) {
    %c0_i32 = arith.constant 0 : i32
    return %arg0, %arg1 : i32, i32
  }
  func.func @transform_5(%arg0: i32, %arg1: i32, %arg2: i32) -> (i32, i32) {
    %c0_i32 = arith.constant 0 : i32
    return %arg0, %arg1 : i32, i32
  }
}

module attributes {stable_mosaic.version = 11 : i64} {
  func.func @_fused_matmul_kernel(%arg0: i32, %arg1: i32, %arg2: i32, %arg3: memref<8x512xbf16, #tpu.memory_space<vmem>>, %arg4: memref<512x128xbf16, #tpu.memory_space<vmem>>, %arg5: memref<1x128xf32, #tpu.memory_space<vmem>>, %arg6: memref<1x128xf32, #tpu.memory_space<vmem>>, %arg7: memref<8x128xf32, #tpu.memory_space<vmem>>, %arg8: memref<8x128xf32, #tpu.memory_space<vmem>>) attributes {dimension_semantics = [#tpu.dimension_semantics<parallel>, #tpu.dimension_semantics<parallel>, #tpu.dimension_semantics<arbitrary>], iteration_bounds = array<i64: 1, 1, 1>, scalar_prefetch = 0 : i64, scratch_operands = 1 : i64, tpu.core_type = #tpu.core_type<tc>, window_params = [{transform_indices = @transform_0, window_bounds = array<i64: 8, 512>}, {transform_indices = @transform_1, window_bounds = array<i64: 512, 128>}, {transform_indices = @transform_2, window_bounds = array<i64: 1, 128>}, {transform_indices = @transform_3, window_bounds = array<i64: 1, 128>}, {transform_indices = @transform_4, window_bounds = array<i64: 8, 128>}]} {
    %c0_i32 = arith.constant 0 : i32
    %0 = arith.cmpi eq, %arg2, %c0_i32 : i32
    %1 = arith.extui %0 : i1 to i32
    %c0_i32_0 = arith.constant 0 : i32
    %2 = arith.cmpi ne, %1, %c0_i32_0 : i32
    scf.if %2 {
      %cst_10 = arith.constant 0.000000e+00 : f32
      %12 = vector.broadcast %cst_10 : f32 to vector<8x128xf32>
      %c0_11 = arith.constant 0 : index
      %c0_12 = arith.constant 0 : index
      %13 = vector.load %arg8[%c0_11, %c0_12] : memref<8x128xf32, #tpu.memory_space<vmem>>, vector<8x128xf32>
      tpu.vector_store %arg8[%c0_11, %c0_12], %12 {strides = array<i32>} : memref<8x128xf32, #tpu.memory_space<vmem>>, vector<8x128xf32>,
    } else {
    }
    %c0 = arith.constant 0 : index
    %c0_1 = arith.constant 0 : index
    %3 = vector.load %arg8[%c0, %c0_1] : memref<8x128xf32, #tpu.memory_space<vmem>>, vector<8x128xf32>
    %c0_2 = arith.constant 0 : index
    %c0_3 = arith.constant 0 : index
    %4 = vector.load %arg3[%c0_2, %c0_3] : memref<8x512xbf16, #tpu.memory_space<vmem>>, vector<8x512xbf16>
    %c0_4 = arith.constant 0 : index
    %c0_5 = arith.constant 0 : index
    %5 = vector.load %arg4[%c0_4, %c0_5] : memref<512x128xbf16, #tpu.memory_space<vmem>>, vector<512x128xbf16>
    %cst = arith.constant dense<0.000000e+00> : vector<8x128xf32>
    %6 = tpu.matmul %4, %5, %cst {dimension_numbers = #tpu.dot_dimension_numbers<[1], [0], [0], [1], [0, 0, 1, 1], [], []>} : vector<8x512xbf16>, vector<512x128xbf16>, vector<8x128xf32> -> vector<8x128xf32>
    %7 = arith.addf %3, %6 : vector<8x128xf32>
    %c0_6 = arith.constant 0 : index
    %c0_7 = arith.constant 0 : index
    %8 = vector.load %arg8[%c0_6, %c0_7] : memref<8x128xf32, #tpu.memory_space<vmem>>, vector<8x128xf32>
    tpu.vector_store %arg8[%c0_6, %c0_7], %7 {strides = array<i32>} : memref<8x128xf32, #tpu.memory_space<vmem>>, vector<8x128xf32>,
    %c0_i32_8 = arith.constant 0 : i32
    %9 = arith.cmpi eq, %arg2, %c0_i32_8 : i32
    %10 = arith.extui %9 : i1 to i32
    %c0_i32_9 = arith.constant 0 : i32
    %11 = arith.cmpi ne, %10, %c0_i32_9 : i32
    scf.if %11 {
      %c0_10 = arith.constant 0 : index
      %c0_11 = arith.constant 0 : index
      %12 = vector.load %arg8[%c0_10, %c0_11] : memref<8x128xf32, #tpu.memory_space<vmem>>, vector<8x128xf32>
      %c0_12 = arith.constant 0 : index
      %c0_13 = arith.constant 0 : index
      %13 = vector.load %arg5[%c0_12, %c0_13] : memref<1x128xf32, #tpu.memory_space<vmem>>, vector<1x128xf32>
      %14 = vector.broadcast %13 : vector<1x128xf32> to vector<8x128xf32>
      %15 = arith.mulf %12, %14 : vector<8x128xf32>
      %c0_14 = arith.constant 0 : index
      %c0_15 = arith.constant 0 : index
      %16 = vector.load %arg6[%c0_14, %c0_15] : memref<1x128xf32, #tpu.memory_space<vmem>>, vector<1x128xf32>
      %17 = vector.broadcast %16 : vector<1x128xf32> to vector<8x128xf32>
      %18 = arith.addf %15, %17 : vector<8x128xf32>
      %cst_16 = arith.constant 0.000000e+00 : f32
      %19 = vector.broadcast %cst_16 : f32 to vector<8x128xf32>
      %20 = arith.maximumf %18, %19 : vector<8x128xf32>
      %c0_17 = arith.constant 0 : index
      %c0_18 = arith.constant 0 : index
      %21 = vector.load %arg7[%c0_17, %c0_18] : memref<8x128xf32, #tpu.memory_space<vmem>>, vector<8x128xf32>
      tpu.vector_store %arg7[%c0_17, %c0_18], %20 {strides = array<i32>} : memref<8x128xf32, #tpu.memory_space<vmem>>, vector<8x128xf32>,
    } else {
    }
    return
  }
  func.func @transform_0(%arg0: i32, %arg1: i32, %arg2: i32) -> (i32, i32) {
    %c0_i32 = arith.constant 0 : i32
    return %arg0, %arg2 : i32, i32
  }
  func.func @transform_1(%arg0: i32, %arg1: i32, %arg2: i32) -> (i32, i32) {
    %c0_i32 = arith.constant 0 : i32
    return %arg2, %arg1 : i32, i32
  }
  func.func @transform_2(%arg0: i32, %arg1: i32, %arg2: i32) -> (i32, i32) {
    %c0_i32 = arith.constant 0 : i32
    %c0_i32_0 = arith.constant 0 : i32
    return %c0_i32, %arg1 : i32, i32
  }
  func.func @transform_3(%arg0: i32, %arg1: i32, %arg2: i32) -> (i32, i32) {
    %c0_i32 = arith.constant 0 : i32
    %c0_i32_0 = arith.constant 0 : i32
    return %c0_i32, %arg1 : i32, i32
  }
  func.func @transform_4(%arg0: i32, %arg1: i32, %arg2: i32) -> (i32, i32) {
    %c0_i32 = arith.constant 0 : i32
    return %arg0, %arg1 : i32, i32
  }
}

module attributes {stable_mosaic.version = 11 : i64} {
  func.func @_global_avgpool_kernel(%arg0: memref<2x4x512xf32, #tpu.memory_space<vmem>>, %arg1: memref<2x512xf32, #tpu.memory_space<vmem>>) attributes {dimension_semantics = [], scalar_prefetch = 0 : i64, scratch_operands = 0 : i64, tpu.core_type = #tpu.core_type<tc>} {
    %c0 = arith.constant 0 : index
    %c0_0 = arith.constant 0 : index
    %c0_1 = arith.constant 0 : index
    %0 = vector.load %arg0[%c0, %c0_0, %c0_1] : memref<2x4x512xf32, #tpu.memory_space<vmem>>, vector<2x4x512xf32>
    %cst = arith.constant dense<0.000000e+00> : vector<2x512xf32>
    %1 = vector.multi_reduction <add>, %0, %cst [1] : vector<2x4x512xf32> to vector<2x512xf32>
    %cst_2 = arith.constant 4.000000e+00 : f32
    %2 = vector.broadcast %cst_2 : f32 to vector<2x512xf32>
    %3 = arith.divf %1, %2 : vector<2x512xf32>
    %c0_3 = arith.constant 0 : index
    %c0_4 = arith.constant 0 : index
    %4 = vector.load %arg1[%c0_3, %c0_4] : memref<2x512xf32, #tpu.memory_space<vmem>>, vector<2x512xf32>
    tpu.vector_store %arg1[%c0_3, %c0_4], %3 {strides = array<i32>} : memref<2x512xf32, #tpu.memory_space<vmem>>, vector<2x512xf32>,
    return
  }
}

</mosaic_0001>

<bundles_post_ra>
// kernel: swav_resnet_forward.31
= control target key start
LH: loop header
LB: loop body
LE: loop exit
PB: predicated region body
PF: predicated region fallthrough
CT: control target
= control target key end

     0   :  { %s1582_s15 = smov 0   ;;  %s1584_s16 = smov 0   ;;  %s1847_s0 = inlined_call_operand.vmem [shape: bf16[2048,256], index: 0, kind: input, shape index: {}]   ;;  %s1848_s1 = inlined_call_operand.vmem [shape: bf16[256,128], index: 1, kind: input, shape index: {}]   ;;  %s1849_s2 = inlined_call_operand.vmem [shape: f32[1,128], index: 2, kind: input, shape index: {}]   ;;  %s1850_s3 = inlined_call_operand.vmem [shape: f32[1,128], index: 3, kind: input, shape index: {}]   ;;  %s1851_s4 = inlined_call_operand.vmem [shape: f32[2048,128], index: 4, kind: output, shape index: {}]  }
   0x1   :  { %s1586_s17 = smov 0  }
   0x2 LB: > { %s33_s18 = sadd.s32 1, %s1551_s16  ;;  %p1242_p0 = scmp.ge.s32.totalorder %s1555_s17, 1  ;;  %s1555_s17 = sphi %s1586_s17, %s14_s17   ;;  %s1551_s16 = sphi %s1584_s16, %s1853_s16   ;;  %s1547_s15 = sphi %s1582_s15, %s1852_s15  }
   0x3   : > { %p35_p1 = scmp.ge.s32.totalorder %s33_s18, 8  ;;  %p224_p2 = scmp.lt.s32.totalorder %s1555_s17, 9 }
   0x5   : > { %s1855_s18 = smov (%p35_p1, %s33_s18), 0  ;;  %p225_p3 = pnand %p1242_p0, %p224_p2 }
   0x6   : > { %s1243_s5 = sshll.u32 (!%p225_p3), %s1547_s15, 5 }
   0x7   : > { %228 = sbr.rel (%p225_p3) target bundleno = 306 (0x132), region = 36  ;;  %p274_p4 = scmp.lt.s32.totalorder (!%p225_p3), %s1243_s5, 255 }
   0xc   : > { %v1482_v0 = vld [vmem:[%s1848_s1 + $0x38] sm:$0xff]  ;;  %v1481_v2 = vld [vmem:[%s1848_s1 + $0x30] sm:$0xff]  ;;  %v1480_v4 = vld [vmem:[%s1848_s1 + $0x28] sm:$0xff]  ;;  %s1857_s5 = smov (!%p274_p4, %s1243_s5), 255 }
   0xd   : > { %v1490_v1 = vld [vmem:[%s1848_s1 + $0x78] sm:$0xff]  ;;  %696 = vmatpush.bf16.msra.mxu0 %v1482_v0  ;;  %1491 = vmatpush.bf16.msra.mxu2 %v1482_v0  ;;  %v1489_v3 = vld [vmem:[%s1848_s1 + $0x70] sm:$0xff]  ;;  %v1488_v5 = vld [vmem:[%s1848_s1 + $0x68] sm:$0xff]  ;;  %s1442_s21 = sshll.u32 %s1857_s5, 3 }
   0xe   : > { %785 = vmatpush.bf16.msra.mxu1 %v1490_v1  ;;  %1499 = vmatpush.bf16.msra.mxu3 %v1490_v1  ;;  %v1479_v6 = vld [vmem:[%s1848_s1 + $0x20] sm:$0xff]  ;;  %v1478_v8 = vld [vmem:[%s1848_s1 + $0x18] sm:$0xff]  ;;  %v1477_v10 = vld [vmem:[%s1848_s1 + $0x10] sm:$0xff]  ;;  %s1650_s26 = scalar_lea.vmem %s1847_s0, %s1442_s21  ;;  %s1742_s14 = scalar_lea.vmem %s1851_s4, %s1442_s21 }
   0xf   : > { %v1487_v7 = vld [vmem:[%s1848_s1 + $0x60] sm:$0xff]  ;;  %v1486_v9 = vld [vmem:[%s1848_s1 + $0x58] sm:$0xff]  ;;  %v1485_v11 = vld [vmem:[%s1848_s1 + $0x50] sm:$0xff] }
  0x10   : > { %v1476_v12 = vld [vmem:[%s1848_s1 + $0x8] sm:$0xff]  ;;  %v1475_v14 = vld [vmem:[%s1848_s1] sm:$0xff]  ;;  %v1258_v28 = vld [vmem:[%s1650_s26 + $0x10] sm:$0xf] }
  0x11   : > { %697 = vmatpush.bf16.msra.mxu0 %v1481_v2  ;;  %1492 = vmatpush.bf16.msra.mxu2 %v1481_v2  ;;  %v1484_v13 = vld [vmem:[%s1848_s1 + $0x48] sm:$0xff]  ;;  %v1483_v15 = vld [vmem:[%s1848_s1 + $0x40] sm:$0xff]  ;;  %v1446_v29 = vld [vmem:[%s1650_s26 + $0x14] sm:$0xf0] }
  0x12   : > { %786 = vmatpush.bf16.msra.mxu1 %v1489_v3  ;;  %1500 = vmatpush.bf16.msra.mxu3 %v1489_v3  ;;  %v1250_v16 = vld [vmem:[%s1650_s26] sm:$0xf]  ;;  %v1444_v17 = vld [vmem:[%s1650_s26 + $0x4] sm:$0xf0]  ;;  %v1443_v20 = vld [vmem:[%s1650_s26 + $0x4] sm:$0xf]  ;;  %v1259_v36 = vor.u32 %v1446_v29, %v1258_v28 }
  0x13   : > { %v1314_v18 = vld [vmem:[%s1650_s26 + $0x80] sm:$0xf]  ;;  %v1460_v19 = vld [vmem:[%s1650_s26 + $0x84] sm:$0xf0]  ;;  %v1252_v21 = vld [vmem:[%s1650_s26 + $0x8] sm:$0xf0]  ;;  %v1251_v24 = vor.u32 %v1444_v17, %v1250_v16 }
  0x14   : > { %v1459_v22 = vld [vmem:[%s1650_s26 + $0x84] sm:$0xf]  ;;  %v1316_v23 = vld [vmem:[%s1650_s26 + $0x88] sm:$0xf0]  ;;  %v1315_v25 = vor.u32 %v1460_v19, %v1314_v18  ;;  %v1255_v26 = vor.u32 %v1443_v20, %v1252_v21  ;;  %v1322_v30 = vld [vmem:[%s1650_s26 + $0x90] sm:$0xf] }
  0x15   : > { %698 = vmatpush.bf16.msra.mxu0 %v1480_v4  ;;  %1493 = vmatpush.bf16.msra.mxu2 %v1480_v4  ;;  %v1319_v27 = vor.u32 %v1459_v22, %v1316_v23  ;;  %v1462_v31 = vld [vmem:[%s1650_s26 + $0x94] sm:$0xf0]  ;;  %v1445_v32 = vld [vmem:[%s1650_s26 + $0x14] sm:$0xf]  ;;  %v1260_v33 = vld [vmem:[%s1650_s26 + $0x18] sm:$0xf0] }
  0x16   : > { %787 = vmatpush.bf16.msra.mxu1 %v1488_v5  ;;  %1501 = vmatpush.bf16.msra.mxu3 %v1488_v5  ;;  %v1461_v34 = vld [vmem:[%s1650_s26 + $0x94] sm:$0xf]  ;;  %v1324_v35 = vld [vmem:[%s1650_s26 + $0x98] sm:$0xf0]  ;;  %v1323_v37 = vor.u32 %v1462_v31, %v1322_v30  ;;  %v1263_v38 = vor.u32 %v1445_v32, %v1260_v33  ;;  %v1266_v40 = vld [vmem:[%s1650_s26 + $0x20] sm:$0xf] }
  0x17   : > { %v1327_v39 = vor.u32 %v1461_v34, %v1324_v35  ;;  %v1448_v41 = vld [vmem:[%s1650_s26 + $0x24] sm:$0xf0]  ;;  %v1330_v42 = vld [vmem:[%s1650_s26 + $0xa0] sm:$0xf]  ;;  %v1447_v44 = vld [vmem:[%s1650_s26 + $0x24] sm:$0xf] }
  0x18   : > { %v1464_v43 = vld [vmem:[%s1650_s26 + $0xa4] sm:$0xf0]  ;;  %v1268_v45 = vld [vmem:[%s1650_s26 + $0x28] sm:$0xf0]  ;;  %v1463_v46 = vld [vmem:[%s1650_s26 + $0xa4] sm:$0xf]  ;;  %v1267_v48 = vor.u32 %v1448_v41, %v1266_v40 }
  0x19   : > { %699 = vmatpush.bf16.msra.mxu0 %v1479_v6  ;;  %1494 = vmatpush.bf16.msra.mxu2 %v1479_v6  ;;  %v1332_v47 = vld [vmem:[%s1650_s26 + $0xa8] sm:$0xf0]  ;;  %v1331_v49 = vor.u32 %v1464_v43, %v1330_v42  ;;  %v1271_v50 = vor.u32 %v1447_v44, %v1268_v45  ;;  %v1274_v52 = vld [vmem:[%s1650_s26 + $0x30] sm:$0xf]  ;;  %v1450_v53 = vld [vmem:[%s1650_s26 + $0x34] sm:$0xf0] }
  0x1a   : > { %788 = vmatpush.bf16.msra.mxu1 %v1487_v7  ;;  %1502 = vmatpush.bf16.msra.mxu3 %v1487_v7  ;;  %v1335_v51 = vor.u32 %v1463_v46, %v1332_v47  ;;  %v1338_v54 = vld [vmem:[%s1650_s26 + $0xb0] sm:$0xf]  ;;  %v1466_v55 = vld [vmem:[%s1650_s26 + $0xb4] sm:$0xf0]  ;;  %v1449_v56 = vld [vmem:[%s1650_s26 + $0x34] sm:$0xf]  ;;  %v1275_v60 = vor.u32 %v1450_v53, %v1274_v52 }
  0x1b   : > { %v1276_v57 = vld [vmem:[%s1650_s26 + $0x38] sm:$0xf0]  ;;  %v1465_v58 = vld [vmem:[%s1650_s26 + $0xb4] sm:$0xf]  ;;  %v1339_v61 = vor.u32 %v1466_v55, %v1338_v54  ;;  %v1282_v0 = vld [vmem:[%s1650_s26 + $0x40] sm:$0xf] }
  0x1c   : > { %v1340_v59 = vld [vmem:[%s1650_s26 + $0xb8] sm:$0xf0]  ;;  %v1279_v62 = vor.u32 %v1449_v56, %v1276_v57  ;;  %v1452_v1 = vld [vmem:[%s1650_s26 + $0x44] sm:$0xf0]  ;;  %v1346_v2 = vld [vmem:[%s1650_s26 + $0xc0] sm:$0xf] }
  0x1d   : > { %700 = vmatpush.bf16.msra.mxu0 %v1478_v8  ;;  %1495 = vmatpush.bf16.msra.mxu2 %v1478_v8  ;;  %v1343_v63 = vor.u32 %v1465_v58, %v1340_v59  ;;  %v1468_v3 = vld [vmem:[%s1650_s26 + $0xc4] sm:$0xf0]  ;;  %v1451_v4 = vld [vmem:[%s1650_s26 + $0x44] sm:$0xf]  ;;  %v1284_v5 = vld [vmem:[%s1650_s26 + $0x48] sm:$0xf0]  ;;  %v1283_v8 = vor.u32 %v1452_v1, %v1282_v0 }
  0x1e   : > { %789 = vmatpush.bf16.msra.mxu1 %v1486_v9  ;;  %1503 = vmatpush.bf16.msra.mxu3 %v1486_v9  ;;  %v1467_v6 = vld [vmem:[%s1650_s26 + $0xc4] sm:$0xf]  ;;  %v1348_v7 = vld [vmem:[%s1650_s26 + $0xc8] sm:$0xf0]  ;;  %v1347_v9 = vor.u32 %v1468_v3, %v1346_v2  ;;  %v1453_v16 = vld [vmem:[%s1650_s26 + $0x54] sm:$0xf] }
  0x1f   : > { %v1292_v17 = vld [vmem:[%s1650_s26 + $0x58] sm:$0xf0]  ;;  %v1469_v18 = vld [vmem:[%s1650_s26 + $0xd4] sm:$0xf]  ;;  %v1455_v28 = vld [vmem:[%s1650_s26 + $0x64] sm:$0xf] }
  0x20   : > { %v1356_v19 = vld [vmem:[%s1650_s26 + $0xd8] sm:$0xf0]  ;;  %v1295_v22 = vor.u32 %v1453_v16, %v1292_v17  ;;  %v1300_v29 = vld [vmem:[%s1650_s26 + $0x68] sm:$0xf0]  ;;  %v1471_v30 = vld [vmem:[%s1650_s26 + $0xe4] sm:$0xf] }
  0x21   : > { %701 = vmatpush.bf16.msra.mxu0 %v1477_v10  ;;  %1496 = vmatpush.bf16.msra.mxu2 %v1477_v10  ;;  %v1287_v10 = vor.u32 %v1451_v4, %v1284_v5  ;;  %v1359_v23 = vor.u32 %v1469_v18, %v1356_v19  ;;  %v1364_v31 = vld [vmem:[%s1650_s26 + $0xe8] sm:$0xf0]  ;;  %v1303_v34 = vor.u32 %v1455_v28, %v1300_v29  ;;  %v1457_v40 = vld [vmem:[%s1650_s26 + $0x74] sm:$0xf]  ;;  %v1308_v41 = vld [vmem:[%s1650_s26 + $0x78] sm:$0xf0] }
  0x22   : > { %790 = vmatpush.bf16.msra.mxu1 %v1485_v11  ;;  %1504 = vmatpush.bf16.msra.mxu3 %v1485_v11  ;;  %v1351_v11 = vor.u32 %v1467_v6, %v1348_v7  ;;  %v1367_v35 = vor.u32 %v1471_v30, %v1364_v31  ;;  %v1473_v42 = vld [vmem:[%s1650_s26 + $0xf4] sm:$0xf]  ;;  %v1372_v43 = vld [vmem:[%s1650_s26 + $0xf8] sm:$0xf0]  ;;  %v1311_v46 = vor.u32 %v1457_v40, %v1308_v41  ;;  %v1733_v52 = vld [vmem:[%s1850_s3] ss:$0 sm:$0xff] }
  0x23   : > { %v1375_v47 = vor.u32 %v1473_v42, %v1372_v43 }
  0x25   : > { %702 = vmatpush.bf16.msra.mxu0 %v1476_v12  ;;  %1497 = vmatpush.bf16.msra.mxu2 %v1476_v12  ;;  %v1290_v12 = vld [vmem:[%s1650_s26 + $0x50] sm:$0xf] }
  0x26   : > { %791 = vmatpush.bf16.msra.mxu1 %v1484_v13  ;;  %1505 = vmatpush.bf16.msra.mxu3 %v1484_v13  ;;  %v1454_v13 = vld [vmem:[%s1650_s26 + $0x54] sm:$0xf0] }
  0x27   : > { %v1291_v20 = vor.u32 %v1454_v13, %v1290_v12 }
  0x29   : > { %703 = vmatpush.bf16.msra.mxu0 %v1475_v14  ;;  %1498 = vmatpush.bf16.msra.mxu2 %v1475_v14  ;;  %v1354_v14 = vld [vmem:[%s1650_s26 + $0xd0] sm:$0xf] }
  0x2a   : > { %792 = vmatpush.bf16.msra.mxu1 %v1483_v15  ;;  %1506 = vmatpush.bf16.msra.mxu3 %v1483_v15  ;;  %v1470_v15 = vld [vmem:[%s1650_s26 + $0xd4] sm:$0xf0] }
  0x2b   : > { %v1355_v21 = vor.u32 %v1470_v15, %v1354_v14 }
  0x2c   : > { %704 = vmatmul.bf16.vlgmr.msra.gmra.mxu0 %v1251_v24  ;;  %744 = vmatmul.bf16.vlgmr.msra.gmra.mxu2 %v1315_v25  ;;  %v1298_v24 = vld [vmem:[%s1650_s26 + $0x60] sm:$0xf]  ;;  %v1456_v25 = vld [vmem:[%s1650_s26 + $0x64] sm:$0xf0] }
  0x2d   : > { %793 = vmatmul.bf16.vlgmr.msra.gmra.mxu1 %v1255_v26  ;;  %833 = vmatmul.bf16.vlgmr.msra.gmra.mxu3 %v1319_v27  ;;  %v1362_v26 = vld [vmem:[%s1650_s26 + $0xe0] sm:$0xf]  ;;  %v1472_v27 = vld [vmem:[%s1650_s26 + $0xe4] sm:$0xf0]  ;;  %v1299_v32 = vor.u32 %v1456_v25, %v1298_v24 }
  0x2e   : > { %v1363_v33 = vor.u32 %v1472_v27, %v1362_v26 }
  0x3c   : > { %709 = vmatmul.bf16.gmra.mxu0 %v1259_v36  ;;  %749 = vmatmul.bf16.gmra.mxu2 %v1323_v37  ;;  %v1306_v36 = vld [vmem:[%s1650_s26 + $0x70] sm:$0xf]  ;;  %v1458_v37 = vld [vmem:[%s1650_s26 + $0x74] sm:$0xf0] }
  0x3d   : > { %798 = vmatmul.bf16.gmra.mxu1 %v1263_v38  ;;  %838 = vmatmul.bf16.gmra.mxu3 %v1327_v39  ;;  %v1370_v38 = vld [vmem:[%s1650_s26 + $0xf0] sm:$0xf]  ;;  %v1474_v39 = vld [vmem:[%s1650_s26 + $0xf4] sm:$0xf0]  ;;  %v1307_v44 = vor.u32 %v1458_v37, %v1306_v36 }
  0x3e   : > { %v1371_v45 = vor.u32 %v1474_v39, %v1370_v38 }
  0x4c   : > { %714 = vmatmul.bf16.gmra.mxu0 %v1267_v48  ;;  %754 = vmatmul.bf16.gmra.mxu2 %v1331_v49  ;;  %v1728_v49 = vld [vmem:[%s1849_s2] ss:$0 sm:$0xff] }
  0x4d   : > { %803 = vmatmul.bf16.gmra.mxu1 %v1271_v50  ;;  %843 = vmatmul.bf16.gmra.mxu3 %v1335_v51 }
  0x5c   : > { %719 = vmatmul.bf16.gmra.mxu0 %v1275_v60  ;;  %759 = vmatmul.bf16.gmra.mxu2 %v1339_v61 }
  0x5d   : > { %808 = vmatmul.bf16.gmra.mxu1 %v1279_v62  ;;  %848 = vmatmul.bf16.gmra.mxu3 %v1343_v63 }
  0x6c   : > { %724 = vmatmul.bf16.gmra.mxu0 %v1283_v8  ;;  %764 = vmatmul.bf16.gmra.mxu2 %v1347_v9 }
  0x6d   : > { %813 = vmatmul.bf16.gmra.mxu1 %v1287_v10  ;;  %853 = vmatmul.bf16.gmra.mxu3 %v1351_v11 }
  0x7c   : > { %729 = vmatmul.bf16.gmra.mxu0 %v1291_v20  ;;  %769 = vmatmul.bf16.gmra.mxu2 %v1355_v21 }
  0x7d   : > { %818 = vmatmul.bf16.gmra.mxu1 %v1295_v22  ;;  %858 = vmatmul.bf16.gmra.mxu3 %v1359_v23 }
  0x8c   : > { %734 = vmatmul.bf16.gmra.mxu0 %v1299_v32  ;;  %774 = vmatmul.bf16.gmra.mxu2 %v1363_v33 }
  0x8d   : > { %823 = vmatmul.bf16.gmra.mxu1 %v1303_v34  ;;  %863 = vmatmul.bf16.gmra.mxu3 %v1367_v35 }
  0x9c   : > { %739 = vmatmul.bf16.gmra.mxu0 %v1307_v44  ;;  %779 = vmatmul.bf16.gmra.mxu2 %v1371_v45 }
  0x9d   : > { %828 = vmatmul.bf16.gmra.mxu1 %v1311_v46  ;;  %868 = vmatmul.bf16.gmra.mxu3 %v1375_v47 }
  0xa9   : > { %v705_v48 = vpop.f32.mrf.mxu0 }
  0xaa   : > { %v794_v50 = vpop.f32.mrf.mxu1 }
  0xab   : > { %v795_v51 = vadd.f32 %v794_v50, %v705_v48 }
  0xad   : > { %v977_v53 = vmul.f32 %v1728_v49, %v795_v51 }
  0xaf   : > { %v1013_v54 = vadd.f32 %v1733_v52, %v977_v53  ;;  %v745_v55 = vpop.f32.mrf.mxu2 }
  0xb0   : > { %v834_v56 = vpop.f32.mrf.mxu3 }
  0xb1   : > { %v1045_v57 = vmax.f32 %v1013_v54, 0.0  ;;  %v835_v58 = vadd.f32 %v834_v56, %v745_v55  ;;  %v707_v59 = vpop.f32.mrf.mxu0 }
  0xb2   : > { %v796_v60 = vpop.f32.mrf.mxu1 }
  0xb3   : > { %1077 = vst [vmem:[%s1742_s14] sm:$0xff] %v1045_v57  ;;  %v993_v61 = vmul.f32 %v1728_v49, %v835_v58  ;;  %v797_v62 = vadd.f32 %v796_v60, %v707_v59 }
  0xb5   : > { %v1029_v63 = vadd.f32 %v1733_v52, %v993_v61  ;;  %v978_v0 = vmul.f32 %v1728_v49, %v797_v62 }
  0xb7   : > { %v1061_v1 = vmax.f32 %v1029_v63, 0.0  ;;  %v1014_v2 = vadd.f32 %v1733_v52, %v978_v0  ;;  %v747_v3 = vpop.f32.mrf.mxu2 }
  0xb8   : > { %v836_v4 = vpop.f32.mrf.mxu3 }
  0xb9   : > { %1093 = vst [vmem:[%s1742_s14 + $0x80] sm:$0xff] %v1061_v1  ;;  %v1046_v5 = vmax.f32 %v1014_v2, 0.0  ;;  %v837_v6 = vadd.f32 %v836_v4, %v747_v3  ;;  %v710_v7 = vpop.f32.mrf.mxu0 }
  0xba   : > { %v799_v8 = vpop.f32.mrf.mxu1 }
  0xbb   : > { %1078 = vst [vmem:[%s1742_s14 + $0x8] sm:$0xff] %v1046_v5  ;;  %v994_v9 = vmul.f32 %v1728_v49, %v837_v6  ;;  %v800_v10 = vadd.f32 %v799_v8, %v710_v7 }
  0xbd   : > { %v1030_v11 = vadd.f32 %v1733_v52, %v994_v9  ;;  %v979_v12 = vmul.f32 %v1728_v49, %v800_v10 }
  0xbf   : > { %v1062_v13 = vmax.f32 %v1030_v11, 0.0  ;;  %v1015_v14 = vadd.f32 %v1733_v52, %v979_v12  ;;  %v750_v15 = vpop.f32.mrf.mxu2 }
  0xc0   : > { %v839_v16 = vpop.f32.mrf.mxu3 }
  0xc1   : > { %1094 = vst [vmem:[%s1742_s14 + $0x88] sm:$0xff] %v1062_v13  ;;  %v1047_v17 = vmax.f32 %v1015_v14, 0.0  ;;  %v840_v18 = vadd.f32 %v839_v16, %v750_v15  ;;  %v712_v19 = vpop.f32.mrf.mxu0 }
  0xc2   : > { %v801_v20 = vpop.f32.mrf.mxu1 }
  0xc3   : > { %1079 = vst [vmem:[%s1742_s14 + $0x10] sm:$0xff] %v1047_v17  ;;  %v995_v21 = vmul.f32 %v1728_v49, %v840_v18  ;;  %v802_v22 = vadd.f32 %v801_v20, %v712_v19 }
  0xc5   : > { %v1031_v23 = vadd.f32 %v1733_v52, %v995_v21  ;;  %v980_v24 = vmul.f32 %v1728_v49, %v802_v22 }
  0xc7   : > { %v1063_v25 = vmax.f32 %v1031_v23, 0.0  ;;  %v1016_v26 = vadd.f32 %v1733_v52, %v980_v24  ;;  %v752_v27 = vpop.f32.mrf.mxu2 }
  0xc8   : > { %v841_v28 = vpop.f32.mrf.mxu3 }
  0xc9   : > { %1095 = vst [vmem:[%s1742_s14 + $0x90] sm:$0xff] %v1063_v25  ;;  %v1048_v29 = vmax.f32 %v1016_v26, 0.0  ;;  %v842_v30 = vadd.f32 %v841_v28, %v752_v27  ;;  %v715_v31 = vpop.f32.mrf.mxu0 }
  0xca   : > { %v804_v32 = vpop.f32.mrf.mxu1 }
  0xcb   : > { %1080 = vst [vmem:[%s1742_s14 + $0x18] sm:$0xff] %v1048_v29  ;;  %v996_v33 = vmul.f32 %v1728_v49, %v842_v30  ;;  %v805_v34 = vadd.f32 %v804_v32, %v715_v31 }
  0xcd   : > { %v1032_v35 = vadd.f32 %v1733_v52, %v996_v33  ;;  %v981_v36 = vmul.f32 %v1728_v49, %v805_v34 }
  0xcf   : > { %v1064_v37 = vmax.f32 %v1032_v35, 0.0  ;;  %v1017_v38 = vadd.f32 %v1733_v52, %v981_v36  ;;  %v755_v39 = vpop.f32.mrf.mxu2 }
  0xd0   : > { %v844_v40 = vpop.f32.mrf.mxu3 }
  0xd1   : > { %1096 = vst [vmem:[%s1742_s14 + $0x98] sm:$0xff] %v1064_v37  ;;  %v1049_v41 = vmax.f32 %v1017_v38, 0.0  ;;  %v845_v42 = vadd.f32 %v844_v40, %v755_v39  ;;  %v717_v43 = vpop.f32.mrf.mxu0 }
  0xd2   : > { %v806_v44 = vpop.f32.mrf.mxu1 }
  0xd3   : > { %1081 = vst [vmem:[%s1742_s14 + $0x20] sm:$0xff] %v1049_v41  ;;  %v997_v45 = vmul.f32 %v1728_v49, %v845_v42  ;;  %v807_v46 = vadd.f32 %v806_v44, %v717_v43 }
  0xd5   : > { %v1033_v47 = vadd.f32 %v1733_v52, %v997_v45  ;;  %v982_v48 = vmul.f32 %v1728_v49, %v807_v46 }
  0xd7   : > { %v1065_v50 = vmax.f32 %v1033_v47, 0.0  ;;  %v1018_v51 = vadd.f32 %v1733_v52, %v982_v48  ;;  %v757_v53 = vpop.f32.mrf.mxu2 }
  0xd8   : > { %v846_v54 = vpop.f32.mrf.mxu3 }
  0xd9   : > { %1097 = vst [vmem:[%s1742_s14 + $0xa0] sm:$0xff] %v1065_v50  ;;  %v1050_v55 = vmax.f32 %v1018_v51, 0.0  ;;  %v847_v56 = vadd.f32 %v846_v54, %v757_v53  ;;  %v720_v57 = vpop.f32.mrf.mxu0 }
  0xda   : > { %v809_v58 = vpop.f32.mrf.mxu1 }
  0xdb   : > { %1082 = vst [vmem:[%s1742_s14 + $0x28] sm:$0xff] %v1050_v55  ;;  %v998_v59 = vmul.f32 %v1728_v49, %v847_v56  ;;  %v810_v60 = vadd.f32 %v809_v58, %v720_v57 }
  0xdd   : > { %v1034_v61 = vadd.f32 %v1733_v52, %v998_v59  ;;  %v983_v62 = vmul.f32 %v1728_v49, %v810_v60 }
  0xdf   : > { %v1066_v63 = vmax.f32 %v1034_v61, 0.0  ;;  %v1019_v0 = vadd.f32 %v1733_v52, %v983_v62  ;;  %v760_v1 = vpop.f32.mrf.mxu2 }
  0xe0   : > { %v849_v2 = vpop.f32.mrf.mxu3 }
  0xe1   : > { %1098 = vst [vmem:[%s1742_s14 + $0xa8] sm:$0xff] %v1066_v63  ;;  %v1051_v3 = vmax.f32 %v1019_v0, 0.0  ;;  %v850_v4 = vadd.f32 %v849_v2, %v760_v1  ;;  %v722_v5 = vpop.f32.mrf.mxu0 }
  0xe2   : > { %v811_v6 = vpop.f32.mrf.mxu1 }
  0xe3   : > { %1083 = vst [vmem:[%s1742_s14 + $0x30] sm:$0xff] %v1051_v3  ;;  %v999_v7 = vmul.f32 %v1728_v49, %v850_v4  ;;  %v812_v8 = vadd.f32 %v811_v6, %v722_v5 }
  0xe5   : > { %v1035_v9 = vadd.f32 %v1733_v52, %v999_v7  ;;  %v984_v10 = vmul.f32 %v1728_v49, %v812_v8 }
  0xe7   : > { %v1067_v11 = vmax.f32 %v1035_v9, 0.0  ;;  %v1020_v12 = vadd.f32 %v1733_v52, %v984_v10  ;;  %v762_v13 = vpop.f32.mrf.mxu2 }
  0xe8   : > { %v851_v14 = vpop.f32.mrf.mxu3 }
  0xe9   : > { %1099 = vst [vmem:[%s1742_s14 + $0xb0] sm:$0xff] %v1067_v11  ;;  %v1052_v15 = vmax.f32 %v1020_v12, 0.0  ;;  %v852_v16 = vadd.f32 %v851_v14, %v762_v13  ;;  %v725_v17 = vpop.f32.mrf.mxu0 }
  0xea   : > { %v814_v18 = vpop.f32.mrf.mxu1 }
  0xeb   : > { %1084 = vst [vmem:[%s1742_s14 + $0x38] sm:$0xff] %v1052_v15  ;;  %v1000_v19 = vmul.f32 %v1728_v49, %v852_v16  ;;  %v815_v20 = vadd.f32 %v814_v18, %v725_v17 }
  0xed   : > { %v1036_v21 = vadd.f32 %v1733_v52, %v1000_v19  ;;  %v985_v22 = vmul.f32 %v1728_v49, %v815_v20 }
  0xef   : > { %v1068_v23 = vmax.f32 %v1036_v21, 0.0  ;;  %v1021_v24 = vadd.f32 %v1733_v52, %v985_v22  ;;  %v765_v25 = vpop.f32.mrf.mxu2 }
  0xf0   : > { %v854_v26 = vpop.f32.mrf.mxu3 }
  0xf1   : > { %1100 = vst [vmem:[%s1742_s14 + $0xb8] sm:$0xff] %v1068_v23  ;;  %v1053_v27 = vmax.f32 %v1021_v24, 0.0  ;;  %v855_v28 = vadd.f32 %v854_v26, %v765_v25  ;;  %v727_v29 = vpop.f32.mrf.mxu0 }
  0xf2   : > { %v816_v30 = vpop.f32.mrf.mxu1 }
  0xf3   : > { %1085 = vst [vmem:[%s1742_s14 + $0x40] sm:$0xff] %v1053_v27  ;;  %v1001_v31 = vmul.f32 %v1728_v49, %v855_v28  ;;  %v817_v32 = vadd.f32 %v816_v30, %v727_v29 }
  0xf5   : > { %v1037_v33 = vadd.f32 %v1733_v52, %v1001_v31  ;;  %v986_v34 = vmul.f32 %v1728_v49, %v817_v32 }
  0xf7   : > { %v1069_v35 = vmax.f32 %v1037_v33, 0.0  ;;  %v1022_v36 = vadd.f32 %v1733_v52, %v986_v34  ;;  %v767_v37 = vpop.f32.mrf.mxu2 }
  0xf8   : > { %v856_v38 = vpop.f32.mrf.mxu3 }
  0xf9   : > { %1101 = vst [vmem:[%s1742_s14 + $0xc0] sm:$0xff] %v1069_v35  ;;  %v1054_v39 = vmax.f32 %v1022_v36, 0.0  ;;  %v857_v40 = vadd.f32 %v856_v38, %v767_v37  ;;  %v730_v41 = vpop.f32.mrf.mxu0 }
  0xfa   : > { %v819_v42 = vpop.f32.mrf.mxu1 }
  0xfb   : > { %1086 = vst [vmem:[%s1742_s14 + $0x48] sm:$0xff] %v1054_v39  ;;  %v1002_v43 = vmul.f32 %v1728_v49, %v857_v40  ;;  %v820_v44 = vadd.f32 %v819_v42, %v730_v41 }
  0xfd   : > { %v1038_v45 = vadd.f32 %v1733_v52, %v1002_v43  ;;  %v987_v46 = vmul.f32 %v1728_v49, %v820_v44 }
  0xff   : > { %v1070_v47 = vmax.f32 %v1038_v45, 0.0  ;;  %v1023_v48 = vadd.f32 %v1733_v52, %v987_v46  ;;  %v770_v50 = vpop.f32.mrf.mxu2 }
 0x100   : > { %v859_v51 = vpop.f32.mrf.mxu3 }
 0x101   : > { %1102 = vst [vmem:[%s1742_s14 + $0xc8] sm:$0xff] %v1070_v47  ;;  %v1055_v53 = vmax.f32 %v1023_v48, 0.0  ;;  %v860_v54 = vadd.f32 %v859_v51, %v770_v50  ;;  %v732_v55 = vpop.f32.mrf.mxu0 }
 0x102   : > { %v821_v56 = vpop.f32.mrf.mxu1 }
 0x103   : > { %1087 = vst [vmem:[%s1742_s14 + $0x50] sm:$0xff] %v1055_v53  ;;  %v1003_v57 = vmul.f32 %v1728_v49, %v860_v54  ;;  %v822_v58 = vadd.f32 %v821_v56, %v732_v55 }
 0x105   : > { %v1039_v59 = vadd.f32 %v1733_v52, %v1003_v57  ;;  %v988_v60 = vmul.f32 %v1728_v49, %v822_v58 }
 0x107   : > { %v1071_v61 = vmax.f32 %v1039_v59, 0.0  ;;  %v1024_v62 = vadd.f32 %v1733_v52, %v988_v60  ;;  %v772_v63 = vpop.f32.mrf.mxu2 }
 0x108   : > { %v861_v0 = vpop.f32.mrf.mxu3 }
 0x109   : > { %1103 = vst [vmem:[%s1742_s14 + $0xd0] sm:$0xff] %v1071_v61  ;;  %v1056_v1 = vmax.f32 %v1024_v62, 0.0  ;;  %v862_v2 = vadd.f32 %v861_v0, %v772_v63  ;;  %v735_v3 = vpop.f32.mrf.mxu0 }
 0x10a   : > { %v824_v4 = vpop.f32.mrf.mxu1 }
 0x10b   : > { %1088 = vst [vmem:[%s1742_s14 + $0x58] sm:$0xff] %v1056_v1  ;;  %v1004_v5 = vmul.f32 %v1728_v49, %v862_v2  ;;  %v825_v6 = vadd.f32 %v824_v4, %v735_v3 }
 0x10d   : > { %v1040_v7 = vadd.f32 %v1733_v52, %v1004_v5  ;;  %v989_v8 = vmul.f32 %v1728_v49, %v825_v6 }
 0x10f   : > { %v1072_v9 = vmax.f32 %v1040_v7, 0.0  ;;  %v1025_v10 = vadd.f32 %v1733_v52, %v989_v8  ;;  %v775_v11 = vpop.f32.mrf.mxu2 }
 0x110   : > { %v864_v12 = vpop.f32.mrf.mxu3 }
 0x111   : > { %1104 = vst [vmem:[%s1742_s14 + $0xd8] sm:$0xff] %v1072_v9  ;;  %v1057_v13 = vmax.f32 %v1025_v10, 0.0  ;;  %v865_v14 = vadd.f32 %v864_v12, %v775_v11  ;;  %v737_v15 = vpop.f32.mrf.mxu0 }
 0x112   : > { %v826_v16 = vpop.f32.mrf.mxu1 }
 0x113   : > { %1089 = vst [vmem:[%s1742_s14 + $0x60] sm:$0xff] %v1057_v13  ;;  %v1005_v17 = vmul.f32 %v1728_v49, %v865_v14  ;;  %v827_v18 = vadd.f32 %v826_v16, %v737_v15 }
 0x115   : > { %v1041_v19 = vadd.f32 %v1733_v52, %v1005_v17  ;;  %v990_v20 = vmul.f32 %v1728_v49, %v827_v18 }
 0x117   : > { %v1073_v21 = vmax.f32 %v1041_v19, 0.0  ;;  %v1026_v22 = vadd.f32 %v1733_v52, %v990_v20  ;;  %v777_v23 = vpop.f32.mrf.mxu2 }
 0x118   : > { %v866_v24 = vpop.f32.mrf.mxu3 }
 0x119   : > { %1105 = vst [vmem:[%s1742_s14 + $0xe0] sm:$0xff] %v1073_v21  ;;  %v1058_v25 = vmax.f32 %v1026_v22, 0.0  ;;  %v867_v26 = vadd.f32 %v866_v24, %v777_v23  ;;  %v740_v27 = vpop.f32.mrf.mxu0 }
 0x11a   : > { %v829_v28 = vpop.f32.mrf.mxu1 }
 0x11b   : > { %1090 = vst [vmem:[%s1742_s14 + $0x68] sm:$0xff] %v1058_v25  ;;  %v1006_v29 = vmul.f32 %v1728_v49, %v867_v26  ;;  %v830_v30 = vadd.f32 %v829_v28, %v740_v27 }
 0x11d   : > { %v1042_v31 = vadd.f32 %v1733_v52, %v1006_v29  ;;  %v991_v32 = vmul.f32 %v1728_v49, %v830_v30 }
 0x11f   : > { %v1074_v33 = vmax.f32 %v1042_v31, 0.0  ;;  %v1027_v34 = vadd.f32 %v1733_v52, %v991_v32  ;;  %v780_v35 = vpop.f32.mrf.mxu2 }
 0x120   : > { %v869_v36 = vpop.f32.mrf.mxu3 }
 0x121   : > { %1106 = vst [vmem:[%s1742_s14 + $0xe8] sm:$0xff] %v1074_v33  ;;  %v1059_v37 = vmax.f32 %v1027_v34, 0.0  ;;  %v870_v38 = vadd.f32 %v869_v36, %v780_v35  ;;  %v742_v39 = vpop.f32.mrf.mxu0 }
 0x122   : > { %v831_v40 = vpop.f32.mrf.mxu1 }
 0x123   : > { %1091 = vst [vmem:[%s1742_s14 + $0x70] sm:$0xff] %v1059_v37  ;;  %v1007_v41 = vmul.f32 %v1728_v49, %v870_v38  ;;  %v832_v42 = vadd.f32 %v831_v40, %v742_v39 }
 0x125   : > { %v1043_v43 = vadd.f32 %v1733_v52, %v1007_v41  ;;  %v992_v44 = vmul.f32 %v1728_v49, %v832_v42 }
 0x127   : > { %v1075_v45 = vmax.f32 %v1043_v43, 0.0  ;;  %v1028_v46 = vadd.f32 %v1733_v52, %v992_v44  ;;  %v782_v47 = vpop.f32.mrf.mxu2 }
 0x128   : > { %v871_v48 = vpop.f32.mrf.mxu3 }
 0x129   : > { %1107 = vst [vmem:[%s1742_s14 + $0xf0] sm:$0xff] %v1075_v45  ;;  %v1060_v50 = vmax.f32 %v1028_v46, 0.0  ;;  %v872_v51 = vadd.f32 %v871_v48, %v782_v47 }
 0x12b   : > { %1092 = vst [vmem:[%s1742_s14 + $0x78] sm:$0xff] %v1060_v50  ;;  %v1008_v53 = vmul.f32 %v1728_v49, %v872_v51 }
 0x12d   : > { %v1044_v54 = vadd.f32 %v1733_v52, %v1008_v53 }
 0x12f   : > { %v1076_v55 = vmax.f32 %v1044_v54, 0.0 }
 0x131   : > { %1108 = vst [vmem:[%s1742_s14 + $0xf8] sm:$0xff] %v1076_v55 }
 0x132 PF: > { %s14_s17 = sadd.s32 1, %s1555_s17   ;;  %s1852_s15 = smov %s1551_s16 }
 0x133   : > { %p11_p5 = scmp.ge.s32.totalorder %s14_s17, 10   ;;  %s1853_s16 = smov %s1855_s18 }
 0x135   :  { %13 = sbr.rel (!%p11_p5) target bundleno = 2 (0x2), region = 83 }

// kernel: swav_resnet_forward.32
= control target key start
LH: loop header
LB: loop body
LE: loop exit
PB: predicated region body
PF: predicated region fallthrough
CT: control target
= control target key end

     0   :  { %s3499_s6 = smov 0   ;;  %s3501_s7 = smov 0   ;;  %s4787_s0 = inlined_call_operand.vmem [shape: f32[9,512,16], index: 0, kind: input, shape index: {}]   ;;  %s4788_s1 = inlined_call_operand.vmem [shape: f32[512,16], index: 1, kind: output, shape index: {}]  }
   0x1   :  { %s3503_s8 = smov 0  }
   0x2 LB: > { %s3427_s9 = sadd.s32 4294967295, %s3487_s8   ;;  %s3516_s10 = sadd.s32 1, %s3487_s8   ;;  %s3487_s8 = sphi %s3503_s8, %s4791_s8   ;;  %s3483_s7 = sphi %s3501_s7, %s4790_s7   ;;  %s3479_s6 = sphi %s3499_s6, %s4789_s6  }
   0x3   : > { %s15_s11 = ssub.s32 %s3487_s8, %s3516_s10  ;;  %s18_s12 = sadd.s32 1, %s3483_s7 }
   0x4   : > { %p16_p0 = scmp.eq.s32.totalorder %s15_s11, 0  ;;  %p25_p1 = scmp.ne.s32.totalorder %s3483_s7, %s3479_s6 }
   0x5   : > { %p26_p2 = scmp.eq.s32.totalorder %s3487_s8, 0  ;;  %p3430_p4 = scmp.ge.s32.totalorder %s3487_s8, 2 }
   0x6   : > { %s3525_s13 = scalar_select %p16_p0, %s3483_s7, %s18_s12  }
   0x7   : > { %p27_p3 = por %p26_p2, %p25_p1  ;;  %77 = sbr.rel (%p3430_p4) target bundleno = 304 (0x130), region = 16 }
   0xc   : > { %80 = sbr.rel (!%p27_p3) target bundleno = 304 (0x130), region = 20  ;;  %s82_s14 = sand.u32 (%p27_p3), 1, %s3483_s7  }
   0xd   : > { %s3438_s15 = sshll.u32 (%p27_p3), %s3487_s8, 8  ;;  %s3439_s16 = smul.u32 (%p27_p3), 2304, %s82_s14 }
   0xe   : > { %s3533_s19 = scalar_lea.vmem (%p27_p3), %s4787_s0, %s3438_s15 }
   0xf   : > { %v691_v0 = vld [vmem:[%s3533_s19] sm:$0xff] (%p27_p3)  ;;  %v693_v1 = vld [vmem:[%s3533_s19 + $0x8] sm:$0xff] (%p27_p3)  ;;  %v695_v2 = vld [vmem:[%s3533_s19 + $0x10] sm:$0xff] (%p27_p3)  ;;  %s3538_s20 = scalar_lea.vmem (%p27_p3), [#allocation2], %s3439_s16 }
  0x10   : > { %692 = vst [vmem:[%s3538_s20] sm:$0xff] (%p27_p3), %v691_v0  ;;  %v697_v3 = vld [vmem:[%s3533_s19 + $0x18] sm:$0xff] (%p27_p3)  ;;  %v699_v4 = vld [vmem:[%s3533_s19 + $0x20] sm:$0xff] (%p27_p3)  ;;  %v701_v5 = vld [vmem:[%s3533_s19 + $0x28] sm:$0xff] (%p27_p3) }
  0x11   : > { %694 = vst [vmem:[%s3538_s20 + $0x8] sm:$0xff] %v693_v1  ;;  %v703_v6 = vld [vmem:[%s3533_s19 + $0x30] sm:$0xff]  ;;  %v705_v7 = vld [vmem:[%s3533_s19 + $0x38] sm:$0xff]  ;;  %v707_v8 = vld [vmem:[%s3533_s19 + $0x40] sm:$0xff] }
  0x12   : > { %696 = vst [vmem:[%s3538_s20 + $0x10] sm:$0xff] %v695_v2  ;;  %v709_v9 = vld [vmem:[%s3533_s19 + $0x48] sm:$0xff]  ;;  %v711_v10 = vld [vmem:[%s3533_s19 + $0x50] sm:$0xff]  ;;  %v713_v11 = vld [vmem:[%s3533_s19 + $0x58] sm:$0xff] }
  0x13   : > { %698 = vst [vmem:[%s3538_s20 + $0x18] sm:$0xff] %v697_v3  ;;  %v715_v12 = vld [vmem:[%s3533_s19 + $0x60] sm:$0xff]  ;;  %v717_v13 = vld [vmem:[%s3533_s19 + $0x68] sm:$0xff]  ;;  %v719_v14 = vld [vmem:[%s3533_s19 + $0x70] sm:$0xff] }
  0x14   : > { %700 = vst [vmem:[%s3538_s20 + $0x20] sm:$0xff] %v699_v4  ;;  %v721_v15 = vld [vmem:[%s3533_s19 + $0x78] sm:$0xff]  ;;  %v723_v16 = vld [vmem:[%s3533_s19 + $0x80] sm:$0xff]  ;;  %v725_v17 = vld [vmem:[%s3533_s19 + $0x88] sm:$0xff] }
  0x15   : > { %702 = vst [vmem:[%s3538_s20 + $0x28] sm:$0xff] %v701_v5  ;;  %v727_v18 = vld [vmem:[%s3533_s19 + $0x90] sm:$0xff]  ;;  %v729_v19 = vld [vmem:[%s3533_s19 + $0x98] sm:$0xff]  ;;  %v731_v20 = vld [vmem:[%s3533_s19 + $0xa0] sm:$0xff] }
  0x16   : > { %704 = vst [vmem:[%s3538_s20 + $0x30] sm:$0xff] %v703_v6  ;;  %v733_v21 = vld [vmem:[%s3533_s19 + $0xa8] sm:$0xff]  ;;  %v735_v22 = vld [vmem:[%s3533_s19 + $0xb0] sm:$0xff]  ;;  %v737_v23 = vld [vmem:[%s3533_s19 + $0xb8] sm:$0xff] }
  0x17   : > { %706 = vst [vmem:[%s3538_s20 + $0x38] sm:$0xff] %v705_v7  ;;  %v739_v24 = vld [vmem:[%s3533_s19 + $0xc0] sm:$0xff]  ;;  %v741_v25 = vld [vmem:[%s3533_s19 + $0xc8] sm:$0xff]  ;;  %v743_v26 = vld [vmem:[%s3533_s19 + $0xd0] sm:$0xff] }
  0x18   : > { %708 = vst [vmem:[%s3538_s20 + $0x40] sm:$0xff] %v707_v8  ;;  %v745_v27 = vld [vmem:[%s3533_s19 + $0xd8] sm:$0xff]  ;;  %v747_v28 = vld [vmem:[%s3533_s19 + $0xe0] sm:$0xff]  ;;  %v749_v29 = vld [vmem:[%s3533_s19 + $0xe8] sm:$0xff] }
  0x19   : > { %710 = vst [vmem:[%s3538_s20 + $0x48] sm:$0xff] %v709_v9  ;;  %v751_v30 = vld [vmem:[%s3533_s19 + $0xf0] sm:$0xff]  ;;  %v753_v31 = vld [vmem:[%s3533_s19 + $0xf8] sm:$0xff]  ;;  %v755_v32 = vld [vmem:[%s3533_s19 + $0x200] sm:$0xff] }
  0x1a   : > { %712 = vst [vmem:[%s3538_s20 + $0x50] sm:$0xff] %v711_v10  ;;  %v757_v33 = vld [vmem:[%s3533_s19 + $0x208] sm:$0xff]  ;;  %v759_v34 = vld [vmem:[%s3533_s19 + $0x210] sm:$0xff]  ;;  %v761_v35 = vld [vmem:[%s3533_s19 + $0x218] sm:$0xff] }
  0x1b   : > { %714 = vst [vmem:[%s3538_s20 + $0x58] sm:$0xff] %v713_v11  ;;  %v763_v36 = vld [vmem:[%s3533_s19 + $0x220] sm:$0xff]  ;;  %v765_v37 = vld [vmem:[%s3533_s19 + $0x228] sm:$0xff]  ;;  %v767_v38 = vld [vmem:[%s3533_s19 + $0x230] sm:$0xff] }
  0x1c   : > { %716 = vst [vmem:[%s3538_s20 + $0x60] sm:$0xff] %v715_v12  ;;  %v769_v39 = vld [vmem:[%s3533_s19 + $0x238] sm:$0xff]  ;;  %v771_v40 = vld [vmem:[%s3533_s19 + $0x240] sm:$0xff]  ;;  %v773_v41 = vld [vmem:[%s3533_s19 + $0x248] sm:$0xff] }
  0x1d   : > { %718 = vst [vmem:[%s3538_s20 + $0x68] sm:$0xff] %v717_v13  ;;  %v775_v42 = vld [vmem:[%s3533_s19 + $0x250] sm:$0xff]  ;;  %v777_v43 = vld [vmem:[%s3533_s19 + $0x258] sm:$0xff]  ;;  %v779_v44 = vld [vmem:[%s3533_s19 + $0x260] sm:$0xff] }
  0x1e   : > { %720 = vst [vmem:[%s3538_s20 + $0x70] sm:$0xff] %v719_v14  ;;  %v781_v45 = vld [vmem:[%s3533_s19 + $0x268] sm:$0xff]  ;;  %v783_v46 = vld [vmem:[%s3533_s19 + $0x270] sm:$0xff]  ;;  %v785_v47 = vld [vmem:[%s3533_s19 + $0x278] sm:$0xff] }
  0x1f   : > { %722 = vst [vmem:[%s3538_s20 + $0x78] sm:$0xff] %v721_v15  ;;  %v787_v48 = vld [vmem:[%s3533_s19 + $0x280] sm:$0xff]  ;;  %v789_v49 = vld [vmem:[%s3533_s19 + $0x288] sm:$0xff]  ;;  %v791_v50 = vld [vmem:[%s3533_s19 + $0x290] sm:$0xff] }
  0x20   : > { %724 = vst [vmem:[%s3538_s20 + $0x80] sm:$0xff] %v723_v16  ;;  %v793_v51 = vld [vmem:[%s3533_s19 + $0x298] sm:$0xff]  ;;  %v795_v52 = vld [vmem:[%s3533_s19 + $0x2a0] sm:$0xff]  ;;  %v797_v53 = vld [vmem:[%s3533_s19 + $0x2a8] sm:$0xff] }
  0x21   : > { %726 = vst [vmem:[%s3538_s20 + $0x88] sm:$0xff] %v725_v17  ;;  %v799_v54 = vld [vmem:[%s3533_s19 + $0x2b0] sm:$0xff]  ;;  %v801_v55 = vld [vmem:[%s3533_s19 + $0x2b8] sm:$0xff]  ;;  %v803_v56 = vld [vmem:[%s3533_s19 + $0x2c0] sm:$0xff] }
  0x22   : > { %728 = vst [vmem:[%s3538_s20 + $0x90] sm:$0xff] %v727_v18  ;;  %v805_v57 = vld [vmem:[%s3533_s19 + $0x2c8] sm:$0xff]  ;;  %v807_v58 = vld [vmem:[%s3533_s19 + $0x2d0] sm:$0xff]  ;;  %v809_v59 = vld [vmem:[%s3533_s19 + $0x2d8] sm:$0xff] }
  0x23   : > { %730 = vst [vmem:[%s3538_s20 + $0x98] sm:$0xff] %v729_v19  ;;  %v811_v60 = vld [vmem:[%s3533_s19 + $0x2e0] sm:$0xff]  ;;  %v813_v61 = vld [vmem:[%s3533_s19 + $0x2e8] sm:$0xff]  ;;  %v815_v62 = vld [vmem:[%s3533_s19 + $0x2f0] sm:$0xff] }
  0x24   : > { %732 = vst [vmem:[%s3538_s20 + $0xa0] sm:$0xff] %v731_v20  ;;  %v817_v63 = vld [vmem:[%s3533_s19 + $0x2f8] sm:$0xff]  ;;  %v819_v0 = vld [vmem:[%s3533_s19 + $0x400] sm:$0xff]  ;;  %v821_v1 = vld [vmem:[%s3533_s19 + $0x408] sm:$0xff] }
  0x25   : > { %734 = vst [vmem:[%s3538_s20 + $0xa8] sm:$0xff] %v733_v21  ;;  %v823_v2 = vld [vmem:[%s3533_s19 + $0x410] sm:$0xff]  ;;  %v825_v3 = vld [vmem:[%s3533_s19 + $0x418] sm:$0xff]  ;;  %v827_v4 = vld [vmem:[%s3533_s19 + $0x420] sm:$0xff] }
  0x26   : > { %736 = vst [vmem:[%s3538_s20 + $0xb0] sm:$0xff] %v735_v22  ;;  %v829_v5 = vld [vmem:[%s3533_s19 + $0x428] sm:$0xff]  ;;  %v831_v6 = vld [vmem:[%s3533_s19 + $0x430] sm:$0xff]  ;;  %v833_v7 = vld [vmem:[%s3533_s19 + $0x438] sm:$0xff] }
  0x27   : > { %738 = vst [vmem:[%s3538_s20 + $0xb8] sm:$0xff] %v737_v23  ;;  %v835_v8 = vld [vmem:[%s3533_s19 + $0x440] sm:$0xff]  ;;  %v837_v9 = vld [vmem:[%s3533_s19 + $0x448] sm:$0xff]  ;;  %v839_v10 = vld [vmem:[%s3533_s19 + $0x450] sm:$0xff] }
  0x28   : > { %740 = vst [vmem:[%s3538_s20 + $0xc0] sm:$0xff] %v739_v24  ;;  %v841_v11 = vld [vmem:[%s3533_s19 + $0x458] sm:$0xff]  ;;  %v843_v12 = vld [vmem:[%s3533_s19 + $0x460] sm:$0xff]  ;;  %v845_v13 = vld [vmem:[%s3533_s19 + $0x468] sm:$0xff] }
  0x29   : > { %742 = vst [vmem:[%s3538_s20 + $0xc8] sm:$0xff] %v741_v25  ;;  %v847_v14 = vld [vmem:[%s3533_s19 + $0x470] sm:$0xff]  ;;  %v849_v15 = vld [vmem:[%s3533_s19 + $0x478] sm:$0xff]  ;;  %v851_v16 = vld [vmem:[%s3533_s19 + $0x480] sm:$0xff] }
  0x2a   : > { %744 = vst [vmem:[%s3538_s20 + $0xd0] sm:$0xff] %v743_v26  ;;  %v853_v17 = vld [vmem:[%s3533_s19 + $0x488] sm:$0xff]  ;;  %v855_v18 = vld [vmem:[%s3533_s19 + $0x490] sm:$0xff]  ;;  %v857_v19 = vld [vmem:[%s3533_s19 + $0x498] sm:$0xff] }
  0x2b   : > { %746 = vst [vmem:[%s3538_s20 + $0xd8] sm:$0xff] %v745_v27  ;;  %v859_v20 = vld [vmem:[%s3533_s19 + $0x4a0] sm:$0xff]  ;;  %v861_v21 = vld [vmem:[%s3533_s19 + $0x4a8] sm:$0xff]  ;;  %v863_v22 = vld [vmem:[%s3533_s19 + $0x4b0] sm:$0xff] }
  0x2c   : > { %748 = vst [vmem:[%s3538_s20 + $0xe0] sm:$0xff] %v747_v28  ;;  %v865_v23 = vld [vmem:[%s3533_s19 + $0x4b8] sm:$0xff]  ;;  %v867_v24 = vld [vmem:[%s3533_s19 + $0x4c0] sm:$0xff]  ;;  %v869_v25 = vld [vmem:[%s3533_s19 + $0x4c8] sm:$0xff] }
  0x2d   : > { %750 = vst [vmem:[%s3538_s20 + $0xe8] sm:$0xff] %v749_v29  ;;  %v871_v26 = vld [vmem:[%s3533_s19 + $0x4d0] sm:$0xff]  ;;  %v873_v27 = vld [vmem:[%s3533_s19 + $0x4d8] sm:$0xff]  ;;  %v875_v28 = vld [vmem:[%s3533_s19 + $0x4e0] sm:$0xff] }
  0x2e   : > { %752 = vst [vmem:[%s3538_s20 + $0xf0] sm:$0xff] %v751_v30  ;;  %v877_v29 = vld [vmem:[%s3533_s19 + $0x4e8] sm:$0xff]  ;;  %v879_v30 = vld [vmem:[%s3533_s19 + $0x4f0] sm:$0xff] }
  0x2f   : > { %754 = vst [vmem:[%s3538_s20 + $0xf8] sm:$0xff] %v753_v31  ;;  %v881_v31 = vld [vmem:[%s3533_s19 + $0x4f8] sm:$0xff] }
  0x30   : > { %756 = vst [vmem:[%s3538_s20 + $0x100] sm:$0xff] %v755_v32  ;;  %v883_v32 = vld [vmem:[%s3533_s19 + $0x600] sm:$0xff] }
  0x31   : > { %758 = vst [vmem:[%s3538_s20 + $0x108] sm:$0xff] %v757_v33  ;;  %v885_v33 = vld [vmem:[%s3533_s19 + $0x608] sm:$0xff] }
  0x32   : > { %760 = vst [vmem:[%s3538_s20 + $0x110] sm:$0xff] %v759_v34  ;;  %v887_v34 = vld [vmem:[%s3533_s19 + $0x610] sm:$0xff] }
  0x33   : > { %762 = vst [vmem:[%s3538_s20 + $0x118] sm:$0xff] %v761_v35  ;;  %v889_v35 = vld [vmem:[%s3533_s19 + $0x618] sm:$0xff] }
  0x34   : > { %764 = vst [vmem:[%s3538_s20 + $0x120] sm:$0xff] %v763_v36  ;;  %v891_v36 = vld [vmem:[%s3533_s19 + $0x620] sm:$0xff] }
  0x35   : > { %766 = vst [vmem:[%s3538_s20 + $0x128] sm:$0xff] %v765_v37  ;;  %v893_v37 = vld [vmem:[%s3533_s19 + $0x628] sm:$0xff] }
  0x36   : > { %768 = vst [vmem:[%s3538_s20 + $0x130] sm:$0xff] %v767_v38  ;;  %v895_v38 = vld [vmem:[%s3533_s19 + $0x630] sm:$0xff] }
  0x37   : > { %770 = vst [vmem:[%s3538_s20 + $0x138] sm:$0xff] %v769_v39  ;;  %v897_v39 = vld [vmem:[%s3533_s19 + $0x638] sm:$0xff] }
  0x38   : > { %772 = vst [vmem:[%s3538_s20 + $0x140] sm:$0xff] %v771_v40  ;;  %v899_v40 = vld [vmem:[%s3533_s19 + $0x640] sm:$0xff] }
  0x39   : > { %774 = vst [vmem:[%s3538_s20 + $0x148] sm:$0xff] %v773_v41  ;;  %v901_v41 = vld [vmem:[%s3533_s19 + $0x648] sm:$0xff] }
  0x3a   : > { %776 = vst [vmem:[%s3538_s20 + $0x150] sm:$0xff] %v775_v42  ;;  %v903_v42 = vld [vmem:[%s3533_s19 + $0x650] sm:$0xff] }
  0x3b   : > { %778 = vst [vmem:[%s3538_s20 + $0x158] sm:$0xff] %v777_v43  ;;  %v905_v43 = vld [vmem:[%s3533_s19 + $0x658] sm:$0xff] }
  0x3c   : > { %780 = vst [vmem:[%s3538_s20 + $0x160] sm:$0xff] %v779_v44  ;;  %v907_v44 = vld [vmem:[%s3533_s19 + $0x660] sm:$0xff] }
  0x3d   : > { %782 = vst [vmem:[%s3538_s20 + $0x168] sm:$0xff] %v781_v45  ;;  %v909_v45 = vld [vmem:[%s3533_s19 + $0x668] sm:$0xff] }
  0x3e   : > { %784 = vst [vmem:[%s3538_s20 + $0x170] sm:$0xff] %v783_v46  ;;  %v911_v46 = vld [vmem:[%s3533_s19 + $0x670] sm:$0xff] }
  0x3f   : > { %786 = vst [vmem:[%s3538_s20 + $0x178] sm:$0xff] %v785_v47  ;;  %v913_v47 = vld [vmem:[%s3533_s19 + $0x678] sm:$0xff] }
  0x40   : > { %788 = vst [vmem:[%s3538_s20 + $0x180] sm:$0xff] %v787_v48  ;;  %v915_v48 = vld [vmem:[%s3533_s19 + $0x680] sm:$0xff] }
  0x41   : > { %790 = vst [vmem:[%s3538_s20 + $0x188] sm:$0xff] %v789_v49  ;;  %v917_v49 = vld [vmem:[%s3533_s19 + $0x688] sm:$0xff] }
  0x42   : > { %792 = vst [vmem:[%s3538_s20 + $0x190] sm:$0xff] %v791_v50  ;;  %v919_v50 = vld [vmem:[%s3533_s19 + $0x690] sm:$0xff] }
  0x43   : > { %794 = vst [vmem:[%s3538_s20 + $0x198] sm:$0xff] %v793_v51  ;;  %v921_v51 = vld [vmem:[%s3533_s19 + $0x698] sm:$0xff] }
  0x44   : > { %796 = vst [vmem:[%s3538_s20 + $0x1a0] sm:$0xff] %v795_v52  ;;  %v923_v52 = vld [vmem:[%s3533_s19 + $0x6a0] sm:$0xff] }
  0x45   : > { %798 = vst [vmem:[%s3538_s20 + $0x1a8] sm:$0xff] %v797_v53  ;;  %v925_v53 = vld [vmem:[%s3533_s19 + $0x6a8] sm:$0xff] }
  0x46   : > { %800 = vst [vmem:[%s3538_s20 + $0x1b0] sm:$0xff] %v799_v54  ;;  %v927_v54 = vld [vmem:[%s3533_s19 + $0x6b0] sm:$0xff] }
  0x47   : > { %802 = vst [vmem:[%s3538_s20 + $0x1b8] sm:$0xff] %v801_v55  ;;  %v929_v55 = vld [vmem:[%s3533_s19 + $0x6b8] sm:$0xff] }
  0x48   : > { %804 = vst [vmem:[%s3538_s20 + $0x1c0] sm:$0xff] %v803_v56  ;;  %v931_v56 = vld [vmem:[%s3533_s19 + $0x6c0] sm:$0xff] }
  0x49   : > { %806 = vst [vmem:[%s3538_s20 + $0x1c8] sm:$0xff] %v805_v57  ;;  %v933_v57 = vld [vmem:[%s3533_s19 + $0x6c8] sm:$0xff] }
  0x4a   : > { %808 = vst [vmem:[%s3538_s20 + $0x1d0] sm:$0xff] %v807_v58  ;;  %v935_v58 = vld [vmem:[%s3533_s19 + $0x6d0] sm:$0xff] }
  0x4b   : > { %810 = vst [vmem:[%s3538_s20 + $0x1d8] sm:$0xff] %v809_v59  ;;  %v937_v59 = vld [vmem:[%s3533_s19 + $0x6d8] sm:$0xff] }
  0x4c   : > { %812 = vst [vmem:[%s3538_s20 + $0x1e0] sm:$0xff] %v811_v60  ;;  %v939_v60 = vld [vmem:[%s3533_s19 + $0x6e0] sm:$0xff] }
  0x4d   : > { %814 = vst [vmem:[%s3538_s20 + $0x1e8] sm:$0xff] %v813_v61  ;;  %v941_v61 = vld [vmem:[%s3533_s19 + $0x6e8] sm:$0xff] }
  0x4e   : > { %816 = vst [vmem:[%s3538_s20 + $0x1f0] sm:$0xff] %v815_v62  ;;  %v943_v62 = vld [vmem:[%s3533_s19 + $0x6f0] sm:$0xff] }
  0x4f   : > { %818 = vst [vmem:[%s3538_s20 + $0x1f8] sm:$0xff] %v817_v63  ;;  %v945_v63 = vld [vmem:[%s3533_s19 + $0x6f8] sm:$0xff] }
  0x50   : > { %820 = vst [vmem:[%s3538_s20 + $0x200] sm:$0xff] %v819_v0  ;;  %v947_v0 = vld [vmem:[%s3533_s19 + $0x800] sm:$0xff] }
  0x51   : > { %822 = vst [vmem:[%s3538_s20 + $0x208] sm:$0xff] %v821_v1  ;;  %v949_v1 = vld [vmem:[%s3533_s19 + $0x808] sm:$0xff] }
  0x52   : > { %824 = vst [vmem:[%s3538_s20 + $0x210] sm:$0xff] %v823_v2  ;;  %v951_v2 = vld [vmem:[%s3533_s19 + $0x810] sm:$0xff] }
  0x53   : > { %826 = vst [vmem:[%s3538_s20 + $0x218] sm:$0xff] %v825_v3  ;;  %v953_v3 = vld [vmem:[%s3533_s19 + $0x818] sm:$0xff] }
  0x54   : > { %828 = vst [vmem:[%s3538_s20 + $0x220] sm:$0xff] %v827_v4  ;;  %v955_v4 = vld [vmem:[%s3533_s19 + $0x820] sm:$0xff] }
  0x55   : > { %830 = vst [vmem:[%s3538_s20 + $0x228] sm:$0xff] %v829_v5  ;;  %v957_v5 = vld [vmem:[%s3533_s19 + $0x828] sm:$0xff] }
  0x56   : > { %832 = vst [vmem:[%s3538_s20 + $0x230] sm:$0xff] %v831_v6  ;;  %v959_v6 = vld [vmem:[%s3533_s19 + $0x830] sm:$0xff] }
  0x57   : > { %834 = vst [vmem:[%s3538_s20 + $0x238] sm:$0xff] %v833_v7  ;;  %v961_v7 = vld [vmem:[%s3533_s19 + $0x838] sm:$0xff] }
  0x58   : > { %836 = vst [vmem:[%s3538_s20 + $0x240] sm:$0xff] %v835_v8  ;;  %v963_v8 = vld [vmem:[%s3533_s19 + $0x840] sm:$0xff] }
  0x59   : > { %838 = vst [vmem:[%s3538_s20 + $0x248] sm:$0xff] %v837_v9  ;;  %v965_v9 = vld [vmem:[%s3533_s19 + $0x848] sm:$0xff] }
  0x5a   : > { %840 = vst [vmem:[%s3538_s20 + $0x250] sm:$0xff] %v839_v10  ;;  %v967_v10 = vld [vmem:[%s3533_s19 + $0x850] sm:$0xff] }
  0x5b   : > { %842 = vst [vmem:[%s3538_s20 + $0x258] sm:$0xff] %v841_v11  ;;  %v969_v11 = vld [vmem:[%s3533_s19 + $0x858] sm:$0xff] }
  0x5c   : > { %844 = vst [vmem:[%s3538_s20 + $0x260] sm:$0xff] %v843_v12  ;;  %v971_v12 = vld [vmem:[%s3533_s19 + $0x860] sm:$0xff] }
  0x5d   : > { %846 = vst [vmem:[%s3538_s20 + $0x268] sm:$0xff] %v845_v13  ;;  %v973_v13 = vld [vmem:[%s3533_s19 + $0x868] sm:$0xff] }
  0x5e   : > { %848 = vst [vmem:[%s3538_s20 + $0x270] sm:$0xff] %v847_v14  ;;  %v975_v14 = vld [vmem:[%s3533_s19 + $0x870] sm:$0xff] }
  0x5f   : > { %850 = vst [vmem:[%s3538_s20 + $0x278] sm:$0xff] %v849_v15  ;;  %v977_v15 = vld [vmem:[%s3533_s19 + $0x878] sm:$0xff] }
  0x60   : > { %852 = vst [vmem:[%s3538_s20 + $0x280] sm:$0xff] %v851_v16  ;;  %v979_v16 = vld [vmem:[%s3533_s19 + $0x880] sm:$0xff] }
  0x61   : > { %854 = vst [vmem:[%s3538_s20 + $0x288] sm:$0xff] %v853_v17  ;;  %v981_v17 = vld [vmem:[%s3533_s19 + $0x888] sm:$0xff] }
  0x62   : > { %856 = vst [vmem:[%s3538_s20 + $0x290] sm:$0xff] %v855_v18  ;;  %v983_v18 = vld [vmem:[%s3533_s19 + $0x890] sm:$0xff] }
  0x63   : > { %858 = vst [vmem:[%s3538_s20 + $0x298] sm:$0xff] %v857_v19  ;;  %v985_v19 = vld [vmem:[%s3533_s19 + $0x898] sm:$0xff] }
  0x64   : > { %860 = vst [vmem:[%s3538_s20 + $0x2a0] sm:$0xff] %v859_v20  ;;  %v987_v20 = vld [vmem:[%s3533_s19 + $0x8a0] sm:$0xff] }
  0x65   : > { %862 = vst [vmem:[%s3538_s20 + $0x2a8] sm:$0xff] %v861_v21  ;;  %v989_v21 = vld [vmem:[%s3533_s19 + $0x8a8] sm:$0xff] }
  0x66   : > { %864 = vst [vmem:[%s3538_s20 + $0x2b0] sm:$0xff] %v863_v22  ;;  %v991_v22 = vld [vmem:[%s3533_s19 + $0x8b0] sm:$0xff] }
  0x67   : > { %866 = vst [vmem:[%s3538_s20 + $0x2b8] sm:$0xff] %v865_v23  ;;  %v993_v23 = vld [vmem:[%s3533_s19 + $0x8b8] sm:$0xff] }
  0x68   : > { %868 = vst [vmem:[%s3538_s20 + $0x2c0] sm:$0xff] %v867_v24  ;;  %v995_v24 = vld [vmem:[%s3533_s19 + $0x8c0] sm:$0xff] }
  0x69   : > { %870 = vst [vmem:[%s3538_s20 + $0x2c8] sm:$0xff] %v869_v25  ;;  %v997_v25 = vld [vmem:[%s3533_s19 + $0x8c8] sm:$0xff] }
  0x6a   : > { %872 = vst [vmem:[%s3538_s20 + $0x2d0] sm:$0xff] %v871_v26  ;;  %v999_v26 = vld [vmem:[%s3533_s19 + $0x8d0] sm:$0xff] }
  0x6b   : > { %874 = vst [vmem:[%s3538_s20 + $0x2d8] sm:$0xff] %v873_v27  ;;  %v1001_v27 = vld [vmem:[%s3533_s19 + $0x8d8] sm:$0xff] }
  0x6c   : > { %876 = vst [vmem:[%s3538_s20 + $0x2e0] sm:$0xff] %v875_v28  ;;  %v1003_v28 = vld [vmem:[%s3533_s19 + $0x8e0] sm:$0xff] }
  0x6d   : > { %878 = vst [vmem:[%s3538_s20 + $0x2e8] sm:$0xff] %v877_v29  ;;  %v1005_v29 = vld [vmem:[%s3533_s19 + $0x8e8] sm:$0xff] }
  0x6e   : > { %880 = vst [vmem:[%s3538_s20 + $0x2f0] sm:$0xff] %v879_v30  ;;  %v1007_v30 = vld [vmem:[%s3533_s19 + $0x8f0] sm:$0xff] }
  0x6f   : > { %882 = vst [vmem:[%s3538_s20 + $0x2f8] sm:$0xff] %v881_v31  ;;  %v1009_v31 = vld [vmem:[%s3533_s19 + $0x8f8] sm:$0xff] }
  0x70   : > { %884 = vst [vmem:[%s3538_s20 + $0x300] sm:$0xff] %v883_v32  ;;  %v1011_v32 = vld [vmem:[%s3533_s19 + $0xa00] sm:$0xff] }
  0x71   : > { %886 = vst [vmem:[%s3538_s20 + $0x308] sm:$0xff] %v885_v33  ;;  %v1013_v33 = vld [vmem:[%s3533_s19 + $0xa08] sm:$0xff] }
  0x72   : > { %888 = vst [vmem:[%s3538_s20 + $0x310] sm:$0xff] %v887_v34  ;;  %v1015_v34 = vld [vmem:[%s3533_s19 + $0xa10] sm:$0xff] }
  0x73   : > { %890 = vst [vmem:[%s3538_s20 + $0x318] sm:$0xff] %v889_v35  ;;  %v1017_v35 = vld [vmem:[%s3533_s19 + $0xa18] sm:$0xff] }
  0x74   : > { %892 = vst [vmem:[%s3538_s20 + $0x320] sm:$0xff] %v891_v36  ;;  %v1019_v36 = vld [vmem:[%s3533_s19 + $0xa20] sm:$0xff] }
  0x75   : > { %894 = vst [vmem:[%s3538_s20 + $0x328] sm:$0xff] %v893_v37  ;;  %v1021_v37 = vld [vmem:[%s3533_s19 + $0xa28] sm:$0xff] }
  0x76   : > { %896 = vst [vmem:[%s3538_s20 + $0x330] sm:$0xff] %v895_v38  ;;  %v1023_v38 = vld [vmem:[%s3533_s19 + $0xa30] sm:$0xff] }
  0x77   : > { %898 = vst [vmem:[%s3538_s20 + $0x338] sm:$0xff] %v897_v39  ;;  %v1025_v39 = vld [vmem:[%s3533_s19 + $0xa38] sm:$0xff] }
  0x78   : > { %900 = vst [vmem:[%s3538_s20 + $0x340] sm:$0xff] %v899_v40  ;;  %v1027_v40 = vld [vmem:[%s3533_s19 + $0xa40] sm:$0xff] }
  0x79   : > { %902 = vst [vmem:[%s3538_s20 + $0x348] sm:$0xff] %v901_v41  ;;  %v1029_v41 = vld [vmem:[%s3533_s19 + $0xa48] sm:$0xff] }
  0x7a   : > { %904 = vst [vmem:[%s3538_s20 + $0x350] sm:$0xff] %v903_v42  ;;  %v1031_v42 = vld [vmem:[%s3533_s19 + $0xa50] sm:$0xff] }
  0x7b   : > { %906 = vst [vmem:[%s3538_s20 + $0x358] sm:$0xff] %v905_v43  ;;  %v1033_v43 = vld [vmem:[%s3533_s19 + $0xa58] sm:$0xff] }
  0x7c   : > { %908 = vst [vmem:[%s3538_s20 + $0x360] sm:$0xff] %v907_v44  ;;  %v1035_v44 = vld [vmem:[%s3533_s19 + $0xa60] sm:$0xff] }
  0x7d   : > { %910 = vst [vmem:[%s3538_s20 + $0x368] sm:$0xff] %v909_v45  ;;  %v1037_v45 = vld [vmem:[%s3533_s19 + $0xa68] sm:$0xff] }
  0x7e   : > { %912 = vst [vmem:[%s3538_s20 + $0x370] sm:$0xff] %v911_v46  ;;  %v1039_v46 = vld [vmem:[%s3533_s19 + $0xa70] sm:$0xff] }
  0x7f   : > { %914 = vst [vmem:[%s3538_s20 + $0x378] sm:$0xff] %v913_v47  ;;  %v1041_v47 = vld [vmem:[%s3533_s19 + $0xa78] sm:$0xff] }
  0x80   : > { %916 = vst [vmem:[%s3538_s20 + $0x380] sm:$0xff] %v915_v48  ;;  %v1043_v48 = vld [vmem:[%s3533_s19 + $0xa80] sm:$0xff] }
  0x81   : > { %918 = vst [vmem:[%s3538_s20 + $0x388] sm:$0xff] %v917_v49  ;;  %v1045_v49 = vld [vmem:[%s3533_s19 + $0xa88] sm:$0xff] }
  0x82   : > { %920 = vst [vmem:[%s3538_s20 + $0x390] sm:$0xff] %v919_v50  ;;  %v1047_v50 = vld [vmem:[%s3533_s19 + $0xa90] sm:$0xff] }
  0x83   : > { %922 = vst [vmem:[%s3538_s20 + $0x398] sm:$0xff] %v921_v51  ;;  %v1049_v51 = vld [vmem:[%s3533_s19 + $0xa98] sm:$0xff] }
  0x84   : > { %924 = vst [vmem:[%s3538_s20 + $0x3a0] sm:$0xff] %v923_v52  ;;  %v1051_v52 = vld [vmem:[%s3533_s19 + $0xaa0] sm:$0xff] }
  0x85   : > { %926 = vst [vmem:[%s3538_s20 + $0x3a8] sm:$0xff] %v925_v53  ;;  %v1053_v53 = vld [vmem:[%s3533_s19 + $0xaa8] sm:$0xff] }
  0x86   : > { %928 = vst [vmem:[%s3538_s20 + $0x3b0] sm:$0xff] %v927_v54  ;;  %v1055_v54 = vld [vmem:[%s3533_s19 + $0xab0] sm:$0xff] }
  0x87   : > { %930 = vst [vmem:[%s3538_s20 + $0x3b8] sm:$0xff] %v929_v55  ;;  %v1057_v55 = vld [vmem:[%s3533_s19 + $0xab8] sm:$0xff] }
  0x88   : > { %932 = vst [vmem:[%s3538_s20 + $0x3c0] sm:$0xff] %v931_v56  ;;  %v1059_v56 = vld [vmem:[%s3533_s19 + $0xac0] sm:$0xff] }
  0x89   : > { %934 = vst [vmem:[%s3538_s20 + $0x3c8] sm:$0xff] %v933_v57  ;;  %v1061_v57 = vld [vmem:[%s3533_s19 + $0xac8] sm:$0xff] }
  0x8a   : > { %936 = vst [vmem:[%s3538_s20 + $0x3d0] sm:$0xff] %v935_v58  ;;  %v1063_v58 = vld [vmem:[%s3533_s19 + $0xad0] sm:$0xff] }
  0x8b   : > { %938 = vst [vmem:[%s3538_s20 + $0x3d8] sm:$0xff] %v937_v59  ;;  %v1065_v59 = vld [vmem:[%s3533_s19 + $0xad8] sm:$0xff] }
  0x8c   : > { %940 = vst [vmem:[%s3538_s20 + $0x3e0] sm:$0xff] %v939_v60  ;;  %v1067_v60 = vld [vmem:[%s3533_s19 + $0xae0] sm:$0xff] }
  0x8d   : > { %942 = vst [vmem:[%s3538_s20 + $0x3e8] sm:$0xff] %v941_v61  ;;  %v1069_v61 = vld [vmem:[%s3533_s19 + $0xae8] sm:$0xff] }
  0x8e   : > { %944 = vst [vmem:[%s3538_s20 + $0x3f0] sm:$0xff] %v943_v62  ;;  %v1071_v62 = vld [vmem:[%s3533_s19 + $0xaf0] sm:$0xff] }
  0x8f   : > { %946 = vst [vmem:[%s3538_s20 + $0x3f8] sm:$0xff] %v945_v63  ;;  %v1073_v63 = vld [vmem:[%s3533_s19 + $0xaf8] sm:$0xff] }
  0x90   : > { %948 = vst [vmem:[%s3538_s20 + $0x400] sm:$0xff] %v947_v0  ;;  %v1075_v0 = vld [vmem:[%s3533_s19 + $0xc00] sm:$0xff] }
  0x91   : > { %950 = vst [vmem:[%s3538_s20 + $0x408] sm:$0xff] %v949_v1  ;;  %v1077_v1 = vld [vmem:[%s3533_s19 + $0xc08] sm:$0xff] }
  0x92   : > { %952 = vst [vmem:[%s3538_s20 + $0x410] sm:$0xff] %v951_v2  ;;  %v1079_v2 = vld [vmem:[%s3533_s19 + $0xc10] sm:$0xff] }
  0x93   : > { %954 = vst [vmem:[%s3538_s20 + $0x418] sm:$0xff] %v953_v3  ;;  %v1081_v3 = vld [vmem:[%s3533_s19 + $0xc18] sm:$0xff] }
  0x94   : > { %956 = vst [vmem:[%s3538_s20 + $0x420] sm:$0xff] %v955_v4  ;;  %v1083_v4 = vld [vmem:[%s3533_s19 + $0xc20] sm:$0xff] }
  0x95   : > { %958 = vst [vmem:[%s3538_s20 + $0x428] sm:$0xff] %v957_v5  ;;  %v1085_v5 = vld [vmem:[%s3533_s19 + $0xc28] sm:$0xff] }
  0x96   : > { %960 = vst [vmem:[%s3538_s20 + $0x430] sm:$0xff] %v959_v6  ;;  %v1087_v6 = vld [vmem:[%s3533_s19 + $0xc30] sm:$0xff] }
  0x97   : > { %962 = vst [vmem:[%s3538_s20 + $0x438] sm:$0xff] %v961_v7  ;;  %v1089_v7 = vld [vmem:[%s3533_s19 + $0xc38] sm:$0xff] }
  0x98   : > { %964 = vst [vmem:[%s3538_s20 + $0x440] sm:$0xff] %v963_v8  ;;  %v1091_v8 = vld [vmem:[%s3533_s19 + $0xc40] sm:$0xff] }
  0x99   : > { %966 = vst [vmem:[%s3538_s20 + $0x448] sm:$0xff] %v965_v9  ;;  %v1093_v9 = vld [vmem:[%s3533_s19 + $0xc48] sm:$0xff] }
  0x9a   : > { %968 = vst [vmem:[%s3538_s20 + $0x450] sm:$0xff] %v967_v10  ;;  %v1095_v10 = vld [vmem:[%s3533_s19 + $0xc50] sm:$0xff] }
  0x9b   : > { %970 = vst [vmem:[%s3538_s20 + $0x458] sm:$0xff] %v969_v11  ;;  %v1097_v11 = vld [vmem:[%s3533_s19 + $0xc58] sm:$0xff] }
  0x9c   : > { %972 = vst [vmem:[%s3538_s20 + $0x460] sm:$0xff] %v971_v12  ;;  %v1099_v12 = vld [vmem:[%s3533_s19 + $0xc60] sm:$0xff] }
  0x9d   : > { %974 = vst [vmem:[%s3538_s20 + $0x468] sm:$0xff] %v973_v13  ;;  %v1101_v13 = vld [vmem:[%s3533_s19 + $0xc68] sm:$0xff] }
  0x9e   : > { %976 = vst [vmem:[%s3538_s20 + $0x470] sm:$0xff] %v975_v14  ;;  %v1103_v14 = vld [vmem:[%s3533_s19 + $0xc70] sm:$0xff] }
  0x9f   : > { %978 = vst [vmem:[%s3538_s20 + $0x478] sm:$0xff] %v977_v15  ;;  %v1105_v15 = vld [vmem:[%s3533_s19 + $0xc78] sm:$0xff] }
  0xa0   : > { %980 = vst [vmem:[%s3538_s20 + $0x480] sm:$0xff] %v979_v16  ;;  %v1107_v16 = vld [vmem:[%s3533_s19 + $0xc80] sm:$0xff] }
  0xa1   : > { %982 = vst [vmem:[%s3538_s20 + $0x488] sm:$0xff] %v981_v17  ;;  %v1109_v17 = vld [vmem:[%s3533_s19 + $0xc88] sm:$0xff] }
  0xa2   : > { %984 = vst [vmem:[%s3538_s20 + $0x490] sm:$0xff] %v983_v18  ;;  %v1111_v18 = vld [vmem:[%s3533_s19 + $0xc90] sm:$0xff] }
  0xa3   : > { %986 = vst [vmem:[%s3538_s20 + $0x498] sm:$0xff] %v985_v19  ;;  %v1113_v19 = vld [vmem:[%s3533_s19 + $0xc98] sm:$0xff] }
  0xa4   : > { %988 = vst [vmem:[%s3538_s20 + $0x4a0] sm:$0xff] %v987_v20  ;;  %v1115_v20 = vld [vmem:[%s3533_s19 + $0xca0] sm:$0xff] }
  0xa5   : > { %990 = vst [vmem:[%s3538_s20 + $0x4a8] sm:$0xff] %v989_v21  ;;  %v1117_v21 = vld [vmem:[%s3533_s19 + $0xca8] sm:$0xff] }
  0xa6   : > { %992 = vst [vmem:[%s3538_s20 + $0x4b0] sm:$0xff] %v991_v22  ;;  %v1119_v22 = vld [vmem:[%s3533_s19 + $0xcb0] sm:$0xff] }
  0xa7   : > { %994 = vst [vmem:[%s3538_s20 + $0x4b8] sm:$0xff] %v993_v23  ;;  %v1121_v23 = vld [vmem:[%s3533_s19 + $0xcb8] sm:$0xff] }
  0xa8   : > { %996 = vst [vmem:[%s3538_s20 + $0x4c0] sm:$0xff] %v995_v24  ;;  %v1123_v24 = vld [vmem:[%s3533_s19 + $0xcc0] sm:$0xff] }
  0xa9   : > { %998 = vst [vmem:[%s3538_s20 + $0x4c8] sm:$0xff] %v997_v25  ;;  %v1125_v25 = vld [vmem:[%s3533_s19 + $0xcc8] sm:$0xff] }
  0xaa   : > { %1000 = vst [vmem:[%s3538_s20 + $0x4d0] sm:$0xff] %v999_v26  ;;  %v1127_v26 = vld [vmem:[%s3533_s19 + $0xcd0] sm:$0xff] }
  0xab   : > { %1002 = vst [vmem:[%s3538_s20 + $0x4d8] sm:$0xff] %v1001_v27  ;;  %v1129_v27 = vld [vmem:[%s3533_s19 + $0xcd8] sm:$0xff] }
  0xac   : > { %1004 = vst [vmem:[%s3538_s20 + $0x4e0] sm:$0xff] %v1003_v28  ;;  %v1131_v28 = vld [vmem:[%s3533_s19 + $0xce0] sm:$0xff] }
  0xad   : > { %1006 = vst [vmem:[%s3538_s20 + $0x4e8] sm:$0xff] %v1005_v29  ;;  %v1133_v29 = vld [vmem:[%s3533_s19 + $0xce8] sm:$0xff] }
  0xae   : > { %1008 = vst [vmem:[%s3538_s20 + $0x4f0] sm:$0xff] %v1007_v30  ;;  %v1135_v30 = vld [vmem:[%s3533_s19 + $0xcf0] sm:$0xff] }
  0xaf   : > { %1010 = vst [vmem:[%s3538_s20 + $0x4f8] sm:$0xff] %v1009_v31  ;;  %v1137_v31 = vld [vmem:[%s3533_s19 + $0xcf8] sm:$0xff] }
  0xb0   : > { %1012 = vst [vmem:[%s3538_s20 + $0x500] sm:$0xff] %v1011_v32  ;;  %v1139_v32 = vld [vmem:[%s3533_s19 + $0xe00] sm:$0xff] }
  0xb1   : > { %1014 = vst [vmem:[%s3538_s20 + $0x508] sm:$0xff] %v1013_v33  ;;  %v1141_v33 = vld [vmem:[%s3533_s19 + $0xe08] sm:$0xff] }
  0xb2   : > { %1016 = vst [vmem:[%s3538_s20 + $0x510] sm:$0xff] %v1015_v34  ;;  %v1143_v34 = vld [vmem:[%s3533_s19 + $0xe10] sm:$0xff] }
  0xb3   : > { %1018 = vst [vmem:[%s3538_s20 + $0x518] sm:$0xff] %v1017_v35  ;;  %v1145_v35 = vld [vmem:[%s3533_s19 + $0xe18] sm:$0xff] }
  0xb4   : > { %1020 = vst [vmem:[%s3538_s20 + $0x520] sm:$0xff] %v1019_v36  ;;  %v1147_v36 = vld [vmem:[%s3533_s19 + $0xe20] sm:$0xff] }
  0xb5   : > { %1022 = vst [vmem:[%s3538_s20 + $0x528] sm:$0xff] %v1021_v37  ;;  %v1149_v37 = vld [vmem:[%s3533_s19 + $0xe28] sm:$0xff] }
  0xb6   : > { %1024 = vst [vmem:[%s3538_s20 + $0x530] sm:$0xff] %v1023_v38  ;;  %v1151_v38 = vld [vmem:[%s3533_s19 + $0xe30] sm:$0xff] }
  0xb7   : > { %1026 = vst [vmem:[%s3538_s20 + $0x538] sm:$0xff] %v1025_v39  ;;  %v1153_v39 = vld [vmem:[%s3533_s19 + $0xe38] sm:$0xff] }
  0xb8   : > { %1028 = vst [vmem:[%s3538_s20 + $0x540] sm:$0xff] %v1027_v40  ;;  %v1155_v40 = vld [vmem:[%s3533_s19 + $0xe40] sm:$0xff] }
  0xb9   : > { %1030 = vst [vmem:[%s3538_s20 + $0x548] sm:$0xff] %v1029_v41  ;;  %v1157_v41 = vld [vmem:[%s3533_s19 + $0xe48] sm:$0xff] }
  0xba   : > { %1032 = vst [vmem:[%s3538_s20 + $0x550] sm:$0xff] %v1031_v42  ;;  %v1159_v42 = vld [vmem:[%s3533_s19 + $0xe50] sm:$0xff] }
  0xbb   : > { %1034 = vst [vmem:[%s3538_s20 + $0x558] sm:$0xff] %v1033_v43  ;;  %v1161_v43 = vld [vmem:[%s3533_s19 + $0xe58] sm:$0xff] }
  0xbc   : > { %1036 = vst [vmem:[%s3538_s20 + $0x560] sm:$0xff] %v1035_v44  ;;  %v1163_v44 = vld [vmem:[%s3533_s19 + $0xe60] sm:$0xff] }
  0xbd   : > { %1038 = vst [vmem:[%s3538_s20 + $0x568] sm:$0xff] %v1037_v45  ;;  %v1165_v45 = vld [vmem:[%s3533_s19 + $0xe68] sm:$0xff] }
  0xbe   : > { %1040 = vst [vmem:[%s3538_s20 + $0x570] sm:$0xff] %v1039_v46  ;;  %v1167_v46 = vld [vmem:[%s3533_s19 + $0xe70] sm:$0xff] }
  0xbf   : > { %1042 = vst [vmem:[%s3538_s20 + $0x578] sm:$0xff] %v1041_v47  ;;  %v1169_v47 = vld [vmem:[%s3533_s19 + $0xe78] sm:$0xff] }
  0xc0   : > { %1044 = vst [vmem:[%s3538_s20 + $0x580] sm:$0xff] %v1043_v48  ;;  %v1171_v48 = vld [vmem:[%s3533_s19 + $0xe80] sm:$0xff] }
  0xc1   : > { %1046 = vst [vmem:[%s3538_s20 + $0x588] sm:$0xff] %v1045_v49  ;;  %v1173_v49 = vld [vmem:[%s3533_s19 + $0xe88] sm:$0xff] }
  0xc2   : > { %1048 = vst [vmem:[%s3538_s20 + $0x590] sm:$0xff] %v1047_v50  ;;  %v1175_v50 = vld [vmem:[%s3533_s19 + $0xe90] sm:$0xff] }
  0xc3   : > { %1050 = vst [vmem:[%s3538_s20 + $0x598] sm:$0xff] %v1049_v51  ;;  %v1177_v51 = vld [vmem:[%s3533_s19 + $0xe98] sm:$0xff] }
  0xc4   : > { %1052 = vst [vmem:[%s3538_s20 + $0x5a0] sm:$0xff] %v1051_v52  ;;  %v1179_v52 = vld [vmem:[%s3533_s19 + $0xea0] sm:$0xff] }
  0xc5   : > { %1054 = vst [vmem:[%s3538_s20 + $0x5a8] sm:$0xff] %v1053_v53  ;;  %v1181_v53 = vld [vmem:[%s3533_s19 + $0xea8] sm:$0xff] }
  0xc6   : > { %1056 = vst [vmem:[%s3538_s20 + $0x5b0] sm:$0xff] %v1055_v54  ;;  %v1183_v54 = vld [vmem:[%s3533_s19 + $0xeb0] sm:$0xff] }
  0xc7   : > { %1058 = vst [vmem:[%s3538_s20 + $0x5b8] sm:$0xff] %v1057_v55  ;;  %v1185_v55 = vld [vmem:[%s3533_s19 + $0xeb8] sm:$0xff] }
  0xc8   : > { %1060 = vst [vmem:[%s3538_s20 + $0x5c0] sm:$0xff] %v1059_v56  ;;  %v1187_v56 = vld [vmem:[%s3533_s19 + $0xec0] sm:$0xff] }
  0xc9   : > { %1062 = vst [vmem:[%s3538_s20 + $0x5c8] sm:$0xff] %v1061_v57  ;;  %v1189_v57 = vld [vmem:[%s3533_s19 + $0xec8] sm:$0xff] }
  0xca   : > { %1064 = vst [vmem:[%s3538_s20 + $0x5d0] sm:$0xff] %v1063_v58  ;;  %v1191_v58 = vld [vmem:[%s3533_s19 + $0xed0] sm:$0xff] }
  0xcb   : > { %1066 = vst [vmem:[%s3538_s20 + $0x5d8] sm:$0xff] %v1065_v59  ;;  %v1193_v59 = vld [vmem:[%s3533_s19 + $0xed8] sm:$0xff] }
  0xcc   : > { %1068 = vst [vmem:[%s3538_s20 + $0x5e0] sm:$0xff] %v1067_v60  ;;  %v1195_v60 = vld [vmem:[%s3533_s19 + $0xee0] sm:$0xff] }
  0xcd   : > { %1070 = vst [vmem:[%s3538_s20 + $0x5e8] sm:$0xff] %v1069_v61  ;;  %v1197_v61 = vld [vmem:[%s3533_s19 + $0xee8] sm:$0xff] }
  0xce   : > { %1072 = vst [vmem:[%s3538_s20 + $0x5f0] sm:$0xff] %v1071_v62  ;;  %v1199_v62 = vld [vmem:[%s3533_s19 + $0xef0] sm:$0xff] }
  0xcf   : > { %1074 = vst [vmem:[%s3538_s20 + $0x5f8] sm:$0xff] %v1073_v63  ;;  %v1201_v63 = vld [vmem:[%s3533_s19 + $0xef8] sm:$0xff] }
  0xd0   : > { %1076 = vst [vmem:[%s3538_s20 + $0x600] sm:$0xff] %v1075_v0  ;;  %v1203_v0 = vld [vmem:[%s3533_s19 + $0x1000] sm:$0xff] }
  0xd1   : > { %1078 = vst [vmem:[%s3538_s20 + $0x608] sm:$0xff] %v1077_v1  ;;  %v1205_v1 = vld [vmem:[%s3533_s19 + $0x1008] sm:$0xff] }
  0xd2   : > { %1080 = vst [vmem:[%s3538_s20 + $0x610] sm:$0xff] %v1079_v2  ;;  %v1207_v2 = vld [vmem:[%s3533_s19 + $0x1010] sm:$0xff] }
  0xd3   : > { %1082 = vst [vmem:[%s3538_s20 + $0x618] sm:$0xff] %v1081_v3  ;;  %v1209_v3 = vld [vmem:[%s3533_s19 + $0x1018] sm:$0xff] }
  0xd4   : > { %1084 = vst [vmem:[%s3538_s20 + $0x620] sm:$0xff] %v1083_v4  ;;  %v1211_v4 = vld [vmem:[%s3533_s19 + $0x1020] sm:$0xff] }
  0xd5   : > { %1086 = vst [vmem:[%s3538_s20 + $0x628] sm:$0xff] %v1085_v5  ;;  %v1213_v5 = vld [vmem:[%s3533_s19 + $0x1028] sm:$0xff] }
  0xd6   : > { %1088 = vst [vmem:[%s3538_s20 + $0x630] sm:$0xff] %v1087_v6  ;;  %v1215_v6 = vld [vmem:[%s3533_s19 + $0x1030] sm:$0xff] }
  0xd7   : > { %1090 = vst [vmem:[%s3538_s20 + $0x638] sm:$0xff] %v1089_v7  ;;  %v1217_v7 = vld [vmem:[%s3533_s19 + $0x1038] sm:$0xff] }
  0xd8   : > { %1092 = vst [vmem:[%s3538_s20 + $0x640] sm:$0xff] %v1091_v8  ;;  %v1219_v8 = vld [vmem:[%s3533_s19 + $0x1040] sm:$0xff] }
  0xd9   : > { %1094 = vst [vmem:[%s3538_s20 + $0x648] sm:$0xff] %v1093_v9  ;;  %v1221_v9 = vld [vmem:[%s3533_s19 + $0x1048] sm:$0xff] }
  0xda   : > { %1096 = vst [vmem:[%s3538_s20 + $0x650] sm:$0xff] %v1095_v10  ;;  %v1223_v10 = vld [vmem:[%s3533_s19 + $0x1050] sm:$0xff] }
  0xdb   : > { %1098 = vst [vmem:[%s3538_s20 + $0x658] sm:$0xff] %v1097_v11  ;;  %v1225_v11 = vld [vmem:[%s3533_s19 + $0x1058] sm:$0xff] }
  0xdc   : > { %1100 = vst [vmem:[%s3538_s20 + $0x660] sm:$0xff] %v1099_v12  ;;  %v1227_v12 = vld [vmem:[%s3533_s19 + $0x1060] sm:$0xff] }
  0xdd   : > { %1102 = vst [vmem:[%s3538_s20 + $0x668] sm:$0xff] %v1101_v13  ;;  %v1229_v13 = vld [vmem:[%s3533_s19 + $0x1068] sm:$0xff] }
  0xde   : > { %1104 = vst [vmem:[%s3538_s20 + $0x670] sm:$0xff] %v1103_v14  ;;  %v1231_v14 = vld [vmem:[%s3533_s19 + $0x1070] sm:$0xff] }
  0xdf   : > { %1106 = vst [vmem:[%s3538_s20 + $0x678] sm:$0xff] %v1105_v15  ;;  %v1233_v15 = vld [vmem:[%s3533_s19 + $0x1078] sm:$0xff] }
  0xe0   : > { %1108 = vst [vmem:[%s3538_s20 + $0x680] sm:$0xff] %v1107_v16  ;;  %v1235_v16 = vld [vmem:[%s3533_s19 + $0x1080] sm:$0xff] }
  0xe1   : > { %1110 = vst [vmem:[%s3538_s20 + $0x688] sm:$0xff] %v1109_v17  ;;  %v1237_v17 = vld [vmem:[%s3533_s19 + $0x1088] sm:$0xff] }
  0xe2   : > { %1112 = vst [vmem:[%s3538_s20 + $0x690] sm:$0xff] %v1111_v18  ;;  %v1239_v18 = vld [vmem:[%s3533_s19 + $0x1090] sm:$0xff] }
  0xe3   : > { %1114 = vst [vmem:[%s3538_s20 + $0x698] sm:$0xff] %v1113_v19  ;;  %v1241_v19 = vld [vmem:[%s3533_s19 + $0x1098] sm:$0xff] }
  0xe4   : > { %1116 = vst [vmem:[%s3538_s20 + $0x6a0] sm:$0xff] %v1115_v20  ;;  %v1243_v20 = vld [vmem:[%s3533_s19 + $0x10a0] sm:$0xff] }
  0xe5   : > { %1118 = vst [vmem:[%s3538_s20 + $0x6a8] sm:$0xff] %v1117_v21  ;;  %v1245_v21 = vld [vmem:[%s3533_s19 + $0x10a8] sm:$0xff] }
  0xe6   : > { %1120 = vst [vmem:[%s3538_s20 + $0x6b0] sm:$0xff] %v1119_v22  ;;  %v1247_v22 = vld [vmem:[%s3533_s19 + $0x10b0] sm:$0xff] }
  0xe7   : > { %1122 = vst [vmem:[%s3538_s20 + $0x6b8] sm:$0xff] %v1121_v23  ;;  %v1249_v23 = vld [vmem:[%s3533_s19 + $0x10b8] sm:$0xff] }
  0xe8   : > { %1124 = vst [vmem:[%s3538_s20 + $0x6c0] sm:$0xff] %v1123_v24  ;;  %v1251_v24 = vld [vmem:[%s3533_s19 + $0x10c0] sm:$0xff] }
  0xe9   : > { %1126 = vst [vmem:[%s3538_s20 + $0x6c8] sm:$0xff] %v1125_v25  ;;  %v1253_v25 = vld [vmem:[%s3533_s19 + $0x10c8] sm:$0xff] }
  0xea   : > { %1128 = vst [vmem:[%s3538_s20 + $0x6d0] sm:$0xff] %v1127_v26  ;;  %v1255_v26 = vld [vmem:[%s3533_s19 + $0x10d0] sm:$0xff] }
  0xeb   : > { %1130 = vst [vmem:[%s3538_s20 + $0x6d8] sm:$0xff] %v1129_v27  ;;  %v1257_v27 = vld [vmem:[%s3533_s19 + $0x10d8] sm:$0xff] }
  0xec   : > { %1132 = vst [vmem:[%s3538_s20 + $0x6e0] sm:$0xff] %v1131_v28  ;;  %v1259_v28 = vld [vmem:[%s3533_s19 + $0x10e0] sm:$0xff] }
  0xed   : > { %1134 = vst [vmem:[%s3538_s20 + $0x6e8] sm:$0xff] %v1133_v29  ;;  %v1261_v29 = vld [vmem:[%s3533_s19 + $0x10e8] sm:$0xff] }
  0xee   : > { %1136 = vst [vmem:[%s3538_s20 + $0x6f0] sm:$0xff] %v1135_v30  ;;  %v1263_v30 = vld [vmem:[%s3533_s19 + $0x10f0] sm:$0xff] }
  0xef   : > { %1138 = vst [vmem:[%s3538_s20 + $0x6f8] sm:$0xff] %v1137_v31  ;;  %v1265_v31 = vld [vmem:[%s3533_s19 + $0x10f8] sm:$0xff] }
  0xf0   : > { %1140 = vst [vmem:[%s3538_s20 + $0x700] sm:$0xff] %v1139_v32 }
  0xf1   : > { %1142 = vst [vmem:[%s3538_s20 + $0x708] sm:$0xff] %v1141_v33 }
  0xf2   : > { %1144 = vst [vmem:[%s3538_s20 + $0x710] sm:$0xff] %v1143_v34 }
  0xf3   : > { %1146 = vst [vmem:[%s3538_s20 + $0x718] sm:$0xff] %v1145_v35 }
  0xf4   : > { %1148 = vst [vmem:[%s3538_s20 + $0x720] sm:$0xff] %v1147_v36 }
  0xf5   : > { %1150 = vst [vmem:[%s3538_s20 + $0x728] sm:$0xff] %v1149_v37 }
  0xf6   : > { %1152 = vst [vmem:[%s3538_s20 + $0x730] sm:$0xff] %v1151_v38 }
  0xf7   : > { %1154 = vst [vmem:[%s3538_s20 + $0x738] sm:$0xff] %v1153_v39 }
  0xf8   : > { %1156 = vst [vmem:[%s3538_s20 + $0x740] sm:$0xff] %v1155_v40 }
  0xf9   : > { %1158 = vst [vmem:[%s3538_s20 + $0x748] sm:$0xff] %v1157_v41 }
  0xfa   : > { %1160 = vst [vmem:[%s3538_s20 + $0x750] sm:$0xff] %v1159_v42 }
  0xfb   : > { %1162 = vst [vmem:[%s3538_s20 + $0x758] sm:$0xff] %v1161_v43 }
  0xfc   : > { %1164 = vst [vmem:[%s3538_s20 + $0x760] sm:$0xff] %v1163_v44 }
  0xfd   : > { %1166 = vst [vmem:[%s3538_s20 + $0x768] sm:$0xff] %v1165_v45 }
  0xfe   : > { %1168 = vst [vmem:[%s3538_s20 + $0x770] sm:$0xff] %v1167_v46 }
  0xff   : > { %1170 = vst [vmem:[%s3538_s20 + $0x778] sm:$0xff] %v1169_v47 }
 0x100   : > { %1172 = vst [vmem:[%s3538_s20 + $0x780] sm:$0xff] %v1171_v48 }
 0x101   : > { %1174 = vst [vmem:[%s3538_s20 + $0x788] sm:$0xff] %v1173_v49 }
 0x102   : > { %1176 = vst [vmem:[%s3538_s20 + $0x790] sm:$0xff] %v1175_v50 }
 0x103   : > { %1178 = vst [vmem:[%s3538_s20 + $0x798] sm:$0xff] %v1177_v51 }
 0x104   : > { %1180 = vst [vmem:[%s3538_s20 + $0x7a0] sm:$0xff] %v1179_v52 }
 0x105   : > { %1182 = vst [vmem:[%s3538_s20 + $0x7a8] sm:$0xff] %v1181_v53 }
 0x106   : > { %1184 = vst [vmem:[%s3538_s20 + $0x7b0] sm:$0xff] %v1183_v54 }
 0x107   : > { %1186 = vst [vmem:[%s3538_s20 + $0x7b8] sm:$0xff] %v1185_v55 }
 0x108   : > { %1188 = vst [vmem:[%s3538_s20 + $0x7c0] sm:$0xff] %v1187_v56 }
 0x109   : > { %1190 = vst [vmem:[%s3538_s20 + $0x7c8] sm:$0xff] %v1189_v57 }
 0x10a   : > { %1192 = vst [vmem:[%s3538_s20 + $0x7d0] sm:$0xff] %v1191_v58 }
 0x10b   : > { %1194 = vst [vmem:[%s3538_s20 + $0x7d8] sm:$0xff] %v1193_v59 }
 0x10c   : > { %1196 = vst [vmem:[%s3538_s20 + $0x7e0] sm:$0xff] %v1195_v60 }
 0x10d   : > { %1198 = vst [vmem:[%s3538_s20 + $0x7e8] sm:$0xff] %v1197_v61 }
 0x10e   : > { %1200 = vst [vmem:[%s3538_s20 + $0x7f0] sm:$0xff] %v1199_v62 }
 0x10f   : > { %1202 = vst [vmem:[%s3538_s20 + $0x7f8] sm:$0xff] %v1201_v63 }
 0x110   : > { %1204 = vst [vmem:[%s3538_s20 + $0x800] sm:$0xff] %v1203_v0 }
 0x111   : > { %1206 = vst [vmem:[%s3538_s20 + $0x808] sm:$0xff] %v1205_v1 }
 0x112   : > { %1208 = vst [vmem:[%s3538_s20 + $0x810] sm:$0xff] %v1207_v2 }
 0x113   : > { %1210 = vst [vmem:[%s3538_s20 + $0x818] sm:$0xff] %v1209_v3 }
 0x114   : > { %1212 = vst [vmem:[%s3538_s20 + $0x820] sm:$0xff] %v1211_v4 }
 0x115   : > { %1214 = vst [vmem:[%s3538_s20 + $0x828] sm:$0xff] %v1213_v5 }
 0x116   : > { %1216 = vst [vmem:[%s3538_s20 + $0x830] sm:$0xff] %v1215_v6 }
 0x117   : > { %1218 = vst [vmem:[%s3538_s20 + $0x838] sm:$0xff] %v1217_v7 }
 0x118   : > { %1220 = vst [vmem:[%s3538_s20 + $0x840] sm:$0xff] %v1219_v8 }
 0x119   : > { %1222 = vst [vmem:[%s3538_s20 + $0x848] sm:$0xff] %v1221_v9 }
 0x11a   : > { %1224 = vst [vmem:[%s3538_s20 + $0x850] sm:$0xff] %v1223_v10 }
 0x11b   : > { %1226 = vst [vmem:[%s3538_s20 + $0x858] sm:$0xff] %v1225_v11 }
 0x11c   : > { %1228 = vst [vmem:[%s3538_s20 + $0x860] sm:$0xff] %v1227_v12 }
 0x11d   : > { %1230 = vst [vmem:[%s3538_s20 + $0x868] sm:$0xff] %v1229_v13 }
 0x11e   : > { %1232 = vst [vmem:[%s3538_s20 + $0x870] sm:$0xff] %v1231_v14 }
 0x11f   : > { %1234 = vst [vmem:[%s3538_s20 + $0x878] sm:$0xff] %v1233_v15 }
 0x120   : > { %1236 = vst [vmem:[%s3538_s20 + $0x880] sm:$0xff] %v1235_v16 }
 0x121   : > { %1238 = vst [vmem:[%s3538_s20 + $0x888] sm:$0xff] %v1237_v17 }
 0x122   : > { %1240 = vst [vmem:[%s3538_s20 + $0x890] sm:$0xff] %v1239_v18 }
 0x123   : > { %1242 = vst [vmem:[%s3538_s20 + $0x898] sm:$0xff] %v1241_v19 }
 0x124   : > { %1244 = vst [vmem:[%s3538_s20 + $0x8a0] sm:$0xff] %v1243_v20 }
 0x125   : > { %1246 = vst [vmem:[%s3538_s20 + $0x8a8] sm:$0xff] %v1245_v21 }
 0x126   : > { %1248 = vst [vmem:[%s3538_s20 + $0x8b0] sm:$0xff] %v1247_v22 }
 0x127   : > { %1250 = vst [vmem:[%s3538_s20 + $0x8b8] sm:$0xff] %v1249_v23 }
 0x128   : > { %1252 = vst [vmem:[%s3538_s20 + $0x8c0] sm:$0xff] %v1251_v24 }
 0x129   : > { %1254 = vst [vmem:[%s3538_s20 + $0x8c8] sm:$0xff] %v1253_v25 }
 0x12a   : > { %1256 = vst [vmem:[%s3538_s20 + $0x8d0] sm:$0xff] %v1255_v26 }
 0x12b   : > { %1258 = vst [vmem:[%s3538_s20 + $0x8d8] sm:$0xff] %v1257_v27 }
 0x12c   : > { %1260 = vst [vmem:[%s3538_s20 + $0x8e0] sm:$0xff] %v1259_v28 }
 0x12d   : > { %1262 = vst [vmem:[%s3538_s20 + $0x8e8] sm:$0xff] %v1261_v29 }
 0x12e   : > { %1264 = vst [vmem:[%s3538_s20 + $0x8f0] sm:$0xff] %v1263_v30 }
 0x12f   : > { %1266 = vst [vmem:[%s3538_s20 + $0x8f8] sm:$0xff] %v1265_v31 }
 0x130 PF: > { %p3433_p5 = scmp.ge.s32.totalorder %s3487_s8, 1  ;;  %p2458_p6 = scmp.lt.s32.totalorder %s3487_s8, 3 }
 0x132   : > { %p2459_p7 = pnand %p3433_p5, %p2458_p6 }
 0x133   : > { %s2465_s21 = sand.u32 (!%p2459_p7), 1, %s3479_s6   ;;  %s4123_s24 = sshll.u32 (!%p2459_p7), %s3427_s9, 5 }
 0x134   : > { %2462 = sbr.rel (%p2459_p7) target bundleno = 460 (0x1cc), region = 72  ;;  %p2486_p8 = scmp.lt.s32.totalorder (!%p2459_p7), %s4123_s24, 63 }
 0x135   : > { %s3440_s22 = smul.u32 (!%p2459_p7), 2304, %s2465_s21 }
 0x137   : > { %s4116_s23 = scalar_lea.vmem (!%p2459_p7), [#allocation2], %s3440_s22 }
 0x139   : > { %vm2779_vm0 = vcmask 130048   ;;  %v2491_v32 = vld [vmem:[%s4116_s23] sm:$0xff]  ;;  %v2492_v45 = vld [vmem:[%s4116_s23 + $0x8] sm:$0xff]  ;;  %v2493_v1 = vld [vmem:[%s4116_s23 + $0x10] sm:$0xff]  ;;  %s4793_s24 = smov (!%p2486_p8, %s4123_s24), 63 }
 0x13a   : > { %v2523_v33 = vld [vmem:[%s4116_s23 + $0x100] sm:$0xff]  ;;  %v2780_v36 = vsel %vm2779_vm0, %v2491_v32, -inf  ;;  %v2524_v46 = vld [vmem:[%s4116_s23 + $0x108] sm:$0xff]  ;;  %v2797_v51 = vsel %vm2779_vm0, %v2492_v45, -inf  ;;  %v2525_v2 = vld [vmem:[%s4116_s23 + $0x110] sm:$0xff]  ;;  %v2814_v8 = vsel %vm2779_vm0, %v2493_v1, -inf }
 0x13b   : > { %v2555_v34 = vld [vmem:[%s4116_s23 + $0x200] sm:$0xff]  ;;  %v2781_v37 = vsel %vm2779_vm0, %v2523_v33, -inf  ;;  %v2556_v49 = vld [vmem:[%s4116_s23 + $0x208] sm:$0xff]  ;;  %v2798_v52 = vsel %vm2779_vm0, %v2524_v46, -inf  ;;  %v2557_v5 = vld [vmem:[%s4116_s23 + $0x210] sm:$0xff]  ;;  %v2815_v9 = vsel %vm2779_vm0, %v2525_v2, -inf }
 0x13c   : > { %v2587_v35 = vld [vmem:[%s4116_s23 + $0x300] sm:$0xff]  ;;  %v2783_v38 = vsel %vm2779_vm0, %v2555_v34, -inf  ;;  %v2782_v42 = vmax.f32 %v2780_v36, %v2781_v37  ;;  %v2588_v50 = vld [vmem:[%s4116_s23 + $0x308] sm:$0xff]  ;;  %v2799_v58 = vmax.f32 %v2797_v51, %v2798_v52  ;;  %v2800_v59 = vsel %vm2779_vm0, %v2556_v49, -inf  ;;  %v2589_v6 = vld [vmem:[%s4116_s23 + $0x310] sm:$0xff]  ;;  %s3435_s25 = sshll.u32 %s4793_s24, 3 }
 0x13d   : > { %v2619_v39 = vld [vmem:[%s4116_s23 + $0x400] sm:$0xff]  ;;  %v2785_v44 = vsel %vm2779_vm0, %v2587_v35, -inf  ;;  %v2620_v55 = vld [vmem:[%s4116_s23 + $0x408] sm:$0xff]  ;;  %v2802_v0 = vsel %vm2779_vm0, %v2588_v50, -inf  ;;  %v2621_v7 = vld [vmem:[%s4116_s23 + $0x410] sm:$0xff]  ;;  %v2816_v13 = vmax.f32 %v2814_v8, %v2815_v9  ;;  %v2817_v14 = vsel %vm2779_vm0, %v2557_v5, -inf  ;;  %s4201_s28 = scalar_lea.vmem %s4788_s1, %s3435_s25 }
 0x13e   : > { %v2651_v40 = vld [vmem:[%s4116_s23 + $0x500] sm:$0xff]  ;;  %v2784_v48 = vmax.f32 %v2782_v42, %v2783_v38  ;;  %v2787_v53 = vsel %vm2779_vm0, %v2619_v39, -inf  ;;  %v2652_v56 = vld [vmem:[%s4116_s23 + $0x508] sm:$0xff]  ;;  %v2801_v4 = vmax.f32 %v2799_v58, %v2800_v59  ;;  %v2804_v12 = vsel %vm2779_vm0, %v2620_v55, -inf  ;;  %v2653_v18 = vld [vmem:[%s4116_s23 + $0x510] sm:$0xff] }
 0x13f   : > { %v2683_v41 = vld [vmem:[%s4116_s23 + $0x600] sm:$0xff]  ;;  %v2789_v54 = vsel %vm2779_vm0, %v2651_v40, -inf  ;;  %v2684_v57 = vld [vmem:[%s4116_s23 + $0x608] sm:$0xff]  ;;  %v2806_v16 = vsel %vm2779_vm0, %v2652_v56, -inf  ;;  %v2819_v19 = vsel %vm2779_vm0, %v2589_v6, -inf  ;;  %v2494_v20 = vld [vmem:[%s4116_s23 + $0x18] sm:$0xff]  ;;  %v2818_v25 = vmax.f32 %v2816_v13, %v2817_v14 }
 0x140   : > { %v2715_v43 = vld [vmem:[%s4116_s23 + $0x700] sm:$0xff]  ;;  %v2786_v60 = vmax.f32 %v2784_v48, %v2785_v44  ;;  %v2791_v61 = vsel %vm2779_vm0, %v2683_v41, -inf  ;;  %v2716_v63 = vld [vmem:[%s4116_s23 + $0x708] sm:$0xff]  ;;  %v2803_v15 = vmax.f32 %v2801_v4, %v2802_v0  ;;  %v2808_v17 = vsel %vm2779_vm0, %v2684_v57, -inf  ;;  %v2526_v21 = vld [vmem:[%s4116_s23 + $0x118] sm:$0xff] }
 0x141   : > { %v2747_v47 = vld [vmem:[%s4116_s23 + $0x800] sm:$0xff]  ;;  %v4150_v62 = vsel %vm2779_vm0, %v2715_v43, -inf  ;;  %v2748_v11 = vld [vmem:[%s4116_s23 + $0x808] sm:$0xff]  ;;  %v2810_v23 = vsel %vm2779_vm0, %v2716_v63, -inf  ;;  %v2685_v24 = vld [vmem:[%s4116_s23 + $0x610] sm:$0xff]  ;;  %v2821_v26 = vsel %vm2779_vm0, %v2621_v7, -inf  ;;  %v2820_v36 = vmax.f32 %v2818_v25, %v2819_v19 }
 0x142   : > { %v2795_v3 = vsel %vm2779_vm0, %v2747_v47, -inf  ;;  %v2788_v10 = vmax.f32 %v2786_v60, %v2787_v53  ;;  %v2558_v27 = vld [vmem:[%s4116_s23 + $0x218] sm:$0xff]  ;;  %v2805_v29 = vmax.f32 %v2803_v15, %v2804_v12  ;;  %v2717_v30 = vld [vmem:[%s4116_s23 + $0x710] sm:$0xff]  ;;  %v2831_v31 = vsel %vm2779_vm0, %v2494_v20, -inf  ;;  %v2495_v39 = vld [vmem:[%s4116_s23 + $0x20] sm:$0xff] }
 0x143   : > { %v2590_v28 = vld [vmem:[%s4116_s23 + $0x318] sm:$0xff]  ;;  %v2832_v32 = vsel %vm2779_vm0, %v2526_v21, -inf  ;;  %v2834_v33 = vsel %vm2779_vm0, %v2558_v27, -inf  ;;  %v2812_v35 = vsel %vm2779_vm0, %v2748_v11, -inf  ;;  %v2527_v40 = vld [vmem:[%s4116_s23 + $0x120] sm:$0xff]  ;;  %v2823_v42 = vsel %vm2779_vm0, %v2653_v18, -inf }
 0x144   : > { %v2790_v22 = vmax.f32 %v2788_v10, %v2789_v54  ;;  %v2622_v37 = vld [vmem:[%s4116_s23 + $0x418] sm:$0xff]  ;;  %v2833_v38 = vmax.f32 %v2831_v31, %v2832_v32  ;;  %v2807_v41 = vmax.f32 %v2805_v29, %v2806_v16  ;;  %v2825_v43 = vsel %vm2779_vm0, %v2685_v24, -inf  ;;  %v2559_v50 = vld [vmem:[%s4116_s23 + $0x220] sm:$0xff]  ;;  %v2749_v53 = vld [vmem:[%s4116_s23 + $0x810] sm:$0xff] }
 0x145   : > { %v2836_v44 = vsel %vm2779_vm0, %v2590_v28, -inf  ;;  %v2822_v46 = vmax.f32 %v2820_v36, %v2821_v26  ;;  %v2827_v47 = vsel %vm2779_vm0, %v2717_v30, -inf  ;;  %v2654_v48 = vld [vmem:[%s4116_s23 + $0x518] sm:$0xff]  ;;  %v2591_v51 = vld [vmem:[%s4116_s23 + $0x320] sm:$0xff]  ;;  %v2838_v54 = vsel %vm2779_vm0, %v2622_v37, -inf  ;;  %v2496_v5 = vld [vmem:[%s4116_s23 + $0x28] sm:$0xff] }
 0x146   : > { %v2792_v34 = vmax.f32 %v2790_v22, %v2791_v61  ;;  %v2835_v49 = vmax.f32 %v2833_v38, %v2834_v33  ;;  %v2809_v52 = vmax.f32 %v2807_v41, %v2808_v17  ;;  %v2848_v55 = vsel %vm2779_vm0, %v2495_v39, -inf  ;;  %v2686_v59 = vld [vmem:[%s4116_s23 + $0x618] sm:$0xff]  ;;  %v2655_v8 = vld [vmem:[%s4116_s23 + $0x520] sm:$0xff]  ;;  %v2528_v10 = vld [vmem:[%s4116_s23 + $0x128] sm:$0xff] }
 0x147   : > { %v2849_v56 = vsel %vm2779_vm0, %v2527_v40, -inf  ;;  %v2824_v58 = vmax.f32 %v2822_v46, %v2823_v42  ;;  %v2718_v60 = vld [vmem:[%s4116_s23 + $0x718] sm:$0xff]  ;;  %v2840_v1 = vsel %vm2779_vm0, %v2654_v48, -inf  ;;  %v2851_v2 = vsel %vm2779_vm0, %v2559_v50, -inf  ;;  %v2560_v11 = vld [vmem:[%s4116_s23 + $0x228] sm:$0xff]  ;;  %v2687_v19 = vld [vmem:[%s4116_s23 + $0x620] sm:$0xff] }
 0x148   : > { %v2794_v45 = vmax.f32 %v2792_v34, %v4150_v62  ;;  %v2837_v61 = vmax.f32 %v2835_v49, %v2836_v44  ;;  %v2623_v62 = vld [vmem:[%s4116_s23 + $0x420] sm:$0xff]  ;;  %v2850_v63 = vmax.f32 %v2848_v55, %v2849_v56  ;;  %v2811_v0 = vmax.f32 %v2809_v52, %v2810_v23  ;;  %v2750_v13 = vld [vmem:[%s4116_s23 + $0x818] sm:$0xff]  ;;  %v2592_v22 = vld [vmem:[%s4116_s23 + $0x328] sm:$0xff] }
 0x149   : > { %v2853_v4 = vsel %vm2779_vm0, %v2591_v51, -inf  ;;  %v2829_v6 = vsel %vm2779_vm0, %v2749_v53, -inf  ;;  %v2842_v14 = vsel %vm2779_vm0, %v2686_v59, -inf  ;;  %v2844_v15 = vsel %vm2779_vm0, %v2718_v60, -inf  ;;  %v2719_v20 = vld [vmem:[%s4116_s23 + $0x720] sm:$0xff]  ;;  %v2497_v28 = vld [vmem:[%s4116_s23 + $0x30] sm:$0xff] }
 0x14a   : > { %v2796_v57 = vmax.f32 %v2794_v45, %v2795_v3  ;;  %v2826_v3 = vmax.f32 %v2824_v58, %v2825_v43  ;;  %v2839_v7 = vmax.f32 %v2837_v61, %v2838_v54  ;;  %v2852_v9 = vmax.f32 %v2850_v63, %v2851_v2  ;;  %v2751_v24 = vld [vmem:[%s4116_s23 + $0x820] sm:$0xff]  ;;  %v2624_v32 = vld [vmem:[%s4116_s23 + $0x428] sm:$0xff]  ;;  %v2529_v34 = vld [vmem:[%s4116_s23 + $0x130] sm:$0xff] }
 0x14b   : > { %v2813_v12 = vmax.f32 %v2811_v0, %v2812_v35  ;;  %v2855_v16 = vsel %vm2779_vm0, %v2623_v62, -inf  ;;  %v2865_v23 = vsel %vm2779_vm0, %v2496_v5, -inf  ;;  %v2857_v25 = vsel %vm2779_vm0, %v2655_v8, -inf  ;;  %v2561_v35 = vld [vmem:[%s4116_s23 + $0x230] sm:$0xff]  ;;  %v2656_v39 = vld [vmem:[%s4116_s23 + $0x528] sm:$0xff]  ;;  %v2498_v53 = vld [vmem:[%s4116_s23 + $0x38] sm:$0xff] }
 0x14c   : > { %3324 = vst.msk [vmem:[%s4201_s28] sm:$0xff] %vm2779_vm0, %v2796_v57  ;;  %v2828_v17 = vmax.f32 %v2826_v3, %v2827_v47  ;;  %v2841_v18 = vmax.f32 %v2839_v7, %v2840_v1  ;;  %v2854_v21 = vmax.f32 %v2852_v9, %v2853_v4  ;;  %v2866_v26 = vsel %vm2779_vm0, %v2528_v10, -inf  ;;  %v2688_v43 = vld [vmem:[%s4116_s23 + $0x628] sm:$0xff]  ;;  %v2593_v46 = vld [vmem:[%s4116_s23 + $0x330] sm:$0xff]  ;;  %v2530_v59 = vld [vmem:[%s4116_s23 + $0x138] sm:$0xff] }
 0x14d   : > { %3325 = vst.msk [vmem:[%s4201_s28 + $0x8] sm:$0xff] %vm2779_vm0, %v2813_v12  ;;  %v2868_v27 = vsel %vm2779_vm0, %v2560_v11, -inf  ;;  %v2867_v33 = vmax.f32 %v2865_v23, %v2866_v26  ;;  %v2846_v36 = vsel %vm2779_vm0, %v2750_v13, -inf  ;;  %v2859_v37 = vsel %vm2779_vm0, %v2687_v19, -inf  ;;  %v2720_v44 = vld [vmem:[%s4116_s23 + $0x728] sm:$0xff]  ;;  %v2625_v57 = vld [vmem:[%s4116_s23 + $0x430] sm:$0xff] }
 0x14e   : > { %v2830_v29 = vmax.f32 %v2828_v17, %v2829_v6  ;;  %v2843_v30 = vmax.f32 %v2841_v18, %v2842_v14  ;;  %v2856_v31 = vmax.f32 %v2854_v21, %v2855_v16  ;;  %v2861_v38 = vsel %vm2779_vm0, %v2719_v20, -inf  ;;  %v2752_v49 = vld [vmem:[%s4116_s23 + $0x828] sm:$0xff]  ;;  %v2562_v60 = vld [vmem:[%s4116_s23 + $0x238] sm:$0xff]  ;;  %v2657_v0 = vld [vmem:[%s4116_s23 + $0x530] sm:$0xff] }
 0x14f   : > { %v2870_v40 = vsel %vm2779_vm0, %v2592_v22, -inf  ;;  %v2869_v45 = vmax.f32 %v2867_v33, %v2868_v27  ;;  %v2882_v47 = vsel %vm2779_vm0, %v2497_v28, -inf  ;;  %v2863_v48 = vsel %vm2779_vm0, %v2751_v24, -inf  ;;  %v2689_v5 = vld [vmem:[%s4116_s23 + $0x630] sm:$0xff]  ;;  %v2594_v7 = vld [vmem:[%s4116_s23 + $0x338] sm:$0xff]  ;;  %v2499_v14 = vld [vmem:[%s4116_s23 + $0x40] sm:$0xff] }
 0x150   : > { %3326 = vst.msk [vmem:[%s4201_s28 + $0x10] sm:$0xff] %vm2779_vm0, %v2830_v29  ;;  %v2845_v41 = vmax.f32 %v2843_v30, %v2844_v15  ;;  %v2858_v42 = vmax.f32 %v2856_v31, %v2857_v25  ;;  %v2872_v50 = vsel %vm2779_vm0, %v2624_v32, -inf  ;;  %v2883_v51 = vsel %vm2779_vm0, %v2529_v34, -inf  ;;  %v2721_v3 = vld [vmem:[%s4116_s23 + $0x730] sm:$0xff]  ;;  %v2626_v18 = vld [vmem:[%s4116_s23 + $0x438] sm:$0xff]  ;;  %v2531_v20 = vld [vmem:[%s4116_s23 + $0x140] sm:$0xff] }
 0x151   : > { %v2885_v52 = vsel %vm2779_vm0, %v2561_v35, -inf  ;;  %v2871_v56 = vmax.f32 %v2869_v45, %v2870_v40  ;;  %v2884_v58 = vmax.f32 %v2882_v47, %v2883_v51  ;;  %v2874_v61 = vsel %vm2779_vm0, %v2656_v39, -inf  ;;  %v2753_v10 = vld [vmem:[%s4116_s23 + $0x830] sm:$0xff]  ;;  %v2563_v21 = vld [vmem:[%s4116_s23 + $0x240] sm:$0xff]  ;;  %v2658_v25 = vld [vmem:[%s4116_s23 + $0x538] sm:$0xff] }
 0x152   : > { %v2847_v54 = vmax.f32 %v2845_v41, %v2846_v36  ;;  %v2860_v55 = vmax.f32 %v2858_v42, %v2859_v37  ;;  %v2876_v62 = vsel %vm2779_vm0, %v2688_v43, -inf  ;;  %v2878_v63 = vsel %vm2779_vm0, %v2720_v44, -inf  ;;  %v2690_v29 = vld [vmem:[%s4116_s23 + $0x638] sm:$0xff]  ;;  %v2595_v32 = vld [vmem:[%s4116_s23 + $0x340] sm:$0xff]  ;;  %v2500_v43 = vld [vmem:[%s4116_s23 + $0x48] sm:$0xff] }
 0x153   : > { %v2887_v1 = vsel %vm2779_vm0, %v2593_v46, -inf  ;;  %v2873_v4 = vmax.f32 %v2871_v56, %v2872_v50  ;;  %v2886_v6 = vmax.f32 %v2884_v58, %v2885_v52  ;;  %v2899_v8 = vsel %vm2779_vm0, %v2498_v53, -inf  ;;  %v2722_v30 = vld [vmem:[%s4116_s23 + $0x738] sm:$0xff]  ;;  %v2627_v36 = vld [vmem:[%s4116_s23 + $0x440] sm:$0xff]  ;;  %v2532_v44 = vld [vmem:[%s4116_s23 + $0x148] sm:$0xff] }
 0x154   : > { %3327 = vst.msk [vmem:[%s4201_s28 + $0x18] sm:$0xff] %vm2779_vm0, %v2847_v54  ;;  %v2862_v2 = vmax.f32 %v2860_v55, %v2861_v38  ;;  %v2880_v9 = vsel %vm2779_vm0, %v2752_v49, -inf  ;;  %v2889_v11 = vsel %vm2779_vm0, %v2625_v57, -inf  ;;  %v2900_v12 = vsel %vm2779_vm0, %v2530_v59, -inf  ;;  %v2564_v45 = vld [vmem:[%s4116_s23 + $0x248] sm:$0xff]  ;;  %v2754_v46 = vld [vmem:[%s4116_s23 + $0x838] sm:$0xff] }
 0x155   : > { %v2902_v13 = vsel %vm2779_vm0, %v2562_v60, -inf  ;;  %v2875_v16 = vmax.f32 %v2873_v4, %v2874_v61  ;;  %v2888_v17 = vmax.f32 %v2886_v6, %v2887_v1  ;;  %v2901_v19 = vmax.f32 %v2899_v8, %v2900_v12  ;;  %v2659_v54 = vld [vmem:[%s4116_s23 + $0x540] sm:$0xff]  ;;  %v2596_v57 = vld [vmem:[%s4116_s23 + $0x348] sm:$0xff]  ;;  %v2501_v4 = vld [vmem:[%s4116_s23 + $0x50] sm:$0xff] }
 0x156   : > { %v2864_v15 = vmax.f32 %v2862_v2, %v2863_v48  ;;  %v2891_v22 = vsel %vm2779_vm0, %v2657_v0, -inf  ;;  %v2893_v23 = vsel %vm2779_vm0, %v2689_v5, -inf  ;;  %v2895_v24 = vsel %vm2779_vm0, %v2721_v3, -inf  ;;  %v2691_v55 = vld [vmem:[%s4116_s23 + $0x640] sm:$0xff]  ;;  %v2628_v59 = vld [vmem:[%s4116_s23 + $0x448] sm:$0xff]  ;;  %v2533_v5 = vld [vmem:[%s4116_s23 + $0x150] sm:$0xff] }
 0x157   : > { %v2904_v26 = vsel %vm2779_vm0, %v2594_v7, -inf  ;;  %v2877_v27 = vmax.f32 %v2875_v16, %v2876_v62  ;;  %v2890_v28 = vmax.f32 %v2888_v17, %v2889_v11  ;;  %v2903_v31 = vmax.f32 %v2901_v19, %v2902_v13  ;;  %v2565_v3 = vld [vmem:[%s4116_s23 + $0x250] sm:$0xff]  ;;  %v2723_v7 = vld [vmem:[%s4116_s23 + $0x740] sm:$0xff] }
 0x158   : > { %3328 = vst.msk [vmem:[%s4201_s28 + $0x20] sm:$0xff] %vm2779_vm0, %v2864_v15  ;;  %v2916_v33 = vsel %vm2779_vm0, %v2499_v14, -inf  ;;  %v2897_v34 = vsel %vm2779_vm0, %v2753_v10, -inf  ;;  %v2906_v35 = vsel %vm2779_vm0, %v2626_v18, -inf  ;;  %v2917_v37 = vsel %vm2779_vm0, %v2531_v20, -inf  ;;  %v2755_v13 = vld [vmem:[%s4116_s23 + $0x840] sm:$0xff] }
 0x159   : > { %v2919_v38 = vsel %vm2779_vm0, %v2563_v21, -inf  ;;  %v2879_v39 = vmax.f32 %v2877_v27, %v2878_v63  ;;  %v2892_v40 = vmax.f32 %v2890_v28, %v2891_v22  ;;  %v2905_v41 = vmax.f32 %v2903_v31, %v2904_v26  ;;  %v2660_v15 = vld [vmem:[%s4116_s23 + $0x548] sm:$0xff]  ;;  %v2597_v17 = vld [vmem:[%s4116_s23 + $0x350] sm:$0xff]  ;;  %v2502_v28 = vld [vmem:[%s4116_s23 + $0x58] sm:$0xff] }
 0x15a   : > { %v2918_v42 = vmax.f32 %v2916_v33, %v2917_v37  ;;  %v2908_v47 = vsel %vm2779_vm0, %v2658_v25, -inf  ;;  %v2910_v48 = vsel %vm2779_vm0, %v2690_v29, -inf  ;;  %v2912_v49 = vsel %vm2779_vm0, %v2722_v30, -inf  ;;  %v2692_v18 = vld [vmem:[%s4116_s23 + $0x648] sm:$0xff]  ;;  %v2629_v26 = vld [vmem:[%s4116_s23 + $0x450] sm:$0xff]  ;;  %v2534_v29 = vld [vmem:[%s4116_s23 + $0x158] sm:$0xff] }
 0x15b   : > { %v2921_v50 = vsel %vm2779_vm0, %v2595_v32, -inf  ;;  %v2881_v51 = vmax.f32 %v2879_v39, %v2880_v9  ;;  %v2894_v52 = vmax.f32 %v2892_v40, %v2893_v23  ;;  %v2907_v53 = vmax.f32 %v2905_v41, %v2906_v35  ;;  %v2724_v32 = vld [vmem:[%s4116_s23 + $0x748] sm:$0xff]  ;;  %v2566_v40 = vld [vmem:[%s4116_s23 + $0x258] sm:$0xff] }
 0x15c   : > { %v2920_v56 = vmax.f32 %v2918_v42, %v2919_v38  ;;  %v2923_v58 = vsel %vm2779_vm0, %v2627_v36, -inf  ;;  %v2933_v60 = vsel %vm2779_vm0, %v2500_v43, -inf  ;;  %v2934_v61 = vsel %vm2779_vm0, %v2532_v44, -inf  ;;  %v2661_v38 = vld [vmem:[%s4116_s23 + $0x550] sm:$0xff]  ;;  %v2598_v41 = vld [vmem:[%s4116_s23 + $0x358] sm:$0xff]  ;;  %v2756_v42 = vld [vmem:[%s4116_s23 + $0x848] sm:$0xff] }
 0x15d   : > { %v2936_v62 = vsel %vm2779_vm0, %v2564_v45, -inf  ;;  %3329 = vst.msk [vmem:[%s4201_s28 + $0x28] sm:$0xff] %vm2779_vm0, %v2881_v51  ;;  %v2896_v63 = vmax.f32 %v2894_v52, %v2895_v24  ;;  %v2909_v0 = vmax.f32 %v2907_v53, %v2908_v47  ;;  %v2935_v2 = vmax.f32 %v2933_v60, %v2934_v61  ;;  %v2630_v51 = vld [vmem:[%s4116_s23 + $0x458] sm:$0xff]  ;;  %v2503_v53 = vld [vmem:[%s4116_s23 + $0x60] sm:$0xff]  ;;  %v2725_v61 = vld [vmem:[%s4116_s23 + $0x750] sm:$0xff] }
 0x15e   : > { %v2922_v1 = vmax.f32 %v2920_v56, %v2921_v50  ;;  %v2914_v6 = vsel %vm2779_vm0, %v2754_v46, -inf  ;;  %v2925_v8 = vsel %vm2779_vm0, %v2659_v54, -inf  ;;  %v2927_v9 = vsel %vm2779_vm0, %v2691_v55, -inf }
 0x15f   : > { %v2938_v10 = vsel %vm2779_vm0, %v2596_v57, -inf  ;;  %v2898_v11 = vmax.f32 %v2896_v63, %v2897_v34  ;;  %v2911_v12 = vmax.f32 %v2909_v0, %v2910_v48  ;;  %v2937_v16 = vmax.f32 %v2935_v2, %v2936_v62  ;;  %v2662_v63 = vld [vmem:[%s4116_s23 + $0x558] sm:$0xff] }
 0x160   : > { %v2924_v14 = vmax.f32 %v2922_v1, %v2923_v58  ;;  %v2940_v19 = vsel %vm2779_vm0, %v2628_v59, -inf  ;;  %v2950_v20 = vsel %vm2779_vm0, %v2501_v4, -inf  ;;  %v2951_v21 = vsel %vm2779_vm0, %v2533_v5, -inf  ;;  %v2535_v58 = vld [vmem:[%s4116_s23 + $0x160] sm:$0xff] }
 0x161   : > { %v2953_v22 = vsel %vm2779_vm0, %v2565_v3, -inf  ;;  %3330 = vst.msk [vmem:[%s4201_s28 + $0x30] sm:$0xff] %vm2779_vm0, %v2898_v11  ;;  %v2913_v23 = vmax.f32 %v2911_v12, %v2912_v49  ;;  %v2939_v25 = vmax.f32 %v2937_v16, %v2938_v10  ;;  %v2952_v27 = vmax.f32 %v2950_v20, %v2951_v21  ;;  %v2693_v49 = vld [vmem:[%s4116_s23 + $0x650] sm:$0xff]  ;;  %v2567_v1 = vld [vmem:[%s4116_s23 + $0x260] sm:$0xff]  ;;  %v2694_v10 = vld [vmem:[%s4116_s23 + $0x658] sm:$0xff] }
 0x162   : > { %v2926_v24 = vmax.f32 %v2924_v14, %v2925_v8  ;;  %v2929_v30 = vsel %vm2779_vm0, %v2723_v7, -inf  ;;  %v2931_v31 = vsel %vm2779_vm0, %v2755_v13, -inf  ;;  %v2942_v33 = vsel %vm2779_vm0, %v2660_v15, -inf  ;;  %v2599_v3 = vld [vmem:[%s4116_s23 + $0x360] sm:$0xff]  ;;  %v2757_v8 = vld [vmem:[%s4116_s23 + $0x850] sm:$0xff] }
 0x163   : > { %v2955_v34 = vsel %vm2779_vm0, %v2597_v17, -inf  ;;  %v2915_v35 = vmax.f32 %v2913_v23, %v2914_v6  ;;  %v2941_v37 = vmax.f32 %v2939_v25, %v2940_v19  ;;  %v2954_v39 = vmax.f32 %v2952_v27, %v2953_v22  ;;  %v2631_v12 = vld [vmem:[%s4116_s23 + $0x460] sm:$0xff]  ;;  %v2536_v19 = vld [vmem:[%s4116_s23 + $0x168] sm:$0xff]  ;;  %v2726_v22 = vld [vmem:[%s4116_s23 + $0x758] sm:$0xff] }
 0x164   : > { %v2928_v36 = vmax.f32 %v2926_v24, %v2927_v9  ;;  %v2944_v43 = vsel %vm2779_vm0, %v2692_v18, -inf  ;;  %v2957_v44 = vsel %vm2779_vm0, %v2629_v26, -inf  ;;  %v2967_v45 = vsel %vm2779_vm0, %v2502_v28, -inf  ;;  %v2504_v18 = vld [vmem:[%s4116_s23 + $0x68] sm:$0xff]  ;;  %v2663_v28 = vld [vmem:[%s4116_s23 + $0x560] sm:$0xff] }
 0x165   : > { %v2968_v46 = vsel %vm2779_vm0, %v2534_v29, -inf  ;;  %3331 = vst.msk [vmem:[%s4201_s28 + $0x38] sm:$0xff] %vm2779_vm0, %v2915_v35  ;;  %v2943_v48 = vmax.f32 %v2941_v37, %v2942_v33  ;;  %v2956_v50 = vmax.f32 %v2954_v39, %v2955_v34  ;;  %v2946_v54 = vsel %vm2779_vm0, %v2724_v32, -inf  ;;  %v2568_v25 = vld [vmem:[%s4116_s23 + $0x268] sm:$0xff]  ;;  %v2758_v33 = vld [vmem:[%s4116_s23 + $0x858] sm:$0xff]  ;;  %v2695_v35 = vld [vmem:[%s4116_s23 + $0x660] sm:$0xff] }
 0x166   : > { %v2930_v47 = vmax.f32 %v2928_v36, %v2929_v30  ;;  %v2969_v52 = vmax.f32 %v2967_v45, %v2968_v46  ;;  %v2959_v55 = vsel %vm2779_vm0, %v2661_v38, -inf  ;;  %v2970_v56 = vsel %vm2779_vm0, %v2566_v40, -inf  ;;  %v2632_v40 = vld [vmem:[%s4116_s23 + $0x468] sm:$0xff] }
 0x167   : > { %v2972_v57 = vsel %vm2779_vm0, %v2598_v41, -inf  ;;  %v2945_v60 = vmax.f32 %v2943_v48, %v2944_v43  ;;  %v2958_v62 = vmax.f32 %v2956_v50, %v2957_v44  ;;  %v2948_v2 = vsel %vm2779_vm0, %v2756_v42, -inf  ;;  %v2505_v43 = vld [vmem:[%s4116_s23 + $0x70] sm:$0xff] }
 0x168   : > { %v2932_v59 = vmax.f32 %v2930_v47, %v2931_v31  ;;  %v2971_v0 = vmax.f32 %v2969_v52, %v2970_v56  ;;  %v2961_v4 = vsel %vm2779_vm0, %v2693_v49, -inf  ;;  %v2974_v5 = vsel %vm2779_vm0, %v2630_v51, -inf  ;;  %v2600_v31 = vld [vmem:[%s4116_s23 + $0x368] sm:$0xff]  ;;  %v2537_v44 = vld [vmem:[%s4116_s23 + $0x170] sm:$0xff]  ;;  %v2727_v51 = vld [vmem:[%s4116_s23 + $0x760] sm:$0xff] }
 0x169   : > { %v2984_v6 = vsel %vm2779_vm0, %v2503_v53, -inf  ;;  %v2947_v7 = vmax.f32 %v2945_v60, %v2946_v54  ;;  %v2960_v9 = vmax.f32 %v2958_v62, %v2959_v55  ;;  %v2985_v13 = vsel %vm2779_vm0, %v2535_v58, -inf  ;;  %v2569_v49 = vld [vmem:[%s4116_s23 + $0x270] sm:$0xff]  ;;  %v2664_v54 = vld [vmem:[%s4116_s23 + $0x568] sm:$0xff]  ;;  %v2759_v58 = vld [vmem:[%s4116_s23 + $0x860] sm:$0xff] }
 0x16a   : > { %3332 = vst.msk [vmem:[%s4201_s28 + $0x40] sm:$0xff] %vm2779_vm0, %v2932_v59  ;;  %v2973_v11 = vmax.f32 %v2971_v0, %v2972_v57  ;;  %v2963_v14 = vsel %vm2779_vm0, %v2725_v61, -inf  ;;  %v2976_v15 = vsel %vm2779_vm0, %v2662_v63, -inf  ;;  %v2986_v16 = vmax.f32 %v2984_v6, %v2985_v13  ;;  %v2601_v56 = vld [vmem:[%s4116_s23 + $0x370] sm:$0xff]  ;;  %v2696_v59 = vld [vmem:[%s4116_s23 + $0x668] sm:$0xff] }
 0x16b   : > { %v2987_v17 = vsel %vm2779_vm0, %v2567_v1, -inf  ;;  %v2949_v20 = vmax.f32 %v2947_v7, %v2948_v2  ;;  %v2962_v21 = vmax.f32 %v2960_v9, %v2961_v4  ;;  %v2989_v24 = vsel %vm2779_vm0, %v2599_v3, -inf  ;;  %v2633_v1 = vld [vmem:[%s4116_s23 + $0x470] sm:$0xff]  ;;  %v2538_v3 = vld [vmem:[%s4116_s23 + $0x178] sm:$0xff] }
 0x16c   : > { %v2975_v23 = vmax.f32 %v2973_v11, %v2974_v5  ;;  %v2965_v26 = vsel %vm2779_vm0, %v2757_v8, -inf  ;;  %v2978_v27 = vsel %vm2779_vm0, %v2694_v10, -inf  ;;  %v2988_v29 = vmax.f32 %v2986_v16, %v2987_v17  ;;  %v2506_v5 = vld [vmem:[%s4116_s23 + $0x78] sm:$0xff]  ;;  %v2728_v8 = vld [vmem:[%s4116_s23 + $0x768] sm:$0xff] }
 0x16d   : > { %v2991_v30 = vsel %vm2779_vm0, %v2631_v12, -inf  ;;  %3333 = vst.msk [vmem:[%s4201_s28 + $0x48] sm:$0xff] %vm2779_vm0, %v2949_v20  ;;  %v2964_v32 = vmax.f32 %v2962_v21, %v2963_v14  ;;  %v3001_v36 = vsel %vm2779_vm0, %v2504_v18, -inf  ;;  %v3002_v37 = vsel %vm2779_vm0, %v2536_v19, -inf  ;;  %v2665_v14 = vld [vmem:[%s4116_s23 + $0x570] sm:$0xff]  ;;  %v2570_v16 = vld [vmem:[%s4116_s23 + $0x278] sm:$0xff] }
 0x16e   : > { %v2977_v34 = vmax.f32 %v2975_v23, %v2976_v15  ;;  %v2980_v38 = vsel %vm2779_vm0, %v2726_v22, -inf  ;;  %v2990_v39 = vmax.f32 %v2988_v29, %v2989_v24  ;;  %v3003_v41 = vmax.f32 %v3001_v36, %v3002_v37  ;;  %v2602_v17 = vld [vmem:[%s4116_s23 + $0x378] sm:$0xff]  ;;  %v2760_v18 = vld [vmem:[%s4116_s23 + $0x868] sm:$0xff]  ;;  %v2507_v29 = vld [vmem:[%s4116_s23 + $0x80] sm:$0xff] }
 0x16f   : > { %v3004_v42 = vsel %vm2779_vm0, %v2568_v25, -inf  ;;  %v2966_v45 = vmax.f32 %v2964_v32, %v2965_v26  ;;  %v2993_v47 = vsel %vm2779_vm0, %v2663_v28, -inf  ;;  %v3006_v48 = vsel %vm2779_vm0, %v2600_v31, -inf  ;;  %v2697_v25 = vld [vmem:[%s4116_s23 + $0x670] sm:$0xff] }
 0x170   : > { %v2979_v46 = vmax.f32 %v2977_v34, %v2978_v27  ;;  %v2982_v50 = vsel %vm2779_vm0, %v2758_v33, -inf  ;;  %v2992_v52 = vmax.f32 %v2990_v39, %v2991_v30  ;;  %v2995_v53 = vsel %vm2779_vm0, %v2695_v35, -inf  ;;  %v2634_v27 = vld [vmem:[%s4116_s23 + $0x478] sm:$0xff]  ;;  %v2539_v34 = vld [vmem:[%s4116_s23 + $0x180] sm:$0xff]  ;;  %v2729_v37 = vld [vmem:[%s4116_s23 + $0x770] sm:$0xff] }
 0x171   : > { %v3005_v55 = vmax.f32 %v3003_v41, %v3004_v42  ;;  %3334 = vst.msk [vmem:[%s4201_s28 + $0x50] sm:$0xff] %vm2779_vm0, %v2966_v45  ;;  %v3008_v60 = vsel %vm2779_vm0, %v2632_v40, -inf  ;;  %v3018_v61 = vsel %vm2779_vm0, %v2505_v43, -inf  ;;  %v3019_v62 = vsel %vm2779_vm0, %v2537_v44, -inf  ;;  %v2666_v39 = vld [vmem:[%s4116_s23 + $0x578] sm:$0xff]  ;;  %v2571_v41 = vld [vmem:[%s4116_s23 + $0x280] sm:$0xff] }
 0x172   : > { %v2981_v57 = vmax.f32 %v2979_v46, %v2980_v38  ;;  %v2994_v63 = vmax.f32 %v2992_v52, %v2993_v47  ;;  %v3020_v2 = vmax.f32 %v3018_v61, %v3019_v62  ;;  %v3021_v4 = vsel %vm2779_vm0, %v2569_v49, -inf  ;;  %v2603_v45 = vld [vmem:[%s4116_s23 + $0x380] sm:$0xff]  ;;  %v2730_v62 = vld [vmem:[%s4116_s23 + $0x778] sm:$0xff] }
 0x173   : > { %v3007_v0 = vmax.f32 %v3005_v55, %v3006_v48  ;;  %v2997_v7 = vsel %vm2779_vm0, %v2727_v51, -inf  ;;  %v3010_v9 = vsel %vm2779_vm0, %v2664_v54, -inf  ;;  %v3023_v10 = vsel %vm2779_vm0, %v2601_v56, -inf  ;;  %v2761_v48 = vld [vmem:[%s4116_s23 + $0x870] sm:$0xff]  ;;  %v2635_v52 = vld [vmem:[%s4116_s23 + $0x480] sm:$0xff] }
 0x174   : > { %v2983_v6 = vmax.f32 %v2981_v57, %v2982_v50  ;;  %v2996_v11 = vmax.f32 %v2994_v63, %v2995_v53  ;;  %v2999_v12 = vsel %vm2779_vm0, %v2759_v58, -inf  ;;  %v3022_v15 = vmax.f32 %v3020_v2, %v3021_v4  ;;  %v2698_v50 = vld [vmem:[%s4116_s23 + $0x678] sm:$0xff]  ;;  %v2508_v58 = vld [vmem:[%s4116_s23 + $0x88] sm:$0xff] }
 0x175   : > { %v3009_v13 = vmax.f32 %v3007_v0, %v3008_v60  ;;  %v3012_v19 = vsel %vm2779_vm0, %v2696_v59, -inf  ;;  %v3025_v20 = vsel %vm2779_vm0, %v2633_v1, -inf  ;;  %v3035_v21 = vsel %vm2779_vm0, %v2506_v5, -inf  ;;  %v2540_v59 = vld [vmem:[%s4116_s23 + $0x188] sm:$0xff]  ;;  %v2667_v5 = vld [vmem:[%s4116_s23 + $0x580] sm:$0xff] }
 0x176   : > { %3335 = vst.msk [vmem:[%s4201_s28 + $0x58] sm:$0xff] %vm2779_vm0, %v2983_v6  ;;  %v3036_v22 = vsel %vm2779_vm0, %v2538_v3, -inf  ;;  %v2998_v23 = vmax.f32 %v2996_v11, %v2997_v7  ;;  %v3024_v26 = vmax.f32 %v3022_v15, %v3023_v10  ;;  %v3014_v30 = vsel %vm2779_vm0, %v2728_v8, -inf  ;;  %v2572_v1 = vld [vmem:[%s4116_s23 + $0x288] sm:$0xff]  ;;  %v2699_v11 = vld [vmem:[%s4116_s23 + $0x680] sm:$0xff] }
 0x177   : > { %v3011_v24 = vmax.f32 %v3009_v13, %v3010_v9  ;;  %v3037_v28 = vmax.f32 %v3035_v21, %v3036_v22  ;;  %v3027_v31 = vsel %vm2779_vm0, %v2665_v14, -inf  ;;  %v3038_v32 = vsel %vm2779_vm0, %v2570_v16, -inf  ;;  %v2604_v7 = vld [vmem:[%s4116_s23 + $0x388] sm:$0xff]  ;;  %v2762_v9 = vld [vmem:[%s4116_s23 + $0x878] sm:$0xff] }
 0x178   : > { %v3040_v33 = vsel %vm2779_vm0, %v2602_v17, -inf  ;;  %v3000_v35 = vmax.f32 %v2998_v23, %v2999_v12  ;;  %v3026_v38 = vmax.f32 %v3024_v26, %v3025_v20  ;;  %v3016_v42 = vsel %vm2779_vm0, %v2760_v18, -inf  ;;  %v2636_v16 = vld [vmem:[%s4116_s23 + $0x488] sm:$0xff]  ;;  %v2541_v20 = vld [vmem:[%s4116_s23 + $0x190] sm:$0xff] }
 0x179   : > { %v3013_v36 = vmax.f32 %v3011_v24, %v3012_v19  ;;  %v3039_v40 = vmax.f32 %v3037_v28, %v3038_v32  ;;  %v3029_v43 = vsel %vm2779_vm0, %v2697_v25, -inf  ;;  %v3042_v44 = vsel %vm2779_vm0, %v2634_v27, -inf  ;;  %v2509_v19 = vld [vmem:[%s4116_s23 + $0x90] sm:$0xff]  ;;  %v2731_v27 = vld [vmem:[%s4116_s23 + $0x780] sm:$0xff] }
 0x17a   : > { %v3052_v46 = vsel %vm2779_vm0, %v2507_v29, -inf  ;;  %3336 = vst.msk [vmem:[%s4201_s28 + $0x60] sm:$0xff] %vm2779_vm0, %v3000_v35  ;;  %v3028_v49 = vmax.f32 %v3026_v38, %v3027_v31  ;;  %v3053_v53 = vsel %vm2779_vm0, %v2539_v34, -inf  ;;  %v3031_v54 = vsel %vm2779_vm0, %v2729_v37, -inf  ;;  %v2573_v25 = vld [vmem:[%s4116_s23 + $0x290] sm:$0xff]  ;;  %v2763_v34 = vld [vmem:[%s4116_s23 + $0x880] sm:$0xff] }
 0x17b   : > { %v3015_v47 = vmax.f32 %v3013_v36, %v3014_v30  ;;  %v3041_v51 = vmax.f32 %v3039_v40, %v3040_v33  ;;  %v3044_v55 = vsel %vm2779_vm0, %v2666_v39, -inf  ;;  %v3054_v56 = vmax.f32 %v3052_v46, %v3053_v53  ;;  %v2668_v30 = vld [vmem:[%s4116_s23 + $0x588] sm:$0xff]  ;;  %v2605_v32 = vld [vmem:[%s4116_s23 + $0x390] sm:$0xff] }
 0x17c   : > { %v3055_v57 = vsel %vm2779_vm0, %v2571_v41, -inf  ;;  %v3030_v61 = vmax.f32 %v3028_v49, %v3029_v43  ;;  %v3057_v0 = vsel %vm2779_vm0, %v2603_v45, -inf  ;;  %v3033_v2 = vsel %vm2779_vm0, %v2761_v48, -inf  ;;  %v2700_v35 = vld [vmem:[%s4116_s23 + $0x688] sm:$0xff]  ;;  %v2637_v41 = vld [vmem:[%s4116_s23 + $0x490] sm:$0xff]  ;;  %v2542_v45 = vld [vmem:[%s4116_s23 + $0x198] sm:$0xff] }
 0x17d   : > { %v3017_v60 = vmax.f32 %v3015_v47, %v3016_v42  ;;  %v3043_v63 = vmax.f32 %v3041_v51, %v3042_v44  ;;  %v3046_v4 = vsel %vm2779_vm0, %v2698_v50, -inf  ;;  %v3056_v3 = vmax.f32 %v3054_v56, %v3055_v57  ;;  %v2510_v44 = vld [vmem:[%s4116_s23 + $0x98] sm:$0xff]  ;;  %v2732_v48 = vld [vmem:[%s4116_s23 + $0x788] sm:$0xff] }
 0x17e   : > { %v3059_v6 = vsel %vm2779_vm0, %v2635_v52, -inf  ;;  %v3032_v8 = vmax.f32 %v3030_v61, %v3031_v54  ;;  %v3069_v12 = vsel %vm2779_vm0, %v2508_v58, -inf  ;;  %v3070_v13 = vsel %vm2779_vm0, %v2540_v59, -inf  ;;  %v2669_v54 = vld [vmem:[%s4116_s23 + $0x590] sm:$0xff]  ;;  %v2574_v56 = vld [vmem:[%s4116_s23 + $0x298] sm:$0xff]  ;;  %v2764_v58 = vld [vmem:[%s4116_s23 + $0x888] sm:$0xff] }
 0x17f   : > { %3337 = vst.msk [vmem:[%s4201_s28 + $0x68] sm:$0xff] %vm2779_vm0, %v3017_v60  ;;  %v3045_v10 = vmax.f32 %v3043_v63, %v3044_v55  ;;  %v3048_v14 = vsel %vm2779_vm0, %v2730_v62, -inf  ;;  %v3058_v15 = vmax.f32 %v3056_v3, %v3057_v0  ;;  %v3071_v17 = vmax.f32 %v3069_v12, %v3070_v13  ;;  %v2606_v57 = vld [vmem:[%s4116_s23 + $0x398] sm:$0xff]  ;;  %v2511_v3 = vld [vmem:[%s4116_s23 + $0xa0] sm:$0xff]  ;;  %v2733_v13 = vld [vmem:[%s4116_s23 + $0x790] sm:$0xff] }
 0x180   : > { %v3072_v18 = vsel %vm2779_vm0, %v2572_v1, -inf  ;;  %v3034_v21 = vmax.f32 %v3032_v8, %v3033_v2  ;;  %v3061_v23 = vsel %vm2779_vm0, %v2667_v5, -inf  ;;  %v3074_v24 = vsel %vm2779_vm0, %v2604_v7, -inf  ;;  %v2701_v1 = vld [vmem:[%s4116_s23 + $0x690] sm:$0xff] }
 0x181   : > { %v3047_v22 = vmax.f32 %v3045_v10, %v3046_v4  ;;  %v3050_v26 = vsel %vm2779_vm0, %v2762_v9, -inf  ;;  %v3060_v28 = vmax.f32 %v3058_v15, %v3059_v6  ;;  %v3063_v29 = vsel %vm2779_vm0, %v2699_v11, -inf  ;;  %v2638_v4 = vld [vmem:[%s4116_s23 + $0x498] sm:$0xff]  ;;  %v2543_v10 = vld [vmem:[%s4116_s23 + $0x1a0] sm:$0xff] }
 0x182   : > { %v3073_v31 = vmax.f32 %v3071_v17, %v3072_v18  ;;  %3338 = vst.msk [vmem:[%s4201_s28 + $0x70] sm:$0xff] %vm2779_vm0, %v3034_v21  ;;  %v3076_v36 = vsel %vm2779_vm0, %v2636_v16, -inf  ;;  %v3086_v37 = vsel %vm2779_vm0, %v2509_v19, -inf  ;;  %v3087_v38 = vsel %vm2779_vm0, %v2541_v20, -inf  ;;  %v2670_v15 = vld [vmem:[%s4116_s23 + $0x598] sm:$0xff]  ;;  %v2575_v17 = vld [vmem:[%s4116_s23 + $0x2a0] sm:$0xff] }
 0x183   : > { %v3049_v33 = vmax.f32 %v3047_v22, %v3048_v14  ;;  %v3062_v39 = vmax.f32 %v3060_v28, %v3061_v23  ;;  %v3088_v42 = vmax.f32 %v3086_v37, %v3087_v38  ;;  %v3089_v43 = vsel %vm2779_vm0, %v2573_v25, -inf  ;;  %v2607_v21 = vld [vmem:[%s4116_s23 + $0x3a0] sm:$0xff]  ;;  %v2734_v38 = vld [vmem:[%s4116_s23 + $0x798] sm:$0xff] }
 0x184   : > { %v3075_v40 = vmax.f32 %v3073_v31, %v3074_v24  ;;  %v3065_v47 = vsel %vm2779_vm0, %v2731_v27, -inf  ;;  %v3078_v49 = vsel %vm2779_vm0, %v2668_v30, -inf  ;;  %v3091_v50 = vsel %vm2779_vm0, %v2605_v32, -inf  ;;  %v2765_v24 = vld [vmem:[%s4116_s23 + $0x890] sm:$0xff]  ;;  %v2639_v28 = vld [vmem:[%s4116_s23 + $0x4a0] sm:$0xff] }
 0x185   : > { %v3051_v46 = vmax.f32 %v3049_v33, %v3050_v26  ;;  %v3064_v51 = vmax.f32 %v3062_v39, %v3063_v29  ;;  %v3067_v52 = vsel %vm2779_vm0, %v2763_v34, -inf  ;;  %v3090_v55 = vmax.f32 %v3088_v42, %v3089_v43  ;;  %v2702_v26 = vld [vmem:[%s4116_s23 + $0x698] sm:$0xff]  ;;  %v2512_v34 = vld [vmem:[%s4116_s23 + $0xa8] sm:$0xff] }
 0x186   : > { %v3077_v53 = vmax.f32 %v3075_v40, %v3076_v36  ;;  %v3080_v59 = vsel %vm2779_vm0, %v2700_v35, -inf  ;;  %v3093_v60 = vsel %vm2779_vm0, %v2637_v41, -inf  ;;  %v3103_v61 = vsel %vm2779_vm0, %v2510_v44, -inf  ;;  %v2544_v35 = vld [vmem:[%s4116_s23 + $0x1a8] sm:$0xff]  ;;  %v2671_v44 = vld [vmem:[%s4116_s23 + $0x5a0] sm:$0xff] }
 0x187   : > { %3339 = vst.msk [vmem:[%s4201_s28 + $0x78] sm:$0xff] %vm2779_vm0, %v3051_v46  ;;  %v3104_v62 = vsel %vm2779_vm0, %v2542_v45, -inf  ;;  %v3066_v63 = vmax.f32 %v3064_v51, %v3065_v47  ;;  %v3092_v2 = vmax.f32 %v3090_v55, %v3091_v50  ;;  %v3082_v6 = vsel %vm2779_vm0, %v2732_v48, -inf  ;;  %v2576_v41 = vld [vmem:[%s4116_s23 + $0x2a8] sm:$0xff]  ;;  %v2703_v51 = vld [vmem:[%s4116_s23 + $0x6a0] sm:$0xff] }
 0x188   : > { %v3079_v0 = vmax.f32 %v3077_v53, %v3078_v49  ;;  %v3105_v5 = vmax.f32 %v3103_v61, %v3104_v62  ;;  %v3095_v7 = vsel %vm2779_vm0, %v2669_v54, -inf  ;;  %v3106_v8 = vsel %vm2779_vm0, %v2574_v56, -inf  ;;  %v2608_v47 = vld [vmem:[%s4116_s23 + $0x3a8] sm:$0xff]  ;;  %v2766_v49 = vld [vmem:[%s4116_s23 + $0x898] sm:$0xff] }
 0x189   : > { %v3108_v9 = vsel %vm2779_vm0, %v2606_v57, -inf  ;;  %v3068_v11 = vmax.f32 %v3066_v63, %v3067_v52  ;;  %v3094_v14 = vmax.f32 %v3092_v2, %v3093_v60  ;;  %v3084_v18 = vsel %vm2779_vm0, %v2764_v58, -inf  ;;  %v2640_v56 = vld [vmem:[%s4116_s23 + $0x4a8] sm:$0xff]  ;;  %v2545_v60 = vld [vmem:[%s4116_s23 + $0x1b0] sm:$0xff] }
 0x18a   : > { %v3081_v12 = vmax.f32 %v3079_v0, %v3080_v59  ;;  %v3107_v16 = vmax.f32 %v3105_v5, %v3106_v8  ;;  %v3097_v19 = vsel %vm2779_vm0, %v2701_v1, -inf  ;;  %v3110_v20 = vsel %vm2779_vm0, %v2638_v4, -inf  ;;  %v2513_v59 = vld [vmem:[%s4116_s23 + $0xb0] sm:$0xff]  ;;  %v2735_v4 = vld [vmem:[%s4116_s23 + $0x7a0] sm:$0xff] }
 0x18b   : > { %v3120_v22 = vsel %vm2779_vm0, %v2511_v3, -inf  ;;  %3340 = vst.msk [vmem:[%s4201_s28 + $0x80] sm:$0xff] %vm2779_vm0, %v3068_v11  ;;  %v3096_v25 = vmax.f32 %v3094_v14, %v3095_v7  ;;  %v3121_v29 = vsel %vm2779_vm0, %v2543_v10, -inf  ;;  %v3099_v30 = vsel %vm2779_vm0, %v2733_v13, -inf  ;;  %v2577_v1 = vld [vmem:[%s4116_s23 + $0x2b0] sm:$0xff]  ;;  %v2767_v10 = vld [vmem:[%s4116_s23 + $0x8a0] sm:$0xff] }
 0x18c   : > { %v3083_v23 = vmax.f32 %v3081_v12, %v3082_v6  ;;  %v3109_v27 = vmax.f32 %v3107_v16, %v3108_v9  ;;  %v3112_v31 = vsel %vm2779_vm0, %v2670_v15, -inf  ;;  %v3122_v32 = vmax.f32 %v3120_v22, %v3121_v29  ;;  %v2672_v6 = vld [vmem:[%s4116_s23 + $0x5a8] sm:$0xff]  ;;  %v2609_v8 = vld [vmem:[%s4116_s23 + $0x3b0] sm:$0xff] }
 0x18d   : > { %v3123_v33 = vsel %vm2779_vm0, %v2575_v17, -inf  ;;  %v3098_v37 = vmax.f32 %v3096_v25, %v3097_v19  ;;  %v3125_v40 = vsel %vm2779_vm0, %v2607_v21, -inf  ;;  %v3101_v42 = vsel %vm2779_vm0, %v2765_v24, -inf  ;;  %v2704_v11 = vld [vmem:[%s4116_s23 + $0x6a8] sm:$0xff]  ;;  %v2641_v17 = vld [vmem:[%s4116_s23 + $0x4b0] sm:$0xff]  ;;  %v2546_v21 = vld [vmem:[%s4116_s23 + $0x1b8] sm:$0xff] }
 0x18e   : > { %v3085_v36 = vmax.f32 %v3083_v23, %v3084_v18  ;;  %v3111_v39 = vmax.f32 %v3109_v27, %v3110_v20  ;;  %v3114_v43 = vsel %vm2779_vm0, %v2702_v26, -inf  ;;  %v3124_v45 = vmax.f32 %v3122_v32, %v3123_v33  ;;  %v2514_v20 = vld [vmem:[%s4116_s23 + $0xb8] sm:$0xff]  ;;  %v2736_v24 = vld [vmem:[%s4116_s23 + $0x7a8] sm:$0xff] }
 0x18f   : > { %v3127_v46 = vsel %vm2779_vm0, %v2639_v28, -inf  ;;  %v3100_v48 = vmax.f32 %v3098_v37, %v3099_v30  ;;  %v3137_v52 = vsel %vm2779_vm0, %v2512_v34, -inf  ;;  %v3138_v53 = vsel %vm2779_vm0, %v2544_v35, -inf  ;;  %v2673_v30 = vld [vmem:[%s4116_s23 + $0x5b0] sm:$0xff]  ;;  %v2578_v32 = vld [vmem:[%s4116_s23 + $0x2b8] sm:$0xff]  ;;  %v2768_v34 = vld [vmem:[%s4116_s23 + $0x8a8] sm:$0xff] }
 0x190   : > { %3341 = vst.msk [vmem:[%s4201_s28 + $0x88] sm:$0xff] %vm2779_vm0, %v3085_v36  ;;  %v3113_v50 = vmax.f32 %v3111_v39, %v3112_v31  ;;  %v3116_v54 = vsel %vm2779_vm0, %v2734_v38, -inf  ;;  %v3126_v55 = vmax.f32 %v3124_v45, %v3125_v40  ;;  %v3139_v57 = vmax.f32 %v3137_v52, %v3138_v53  ;;  %v2610_v33 = vld [vmem:[%s4116_s23 + $0x3b8] sm:$0xff]  ;;  %v2515_v45 = vld [vmem:[%s4116_s23 + $0xc0] sm:$0xff]  ;;  %v2737_v53 = vld [vmem:[%s4116_s23 + $0x7b0] sm:$0xff] }
 0x191   : > { %v3140_v58 = vsel %vm2779_vm0, %v2576_v41, -inf  ;;  %v3102_v61 = vmax.f32 %v3100_v48, %v3101_v42  ;;  %v3129_v63 = vsel %vm2779_vm0, %v2671_v44, -inf  ;;  %v3142_v0 = vsel %vm2779_vm0, %v2608_v47, -inf  ;;  %v2705_v41 = vld [vmem:[%s4116_s23 + $0x6b0] sm:$0xff] }
 0x192   : > { %v3115_v62 = vmax.f32 %v3113_v50, %v3114_v43  ;;  %v3118_v2 = vsel %vm2779_vm0, %v2766_v49, -inf  ;;  %v3128_v5 = vmax.f32 %v3126_v55, %v3127_v46  ;;  %v3131_v3 = vsel %vm2779_vm0, %v2703_v51, -inf  ;;  %v2642_v43 = vld [vmem:[%s4116_s23 + $0x4b8] sm:$0xff]  ;;  %v2547_v50 = vld [vmem:[%s4116_s23 + $0x1c0] sm:$0xff] }
 0x193   : > { %v3141_v7 = vmax.f32 %v3139_v57, %v3140_v58  ;;  %3342 = vst.msk [vmem:[%s4201_s28 + $0x90] sm:$0xff] %vm2779_vm0, %v3102_v61  ;;  %v3144_v12 = vsel %vm2779_vm0, %v2640_v56, -inf  ;;  %v3154_v13 = vsel %vm2779_vm0, %v2513_v59, -inf  ;;  %v3155_v14 = vsel %vm2779_vm0, %v2545_v60, -inf  ;;  %v2674_v55 = vld [vmem:[%s4116_s23 + $0x5b8] sm:$0xff]  ;;  %v2579_v57 = vld [vmem:[%s4116_s23 + $0x2c0] sm:$0xff] }
 0x194   : > { %v3117_v9 = vmax.f32 %v3115_v62, %v3116_v54  ;;  %v3130_v15 = vmax.f32 %v3128_v5, %v3129_v63  ;;  %v3156_v18 = vmax.f32 %v3154_v13, %v3155_v14  ;;  %v3157_v19 = vsel %vm2779_vm0, %v2577_v1, -inf  ;;  %v2611_v61 = vld [vmem:[%s4116_s23 + $0x3c0] sm:$0xff]  ;;  %v2738_v14 = vld [vmem:[%s4116_s23 + $0x7b8] sm:$0xff] }
 0x195   : > { %v3143_v16 = vmax.f32 %v3141_v7, %v3142_v0  ;;  %v3133_v23 = vsel %vm2779_vm0, %v2735_v4, -inf  ;;  %v3146_v25 = vsel %vm2779_vm0, %v2672_v6, -inf  ;;  %v3159_v26 = vsel %vm2779_vm0, %v2609_v8, -inf  ;;  %v2769_v0 = vld [vmem:[%s4116_s23 + $0x8b0] sm:$0xff]  ;;  %v2643_v5 = vld [vmem:[%s4116_s23 + $0x4c0] sm:$0xff] }
 0x196   : > { %v3119_v22 = vmax.f32 %v3117_v9, %v3118_v2  ;;  %v3132_v27 = vmax.f32 %v3130_v15, %v3131_v3  ;;  %v3135_v28 = vsel %vm2779_vm0, %v2767_v10, -inf  ;;  %v3158_v31 = vmax.f32 %v3156_v18, %v3157_v19  ;;  %v2706_v2 = vld [vmem:[%s4116_s23 + $0x6b8] sm:$0xff]  ;;  %v2516_v10 = vld [vmem:[%s4116_s23 + $0xc8] sm:$0xff] }
 0x197   : > { %v3145_v29 = vmax.f32 %v3143_v16, %v3144_v12  ;;  %v3148_v35 = vsel %vm2779_vm0, %v2704_v11, -inf  ;;  %v3161_v36 = vsel %vm2779_vm0, %v2641_v17, -inf  ;;  %v3171_v37 = vsel %vm2779_vm0, %v2514_v20, -inf  ;;  %v2548_v11 = vld [vmem:[%s4116_s23 + $0x1c8] sm:$0xff]  ;;  %v2675_v20 = vld [vmem:[%s4116_s23 + $0x5c0] sm:$0xff] }
 0x198   : > { %3343 = vst.msk [vmem:[%s4201_s28 + $0x98] sm:$0xff] %vm2779_vm0, %v3119_v22  ;;  %v3172_v38 = vsel %vm2779_vm0, %v2546_v21, -inf  ;;  %v3134_v39 = vmax.f32 %v3132_v27, %v3133_v23  ;;  %v3160_v42 = vmax.f32 %v3158_v31, %v3159_v26  ;;  %v3150_v46 = vsel %vm2779_vm0, %v2736_v24, -inf  ;;  %v2580_v17 = vld [vmem:[%s4116_s23 + $0x2c8] sm:$0xff]  ;;  %v2707_v27 = vld [vmem:[%s4116_s23 + $0x6c0] sm:$0xff] }
 0x199   : > { %v3147_v40 = vmax.f32 %v3145_v29, %v3146_v25  ;;  %v3173_v44 = vmax.f32 %v3171_v37, %v3172_v38  ;;  %v3163_v47 = vsel %vm2779_vm0, %v2673_v30, -inf  ;;  %v3174_v48 = vsel %vm2779_vm0, %v2578_v32, -inf  ;;  %v2612_v23 = vld [vmem:[%s4116_s23 + $0x3c8] sm:$0xff]  ;;  %v2770_v25 = vld [vmem:[%s4116_s23 + $0x8b8] sm:$0xff] }
 0x19a   : > { %v3176_v49 = vsel %vm2779_vm0, %v2610_v33, -inf  ;;  %v3136_v51 = vmax.f32 %v3134_v39, %v3135_v28  ;;  %v3162_v54 = vmax.f32 %v3160_v42, %v3161_v36  ;;  %v3152_v58 = vsel %vm2779_vm0, %v2768_v34, -inf  ;;  %v2644_v32 = vld [vmem:[%s4116_s23 + $0x4c8] sm:$0xff]  ;;  %v2549_v36 = vld [vmem:[%s4116_s23 + $0x1d0] sm:$0xff] }
 0x19b   : > { %v3149_v52 = vmax.f32 %v3147_v40, %v3148_v35  ;;  %v3175_v56 = vmax.f32 %v3173_v44, %v3174_v48  ;;  %v3165_v59 = vsel %vm2779_vm0, %v2705_v41, -inf  ;;  %v3178_v60 = vsel %vm2779_vm0, %v2642_v43, -inf  ;;  %v2517_v35 = vld [vmem:[%s4116_s23 + $0xd0] sm:$0xff]  ;;  %v2739_v43 = vld [vmem:[%s4116_s23 + $0x7c0] sm:$0xff] }
 0x19c   : > { %v3188_v62 = vsel %vm2779_vm0, %v2515_v45, -inf  ;;  %3344 = vst.msk [vmem:[%s4201_s28 + $0xa0] sm:$0xff] %vm2779_vm0, %v3136_v51  ;;  %v3164_v1 = vmax.f32 %v3162_v54, %v3163_v47  ;;  %v3189_v3 = vsel %vm2779_vm0, %v2547_v50, -inf  ;;  %v3167_v6 = vsel %vm2779_vm0, %v2737_v53, -inf  ;;  %v2581_v41 = vld [vmem:[%s4116_s23 + $0x2d0] sm:$0xff]  ;;  %v2771_v50 = vld [vmem:[%s4116_s23 + $0x8c0] sm:$0xff] }
 0x19d   : > { %v3151_v63 = vmax.f32 %v3149_v52, %v3150_v46  ;;  %v3177_v4 = vmax.f32 %v3175_v56, %v3176_v49  ;;  %v3180_v7 = vsel %vm2779_vm0, %v2674_v55, -inf  ;;  %v3190_v8 = vmax.f32 %v3188_v62, %v3189_v3  ;;  %v2676_v46 = vld [vmem:[%s4116_s23 + $0x5c8] sm:$0xff]  ;;  %v2613_v48 = vld [vmem:[%s4116_s23 + $0x3d0] sm:$0xff] }
 0x19e   : > { %v3191_v9 = vsel %vm2779_vm0, %v2579_v57, -inf  ;;  %v3166_v13 = vmax.f32 %v3164_v1, %v3165_v59  ;;  %v3193_v16 = vsel %vm2779_vm0, %v2611_v61, -inf  ;;  %v3169_v18 = vsel %vm2779_vm0, %v2769_v0, -inf  ;;  %v2708_v51 = vld [vmem:[%s4116_s23 + $0x6c8] sm:$0xff]  ;;  %v2645_v57 = vld [vmem:[%s4116_s23 + $0x4d0] sm:$0xff]  ;;  %v2550_v61 = vld [vmem:[%s4116_s23 + $0x1d8] sm:$0xff] }
 0x19f   : > { %v3153_v12 = vmax.f32 %v3151_v63, %v3152_v58  ;;  %v3179_v15 = vmax.f32 %v3177_v4, %v3178_v60  ;;  %v3182_v19 = vsel %vm2779_vm0, %v2706_v2, -inf  ;;  %v3192_v21 = vmax.f32 %v3190_v8, %v3191_v9  ;;  %v2518_v60 = vld [vmem:[%s4116_s23 + $0xd8] sm:$0xff]  ;;  %v2740_v0 = vld [vmem:[%s4116_s23 + $0x7c8] sm:$0xff] }
 0x1a0   : > { %v3195_v22 = vsel %vm2779_vm0, %v2643_v5, -inf  ;;  %v3168_v24 = vmax.f32 %v3166_v13, %v3167_v6  ;;  %v3205_v28 = vsel %vm2779_vm0, %v2516_v10, -inf  ;;  %v3206_v29 = vsel %vm2779_vm0, %v2548_v11, -inf  ;;  %v2677_v6 = vld [vmem:[%s4116_s23 + $0x5d0] sm:$0xff]  ;;  %v2582_v8 = vld [vmem:[%s4116_s23 + $0x2d8] sm:$0xff]  ;;  %v2772_v10 = vld [vmem:[%s4116_s23 + $0x8c8] sm:$0xff] }
 0x1a1   : > { %3345 = vst.msk [vmem:[%s4201_s28 + $0xa8] sm:$0xff] %vm2779_vm0, %v3153_v12  ;;  %v3181_v26 = vmax.f32 %v3179_v15, %v3180_v7  ;;  %v3184_v30 = vsel %vm2779_vm0, %v2738_v14, -inf  ;;  %v3194_v31 = vmax.f32 %v3192_v21, %v3193_v16  ;;  %v3207_v33 = vmax.f32 %v3205_v28, %v3206_v29  ;;  %v2614_v9 = vld [vmem:[%s4116_s23 + $0x3d8] sm:$0xff]  ;;  %v2519_v21 = vld [vmem:[%s4116_s23 + $0xe0] sm:$0xff]  ;;  %v2741_v29 = vld [vmem:[%s4116_s23 + $0x7d0] sm:$0xff] }
 0x1a2   : > { %v3208_v34 = vsel %vm2779_vm0, %v2580_v17, -inf  ;;  %v3170_v37 = vmax.f32 %v3168_v24, %v3169_v18  ;;  %v3197_v39 = vsel %vm2779_vm0, %v2675_v20, -inf  ;;  %v3210_v40 = vsel %vm2779_vm0, %v2612_v23, -inf  ;;  %v2709_v17 = vld [vmem:[%s4116_s23 + $0x6d0] sm:$0xff] }
 0x1a3   : > { %v3183_v38 = vmax.f32 %v3181_v26, %v3182_v19  ;;  %v3186_v42 = vsel %vm2779_vm0, %v2770_v25, -inf  ;;  %v3196_v44 = vmax.f32 %v3194_v31, %v3195_v22  ;;  %v3199_v45 = vsel %vm2779_vm0, %v2707_v27, -inf  ;;  %v2646_v19 = vld [vmem:[%s4116_s23 + $0x4d8] sm:$0xff]  ;;  %v2551_v26 = vld [vmem:[%s4116_s23 + $0x1e0] sm:$0xff] }
 0x1a4   : > { %v3209_v47 = vmax.f32 %v3207_v33, %v3208_v34  ;;  %3346 = vst.msk [vmem:[%s4201_s28 + $0xb0] sm:$0xff] %vm2779_vm0, %v3170_v37  ;;  %v3212_v52 = vsel %vm2779_vm0, %v2644_v32, -inf  ;;  %v3222_v53 = vsel %vm2779_vm0, %v2517_v35, -inf  ;;  %v3223_v54 = vsel %vm2779_vm0, %v2549_v36, -inf  ;;  %v2678_v31 = vld [vmem:[%s4116_s23 + $0x5d8] sm:$0xff]  ;;  %v2583_v33 = vld [vmem:[%s4116_s23 + $0x2e0] sm:$0xff] }
 0x1a5   : > { %v3185_v49 = vmax.f32 %v3183_v38, %v3184_v30  ;;  %v3198_v55 = vmax.f32 %v3196_v44, %v3197_v39  ;;  %v3224_v58 = vmax.f32 %v3222_v53, %v3223_v54  ;;  %v3225_v59 = vsel %vm2779_vm0, %v2581_v41, -inf  ;;  %v2615_v37 = vld [vmem:[%s4116_s23 + $0x3e0] sm:$0xff]  ;;  %v2742_v54 = vld [vmem:[%s4116_s23 + $0x7d8] sm:$0xff] }
 0x1a6   : > { %v3211_v56 = vmax.f32 %v3209_v47, %v3210_v40  ;;  %v3201_v63 = vsel %vm2779_vm0, %v2739_v43, -inf  ;;  %v3214_v1 = vsel %vm2779_vm0, %v2676_v46, -inf  ;;  %v3227_v2 = vsel %vm2779_vm0, %v2613_v48, -inf  ;;  %v2773_v40 = vld [vmem:[%s4116_s23 + $0x8d0] sm:$0xff]  ;;  %v2647_v44 = vld [vmem:[%s4116_s23 + $0x4e0] sm:$0xff] }
 0x1a7   : > { %v3187_v62 = vmax.f32 %v3185_v49, %v3186_v42  ;;  %v3200_v4 = vmax.f32 %v3198_v55, %v3199_v45  ;;  %v3203_v5 = vsel %vm2779_vm0, %v2771_v50, -inf  ;;  %v3226_v7 = vmax.f32 %v3224_v58, %v3225_v59  ;;  %v2710_v42 = vld [vmem:[%s4116_s23 + $0x6d8] sm:$0xff]  ;;  %v2520_v50 = vld [vmem:[%s4116_s23 + $0xe8] sm:$0xff] }
 0x1a8   : > { %v3213_v3 = vmax.f32 %v3211_v56, %v3212_v52  ;;  %v3216_v11 = vsel %vm2779_vm0, %v2708_v51, -inf  ;;  %v3229_v12 = vsel %vm2779_vm0, %v2645_v57, -inf  ;;  %v3239_v13 = vsel %vm2779_vm0, %v2518_v60, -inf  ;;  %v2552_v51 = vld [vmem:[%s4116_s23 + $0x1e8] sm:$0xff]  ;;  %v2679_v60 = vld [vmem:[%s4116_s23 + $0x5e0] sm:$0xff] }
 0x1a9   : > { %3347 = vst.msk [vmem:[%s4201_s28 + $0xb8] sm:$0xff] %vm2779_vm0, %v3187_v62  ;;  %v3240_v14 = vsel %vm2779_vm0, %v2550_v61, -inf  ;;  %v3202_v15 = vmax.f32 %v3200_v4, %v3201_v63  ;;  %v3228_v18 = vmax.f32 %v3226_v7, %v3227_v2  ;;  %v3218_v22 = vsel %vm2779_vm0, %v2740_v0, -inf  ;;  %v2584_v57 = vld [vmem:[%s4116_s23 + $0x2e8] sm:$0xff]  ;;  %v2711_v4 = vld [vmem:[%s4116_s23 + $0x6e0] sm:$0xff] }
 0x1aa   : > { %v3215_v16 = vmax.f32 %v3213_v3, %v3214_v1  ;;  %v3241_v20 = vmax.f32 %v3239_v13, %v3240_v14  ;;  %v3231_v23 = vsel %vm2779_vm0, %v2677_v6, -inf  ;;  %v3242_v24 = vsel %vm2779_vm0, %v2582_v8, -inf  ;;  %v2616_v63 = vld [vmem:[%s4116_s23 + $0x3e8] sm:$0xff]  ;;  %v2774_v1 = vld [vmem:[%s4116_s23 + $0x8d8] sm:$0xff] }
 0x1ab   : > { %v3244_v25 = vsel %vm2779_vm0, %v2614_v9, -inf  ;;  %v3204_v27 = vmax.f32 %v3202_v15, %v3203_v5  ;;  %v3230_v30 = vmax.f32 %v3228_v18, %v3229_v12  ;;  %v3220_v34 = vsel %vm2779_vm0, %v2772_v10, -inf  ;;  %v2648_v8 = vld [vmem:[%s4116_s23 + $0x4e8] sm:$0xff]  ;;  %v2553_v12 = vld [vmem:[%s4116_s23 + $0x1f0] sm:$0xff] }
 0x1ac   : > { %v3217_v28 = vmax.f32 %v3215_v16, %v3216_v11  ;;  %v3243_v32 = vmax.f32 %v3241_v20, %v3242_v24  ;;  %v3233_v35 = vsel %vm2779_vm0, %v2709_v17, -inf  ;;  %v3246_v36 = vsel %vm2779_vm0, %v2646_v19, -inf  ;;  %v2521_v11 = vld [vmem:[%s4116_s23 + $0xf0] sm:$0xff]  ;;  %v2743_v19 = vld [vmem:[%s4116_s23 + $0x7e0] sm:$0xff] }
 0x1ad   : > { %v3256_v38 = vsel %vm2779_vm0, %v2519_v21, -inf  ;;  %3348 = vst.msk [vmem:[%s4201_s28 + $0xc0] sm:$0xff] %vm2779_vm0, %v3204_v27  ;;  %v3232_v41 = vmax.f32 %v3230_v30, %v3231_v23  ;;  %v3257_v45 = vsel %vm2779_vm0, %v2551_v26, -inf  ;;  %v3235_v46 = vsel %vm2779_vm0, %v2741_v29, -inf  ;;  %v2585_v17 = vld [vmem:[%s4116_s23 + $0x2f0] sm:$0xff]  ;;  %v2775_v26 = vld [vmem:[%s4116_s23 + $0x8e0] sm:$0xff] }
 0x1ae   : > { %v3219_v39 = vmax.f32 %v3217_v28, %v3218_v22  ;;  %v3245_v43 = vmax.f32 %v3243_v32, %v3244_v25  ;;  %v3248_v47 = vsel %vm2779_vm0, %v2678_v31, -inf  ;;  %v3258_v48 = vmax.f32 %v3256_v38, %v3257_v45  ;;  %v2680_v22 = vld [vmem:[%s4116_s23 + $0x5e8] sm:$0xff]  ;;  %v2617_v24 = vld [vmem:[%s4116_s23 + $0x3f0] sm:$0xff] }
 0x1af   : > { %v3259_v49 = vsel %vm2779_vm0, %v2583_v33, -inf  ;;  %v3234_v53 = vmax.f32 %v3232_v41, %v3233_v35  ;;  %v3261_v56 = vsel %vm2779_vm0, %v2615_v37, -inf  ;;  %v3237_v58 = vsel %vm2779_vm0, %v2773_v40, -inf  ;;  %v2712_v27 = vld [vmem:[%s4116_s23 + $0x6e8] sm:$0xff]  ;;  %v2649_v33 = vld [vmem:[%s4116_s23 + $0x4f0] sm:$0xff]  ;;  %v2554_v37 = vld [vmem:[%s4116_s23 + $0x1f8] sm:$0xff] }
 0x1b0   : > { %v3221_v52 = vmax.f32 %v3219_v39, %v3220_v34  ;;  %v3247_v55 = vmax.f32 %v3245_v43, %v3246_v36  ;;  %v3250_v59 = vsel %vm2779_vm0, %v2710_v42, -inf  ;;  %v3260_v61 = vmax.f32 %v3258_v48, %v3259_v49  ;;  %v2522_v36 = vld [vmem:[%s4116_s23 + $0xf8] sm:$0xff]  ;;  %v2744_v40 = vld [vmem:[%s4116_s23 + $0x7e8] sm:$0xff] }
 0x1b1   : > { %v3263_v62 = vsel %vm2779_vm0, %v2647_v44, -inf  ;;  %v3236_v0 = vmax.f32 %v3234_v53, %v3235_v46  ;;  %v3273_v5 = vsel %vm2779_vm0, %v2520_v50, -inf  ;;  %v3274_v3 = vsel %vm2779_vm0, %v2552_v51, -inf  ;;  %v2681_v46 = vld [vmem:[%s4116_s23 + $0x5f0] sm:$0xff]  ;;  %v2586_v48 = vld [vmem:[%s4116_s23 + $0x2f8] sm:$0xff] }
 0x1b2   : > { %3349 = vst.msk [vmem:[%s4201_s28 + $0xc8] sm:$0xff] %vm2779_vm0, %v3221_v52  ;;  %v3249_v2 = vmax.f32 %v3247_v55, %v3248_v47  ;;  %v3252_v6 = vsel %vm2779_vm0, %v2742_v54, -inf  ;;  %v3262_v7 = vmax.f32 %v3260_v61, %v3261_v56  ;;  %v3275_v9 = vmax.f32 %v3273_v5, %v3274_v3  ;;  %v2618_v49 = vld [vmem:[%s4116_s23 + $0x3f8] sm:$0xff]  ;;  %v2776_v55 = vld [vmem:[%s4116_s23 + $0x8e8] sm:$0xff] }
 0x1b3   : > { %v3276_v10 = vsel %vm2779_vm0, %v2584_v57, -inf  ;;  %v3238_v13 = vmax.f32 %v3236_v0, %v3237_v58  ;;  %v3265_v15 = vsel %vm2779_vm0, %v2679_v60, -inf  ;;  %v3278_v16 = vsel %vm2779_vm0, %v2616_v63, -inf  ;;  %v2713_v57 = vld [vmem:[%s4116_s23 + $0x6f0] sm:$0xff]  ;;  %v2682_v3 = vld [vmem:[%s4116_s23 + $0x5f8] sm:$0xff] }
 0x1b4   : > { %v3251_v14 = vmax.f32 %v3249_v2, %v3250_v59  ;;  %v3254_v18 = vsel %vm2779_vm0, %v2774_v1, -inf  ;;  %v3264_v20 = vmax.f32 %v3262_v7, %v3263_v62  ;;  %v3267_v21 = vsel %vm2779_vm0, %v2711_v4, -inf  ;;  %v2650_v59 = vld [vmem:[%s4116_s23 + $0x4f8] sm:$0xff]  ;;  %v2745_v4 = vld [vmem:[%s4116_s23 + $0x7f0] sm:$0xff] }
 0x1b5   : > { %v3277_v23 = vmax.f32 %v3275_v9, %v3276_v10  ;;  %3350 = vst.msk [vmem:[%s4201_s28 + $0xd0] sm:$0xff] %vm2779_vm0, %v3238_v13  ;;  %v3280_v28 = vsel %vm2779_vm0, %v2648_v8, -inf  ;;  %v3290_v29 = vsel %vm2779_vm0, %v2521_v11, -inf  ;;  %v3291_v30 = vsel %vm2779_vm0, %v2553_v12, -inf  ;;  %v2777_v11 = vld [vmem:[%s4116_s23 + $0x8f0] sm:$0xff]  ;;  %v2714_v13 = vld [vmem:[%s4116_s23 + $0x6f8] sm:$0xff] }
 0x1b6   : > { %v3253_v25 = vmax.f32 %v3251_v14, %v3252_v6  ;;  %v3266_v31 = vmax.f32 %v3264_v20, %v3265_v15  ;;  %v3292_v34 = vmax.f32 %v3290_v29, %v3291_v30  ;;  %v3293_v35 = vsel %vm2779_vm0, %v2585_v17, -inf }
 0x1b7   : > { %v3279_v32 = vmax.f32 %v3277_v23, %v3278_v16  ;;  %v3269_v39 = vsel %vm2779_vm0, %v2743_v19, -inf  ;;  %v3282_v41 = vsel %vm2779_vm0, %v2680_v22, -inf  ;;  %v3295_v42 = vsel %vm2779_vm0, %v2617_v24, -inf  ;;  %v2746_v19 = vld [vmem:[%s4116_s23 + $0x7f8] sm:$0xff] }
 0x1b8   : > { %v3255_v38 = vmax.f32 %v3253_v25, %v3254_v18  ;;  %v3268_v43 = vmax.f32 %v3266_v31, %v3267_v21  ;;  %v3271_v44 = vsel %vm2779_vm0, %v2775_v26, -inf  ;;  %v3294_v47 = vmax.f32 %v3292_v34, %v3293_v35  ;;  %v2778_v24 = vld [vmem:[%s4116_s23 + $0x8f8] sm:$0xff] }
 0x1b9   : > { %v3281_v45 = vmax.f32 %v3279_v32, %v3280_v28  ;;  %v3284_v50 = vsel %vm2779_vm0, %v2712_v27, -inf  ;;  %v3297_v51 = vsel %vm2779_vm0, %v2649_v33, -inf  ;;  %v3307_v52 = vsel %vm2779_vm0, %v2522_v36, -inf }
 0x1ba   : > { %3351 = vst.msk [vmem:[%s4201_s28 + $0xd8] sm:$0xff] %vm2779_vm0, %v3255_v38  ;;  %v3308_v53 = vsel %vm2779_vm0, %v2554_v37, -inf  ;;  %v3270_v54 = vmax.f32 %v3268_v43, %v3269_v39  ;;  %v3296_v58 = vmax.f32 %v3294_v47, %v3295_v42  ;;  %v3286_v61 = vsel %vm2779_vm0, %v2744_v40, -inf }
 0x1bb   : > { %v3283_v56 = vmax.f32 %v3281_v45, %v3282_v41  ;;  %v3309_v60 = vmax.f32 %v3307_v52, %v3308_v53  ;;  %v3299_v62 = vsel %vm2779_vm0, %v2681_v46, -inf  ;;  %v3310_v63 = vsel %vm2779_vm0, %v2586_v48, -inf }
 0x1bc   : > { %v3312_v0 = vsel %vm2779_vm0, %v2618_v49, -inf  ;;  %v3272_v1 = vmax.f32 %v3270_v54, %v3271_v44  ;;  %v3298_v5 = vmax.f32 %v3296_v58, %v3297_v51  ;;  %v3288_v7 = vsel %vm2779_vm0, %v2776_v55, -inf }
 0x1bd   : > { %v3285_v2 = vmax.f32 %v3283_v56, %v3284_v50  ;;  %v3311_v6 = vmax.f32 %v3309_v60, %v3310_v63  ;;  %v3301_v8 = vsel %vm2779_vm0, %v2713_v57, -inf  ;;  %v3314_v9 = vsel %vm2779_vm0, %v2650_v59, -inf }
 0x1be   : > { %3352 = vst.msk [vmem:[%s4201_s28 + $0xe0] sm:$0xff] %vm2779_vm0, %v3272_v1  ;;  %v3300_v12 = vmax.f32 %v3298_v5, %v3299_v62  ;;  %v3303_v15 = vsel %vm2779_vm0, %v2745_v4, -inf  ;;  %v3316_v16 = vsel %vm2779_vm0, %v2682_v3, -inf  ;;  %v3305_v21 = vsel %vm2779_vm0, %v2777_v11, -inf }
 0x1bf   : > { %v3287_v10 = vmax.f32 %v3285_v2, %v3286_v61  ;;  %v3313_v14 = vmax.f32 %v3311_v6, %v3312_v0  ;;  %v3318_v22 = vsel %vm2779_vm0, %v2714_v13, -inf  ;;  %v3320_v26 = vsel %vm2779_vm0, %v2746_v19, -inf }
 0x1c0   : > { %v3302_v18 = vmax.f32 %v3300_v12, %v3301_v8  ;;  %v3322_v29 = vsel %vm2779_vm0, %v2778_v24, -inf }
 0x1c1   : > { %v3289_v17 = vmax.f32 %v3287_v10, %v3288_v7  ;;  %v3315_v20 = vmax.f32 %v3313_v14, %v3314_v9 }
 0x1c2   : > { %v3304_v23 = vmax.f32 %v3302_v18, %v3303_v15 }
 0x1c3   : > { %3353 = vst.msk [vmem:[%s4201_s28 + $0xe8] sm:$0xff] %vm2779_vm0, %v3289_v17  ;;  %v3317_v25 = vmax.f32 %v3315_v20, %v3316_v16 }
 0x1c4   : > { %v3306_v27 = vmax.f32 %v3304_v23, %v3305_v21 }
 0x1c5   : > { %v3319_v28 = vmax.f32 %v3317_v25, %v3318_v22 }
 0x1c6   : > { %3354 = vst.msk [vmem:[%s4201_s28 + $0xf0] sm:$0xff] %vm2779_vm0, %v3306_v27 }
 0x1c7   : > { %v3321_v30 = vmax.f32 %v3319_v28, %v3320_v26 }
 0x1c9   : > { %v3323_v31 = vmax.f32 %v3321_v30, %v3322_v29 }
 0x1cb   : > { %3355 = vst.msk [vmem:[%s4201_s28 + $0xf8] sm:$0xff] %vm2779_vm0, %v3323_v31 }
 0x1cc PF: > { %p8_p9 = scmp.ge.s32.totalorder %s3516_s10, 4   ;;  %s4789_s6 = smov %s3483_s7 }
 0x1cd   : > { %s4790_s7 = smov %s3525_s13  ;;  %s4791_s8 = smov %s3516_s10 }
 0x1ce   :  { %10 = sbr.rel (!%p8_p9) target bundleno = 2 (0x2), region = 117 }

// kernel: swav_resnet_forward.33
= control target key start
LH: loop header
LB: loop body
LE: loop exit
PB: predicated region body
PF: predicated region fallthrough
CT: control target
= control target key end

     0   :  { %s1240_s15 = smov 0   ;;  %s1242_s16 = smov 0   ;;  %s1430_s0 = inlined_call_operand.vmem [shape: bf16[512,128], index: 0, kind: input, shape index: {}]   ;;  %s1431_s1 = inlined_call_operand.vmem [shape: bf16[128,128], index: 1, kind: input, shape index: {}]   ;;  %s1432_s2 = inlined_call_operand.vmem [shape: f32[1,128], index: 2, kind: input, shape index: {}]   ;;  %s1433_s3 = inlined_call_operand.vmem [shape: f32[1,128], index: 3, kind: input, shape index: {}]   ;;  %s1434_s4 = inlined_call_operand.vmem [shape: f32[512,128], index: 4, kind: output, shape index: {}]  }
   0x1   :  { %s1244_s17 = smov 0  }
   0x2 LB: > { %s33_s18 = sadd.s32 1, %s1209_s16  ;;  %p1014_p0 = scmp.ge.s32.totalorder %s1213_s17, 1  ;;  %s1213_s17 = sphi %s1244_s17, %s14_s17   ;;  %s1209_s16 = sphi %s1242_s16, %s1436_s16   ;;  %s1205_s15 = sphi %s1240_s15, %s1435_s15  }
   0x3   : > { %p35_p1 = scmp.ge.s32.totalorder %s33_s18, 2  ;;  %p221_p2 = scmp.lt.s32.totalorder %s1213_s17, 3 }
   0x5   : > { %s1438_s18 = smov (%p35_p1, %s33_s18), 0  ;;  %p222_p3 = pnand %p1014_p0, %p221_p2 }
   0x6   : > { %s1015_s27 = sshll.u32 (!%p222_p3), %s1205_s15, 5 }
   0x7   : > { %225 = sbr.rel (%p222_p3) target bundleno = 241 (0xf1), region = 36  ;;  %p268_p4 = scmp.lt.s32.totalorder (!%p222_p3), %s1015_s27, 63 }
   0xc   : > { %v1140_v0 = vld [vmem:[%s1431_s1 + $0x38] sm:$0xff]  ;;  %v1139_v1 = vld [vmem:[%s1431_s1 + $0x30] sm:$0xff]  ;;  %v1138_v2 = vld [vmem:[%s1431_s1 + $0x28] sm:$0xff]  ;;  %s1440_s27 = smov (!%p268_p4, %s1015_s27), 63 }
   0xd   : > { %560 = vmatpush.bf16.msra.mxu0 %v1140_v0  ;;  %1141 = vmatpush.bf16.msra.mxu1 %v1140_v0  ;;  %v1137_v3 = vld [vmem:[%s1431_s1 + $0x20] sm:$0xff]  ;;  %v1136_v4 = vld [vmem:[%s1431_s1 + $0x18] sm:$0xff]  ;;  %v1135_v5 = vld [vmem:[%s1431_s1 + $0x10] sm:$0xff]  ;;  %s1016_s8 = sshll.u32 %s1440_s27, 2  ;;  %s1018_s21 = sshll.u32 %s1440_s27, 3 }
   0xe   : > { %1142 = vmatpush.bf16.msra.mxu2 %v1140_v0  ;;  %1143 = vmatpush.bf16.msra.mxu3 %v1140_v0  ;;  %v1134_v6 = vld [vmem:[%s1431_s1 + $0x8] sm:$0xff]  ;;  %v1133_v7 = vld [vmem:[%s1431_s1] sm:$0xff]  ;;  %s1291_s13 = scalar_lea.vmem %s1430_s0, %s1016_s8  ;;  %s1327_s24 = scalar_lea.vmem %s1434_s4, %s1018_s21 }
   0xf   : > { %v1117_v8 = vld [vmem:[%s1291_s13] sm:$0xff]  ;;  %v1118_v12 = vld [vmem:[%s1291_s13 + $0x8] sm:$0xff]  ;;  %v1119_v16 = vld [vmem:[%s1291_s13 + $0x10] sm:$0xff] }
  0x10   : > { %v1121_v9 = vld [vmem:[%s1291_s13 + $0x20] sm:$0xff]  ;;  %v1122_v13 = vld [vmem:[%s1291_s13 + $0x28] sm:$0xff]  ;;  %v1123_v17 = vld [vmem:[%s1291_s13 + $0x30] sm:$0xff] }
  0x11   : > { %561 = vmatpush.bf16.msra.mxu0 %v1139_v1  ;;  %1144 = vmatpush.bf16.msra.mxu1 %v1139_v1  ;;  %v1125_v10 = vld [vmem:[%s1291_s13 + $0x40] sm:$0xff]  ;;  %v1126_v14 = vld [vmem:[%s1291_s13 + $0x48] sm:$0xff]  ;;  %v1127_v18 = vld [vmem:[%s1291_s13 + $0x50] sm:$0xff] }
  0x12   : > { %1145 = vmatpush.bf16.msra.mxu2 %v1139_v1  ;;  %1146 = vmatpush.bf16.msra.mxu3 %v1139_v1  ;;  %v1129_v11 = vld [vmem:[%s1291_s13 + $0x60] sm:$0xff]  ;;  %v1130_v15 = vld [vmem:[%s1291_s13 + $0x68] sm:$0xff]  ;;  %v1131_v19 = vld [vmem:[%s1291_s13 + $0x70] sm:$0xff] }
  0x13   : > { %v1120_v20 = vld [vmem:[%s1291_s13 + $0x18] sm:$0xff]  ;;  %v1312_v24 = vld [vmem:[%s1432_s2] ss:$0 sm:$0xff] }
  0x14   : > { %v1124_v21 = vld [vmem:[%s1291_s13 + $0x38] sm:$0xff]  ;;  %v1317_v25 = vld [vmem:[%s1433_s3] ss:$0 sm:$0xff] }
  0x15   : > { %562 = vmatpush.bf16.msra.mxu0 %v1138_v2  ;;  %1147 = vmatpush.bf16.msra.mxu1 %v1138_v2  ;;  %v1128_v22 = vld [vmem:[%s1291_s13 + $0x58] sm:$0xff] }
  0x16   : > { %1148 = vmatpush.bf16.msra.mxu2 %v1138_v2  ;;  %1149 = vmatpush.bf16.msra.mxu3 %v1138_v2  ;;  %v1132_v23 = vld [vmem:[%s1291_s13 + $0x78] sm:$0xff] }
  0x19   : > { %563 = vmatpush.bf16.msra.mxu0 %v1137_v3  ;;  %1150 = vmatpush.bf16.msra.mxu1 %v1137_v3 }
  0x1a   : > { %1151 = vmatpush.bf16.msra.mxu2 %v1137_v3  ;;  %1152 = vmatpush.bf16.msra.mxu3 %v1137_v3 }
  0x1d   : > { %564 = vmatpush.bf16.msra.mxu0 %v1136_v4  ;;  %1153 = vmatpush.bf16.msra.mxu1 %v1136_v4 }
  0x1e   : > { %1154 = vmatpush.bf16.msra.mxu2 %v1136_v4  ;;  %1155 = vmatpush.bf16.msra.mxu3 %v1136_v4 }
  0x21   : > { %565 = vmatpush.bf16.msra.mxu0 %v1135_v5  ;;  %1156 = vmatpush.bf16.msra.mxu1 %v1135_v5 }
  0x22   : > { %1157 = vmatpush.bf16.msra.mxu2 %v1135_v5  ;;  %1158 = vmatpush.bf16.msra.mxu3 %v1135_v5 }
  0x25   : > { %566 = vmatpush.bf16.msra.mxu0 %v1134_v6  ;;  %1159 = vmatpush.bf16.msra.mxu1 %v1134_v6 }
  0x26   : > { %1160 = vmatpush.bf16.msra.mxu2 %v1134_v6  ;;  %1161 = vmatpush.bf16.msra.mxu3 %v1134_v6 }
  0x29   : > { %567 = vmatpush.bf16.msra.mxu0 %v1133_v7  ;;  %1162 = vmatpush.bf16.msra.mxu1 %v1133_v7 }
  0x2a   : > { %1163 = vmatpush.bf16.msra.mxu2 %v1133_v7  ;;  %1164 = vmatpush.bf16.msra.mxu3 %v1133_v7 }
  0x2c   : > { %568 = vmatmul.bf16.vlgmr.msra.gmra.mxu0 %v1117_v8  ;;  %588 = vmatmul.bf16.vlgmr.msra.gmra.mxu1 %v1121_v9 }
  0x2d   : > { %608 = vmatmul.bf16.vlgmr.msra.gmra.mxu2 %v1125_v10  ;;  %628 = vmatmul.bf16.vlgmr.msra.gmra.mxu3 %v1129_v11 }
  0x3c   : > { %573 = vmatmul.bf16.gmra.mxu0 %v1118_v12  ;;  %593 = vmatmul.bf16.gmra.mxu1 %v1122_v13 }
  0x3d   : > { %613 = vmatmul.bf16.gmra.mxu2 %v1126_v14  ;;  %633 = vmatmul.bf16.gmra.mxu3 %v1130_v15 }
  0x4c   : > { %578 = vmatmul.bf16.gmra.mxu0 %v1119_v16  ;;  %598 = vmatmul.bf16.gmra.mxu1 %v1123_v17 }
  0x4d   : > { %618 = vmatmul.bf16.gmra.mxu2 %v1127_v18  ;;  %638 = vmatmul.bf16.gmra.mxu3 %v1131_v19 }
  0x5c   : > { %583 = vmatmul.bf16.gmra.mxu0 %v1120_v20  ;;  %603 = vmatmul.bf16.gmra.mxu1 %v1124_v21 }
  0x5d   : > { %623 = vmatmul.bf16.gmra.mxu2 %v1128_v22  ;;  %643 = vmatmul.bf16.gmra.mxu3 %v1132_v23 }
  0xa9   : > { %v569_v26 = vpop.f32.mrf.mxu0  ;;  %v589_v27 = vpop.f32.mrf.mxu1 }
  0xaa   : > { %v752_v28 = vmul.f32 %v1312_v24, %v569_v26  ;;  %v760_v29 = vmul.f32 %v1312_v24, %v589_v27 }
  0xac   : > { %v788_v30 = vadd.f32 %v1317_v25, %v752_v28  ;;  %v796_v31 = vadd.f32 %v1317_v25, %v760_v29 }
  0xae   : > { %v820_v32 = vmax.f32 %v788_v30, 0.0  ;;  %v828_v33 = vmax.f32 %v796_v31, 0.0 }
  0xb0   : > { %852 = vst [vmem:[%s1327_s24] sm:$0xff] %v820_v32  ;;  %v609_v34 = vpop.f32.mrf.mxu2  ;;  %v629_v35 = vpop.f32.mrf.mxu3 }
  0xb1   : > { %860 = vst [vmem:[%s1327_s24 + $0x40] sm:$0xff] %v828_v33  ;;  %v768_v36 = vmul.f32 %v1312_v24, %v609_v34  ;;  %v776_v37 = vmul.f32 %v1312_v24, %v629_v35  ;;  %v571_v38 = vpop.f32.mrf.mxu0  ;;  %v591_v39 = vpop.f32.mrf.mxu1 }
  0xb2   : > { %v753_v40 = vmul.f32 %v1312_v24, %v571_v38  ;;  %v761_v41 = vmul.f32 %v1312_v24, %v591_v39 }
  0xb3   : > { %v804_v42 = vadd.f32 %v1317_v25, %v768_v36  ;;  %v812_v43 = vadd.f32 %v1317_v25, %v776_v37 }
  0xb4   : > { %v789_v44 = vadd.f32 %v1317_v25, %v753_v40  ;;  %v797_v45 = vadd.f32 %v1317_v25, %v761_v41 }
  0xb5   : > { %v836_v46 = vmax.f32 %v804_v42, 0.0  ;;  %v844_v47 = vmax.f32 %v812_v43, 0.0 }
  0xb6   : > { %v821_v48 = vmax.f32 %v789_v44, 0.0  ;;  %v829_v49 = vmax.f32 %v797_v45, 0.0 }
  0xb7   : > { %868 = vst [vmem:[%s1327_s24 + $0x80] sm:$0xff] %v836_v46 }
  0xb8   : > { %876 = vst [vmem:[%s1327_s24 + $0xc0] sm:$0xff] %v844_v47  ;;  %v611_v50 = vpop.f32.mrf.mxu2  ;;  %v631_v51 = vpop.f32.mrf.mxu3 }
  0xb9   : > { %853 = vst [vmem:[%s1327_s24 + $0x8] sm:$0xff] %v821_v48  ;;  %v769_v52 = vmul.f32 %v1312_v24, %v611_v50  ;;  %v777_v53 = vmul.f32 %v1312_v24, %v631_v51  ;;  %v574_v54 = vpop.f32.mrf.mxu0  ;;  %v594_v55 = vpop.f32.mrf.mxu1 }
  0xba   : > { %861 = vst [vmem:[%s1327_s24 + $0x48] sm:$0xff] %v829_v49  ;;  %v754_v56 = vmul.f32 %v1312_v24, %v574_v54  ;;  %v762_v57 = vmul.f32 %v1312_v24, %v594_v55 }
  0xbb   : > { %v805_v58 = vadd.f32 %v1317_v25, %v769_v52  ;;  %v813_v59 = vadd.f32 %v1317_v25, %v777_v53 }
  0xbc   : > { %v790_v60 = vadd.f32 %v1317_v25, %v754_v56  ;;  %v798_v61 = vadd.f32 %v1317_v25, %v762_v57 }
  0xbd   : > { %v837_v62 = vmax.f32 %v805_v58, 0.0  ;;  %v845_v63 = vmax.f32 %v813_v59, 0.0 }
  0xbe   : > { %v822_v0 = vmax.f32 %v790_v60, 0.0  ;;  %v830_v1 = vmax.f32 %v798_v61, 0.0 }
  0xbf   : > { %869 = vst [vmem:[%s1327_s24 + $0x88] sm:$0xff] %v837_v62 }
  0xc0   : > { %877 = vst [vmem:[%s1327_s24 + $0xc8] sm:$0xff] %v845_v63  ;;  %v614_v2 = vpop.f32.mrf.mxu2  ;;  %v634_v3 = vpop.f32.mrf.mxu3 }
  0xc1   : > { %854 = vst [vmem:[%s1327_s24 + $0x10] sm:$0xff] %v822_v0  ;;  %v770_v4 = vmul.f32 %v1312_v24, %v614_v2  ;;  %v778_v5 = vmul.f32 %v1312_v24, %v634_v3  ;;  %v576_v6 = vpop.f32.mrf.mxu0  ;;  %v596_v7 = vpop.f32.mrf.mxu1 }
  0xc2   : > { %862 = vst [vmem:[%s1327_s24 + $0x50] sm:$0xff] %v830_v1  ;;  %v755_v8 = vmul.f32 %v1312_v24, %v576_v6  ;;  %v763_v9 = vmul.f32 %v1312_v24, %v596_v7 }
  0xc3   : > { %v806_v10 = vadd.f32 %v1317_v25, %v770_v4  ;;  %v814_v11 = vadd.f32 %v1317_v25, %v778_v5 }
  0xc4   : > { %v791_v12 = vadd.f32 %v1317_v25, %v755_v8  ;;  %v799_v13 = vadd.f32 %v1317_v25, %v763_v9 }
  0xc5   : > { %v838_v14 = vmax.f32 %v806_v10, 0.0  ;;  %v846_v15 = vmax.f32 %v814_v11, 0.0 }
  0xc6   : > { %v823_v16 = vmax.f32 %v791_v12, 0.0  ;;  %v831_v17 = vmax.f32 %v799_v13, 0.0 }
  0xc7   : > { %870 = vst [vmem:[%s1327_s24 + $0x90] sm:$0xff] %v838_v14 }
  0xc8   : > { %878 = vst [vmem:[%s1327_s24 + $0xd0] sm:$0xff] %v846_v15  ;;  %v616_v18 = vpop.f32.mrf.mxu2  ;;  %v636_v19 = vpop.f32.mrf.mxu3 }
  0xc9   : > { %855 = vst [vmem:[%s1327_s24 + $0x18] sm:$0xff] %v823_v16  ;;  %v771_v20 = vmul.f32 %v1312_v24, %v616_v18  ;;  %v779_v21 = vmul.f32 %v1312_v24, %v636_v19  ;;  %v579_v22 = vpop.f32.mrf.mxu0  ;;  %v599_v23 = vpop.f32.mrf.mxu1 }
  0xca   : > { %863 = vst [vmem:[%s1327_s24 + $0x58] sm:$0xff] %v831_v17  ;;  %v756_v26 = vmul.f32 %v1312_v24, %v579_v22  ;;  %v764_v27 = vmul.f32 %v1312_v24, %v599_v23 }
  0xcb   : > { %v807_v28 = vadd.f32 %v1317_v25, %v771_v20  ;;  %v815_v29 = vadd.f32 %v1317_v25, %v779_v21 }
  0xcc   : > { %v792_v30 = vadd.f32 %v1317_v25, %v756_v26  ;;  %v800_v31 = vadd.f32 %v1317_v25, %v764_v27 }
  0xcd   : > { %v839_v32 = vmax.f32 %v807_v28, 0.0  ;;  %v847_v33 = vmax.f32 %v815_v29, 0.0 }
  0xce   : > { %v824_v34 = vmax.f32 %v792_v30, 0.0  ;;  %v832_v35 = vmax.f32 %v800_v31, 0.0 }
  0xcf   : > { %871 = vst [vmem:[%s1327_s24 + $0x98] sm:$0xff] %v839_v32 }
  0xd0   : > { %879 = vst [vmem:[%s1327_s24 + $0xd8] sm:$0xff] %v847_v33  ;;  %v619_v36 = vpop.f32.mrf.mxu2  ;;  %v639_v37 = vpop.f32.mrf.mxu3 }
  0xd1   : > { %856 = vst [vmem:[%s1327_s24 + $0x20] sm:$0xff] %v824_v34  ;;  %v772_v38 = vmul.f32 %v1312_v24, %v619_v36  ;;  %v780_v39 = vmul.f32 %v1312_v24, %v639_v37  ;;  %v581_v40 = vpop.f32.mrf.mxu0  ;;  %v601_v41 = vpop.f32.mrf.mxu1 }
  0xd2   : > { %864 = vst [vmem:[%s1327_s24 + $0x60] sm:$0xff] %v832_v35  ;;  %v757_v42 = vmul.f32 %v1312_v24, %v581_v40  ;;  %v765_v43 = vmul.f32 %v1312_v24, %v601_v41 }
  0xd3   : > { %v808_v44 = vadd.f32 %v1317_v25, %v772_v38  ;;  %v816_v45 = vadd.f32 %v1317_v25, %v780_v39 }
  0xd4   : > { %v793_v46 = vadd.f32 %v1317_v25, %v757_v42  ;;  %v801_v47 = vadd.f32 %v1317_v25, %v765_v43 }
  0xd5   : > { %v840_v48 = vmax.f32 %v808_v44, 0.0  ;;  %v848_v49 = vmax.f32 %v816_v45, 0.0 }
  0xd6   : > { %v825_v50 = vmax.f32 %v793_v46, 0.0  ;;  %v833_v51 = vmax.f32 %v801_v47, 0.0 }
  0xd7   : > { %872 = vst [vmem:[%s1327_s24 + $0xa0] sm:$0xff] %v840_v48 }
  0xd8   : > { %880 = vst [vmem:[%s1327_s24 + $0xe0] sm:$0xff] %v848_v49  ;;  %v621_v52 = vpop.f32.mrf.mxu2  ;;  %v641_v53 = vpop.f32.mrf.mxu3 }
  0xd9   : > { %857 = vst [vmem:[%s1327_s24 + $0x28] sm:$0xff] %v825_v50  ;;  %v773_v54 = vmul.f32 %v1312_v24, %v621_v52  ;;  %v781_v55 = vmul.f32 %v1312_v24, %v641_v53  ;;  %v584_v56 = vpop.f32.mrf.mxu0  ;;  %v604_v57 = vpop.f32.mrf.mxu1 }
  0xda   : > { %865 = vst [vmem:[%s1327_s24 + $0x68] sm:$0xff] %v833_v51  ;;  %v758_v58 = vmul.f32 %v1312_v24, %v584_v56  ;;  %v766_v59 = vmul.f32 %v1312_v24, %v604_v57 }
  0xdb   : > { %v809_v60 = vadd.f32 %v1317_v25, %v773_v54  ;;  %v817_v61 = vadd.f32 %v1317_v25, %v781_v55 }
  0xdc   : > { %v794_v62 = vadd.f32 %v1317_v25, %v758_v58  ;;  %v802_v63 = vadd.f32 %v1317_v25, %v766_v59 }
  0xdd   : > { %v841_v0 = vmax.f32 %v809_v60, 0.0  ;;  %v849_v1 = vmax.f32 %v817_v61, 0.0 }
  0xde   : > { %v826_v2 = vmax.f32 %v794_v62, 0.0  ;;  %v834_v3 = vmax.f32 %v802_v63, 0.0 }
  0xdf   : > { %873 = vst [vmem:[%s1327_s24 + $0xa8] sm:$0xff] %v841_v0 }
  0xe0   : > { %881 = vst [vmem:[%s1327_s24 + $0xe8] sm:$0xff] %v849_v1  ;;  %v624_v4 = vpop.f32.mrf.mxu2  ;;  %v644_v5 = vpop.f32.mrf.mxu3 }
  0xe1   : > { %858 = vst [vmem:[%s1327_s24 + $0x30] sm:$0xff] %v826_v2  ;;  %v774_v6 = vmul.f32 %v1312_v24, %v624_v4  ;;  %v782_v7 = vmul.f32 %v1312_v24, %v644_v5  ;;  %v586_v8 = vpop.f32.mrf.mxu0  ;;  %v606_v9 = vpop.f32.mrf.mxu1 }
  0xe2   : > { %866 = vst [vmem:[%s1327_s24 + $0x70] sm:$0xff] %v834_v3  ;;  %v759_v10 = vmul.f32 %v1312_v24, %v586_v8  ;;  %v767_v11 = vmul.f32 %v1312_v24, %v606_v9 }
  0xe3   : > { %v810_v12 = vadd.f32 %v1317_v25, %v774_v6  ;;  %v818_v13 = vadd.f32 %v1317_v25, %v782_v7 }
  0xe4   : > { %v795_v14 = vadd.f32 %v1317_v25, %v759_v10  ;;  %v803_v15 = vadd.f32 %v1317_v25, %v767_v11 }
  0xe5   : > { %v842_v16 = vmax.f32 %v810_v12, 0.0  ;;  %v850_v17 = vmax.f32 %v818_v13, 0.0 }
  0xe6   : > { %v827_v18 = vmax.f32 %v795_v14, 0.0  ;;  %v835_v19 = vmax.f32 %v803_v15, 0.0 }
  0xe7   : > { %874 = vst [vmem:[%s1327_s24 + $0xb0] sm:$0xff] %v842_v16 }
  0xe8   : > { %882 = vst [vmem:[%s1327_s24 + $0xf0] sm:$0xff] %v850_v17  ;;  %v626_v20 = vpop.f32.mrf.mxu2  ;;  %v646_v21 = vpop.f32.mrf.mxu3 }
  0xe9   : > { %859 = vst [vmem:[%s1327_s24 + $0x38] sm:$0xff] %v827_v18  ;;  %v775_v22 = vmul.f32 %v1312_v24, %v626_v20  ;;  %v783_v23 = vmul.f32 %v1312_v24, %v646_v21 }
  0xea   : > { %867 = vst [vmem:[%s1327_s24 + $0x78] sm:$0xff] %v835_v19 }
  0xeb   : > { %v811_v26 = vadd.f32 %v1317_v25, %v775_v22  ;;  %v819_v27 = vadd.f32 %v1317_v25, %v783_v23 }
  0xed   : > { %v843_v28 = vmax.f32 %v811_v26, 0.0  ;;  %v851_v29 = vmax.f32 %v819_v27, 0.0 }
  0xef   : > { %875 = vst [vmem:[%s1327_s24 + $0xb8] sm:$0xff] %v843_v28 }
  0xf0   : > { %883 = vst [vmem:[%s1327_s24 + $0xf8] sm:$0xff] %v851_v29 }
  0xf1 PF: > { %s14_s17 = sadd.s32 1, %s1213_s17   ;;  %s1435_s15 = smov %s1209_s16 }
  0xf2   : > { %p11_p5 = scmp.ge.s32.totalorder %s14_s17, 4   ;;  %s1436_s16 = smov %s1438_s18 }
  0xf4   :  { %13 = sbr.rel (!%p11_p5) target bundleno = 2 (0x2), region = 83 }

// kernel: swav_resnet_forward.34
= control target key start
LH: loop header
LB: loop body
LE: loop exit
PB: predicated region body
PF: predicated region fallthrough
CT: control target
= control target key end

     0   :  { %s1582_s15 = smov 0   ;;  %s1584_s16 = smov 0   ;;  %s1847_s0 = inlined_call_operand.vmem [shape: bf16[512,256], index: 0, kind: input, shape index: {}]   ;;  %s1848_s1 = inlined_call_operand.vmem [shape: bf16[256,128], index: 1, kind: input, shape index: {}]   ;;  %s1849_s2 = inlined_call_operand.vmem [shape: f32[1,128], index: 2, kind: input, shape index: {}]   ;;  %s1850_s3 = inlined_call_operand.vmem [shape: f32[1,128], index: 3, kind: input, shape index: {}]   ;;  %s1851_s4 = inlined_call_operand.vmem [shape: f32[512,128], index: 4, kind: output, shape index: {}]  }
   0x1   :  { %s1586_s17 = smov 0  }
   0x2 LB: > { %s33_s18 = sadd.s32 1, %s1551_s16  ;;  %p1242_p0 = scmp.ge.s32.totalorder %s1555_s17, 1  ;;  %s1555_s17 = sphi %s1586_s17, %s14_s17   ;;  %s1551_s16 = sphi %s1584_s16, %s1853_s16   ;;  %s1547_s15 = sphi %s1582_s15, %s1852_s15  }
   0x3   : > { %p35_p1 = scmp.ge.s32.totalorder %s33_s18, 2  ;;  %p224_p2 = scmp.lt.s32.totalorder %s1555_s17, 3 }
   0x5   : > { %s1855_s18 = smov (%p35_p1, %s33_s18), 0  ;;  %p225_p3 = pnand %p1242_p0, %p224_p2 }
   0x6   : > { %s1243_s5 = sshll.u32 (!%p225_p3), %s1547_s15, 5 }
   0x7   : > { %228 = sbr.rel (%p225_p3) target bundleno = 306 (0x132), region = 36  ;;  %p274_p4 = scmp.lt.s32.totalorder (!%p225_p3), %s1243_s5, 63 }
   0xc   : > { %v1482_v0 = vld [vmem:[%s1848_s1 + $0x38] sm:$0xff]  ;;  %v1481_v2 = vld [vmem:[%s1848_s1 + $0x30] sm:$0xff]  ;;  %v1480_v4 = vld [vmem:[%s1848_s1 + $0x28] sm:$0xff]  ;;  %s1857_s5 = smov (!%p274_p4, %s1243_s5), 63 }
   0xd   : > { %v1490_v1 = vld [vmem:[%s1848_s1 + $0x78] sm:$0xff]  ;;  %696 = vmatpush.bf16.msra.mxu0 %v1482_v0  ;;  %1491 = vmatpush.bf16.msra.mxu2 %v1482_v0  ;;  %v1489_v3 = vld [vmem:[%s1848_s1 + $0x70] sm:$0xff]  ;;  %v1488_v5 = vld [vmem:[%s1848_s1 + $0x68] sm:$0xff]  ;;  %s1442_s21 = sshll.u32 %s1857_s5, 3 }
   0xe   : > { %785 = vmatpush.bf16.msra.mxu1 %v1490_v1  ;;  %1499 = vmatpush.bf16.msra.mxu3 %v1490_v1  ;;  %v1479_v6 = vld [vmem:[%s1848_s1 + $0x20] sm:$0xff]  ;;  %v1478_v8 = vld [vmem:[%s1848_s1 + $0x18] sm:$0xff]  ;;  %v1477_v10 = vld [vmem:[%s1848_s1 + $0x10] sm:$0xff]  ;;  %s1650_s26 = scalar_lea.vmem %s1847_s0, %s1442_s21  ;;  %s1742_s14 = scalar_lea.vmem %s1851_s4, %s1442_s21 }
   0xf   : > { %v1487_v7 = vld [vmem:[%s1848_s1 + $0x60] sm:$0xff]  ;;  %v1486_v9 = vld [vmem:[%s1848_s1 + $0x58] sm:$0xff]  ;;  %v1485_v11 = vld [vmem:[%s1848_s1 + $0x50] sm:$0xff] }
  0x10   : > { %v1476_v12 = vld [vmem:[%s1848_s1 + $0x8] sm:$0xff]  ;;  %v1475_v14 = vld [vmem:[%s1848_s1] sm:$0xff]  ;;  %v1258_v28 = vld [vmem:[%s1650_s26 + $0x10] sm:$0xf] }
  0x11   : > { %697 = vmatpush.bf16.msra.mxu0 %v1481_v2  ;;  %1492 = vmatpush.bf16.msra.mxu2 %v1481_v2  ;;  %v1484_v13 = vld [vmem:[%s1848_s1 + $0x48] sm:$0xff]  ;;  %v1483_v15 = vld [vmem:[%s1848_s1 + $0x40] sm:$0xff]  ;;  %v1446_v29 = vld [vmem:[%s1650_s26 + $0x14] sm:$0xf0] }
  0x12   : > { %786 = vmatpush.bf16.msra.mxu1 %v1489_v3  ;;  %1500 = vmatpush.bf16.msra.mxu3 %v1489_v3  ;;  %v1250_v16 = vld [vmem:[%s1650_s26] sm:$0xf]  ;;  %v1444_v17 = vld [vmem:[%s1650_s26 + $0x4] sm:$0xf0]  ;;  %v1443_v20 = vld [vmem:[%s1650_s26 + $0x4] sm:$0xf]  ;;  %v1259_v36 = vor.u32 %v1446_v29, %v1258_v28 }
  0x13   : > { %v1314_v18 = vld [vmem:[%s1650_s26 + $0x80] sm:$0xf]  ;;  %v1460_v19 = vld [vmem:[%s1650_s26 + $0x84] sm:$0xf0]  ;;  %v1252_v21 = vld [vmem:[%s1650_s26 + $0x8] sm:$0xf0]  ;;  %v1251_v24 = vor.u32 %v1444_v17, %v1250_v16 }
  0x14   : > { %v1459_v22 = vld [vmem:[%s1650_s26 + $0x84] sm:$0xf]  ;;  %v1316_v23 = vld [vmem:[%s1650_s26 + $0x88] sm:$0xf0]  ;;  %v1315_v25 = vor.u32 %v1460_v19, %v1314_v18  ;;  %v1255_v26 = vor.u32 %v1443_v20, %v1252_v21  ;;  %v1322_v30 = vld [vmem:[%s1650_s26 + $0x90] sm:$0xf] }
  0x15   : > { %698 = vmatpush.bf16.msra.mxu0 %v1480_v4  ;;  %1493 = vmatpush.bf16.msra.mxu2 %v1480_v4  ;;  %v1319_v27 = vor.u32 %v1459_v22, %v1316_v23  ;;  %v1462_v31 = vld [vmem:[%s1650_s26 + $0x94] sm:$0xf0]  ;;  %v1445_v32 = vld [vmem:[%s1650_s26 + $0x14] sm:$0xf]  ;;  %v1260_v33 = vld [vmem:[%s1650_s26 + $0x18] sm:$0xf0] }
  0x16   : > { %787 = vmatpush.bf16.msra.mxu1 %v1488_v5  ;;  %1501 = vmatpush.bf16.msra.mxu3 %v1488_v5  ;;  %v1461_v34 = vld [vmem:[%s1650_s26 + $0x94] sm:$0xf]  ;;  %v1324_v35 = vld [vmem:[%s1650_s26 + $0x98] sm:$0xf0]  ;;  %v1323_v37 = vor.u32 %v1462_v31, %v1322_v30  ;;  %v1263_v38 = vor.u32 %v1445_v32, %v1260_v33  ;;  %v1266_v40 = vld [vmem:[%s1650_s26 + $0x20] sm:$0xf] }
  0x17   : > { %v1327_v39 = vor.u32 %v1461_v34, %v1324_v35  ;;  %v1448_v41 = vld [vmem:[%s1650_s26 + $0x24] sm:$0xf0]  ;;  %v1330_v42 = vld [vmem:[%s1650_s26 + $0xa0] sm:$0xf]  ;;  %v1447_v44 = vld [vmem:[%s1650_s26 + $0x24] sm:$0xf] }
  0x18   : > { %v1464_v43 = vld [vmem:[%s1650_s26 + $0xa4] sm:$0xf0]  ;;  %v1268_v45 = vld [vmem:[%s1650_s26 + $0x28] sm:$0xf0]  ;;  %v1463_v46 = vld [vmem:[%s1650_s26 + $0xa4] sm:$0xf]  ;;  %v1267_v48 = vor.u32 %v1448_v41, %v1266_v40 }
  0x19   : > { %699 = vmatpush.bf16.msra.mxu0 %v1479_v6  ;;  %1494 = vmatpush.bf16.msra.mxu2 %v1479_v6  ;;  %v1332_v47 = vld [vmem:[%s1650_s26 + $0xa8] sm:$0xf0]  ;;  %v1331_v49 = vor.u32 %v1464_v43, %v1330_v42  ;;  %v1271_v50 = vor.u32 %v1447_v44, %v1268_v45  ;;  %v1274_v52 = vld [vmem:[%s1650_s26 + $0x30] sm:$0xf]  ;;  %v1450_v53 = vld [vmem:[%s1650_s26 + $0x34] sm:$0xf0] }
  0x1a   : > { %788 = vmatpush.bf16.msra.mxu1 %v1487_v7  ;;  %1502 = vmatpush.bf16.msra.mxu3 %v1487_v7  ;;  %v1335_v51 = vor.u32 %v1463_v46, %v1332_v47  ;;  %v1338_v54 = vld [vmem:[%s1650_s26 + $0xb0] sm:$0xf]  ;;  %v1466_v55 = vld [vmem:[%s1650_s26 + $0xb4] sm:$0xf0]  ;;  %v1449_v56 = vld [vmem:[%s1650_s26 + $0x34] sm:$0xf]  ;;  %v1275_v60 = vor.u32 %v1450_v53, %v1274_v52 }
  0x1b   : > { %v1276_v57 = vld [vmem:[%s1650_s26 + $0x38] sm:$0xf0]  ;;  %v1465_v58 = vld [vmem:[%s1650_s26 + $0xb4] sm:$0xf]  ;;  %v1339_v61 = vor.u32 %v1466_v55, %v1338_v54  ;;  %v1282_v0 = vld [vmem:[%s1650_s26 + $0x40] sm:$0xf] }
  0x1c   : > { %v1340_v59 = vld [vmem:[%s1650_s26 + $0xb8] sm:$0xf0]  ;;  %v1279_v62 = vor.u32 %v1449_v56, %v1276_v57  ;;  %v1452_v1 = vld [vmem:[%s1650_s26 + $0x44] sm:$0xf0]  ;;  %v1346_v2 = vld [vmem:[%s1650_s26 + $0xc0] sm:$0xf] }
  0x1d   : > { %700 = vmatpush.bf16.msra.mxu0 %v1478_v8  ;;  %1495 = vmatpush.bf16.msra.mxu2 %v1478_v8  ;;  %v1343_v63 = vor.u32 %v1465_v58, %v1340_v59  ;;  %v1468_v3 = vld [vmem:[%s1650_s26 + $0xc4] sm:$0xf0]  ;;  %v1451_v4 = vld [vmem:[%s1650_s26 + $0x44] sm:$0xf]  ;;  %v1284_v5 = vld [vmem:[%s1650_s26 + $0x48] sm:$0xf0]  ;;  %v1283_v8 = vor.u32 %v1452_v1, %v1282_v0 }
  0x1e   : > { %789 = vmatpush.bf16.msra.mxu1 %v1486_v9  ;;  %1503 = vmatpush.bf16.msra.mxu3 %v1486_v9  ;;  %v1467_v6 = vld [vmem:[%s1650_s26 + $0xc4] sm:$0xf]  ;;  %v1348_v7 = vld [vmem:[%s1650_s26 + $0xc8] sm:$0xf0]  ;;  %v1347_v9 = vor.u32 %v1468_v3, %v1346_v2  ;;  %v1453_v16 = vld [vmem:[%s1650_s26 + $0x54] sm:$0xf] }
  0x1f   : > { %v1292_v17 = vld [vmem:[%s1650_s26 + $0x58] sm:$0xf0]  ;;  %v1469_v18 = vld [vmem:[%s1650_s26 + $0xd4] sm:$0xf]  ;;  %v1455_v28 = vld [vmem:[%s1650_s26 + $0x64] sm:$0xf] }
  0x20   : > { %v1356_v19 = vld [vmem:[%s1650_s26 + $0xd8] sm:$0xf0]  ;;  %v1295_v22 = vor.u32 %v1453_v16, %v1292_v17  ;;  %v1300_v29 = vld [vmem:[%s1650_s26 + $0x68] sm:$0xf0]  ;;  %v1471_v30 = vld [vmem:[%s1650_s26 + $0xe4] sm:$0xf] }
  0x21   : > { %701 = vmatpush.bf16.msra.mxu0 %v1477_v10  ;;  %1496 = vmatpush.bf16.msra.mxu2 %v1477_v10  ;;  %v1287_v10 = vor.u32 %v1451_v4, %v1284_v5  ;;  %v1359_v23 = vor.u32 %v1469_v18, %v1356_v19  ;;  %v1364_v31 = vld [vmem:[%s1650_s26 + $0xe8] sm:$0xf0]  ;;  %v1303_v34 = vor.u32 %v1455_v28, %v1300_v29  ;;  %v1457_v40 = vld [vmem:[%s1650_s26 + $0x74] sm:$0xf]  ;;  %v1308_v41 = vld [vmem:[%s1650_s26 + $0x78] sm:$0xf0] }
  0x22   : > { %790 = vmatpush.bf16.msra.mxu1 %v1485_v11  ;;  %1504 = vmatpush.bf16.msra.mxu3 %v1485_v11  ;;  %v1351_v11 = vor.u32 %v1467_v6, %v1348_v7  ;;  %v1367_v35 = vor.u32 %v1471_v30, %v1364_v31  ;;  %v1473_v42 = vld [vmem:[%s1650_s26 + $0xf4] sm:$0xf]  ;;  %v1372_v43 = vld [vmem:[%s1650_s26 + $0xf8] sm:$0xf0]  ;;  %v1311_v46 = vor.u32 %v1457_v40, %v1308_v41  ;;  %v1733_v52 = vld [vmem:[%s1850_s3] ss:$0 sm:$0xff] }
  0x23   : > { %v1375_v47 = vor.u32 %v1473_v42, %v1372_v43 }
  0x25   : > { %702 = vmatpush.bf16.msra.mxu0 %v1476_v12  ;;  %1497 = vmatpush.bf16.msra.mxu2 %v1476_v12  ;;  %v1290_v12 = vld [vmem:[%s1650_s26 + $0x50] sm:$0xf] }
  0x26   : > { %791 = vmatpush.bf16.msra.mxu1 %v1484_v13  ;;  %1505 = vmatpush.bf16.msra.mxu3 %v1484_v13  ;;  %v1454_v13 = vld [vmem:[%s1650_s26 + $0x54] sm:$0xf0] }
  0x27   : > { %v1291_v20 = vor.u32 %v1454_v13, %v1290_v12 }
  0x29   : > { %703 = vmatpush.bf16.msra.mxu0 %v1475_v14  ;;  %1498 = vmatpush.bf16.msra.mxu2 %v1475_v14  ;;  %v1354_v14 = vld [vmem:[%s1650_s26 + $0xd0] sm:$0xf] }
  0x2a   : > { %792 = vmatpush.bf16.msra.mxu1 %v1483_v15  ;;  %1506 = vmatpush.bf16.msra.mxu3 %v1483_v15  ;;  %v1470_v15 = vld [vmem:[%s1650_s26 + $0xd4] sm:$0xf0] }
  0x2b   : > { %v1355_v21 = vor.u32 %v1470_v15, %v1354_v14 }
  0x2c   : > { %704 = vmatmul.bf16.vlgmr.msra.gmra.mxu0 %v1251_v24  ;;  %744 = vmatmul.bf16.vlgmr.msra.gmra.mxu2 %v1315_v25  ;;  %v1298_v24 = vld [vmem:[%s1650_s26 + $0x60] sm:$0xf]  ;;  %v1456_v25 = vld [vmem:[%s1650_s26 + $0x64] sm:$0xf0] }
  0x2d   : > { %793 = vmatmul.bf16.vlgmr.msra.gmra.mxu1 %v1255_v26  ;;  %833 = vmatmul.bf16.vlgmr.msra.gmra.mxu3 %v1319_v27  ;;  %v1362_v26 = vld [vmem:[%s1650_s26 + $0xe0] sm:$0xf]  ;;  %v1472_v27 = vld [vmem:[%s1650_s26 + $0xe4] sm:$0xf0]  ;;  %v1299_v32 = vor.u32 %v1456_v25, %v1298_v24 }
  0x2e   : > { %v1363_v33 = vor.u32 %v1472_v27, %v1362_v26 }
  0x3c   : > { %709 = vmatmul.bf16.gmra.mxu0 %v1259_v36  ;;  %749 = vmatmul.bf16.gmra.mxu2 %v1323_v37  ;;  %v1306_v36 = vld [vmem:[%s1650_s26 + $0x70] sm:$0xf]  ;;  %v1458_v37 = vld [vmem:[%s1650_s26 + $0x74] sm:$0xf0] }
  0x3d   : > { %798 = vmatmul.bf16.gmra.mxu1 %v1263_v38  ;;  %838 = vmatmul.bf16.gmra.mxu3 %v1327_v39  ;;  %v1370_v38 = vld [vmem:[%s1650_s26 + $0xf0] sm:$0xf]  ;;  %v1474_v39 = vld [vmem:[%s1650_s26 + $0xf4] sm:$0xf0]  ;;  %v1307_v44 = vor.u32 %v1458_v37, %v1306_v36 }
  0x3e   : > { %v1371_v45 = vor.u32 %v1474_v39, %v1370_v38 }
  0x4c   : > { %714 = vmatmul.bf16.gmra.mxu0 %v1267_v48  ;;  %754 = vmatmul.bf16.gmra.mxu2 %v1331_v49  ;;  %v1728_v49 = vld [vmem:[%s1849_s2] ss:$0 sm:$0xff] }
  0x4d   : > { %803 = vmatmul.bf16.gmra.mxu1 %v1271_v50  ;;  %843 = vmatmul.bf16.gmra.mxu3 %v1335_v51 }
  0x5c   : > { %719 = vmatmul.bf16.gmra.mxu0 %v1275_v60  ;;  %759 = vmatmul.bf16.gmra.mxu2 %v1339_v61 }
  0x5d   : > { %808 = vmatmul.bf16.gmra.mxu1 %v1279_v62  ;;  %848 = vmatmul.bf16.gmra.mxu3 %v1343_v63 }
  0x6c   : > { %724 = vmatmul.bf16.gmra.mxu0 %v1283_v8  ;;  %764 = vmatmul.bf16.gmra.mxu2 %v1347_v9 }
  0x6d   : > { %813 = vmatmul.bf16.gmra.mxu1 %v1287_v10  ;;  %853 = vmatmul.bf16.gmra.mxu3 %v1351_v11 }
  0x7c   : > { %729 = vmatmul.bf16.gmra.mxu0 %v1291_v20  ;;  %769 = vmatmul.bf16.gmra.mxu2 %v1355_v21 }
  0x7d   : > { %818 = vmatmul.bf16.gmra.mxu1 %v1295_v22  ;;  %858 = vmatmul.bf16.gmra.mxu3 %v1359_v23 }
  0x8c   : > { %734 = vmatmul.bf16.gmra.mxu0 %v1299_v32  ;;  %774 = vmatmul.bf16.gmra.mxu2 %v1363_v33 }
  0x8d   : > { %823 = vmatmul.bf16.gmra.mxu1 %v1303_v34  ;;  %863 = vmatmul.bf16.gmra.mxu3 %v1367_v35 }
  0x9c   : > { %739 = vmatmul.bf16.gmra.mxu0 %v1307_v44  ;;  %779 = vmatmul.bf16.gmra.mxu2 %v1371_v45 }
  0x9d   : > { %828 = vmatmul.bf16.gmra.mxu1 %v1311_v46  ;;  %868 = vmatmul.bf16.gmra.mxu3 %v1375_v47 }
  0xa9   : > { %v705_v48 = vpop.f32.mrf.mxu0 }
  0xaa   : > { %v794_v50 = vpop.f32.mrf.mxu1 }
  0xab   : > { %v795_v51 = vadd.f32 %v794_v50, %v705_v48 }
  0xad   : > { %v977_v53 = vmul.f32 %v1728_v49, %v795_v51 }
  0xaf   : > { %v1013_v54 = vadd.f32 %v1733_v52, %v977_v53  ;;  %v745_v55 = vpop.f32.mrf.mxu2 }
  0xb0   : > { %v834_v56 = vpop.f32.mrf.mxu3 }
  0xb1   : > { %v1045_v57 = vmax.f32 %v1013_v54, 0.0  ;;  %v835_v58 = vadd.f32 %v834_v56, %v745_v55  ;;  %v707_v59 = vpop.f32.mrf.mxu0 }
  0xb2   : > { %v796_v60 = vpop.f32.mrf.mxu1 }
  0xb3   : > { %1077 = vst [vmem:[%s1742_s14] sm:$0xff] %v1045_v57  ;;  %v993_v61 = vmul.f32 %v1728_v49, %v835_v58  ;;  %v797_v62 = vadd.f32 %v796_v60, %v707_v59 }
  0xb5   : > { %v1029_v63 = vadd.f32 %v1733_v52, %v993_v61  ;;  %v978_v0 = vmul.f32 %v1728_v49, %v797_v62 }
  0xb7   : > { %v1061_v1 = vmax.f32 %v1029_v63, 0.0  ;;  %v1014_v2 = vadd.f32 %v1733_v52, %v978_v0  ;;  %v747_v3 = vpop.f32.mrf.mxu2 }
  0xb8   : > { %v836_v4 = vpop.f32.mrf.mxu3 }
  0xb9   : > { %1093 = vst [vmem:[%s1742_s14 + $0x80] sm:$0xff] %v1061_v1  ;;  %v1046_v5 = vmax.f32 %v1014_v2, 0.0  ;;  %v837_v6 = vadd.f32 %v836_v4, %v747_v3  ;;  %v710_v7 = vpop.f32.mrf.mxu0 }
  0xba   : > { %v799_v8 = vpop.f32.mrf.mxu1 }
  0xbb   : > { %1078 = vst [vmem:[%s1742_s14 + $0x8] sm:$0xff] %v1046_v5  ;;  %v994_v9 = vmul.f32 %v1728_v49, %v837_v6  ;;  %v800_v10 = vadd.f32 %v799_v8, %v710_v7 }
  0xbd   : > { %v1030_v11 = vadd.f32 %v1733_v52, %v994_v9  ;;  %v979_v12 = vmul.f32 %v1728_v49, %v800_v10 }
  0xbf   : > { %v1062_v13 = vmax.f32 %v1030_v11, 0.0  ;;  %v1015_v14 = vadd.f32 %v1733_v52, %v979_v12  ;;  %v750_v15 = vpop.f32.mrf.mxu2 }
  0xc0   : > { %v839_v16 = vpop.f32.mrf.mxu3 }
  0xc1   : > { %1094 = vst [vmem:[%s1742_s14 + $0x88] sm:$0xff] %v1062_v13  ;;  %v1047_v17 = vmax.f32 %v1015_v14, 0.0  ;;  %v840_v18 = vadd.f32 %v839_v16, %v750_v15  ;;  %v712_v19 = vpop.f32.mrf.mxu0 }
  0xc2   : > { %v801_v20 = vpop.f32.mrf.mxu1 }
  0xc3   : > { %1079 = vst [vmem:[%s1742_s14 + $0x10] sm:$0xff] %v1047_v17  ;;  %v995_v21 = vmul.f32 %v1728_v49, %v840_v18  ;;  %v802_v22 = vadd.f32 %v801_v20, %v712_v19 }
  0xc5   : > { %v1031_v23 = vadd.f32 %v1733_v52, %v995_v21  ;;  %v980_v24 = vmul.f32 %v1728_v49, %v802_v22 }
  0xc7   : > { %v1063_v25 = vmax.f32 %v1031_v23, 0.0  ;;  %v1016_v26 = vadd.f32 %v1733_v52, %v980_v24  ;;  %v752_v27 = vpop.f32.mrf.mxu2 }
  0xc8   : > { %v841_v28 = vpop.f32.mrf.mxu3 }
  0xc9   : > { %1095 = vst [vmem:[%s1742_s14 + $0x90] sm:$0xff] %v1063_v25  ;;  %v1048_v29 = vmax.f32 %v1016_v26, 0.0  ;;  %v842_v30 = vadd.f32 %v841_v28, %v752_v27  ;;  %v715_v31 = vpop.f32.mrf.mxu0 }
  0xca   : > { %v804_v32 = vpop.f32.mrf.mxu1 }
  0xcb   : > { %1080 = vst [vmem:[%s1742_s14 + $0x18] sm:$0xff] %v1048_v29  ;;  %v996_v33 = vmul.f32 %v1728_v49, %v842_v30  ;;  %v805_v34 = vadd.f32 %v804_v32, %v715_v31 }
  0xcd   : > { %v1032_v35 = vadd.f32 %v1733_v52, %v996_v33  ;;  %v981_v36 = vmul.f32 %v1728_v49, %v805_v34 }
  0xcf   : > { %v1064_v37 = vmax.f32 %v1032_v35, 0.0  ;;  %v1017_v38 = vadd.f32 %v1733_v52, %v981_v36  ;;  %v755_v39 = vpop.f32.mrf.mxu2 }
  0xd0   : > { %v844_v40 = vpop.f32.mrf.mxu3 }
  0xd1   : > { %1096 = vst [vmem:[%s1742_s14 + $0x98] sm:$0xff] %v1064_v37  ;;  %v1049_v41 = vmax.f32 %v1017_v38, 0.0  ;;  %v845_v42 = vadd.f32 %v844_v40, %v755_v39  ;;  %v717_v43 = vpop.f32.mrf.mxu0 }
  0xd2   : > { %v806_v44 = vpop.f32.mrf.mxu1 }
  0xd3   : > { %1081 = vst [vmem:[%s1742_s14 + $0x20] sm:$0xff] %v1049_v41  ;;  %v997_v45 = vmul.f32 %v1728_v49, %v845_v42  ;;  %v807_v46 = vadd.f32 %v806_v44, %v717_v43 }
  0xd5   : > { %v1033_v47 = vadd.f32 %v1733_v52, %v997_v45  ;;  %v982_v48 = vmul.f32 %v1728_v49, %v807_v46 }
  0xd7   : > { %v1065_v50 = vmax.f32 %v1033_v47, 0.0  ;;  %v1018_v51 = vadd.f32 %v1733_v52, %v982_v48  ;;  %v757_v53 = vpop.f32.mrf.mxu2 }
  0xd8   : > { %v846_v54 = vpop.f32.mrf.mxu3 }
  0xd9   : > { %1097 = vst [vmem:[%s1742_s14 + $0xa0] sm:$0xff] %v1065_v50  ;;  %v1050_v55 = vmax.f32 %v1018_v51, 0.0  ;;  %v847_v56 = vadd.f32 %v846_v54, %v757_v53  ;;  %v720_v57 = vpop.f32.mrf.mxu0 }
  0xda   : > { %v809_v58 = vpop.f32.mrf.mxu1 }
  0xdb   : > { %1082 = vst [vmem:[%s1742_s14 + $0x28] sm:$0xff] %v1050_v55  ;;  %v998_v59 = vmul.f32 %v1728_v49, %v847_v56  ;;  %v810_v60 = vadd.f32 %v809_v58, %v720_v57 }
  0xdd   : > { %v1034_v61 = vadd.f32 %v1733_v52, %v998_v59  ;;  %v983_v62 = vmul.f32 %v1728_v49, %v810_v60 }
  0xdf   : > { %v1066_v63 = vmax.f32 %v1034_v61, 0.0  ;;  %v1019_v0 = vadd.f32 %v1733_v52, %v983_v62  ;;  %v760_v1 = vpop.f32.mrf.mxu2 }
  0xe0   : > { %v849_v2 = vpop.f32.mrf.mxu3 }
  0xe1   : > { %1098 = vst [vmem:[%s1742_s14 + $0xa8] sm:$0xff] %v1066_v63  ;;  %v1051_v3 = vmax.f32 %v1019_v0, 0.0  ;;  %v850_v4 = vadd.f32 %v849_v2, %v760_v1  ;;  %v722_v5 = vpop.f32.mrf.mxu0 }
  0xe2   : > { %v811_v6 = vpop.f32.mrf.mxu1 }
  0xe3   : > { %1083 = vst [vmem:[%s1742_s14 + $0x30] sm:$0xff] %v1051_v3  ;;  %v999_v7 = vmul.f32 %v1728_v49, %v850_v4  ;;  %v812_v8 = vadd.f32 %v811_v6, %v722_v5 }
  0xe5   : > { %v1035_v9 = vadd.f32 %v1733_v52, %v999_v7  ;;  %v984_v10 = vmul.f32 %v1728_v49, %v812_v8 }
  0xe7   : > { %v1067_v11 = vmax.f32 %v1035_v9, 0.0  ;;  %v1020_v12 = vadd.f32 %v1733_v52, %v984_v10  ;;  %v762_v13 = vpop.f32.mrf.mxu2 }
  0xe8   : > { %v851_v14 = vpop.f32.mrf.mxu3 }
  0xe9   : > { %1099 = vst [vmem:[%s1742_s14 + $0xb0] sm:$0xff] %v1067_v11  ;;  %v1052_v15 = vmax.f32 %v1020_v12, 0.0  ;;  %v852_v16 = vadd.f32 %v851_v14, %v762_v13  ;;  %v725_v17 = vpop.f32.mrf.mxu0 }
  0xea   : > { %v814_v18 = vpop.f32.mrf.mxu1 }
  0xeb   : > { %1084 = vst [vmem:[%s1742_s14 + $0x38] sm:$0xff] %v1052_v15  ;;  %v1000_v19 = vmul.f32 %v1728_v49, %v852_v16  ;;  %v815_v20 = vadd.f32 %v814_v18, %v725_v17 }
  0xed   : > { %v1036_v21 = vadd.f32 %v1733_v52, %v1000_v19  ;;  %v985_v22 = vmul.f32 %v1728_v49, %v815_v20 }
  0xef   : > { %v1068_v23 = vmax.f32 %v1036_v21, 0.0  ;;  %v1021_v24 = vadd.f32 %v1733_v52, %v985_v22  ;;  %v765_v25 = vpop.f32.mrf.mxu2 }
  0xf0   : > { %v854_v26 = vpop.f32.mrf.mxu3 }
  0xf1   : > { %1100 = vst [vmem:[%s1742_s14 + $0xb8] sm:$0xff] %v1068_v23  ;;  %v1053_v27 = vmax.f32 %v1021_v24, 0.0  ;;  %v855_v28 = vadd.f32 %v854_v26, %v765_v25  ;;  %v727_v29 = vpop.f32.mrf.mxu0 }
  0xf2   : > { %v816_v30 = vpop.f32.mrf.mxu1 }
  0xf3   : > { %1085 = vst [vmem:[%s1742_s14 + $0x40] sm:$0xff] %v1053_v27  ;;  %v1001_v31 = vmul.f32 %v1728_v49, %v855_v28  ;;  %v817_v32 = vadd.f32 %v816_v30, %v727_v29 }
  0xf5   : > { %v1037_v33 = vadd.f32 %v1733_v52, %v1001_v31  ;;  %v986_v34 = vmul.f32 %v1728_v49, %v817_v32 }
  0xf7   : > { %v1069_v35 = vmax.f32 %v1037_v33, 0.0  ;;  %v1022_v36 = vadd.f32 %v1733_v52, %v986_v34  ;;  %v767_v37 = vpop.f32.mrf.mxu2 }
  0xf8   : > { %v856_v38 = vpop.f32.mrf.mxu3 }
  0xf9   : > { %1101 = vst [vmem:[%s1742_s14 + $0xc0] sm:$0xff] %v1069_v35  ;;  %v1054_v39 = vmax.f32 %v1022_v36, 0.0  ;;  %v857_v40 = vadd.f32 %v856_v38, %v767_v37  ;;  %v730_v41 = vpop.f32.mrf.mxu0 }
  0xfa   : > { %v819_v42 = vpop.f32.mrf.mxu1 }
  0xfb   : > { %1086 = vst [vmem:[%s1742_s14 + $0x48] sm:$0xff] %v1054_v39  ;;  %v1002_v43 = vmul.f32 %v1728_v49, %v857_v40  ;;  %v820_v44 = vadd.f32 %v819_v42, %v730_v41 }
  0xfd   : > { %v1038_v45 = vadd.f32 %v1733_v52, %v1002_v43  ;;  %v987_v46 = vmul.f32 %v1728_v49, %v820_v44 }
  0xff   : > { %v1070_v47 = vmax.f32 %v1038_v45, 0.0  ;;  %v1023_v48 = vadd.f32 %v1733_v52, %v987_v46  ;;  %v770_v50 = vpop.f32.mrf.mxu2 }
 0x100   : > { %v859_v51 = vpop.f32.mrf.mxu3 }
 0x101   : > { %1102 = vst [vmem:[%s1742_s14 + $0xc8] sm:$0xff] %v1070_v47  ;;  %v1055_v53 = vmax.f32 %v1023_v48, 0.0  ;;  %v860_v54 = vadd.f32 %v859_v51, %v770_v50  ;;  %v732_v55 = vpop.f32.mrf.mxu0 }
 0x102   : > { %v821_v56 = vpop.f32.mrf.mxu1 }
 0x103   : > { %1087 = vst [vmem:[%s1742_s14 + $0x50] sm:$0xff] %v1055_v53  ;;  %v1003_v57 = vmul.f32 %v1728_v49, %v860_v54  ;;  %v822_v58 = vadd.f32 %v821_v56, %v732_v55 }
 0x105   : > { %v1039_v59 = vadd.f32 %v1733_v52, %v1003_v57  ;;  %v988_v60 = vmul.f32 %v1728_v49, %v822_v58 }
 0x107   : > { %v1071_v61 = vmax.f32 %v1039_v59, 0.0  ;;  %v1024_v62 = vadd.f32 %v1733_v52, %v988_v60  ;;  %v772_v63 = vpop.f32.mrf.mxu2 }
 0x108   : > { %v861_v0 = vpop.f32.mrf.mxu3 }
 0x109   : > { %1103 = vst [vmem:[%s1742_s14 + $0xd0] sm:$0xff] %v1071_v61  ;;  %v1056_v1 = vmax.f32 %v1024_v62, 0.0  ;;  %v862_v2 = vadd.f32 %v861_v0, %v772_v63  ;;  %v735_v3 = vpop.f32.mrf.mxu0 }
 0x10a   : > { %v824_v4 = vpop.f32.mrf.mxu1 }
 0x10b   : > { %1088 = vst [vmem:[%s1742_s14 + $0x58] sm:$0xff] %v1056_v1  ;;  %v1004_v5 = vmul.f32 %v1728_v49, %v862_v2  ;;  %v825_v6 = vadd.f32 %v824_v4, %v735_v3 }
 0x10d   : > { %v1040_v7 = vadd.f32 %v1733_v52, %v1004_v5  ;;  %v989_v8 = vmul.f32 %v1728_v49, %v825_v6 }
 0x10f   : > { %v1072_v9 = vmax.f32 %v1040_v7, 0.0  ;;  %v1025_v10 = vadd.f32 %v1733_v52, %v989_v8  ;;  %v775_v11 = vpop.f32.mrf.mxu2 }
 0x110   : > { %v864_v12 = vpop.f32.mrf.mxu3 }
 0x111   : > { %1104 = vst [vmem:[%s1742_s14 + $0xd8] sm:$0xff] %v1072_v9  ;;  %v1057_v13 = vmax.f32 %v1025_v10, 0.0  ;;  %v865_v14 = vadd.f32 %v864_v12, %v775_v11  ;;  %v737_v15 = vpop.f32.mrf.mxu0 }
 0x112   : > { %v826_v16 = vpop.f32.mrf.mxu1 }
 0x113   : > { %1089 = vst [vmem:[%s1742_s14 + $0x60] sm:$0xff] %v1057_v13  ;;  %v1005_v17 = vmul.f32 %v1728_v49, %v865_v14  ;;  %v827_v18 = vadd.f32 %v826_v16, %v737_v15 }
 0x115   : > { %v1041_v19 = vadd.f32 %v1733_v52, %v1005_v17  ;;  %v990_v20 = vmul.f32 %v1728_v49, %v827_v18 }
 0x117   : > { %v1073_v21 = vmax.f32 %v1041_v19, 0.0  ;;  %v1026_v22 = vadd.f32 %v1733_v52, %v990_v20  ;;  %v777_v23 = vpop.f32.mrf.mxu2 }
 0x118   : > { %v866_v24 = vpop.f32.mrf.mxu3 }
 0x119   : > { %1105 = vst [vmem:[%s1742_s14 + $0xe0] sm:$0xff] %v1073_v21  ;;  %v1058_v25 = vmax.f32 %v1026_v22, 0.0  ;;  %v867_v26 = vadd.f32 %v866_v24, %v777_v23  ;;  %v740_v27 = vpop.f32.mrf.mxu0 }
 0x11a   : > { %v829_v28 = vpop.f32.mrf.mxu1 }
 0x11b   : > { %1090 = vst [vmem:[%s1742_s14 + $0x68] sm:$0xff] %v1058_v25  ;;  %v1006_v29 = vmul.f32 %v1728_v49, %v867_v26  ;;  %v830_v30 = vadd.f32 %v829_v28, %v740_v27 }
 0x11d   : > { %v1042_v31 = vadd.f32 %v1733_v52, %v1006_v29  ;;  %v991_v32 = vmul.f32 %v1728_v49, %v830_v30 }
 0x11f   : > { %v1074_v33 = vmax.f32 %v1042_v31, 0.0  ;;  %v1027_v34 = vadd.f32 %v1733_v52, %v991_v32  ;;  %v780_v35 = vpop.f32.mrf.mxu2 }
 0x120   : > { %v869_v36 = vpop.f32.mrf.mxu3 }
 0x121   : > { %1106 = vst [vmem:[%s1742_s14 + $0xe8] sm:$0xff] %v1074_v33  ;;  %v1059_v37 = vmax.f32 %v1027_v34, 0.0  ;;  %v870_v38 = vadd.f32 %v869_v36, %v780_v35  ;;  %v742_v39 = vpop.f32.mrf.mxu0 }
 0x122   : > { %v831_v40 = vpop.f32.mrf.mxu1 }
 0x123   : > { %1091 = vst [vmem:[%s1742_s14 + $0x70] sm:$0xff] %v1059_v37  ;;  %v1007_v41 = vmul.f32 %v1728_v49, %v870_v38  ;;  %v832_v42 = vadd.f32 %v831_v40, %v742_v39 }
 0x125   : > { %v1043_v43 = vadd.f32 %v1733_v52, %v1007_v41  ;;  %v992_v44 = vmul.f32 %v1728_v49, %v832_v42 }
 0x127   : > { %v1075_v45 = vmax.f32 %v1043_v43, 0.0  ;;  %v1028_v46 = vadd.f32 %v1733_v52, %v992_v44  ;;  %v782_v47 = vpop.f32.mrf.mxu2 }
 0x128   : > { %v871_v48 = vpop.f32.mrf.mxu3 }
 0x129   : > { %1107 = vst [vmem:[%s1742_s14 + $0xf0] sm:$0xff] %v1075_v45  ;;  %v1060_v50 = vmax.f32 %v1028_v46, 0.0  ;;  %v872_v51 = vadd.f32 %v871_v48, %v782_v47 }
 0x12b   : > { %1092 = vst [vmem:[%s1742_s14 + $0x78] sm:$0xff] %v1060_v50  ;;  %v1008_v53 = vmul.f32 %v1728_v49, %v872_v51 }
 0x12d   : > { %v1044_v54 = vadd.f32 %v1733_v52, %v1008_v53 }
 0x12f   : > { %v1076_v55 = vmax.f32 %v1044_v54, 0.0 }
 0x131   : > { %1108 = vst [vmem:[%s1742_s14 + $0xf8] sm:$0xff] %v1076_v55 }
 0x132 PF: > { %s14_s17 = sadd.s32 1, %s1555_s17   ;;  %s1852_s15 = smov %s1551_s16 }
 0x133   : > { %p11_p5 = scmp.ge.s32.totalorder %s14_s17, 4   ;;  %s1853_s16 = smov %s1855_s18 }
 0x135   :  { %13 = sbr.rel (!%p11_p5) target bundleno = 2 (0x2), region = 83 }

// kernel: swav_resnet_forward.35
= control target key start
LH: loop header
LB: loop body
LE: loop exit
PB: predicated region body
PF: predicated region fallthrough
CT: control target
= control target key end

     0   :  { %s1208_s15 = smov 0   ;;  %s1210_s16 = smov 0   ;;  %s1398_s0 = inlined_call_operand.vmem [shape: bf16[512,128], index: 0, kind: input, shape index: {}]   ;;  %s1399_s1 = inlined_call_operand.vmem [shape: bf16[128,128], index: 1, kind: input, shape index: {}]   ;;  %s1400_s2 = inlined_call_operand.vmem [shape: f32[1,128], index: 2, kind: input, shape index: {}]   ;;  %s1401_s3 = inlined_call_operand.vmem [shape: f32[1,128], index: 3, kind: input, shape index: {}]   ;;  %s1402_s4 = inlined_call_operand.vmem [shape: f32[512,128], index: 4, kind: output, shape index: {}]  }
   0x1   :  { %s1212_s17 = smov 0  }
   0x2 LB: > { %s33_s18 = sadd.s32 1, %s1177_s16  ;;  %p982_p0 = scmp.ge.s32.totalorder %s1181_s17, 1  ;;  %s1181_s17 = sphi %s1212_s17, %s14_s17   ;;  %s1177_s16 = sphi %s1210_s16, %s1404_s16   ;;  %s1173_s15 = sphi %s1208_s15, %s1403_s15  }
   0x3   : > { %p35_p1 = scmp.ge.s32.totalorder %s33_s18, 2  ;;  %p221_p2 = scmp.lt.s32.totalorder %s1181_s17, 3 }
   0x5   : > { %s1406_s18 = smov (%p35_p1, %s33_s18), 0  ;;  %p222_p3 = pnand %p982_p0, %p221_p2 }
   0x6   : > { %s983_s27 = sshll.u32 (!%p222_p3), %s1173_s15, 5 }
   0x7   : > { %225 = sbr.rel (%p222_p3) target bundleno = 239 (0xef), region = 36  ;;  %p268_p4 = scmp.lt.s32.totalorder (!%p222_p3), %s983_s27, 63 }
   0xc   : > { %v1108_v0 = vld [vmem:[%s1399_s1 + $0x38] sm:$0xff]  ;;  %v1107_v1 = vld [vmem:[%s1399_s1 + $0x30] sm:$0xff]  ;;  %v1106_v2 = vld [vmem:[%s1399_s1 + $0x28] sm:$0xff]  ;;  %s1408_s27 = smov (!%p268_p4, %s983_s27), 63 }
   0xd   : > { %560 = vmatpush.bf16.msra.mxu0 %v1108_v0  ;;  %1109 = vmatpush.bf16.msra.mxu1 %v1108_v0  ;;  %v1105_v3 = vld [vmem:[%s1399_s1 + $0x20] sm:$0xff]  ;;  %v1104_v4 = vld [vmem:[%s1399_s1 + $0x18] sm:$0xff]  ;;  %v1103_v5 = vld [vmem:[%s1399_s1 + $0x10] sm:$0xff]  ;;  %s984_s8 = sshll.u32 %s1408_s27, 2  ;;  %s986_s19 = sshll.u32 %s1408_s27, 3 }
   0xe   : > { %1110 = vmatpush.bf16.msra.mxu2 %v1108_v0  ;;  %1111 = vmatpush.bf16.msra.mxu3 %v1108_v0  ;;  %v1102_v6 = vld [vmem:[%s1399_s1 + $0x8] sm:$0xff]  ;;  %v1101_v7 = vld [vmem:[%s1399_s1] sm:$0xff]  ;;  %s1259_s13 = scalar_lea.vmem %s1398_s0, %s984_s8  ;;  %s1293_s24 = scalar_lea.vmem %s1402_s4, %s986_s19 }
   0xf   : > { %v1085_v8 = vld [vmem:[%s1259_s13] sm:$0xff]  ;;  %v1086_v12 = vld [vmem:[%s1259_s13 + $0x8] sm:$0xff]  ;;  %v1087_v16 = vld [vmem:[%s1259_s13 + $0x10] sm:$0xff] }
  0x10   : > { %v1089_v9 = vld [vmem:[%s1259_s13 + $0x20] sm:$0xff]  ;;  %v1090_v13 = vld [vmem:[%s1259_s13 + $0x28] sm:$0xff]  ;;  %v1091_v17 = vld [vmem:[%s1259_s13 + $0x30] sm:$0xff] }
  0x11   : > { %561 = vmatpush.bf16.msra.mxu0 %v1107_v1  ;;  %1112 = vmatpush.bf16.msra.mxu1 %v1107_v1  ;;  %v1093_v10 = vld [vmem:[%s1259_s13 + $0x40] sm:$0xff]  ;;  %v1094_v14 = vld [vmem:[%s1259_s13 + $0x48] sm:$0xff]  ;;  %v1095_v18 = vld [vmem:[%s1259_s13 + $0x50] sm:$0xff] }
  0x12   : > { %1113 = vmatpush.bf16.msra.mxu2 %v1107_v1  ;;  %1114 = vmatpush.bf16.msra.mxu3 %v1107_v1  ;;  %v1097_v11 = vld [vmem:[%s1259_s13 + $0x60] sm:$0xff]  ;;  %v1098_v15 = vld [vmem:[%s1259_s13 + $0x68] sm:$0xff]  ;;  %v1099_v19 = vld [vmem:[%s1259_s13 + $0x70] sm:$0xff] }
  0x13   : > { %v1088_v20 = vld [vmem:[%s1259_s13 + $0x18] sm:$0xff]  ;;  %v1280_v24 = vld [vmem:[%s1400_s2] ss:$0 sm:$0xff] }
  0x14   : > { %v1092_v21 = vld [vmem:[%s1259_s13 + $0x38] sm:$0xff]  ;;  %v1286_v25 = vld [vmem:[%s1401_s3] ss:$0 sm:$0xff] }
  0x15   : > { %562 = vmatpush.bf16.msra.mxu0 %v1106_v2  ;;  %1115 = vmatpush.bf16.msra.mxu1 %v1106_v2  ;;  %v1096_v22 = vld [vmem:[%s1259_s13 + $0x58] sm:$0xff] }
  0x16   : > { %1116 = vmatpush.bf16.msra.mxu2 %v1106_v2  ;;  %1117 = vmatpush.bf16.msra.mxu3 %v1106_v2  ;;  %v1100_v23 = vld [vmem:[%s1259_s13 + $0x78] sm:$0xff] }
  0x19   : > { %563 = vmatpush.bf16.msra.mxu0 %v1105_v3  ;;  %1118 = vmatpush.bf16.msra.mxu1 %v1105_v3 }
  0x1a   : > { %1119 = vmatpush.bf16.msra.mxu2 %v1105_v3  ;;  %1120 = vmatpush.bf16.msra.mxu3 %v1105_v3 }
  0x1d   : > { %564 = vmatpush.bf16.msra.mxu0 %v1104_v4  ;;  %1121 = vmatpush.bf16.msra.mxu1 %v1104_v4 }
  0x1e   : > { %1122 = vmatpush.bf16.msra.mxu2 %v1104_v4  ;;  %1123 = vmatpush.bf16.msra.mxu3 %v1104_v4 }
  0x21   : > { %565 = vmatpush.bf16.msra.mxu0 %v1103_v5  ;;  %1124 = vmatpush.bf16.msra.mxu1 %v1103_v5 }
  0x22   : > { %1125 = vmatpush.bf16.msra.mxu2 %v1103_v5  ;;  %1126 = vmatpush.bf16.msra.mxu3 %v1103_v5 }
  0x25   : > { %566 = vmatpush.bf16.msra.mxu0 %v1102_v6  ;;  %1127 = vmatpush.bf16.msra.mxu1 %v1102_v6 }
  0x26   : > { %1128 = vmatpush.bf16.msra.mxu2 %v1102_v6  ;;  %1129 = vmatpush.bf16.msra.mxu3 %v1102_v6 }
  0x29   : > { %567 = vmatpush.bf16.msra.mxu0 %v1101_v7  ;;  %1130 = vmatpush.bf16.msra.mxu1 %v1101_v7 }
  0x2a   : > { %1131 = vmatpush.bf16.msra.mxu2 %v1101_v7  ;;  %1132 = vmatpush.bf16.msra.mxu3 %v1101_v7 }
  0x2c   : > { %568 = vmatmul.bf16.vlgmr.msra.gmra.mxu0 %v1085_v8  ;;  %588 = vmatmul.bf16.vlgmr.msra.gmra.mxu1 %v1089_v9 }
  0x2d   : > { %608 = vmatmul.bf16.vlgmr.msra.gmra.mxu2 %v1093_v10  ;;  %628 = vmatmul.bf16.vlgmr.msra.gmra.mxu3 %v1097_v11 }
  0x3c   : > { %573 = vmatmul.bf16.gmra.mxu0 %v1086_v12  ;;  %593 = vmatmul.bf16.gmra.mxu1 %v1090_v13 }
  0x3d   : > { %613 = vmatmul.bf16.gmra.mxu2 %v1094_v14  ;;  %633 = vmatmul.bf16.gmra.mxu3 %v1098_v15 }
  0x4c   : > { %578 = vmatmul.bf16.gmra.mxu0 %v1087_v16  ;;  %598 = vmatmul.bf16.gmra.mxu1 %v1091_v17 }
  0x4d   : > { %618 = vmatmul.bf16.gmra.mxu2 %v1095_v18  ;;  %638 = vmatmul.bf16.gmra.mxu3 %v1099_v19 }
  0x5c   : > { %583 = vmatmul.bf16.gmra.mxu0 %v1088_v20  ;;  %603 = vmatmul.bf16.gmra.mxu1 %v1092_v21 }
  0x5d   : > { %623 = vmatmul.bf16.gmra.mxu2 %v1096_v22  ;;  %643 = vmatmul.bf16.gmra.mxu3 %v1100_v23 }
  0xa9   : > { %v569_v26 = vpop.f32.mrf.mxu0  ;;  %v589_v27 = vpop.f32.mrf.mxu1 }
  0xaa   : > { %v752_v28 = vmul.f32 %v1280_v24, %v569_v26  ;;  %v760_v29 = vmul.f32 %v1280_v24, %v589_v27 }
  0xac   : > { %v788_v30 = vadd.f32 %v1286_v25, %v752_v28  ;;  %v796_v31 = vadd.f32 %v1286_v25, %v760_v29 }
  0xae   : > { %820 = vst [vmem:[%s1293_s24] sm:$0xff] %v788_v30 }
  0xaf   : > { %828 = vst [vmem:[%s1293_s24 + $0x40] sm:$0xff] %v796_v31 }
  0xb0   : > { %v609_v32 = vpop.f32.mrf.mxu2  ;;  %v629_v33 = vpop.f32.mrf.mxu3 }
  0xb1   : > { %v768_v34 = vmul.f32 %v1280_v24, %v609_v32  ;;  %v776_v35 = vmul.f32 %v1280_v24, %v629_v33  ;;  %v571_v36 = vpop.f32.mrf.mxu0  ;;  %v591_v37 = vpop.f32.mrf.mxu1 }
  0xb2   : > { %v753_v38 = vmul.f32 %v1280_v24, %v571_v36  ;;  %v761_v39 = vmul.f32 %v1280_v24, %v591_v37 }
  0xb3   : > { %v804_v40 = vadd.f32 %v1286_v25, %v768_v34  ;;  %v812_v41 = vadd.f32 %v1286_v25, %v776_v35 }
  0xb4   : > { %v789_v42 = vadd.f32 %v1286_v25, %v753_v38  ;;  %v797_v43 = vadd.f32 %v1286_v25, %v761_v39 }
  0xb5   : > { %836 = vst [vmem:[%s1293_s24 + $0x80] sm:$0xff] %v804_v40 }
  0xb6   : > { %844 = vst [vmem:[%s1293_s24 + $0xc0] sm:$0xff] %v812_v41 }
  0xb7   : > { %821 = vst [vmem:[%s1293_s24 + $0x8] sm:$0xff] %v789_v42 }
  0xb8   : > { %829 = vst [vmem:[%s1293_s24 + $0x48] sm:$0xff] %v797_v43  ;;  %v611_v44 = vpop.f32.mrf.mxu2  ;;  %v631_v45 = vpop.f32.mrf.mxu3 }
  0xb9   : > { %v769_v46 = vmul.f32 %v1280_v24, %v611_v44  ;;  %v777_v47 = vmul.f32 %v1280_v24, %v631_v45  ;;  %v574_v48 = vpop.f32.mrf.mxu0  ;;  %v594_v49 = vpop.f32.mrf.mxu1 }
  0xba   : > { %v754_v50 = vmul.f32 %v1280_v24, %v574_v48  ;;  %v762_v51 = vmul.f32 %v1280_v24, %v594_v49 }
  0xbb   : > { %v805_v52 = vadd.f32 %v1286_v25, %v769_v46  ;;  %v813_v53 = vadd.f32 %v1286_v25, %v777_v47 }
  0xbc   : > { %v790_v54 = vadd.f32 %v1286_v25, %v754_v50  ;;  %v798_v55 = vadd.f32 %v1286_v25, %v762_v51 }
  0xbd   : > { %837 = vst [vmem:[%s1293_s24 + $0x88] sm:$0xff] %v805_v52 }
  0xbe   : > { %845 = vst [vmem:[%s1293_s24 + $0xc8] sm:$0xff] %v813_v53 }
  0xbf   : > { %822 = vst [vmem:[%s1293_s24 + $0x10] sm:$0xff] %v790_v54 }
  0xc0   : > { %830 = vst [vmem:[%s1293_s24 + $0x50] sm:$0xff] %v798_v55  ;;  %v614_v56 = vpop.f32.mrf.mxu2  ;;  %v634_v57 = vpop.f32.mrf.mxu3 }
  0xc1   : > { %v770_v58 = vmul.f32 %v1280_v24, %v614_v56  ;;  %v778_v59 = vmul.f32 %v1280_v24, %v634_v57  ;;  %v576_v60 = vpop.f32.mrf.mxu0  ;;  %v596_v61 = vpop.f32.mrf.mxu1 }
  0xc2   : > { %v755_v62 = vmul.f32 %v1280_v24, %v576_v60  ;;  %v763_v63 = vmul.f32 %v1280_v24, %v596_v61 }
  0xc3   : > { %v806_v0 = vadd.f32 %v1286_v25, %v770_v58  ;;  %v814_v1 = vadd.f32 %v1286_v25, %v778_v59 }
  0xc4   : > { %v791_v2 = vadd.f32 %v1286_v25, %v755_v62  ;;  %v799_v3 = vadd.f32 %v1286_v25, %v763_v63 }
  0xc5   : > { %838 = vst [vmem:[%s1293_s24 + $0x90] sm:$0xff] %v806_v0 }
  0xc6   : > { %846 = vst [vmem:[%s1293_s24 + $0xd0] sm:$0xff] %v814_v1 }
  0xc7   : > { %823 = vst [vmem:[%s1293_s24 + $0x18] sm:$0xff] %v791_v2 }
  0xc8   : > { %831 = vst [vmem:[%s1293_s24 + $0x58] sm:$0xff] %v799_v3  ;;  %v616_v4 = vpop.f32.mrf.mxu2  ;;  %v636_v5 = vpop.f32.mrf.mxu3 }
  0xc9   : > { %v771_v6 = vmul.f32 %v1280_v24, %v616_v4  ;;  %v779_v7 = vmul.f32 %v1280_v24, %v636_v5  ;;  %v579_v8 = vpop.f32.mrf.mxu0  ;;  %v599_v9 = vpop.f32.mrf.mxu1 }
  0xca   : > { %v756_v10 = vmul.f32 %v1280_v24, %v579_v8  ;;  %v764_v11 = vmul.f32 %v1280_v24, %v599_v9 }
  0xcb   : > { %v807_v12 = vadd.f32 %v1286_v25, %v771_v6  ;;  %v815_v13 = vadd.f32 %v1286_v25, %v779_v7 }
  0xcc   : > { %v792_v14 = vadd.f32 %v1286_v25, %v756_v10  ;;  %v800_v15 = vadd.f32 %v1286_v25, %v764_v11 }
  0xcd   : > { %839 = vst [vmem:[%s1293_s24 + $0x98] sm:$0xff] %v807_v12 }
  0xce   : > { %847 = vst [vmem:[%s1293_s24 + $0xd8] sm:$0xff] %v815_v13 }
  0xcf   : > { %824 = vst [vmem:[%s1293_s24 + $0x20] sm:$0xff] %v792_v14 }
  0xd0   : > { %832 = vst [vmem:[%s1293_s24 + $0x60] sm:$0xff] %v800_v15  ;;  %v619_v16 = vpop.f32.mrf.mxu2  ;;  %v639_v17 = vpop.f32.mrf.mxu3 }
  0xd1   : > { %v772_v18 = vmul.f32 %v1280_v24, %v619_v16  ;;  %v780_v19 = vmul.f32 %v1280_v24, %v639_v17  ;;  %v581_v20 = vpop.f32.mrf.mxu0  ;;  %v601_v21 = vpop.f32.mrf.mxu1 }
  0xd2   : > { %v757_v22 = vmul.f32 %v1280_v24, %v581_v20  ;;  %v765_v23 = vmul.f32 %v1280_v24, %v601_v21 }
  0xd3   : > { %v808_v26 = vadd.f32 %v1286_v25, %v772_v18  ;;  %v816_v27 = vadd.f32 %v1286_v25, %v780_v19 }
  0xd4   : > { %v793_v28 = vadd.f32 %v1286_v25, %v757_v22  ;;  %v801_v29 = vadd.f32 %v1286_v25, %v765_v23 }
  0xd5   : > { %840 = vst [vmem:[%s1293_s24 + $0xa0] sm:$0xff] %v808_v26 }
  0xd6   : > { %848 = vst [vmem:[%s1293_s24 + $0xe0] sm:$0xff] %v816_v27 }
  0xd7   : > { %825 = vst [vmem:[%s1293_s24 + $0x28] sm:$0xff] %v793_v28 }
  0xd8   : > { %833 = vst [vmem:[%s1293_s24 + $0x68] sm:$0xff] %v801_v29  ;;  %v621_v30 = vpop.f32.mrf.mxu2  ;;  %v641_v31 = vpop.f32.mrf.mxu3 }
  0xd9   : > { %v773_v32 = vmul.f32 %v1280_v24, %v621_v30  ;;  %v781_v33 = vmul.f32 %v1280_v24, %v641_v31  ;;  %v584_v34 = vpop.f32.mrf.mxu0  ;;  %v604_v35 = vpop.f32.mrf.mxu1 }
  0xda   : > { %v758_v36 = vmul.f32 %v1280_v24, %v584_v34  ;;  %v766_v37 = vmul.f32 %v1280_v24, %v604_v35 }
  0xdb   : > { %v809_v38 = vadd.f32 %v1286_v25, %v773_v32  ;;  %v817_v39 = vadd.f32 %v1286_v25, %v781_v33 }
  0xdc   : > { %v794_v40 = vadd.f32 %v1286_v25, %v758_v36  ;;  %v802_v41 = vadd.f32 %v1286_v25, %v766_v37 }
  0xdd   : > { %841 = vst [vmem:[%s1293_s24 + $0xa8] sm:$0xff] %v809_v38 }
  0xde   : > { %849 = vst [vmem:[%s1293_s24 + $0xe8] sm:$0xff] %v817_v39 }
  0xdf   : > { %826 = vst [vmem:[%s1293_s24 + $0x30] sm:$0xff] %v794_v40 }
  0xe0   : > { %834 = vst [vmem:[%s1293_s24 + $0x70] sm:$0xff] %v802_v41  ;;  %v624_v42 = vpop.f32.mrf.mxu2  ;;  %v644_v43 = vpop.f32.mrf.mxu3 }
  0xe1   : > { %v774_v44 = vmul.f32 %v1280_v24, %v624_v42  ;;  %v782_v45 = vmul.f32 %v1280_v24, %v644_v43  ;;  %v586_v46 = vpop.f32.mrf.mxu0  ;;  %v606_v47 = vpop.f32.mrf.mxu1 }
  0xe2   : > { %v759_v48 = vmul.f32 %v1280_v24, %v586_v46  ;;  %v767_v49 = vmul.f32 %v1280_v24, %v606_v47 }
  0xe3   : > { %v810_v50 = vadd.f32 %v1286_v25, %v774_v44  ;;  %v818_v51 = vadd.f32 %v1286_v25, %v782_v45 }
  0xe4   : > { %v795_v52 = vadd.f32 %v1286_v25, %v759_v48  ;;  %v803_v53 = vadd.f32 %v1286_v25, %v767_v49 }
  0xe5   : > { %842 = vst [vmem:[%s1293_s24 + $0xb0] sm:$0xff] %v810_v50 }
  0xe6   : > { %850 = vst [vmem:[%s1293_s24 + $0xf0] sm:$0xff] %v818_v51 }
  0xe7   : > { %827 = vst [vmem:[%s1293_s24 + $0x38] sm:$0xff] %v795_v52 }
  0xe8   : > { %835 = vst [vmem:[%s1293_s24 + $0x78] sm:$0xff] %v803_v53  ;;  %v626_v54 = vpop.f32.mrf.mxu2  ;;  %v646_v55 = vpop.f32.mrf.mxu3 }
  0xe9   : > { %v775_v56 = vmul.f32 %v1280_v24, %v626_v54  ;;  %v783_v57 = vmul.f32 %v1280_v24, %v646_v55 }
  0xeb   : > { %v811_v58 = vadd.f32 %v1286_v25, %v775_v56  ;;  %v819_v59 = vadd.f32 %v1286_v25, %v783_v57 }
  0xed   : > { %843 = vst [vmem:[%s1293_s24 + $0xb8] sm:$0xff] %v811_v58 }
  0xee   : > { %851 = vst [vmem:[%s1293_s24 + $0xf8] sm:$0xff] %v819_v59 }
  0xef PF: > { %s14_s17 = sadd.s32 1, %s1181_s17   ;;  %s1403_s15 = smov %s1177_s16 }
  0xf0   : > { %p11_p5 = scmp.ge.s32.totalorder %s14_s17, 4   ;;  %s1404_s16 = smov %s1406_s18 }
  0xf2   :  { %13 = sbr.rel (!%p11_p5) target bundleno = 2 (0x2), region = 83 }

// kernel: swav_resnet_forward.36
= control target key start
LH: loop header
LB: loop body
LE: loop exit
PB: predicated region body
PF: predicated region fallthrough
CT: control target
= control target key end

     0   :  { %s1386_s18 = smov 0   ;;  %s1388_s19 = smov 0   ;;  %s1613_s0 = inlined_call_operand.vmem [shape: bf16[512,128], index: 0, kind: input, shape index: {}]   ;;  %s1614_s1 = inlined_call_operand.vmem [shape: bf16[128,128], index: 1, kind: input, shape index: {}]   ;;  %s1615_s2 = inlined_call_operand.vmem [shape: f32[1,128], index: 2, kind: input, shape index: {}]   ;;  %s1616_s3 = inlined_call_operand.vmem [shape: f32[1,128], index: 3, kind: input, shape index: {}]   ;;  %s1617_s4 = inlined_call_operand.vmem [shape: f32[512,128], index: 4, kind: input, shape index: {}]   ;;  %s1618_s5 = inlined_call_operand.vmem [shape: f32[512,128], index: 5, kind: output, shape index: {}]  }
   0x1   :  { %s1390_s20 = smov 0  }
   0x2 LB: > { %s34_s21 = sadd.s32 1, %s1350_s19  ;;  %p1153_p0 = scmp.ge.s32.totalorder %s1354_s20, 1  ;;  %s1354_s20 = sphi %s1390_s20, %s15_s20   ;;  %s1350_s19 = sphi %s1388_s19, %s1620_s19   ;;  %s1346_s18 = sphi %s1386_s18, %s1619_s18  }
   0x3   : > { %p36_p1 = scmp.ge.s32.totalorder %s34_s21, 2  ;;  %p262_p2 = scmp.lt.s32.totalorder %s1354_s20, 3 }
   0x5   : > { %s1622_s21 = smov (%p36_p1, %s34_s21), 0  ;;  %p263_p3 = pnand %p1153_p0, %p262_p2 }
   0x6   : > { %s1154_s30 = sshll.u32 (!%p263_p3), %s1346_s18, 5 }
   0x7   : > { %266 = sbr.rel (%p263_p3) target bundleno = 243 (0xf3), region = 40  ;;  %p319_p4 = scmp.lt.s32.totalorder (!%p263_p3), %s1154_s30, 63 }
   0xc   : > { %v1281_v0 = vld [vmem:[%s1614_s1 + $0x38] sm:$0xff]  ;;  %v1280_v1 = vld [vmem:[%s1614_s1 + $0x30] sm:$0xff]  ;;  %v1279_v2 = vld [vmem:[%s1614_s1 + $0x28] sm:$0xff]  ;;  %s1624_s30 = smov (!%p319_p4, %s1154_s30), 63 }
   0xd   : > { %620 = vmatpush.bf16.msra.mxu0 %v1281_v0  ;;  %1282 = vmatpush.bf16.msra.mxu1 %v1281_v0  ;;  %v1278_v3 = vld [vmem:[%s1614_s1 + $0x20] sm:$0xff]  ;;  %v1277_v4 = vld [vmem:[%s1614_s1 + $0x18] sm:$0xff]  ;;  %v1276_v5 = vld [vmem:[%s1614_s1 + $0x10] sm:$0xff]  ;;  %s1155_s12 = sshll.u32 %s1624_s30, 2  ;;  %s1157_s18 = sshll.u32 %s1624_s30, 3 }
   0xe   : > { %1283 = vmatpush.bf16.msra.mxu2 %v1281_v0  ;;  %1284 = vmatpush.bf16.msra.mxu3 %v1281_v0  ;;  %v1275_v6 = vld [vmem:[%s1614_s1 + $0x8] sm:$0xff]  ;;  %v1274_v7 = vld [vmem:[%s1614_s1] sm:$0xff]  ;;  %s1437_s17 = scalar_lea.vmem %s1613_s0, %s1155_s12  ;;  %s1464_s26 = scalar_lea.vmem %s1617_s4, %s1157_s18 }
   0xf   : > { %v1258_v8 = vld [vmem:[%s1437_s17] sm:$0xff]  ;;  %v1259_v12 = vld [vmem:[%s1437_s17 + $0x8] sm:$0xff]  ;;  %v1260_v16 = vld [vmem:[%s1437_s17 + $0x10] sm:$0xff]  ;;  %s1480_s6 = scalar_lea.vmem %s1618_s5, %s1157_s18 }
  0x10   : > { %v1262_v9 = vld [vmem:[%s1437_s17 + $0x20] sm:$0xff]  ;;  %v1263_v13 = vld [vmem:[%s1437_s17 + $0x28] sm:$0xff]  ;;  %v1264_v17 = vld [vmem:[%s1437_s17 + $0x30] sm:$0xff] }
  0x11   : > { %621 = vmatpush.bf16.msra.mxu0 %v1280_v1  ;;  %1285 = vmatpush.bf16.msra.mxu1 %v1280_v1  ;;  %v1266_v10 = vld [vmem:[%s1437_s17 + $0x40] sm:$0xff]  ;;  %v1267_v14 = vld [vmem:[%s1437_s17 + $0x48] sm:$0xff]  ;;  %v1268_v18 = vld [vmem:[%s1437_s17 + $0x50] sm:$0xff] }
  0x12   : > { %1286 = vmatpush.bf16.msra.mxu2 %v1280_v1  ;;  %1287 = vmatpush.bf16.msra.mxu3 %v1280_v1  ;;  %v1270_v11 = vld [vmem:[%s1437_s17 + $0x60] sm:$0xff]  ;;  %v1271_v15 = vld [vmem:[%s1437_s17 + $0x68] sm:$0xff]  ;;  %v1272_v19 = vld [vmem:[%s1437_s17 + $0x70] sm:$0xff] }
  0x13   : > { %v1261_v20 = vld [vmem:[%s1437_s17 + $0x18] sm:$0xff]  ;;  %v1459_v24 = vld [vmem:[%s1615_s2] ss:$0 sm:$0xff]  ;;  %v881_v50 = vld [vmem:[%s1464_s26 + $0x8] sm:$0xff] }
  0x14   : > { %v1265_v21 = vld [vmem:[%s1437_s17 + $0x38] sm:$0xff]  ;;  %v1469_v25 = vld [vmem:[%s1616_s3] ss:$0 sm:$0xff]  ;;  %v889_v51 = vld [vmem:[%s1464_s26 + $0x48] sm:$0xff] }
  0x15   : > { %622 = vmatpush.bf16.msra.mxu0 %v1279_v2  ;;  %1288 = vmatpush.bf16.msra.mxu1 %v1279_v2  ;;  %v1269_v22 = vld [vmem:[%s1437_s17 + $0x58] sm:$0xff]  ;;  %v880_v30 = vld [vmem:[%s1464_s26] sm:$0xff] }
  0x16   : > { %1289 = vmatpush.bf16.msra.mxu2 %v1279_v2  ;;  %1290 = vmatpush.bf16.msra.mxu3 %v1279_v2  ;;  %v1273_v23 = vld [vmem:[%s1437_s17 + $0x78] sm:$0xff]  ;;  %v888_v31 = vld [vmem:[%s1464_s26 + $0x40] sm:$0xff] }
  0x17   : > { %v896_v44 = vld [vmem:[%s1464_s26 + $0x80] sm:$0xff] }
  0x18   : > { %v904_v45 = vld [vmem:[%s1464_s26 + $0xc0] sm:$0xff] }
  0x19   : > { %623 = vmatpush.bf16.msra.mxu0 %v1278_v3  ;;  %1291 = vmatpush.bf16.msra.mxu1 %v1278_v3 }
  0x1a   : > { %1292 = vmatpush.bf16.msra.mxu2 %v1278_v3  ;;  %1293 = vmatpush.bf16.msra.mxu3 %v1278_v3 }
  0x1d   : > { %624 = vmatpush.bf16.msra.mxu0 %v1277_v4  ;;  %1294 = vmatpush.bf16.msra.mxu1 %v1277_v4 }
  0x1e   : > { %1295 = vmatpush.bf16.msra.mxu2 %v1277_v4  ;;  %1296 = vmatpush.bf16.msra.mxu3 %v1277_v4  ;;  %v897_v4 = vld [vmem:[%s1464_s26 + $0x88] sm:$0xff] }
  0x21   : > { %625 = vmatpush.bf16.msra.mxu0 %v1276_v5  ;;  %1297 = vmatpush.bf16.msra.mxu1 %v1276_v5 }
  0x22   : > { %1298 = vmatpush.bf16.msra.mxu2 %v1276_v5  ;;  %1299 = vmatpush.bf16.msra.mxu3 %v1276_v5  ;;  %v905_v5 = vld [vmem:[%s1464_s26 + $0xc8] sm:$0xff] }
  0x25   : > { %626 = vmatpush.bf16.msra.mxu0 %v1275_v6  ;;  %1300 = vmatpush.bf16.msra.mxu1 %v1275_v6 }
  0x26   : > { %1301 = vmatpush.bf16.msra.mxu2 %v1275_v6  ;;  %1302 = vmatpush.bf16.msra.mxu3 %v1275_v6 }
  0x29   : > { %627 = vmatpush.bf16.msra.mxu0 %v1274_v7  ;;  %1303 = vmatpush.bf16.msra.mxu1 %v1274_v7 }
  0x2a   : > { %1304 = vmatpush.bf16.msra.mxu2 %v1274_v7  ;;  %1305 = vmatpush.bf16.msra.mxu3 %v1274_v7 }
  0x2c   : > { %628 = vmatmul.bf16.vlgmr.msra.gmra.mxu0 %v1258_v8  ;;  %648 = vmatmul.bf16.vlgmr.msra.gmra.mxu1 %v1262_v9 }
  0x2d   : > { %668 = vmatmul.bf16.vlgmr.msra.gmra.mxu2 %v1266_v10  ;;  %688 = vmatmul.bf16.vlgmr.msra.gmra.mxu3 %v1270_v11  ;;  %v882_v10 = vld [vmem:[%s1464_s26 + $0x10] sm:$0xff] }
  0x2e   : > { %v890_v11 = vld [vmem:[%s1464_s26 + $0x50] sm:$0xff] }
  0x3c   : > { %633 = vmatmul.bf16.gmra.mxu0 %v1259_v12  ;;  %653 = vmatmul.bf16.gmra.mxu1 %v1263_v13 }
  0x3d   : > { %673 = vmatmul.bf16.gmra.mxu2 %v1267_v14  ;;  %693 = vmatmul.bf16.gmra.mxu3 %v1271_v15 }
  0x4c   : > { %638 = vmatmul.bf16.gmra.mxu0 %v1260_v16  ;;  %658 = vmatmul.bf16.gmra.mxu1 %v1264_v17 }
  0x4d   : > { %678 = vmatmul.bf16.gmra.mxu2 %v1268_v18  ;;  %698 = vmatmul.bf16.gmra.mxu3 %v1272_v19 }
  0x5c   : > { %643 = vmatmul.bf16.gmra.mxu0 %v1261_v20  ;;  %663 = vmatmul.bf16.gmra.mxu1 %v1265_v21 }
  0x5d   : > { %683 = vmatmul.bf16.gmra.mxu2 %v1269_v22  ;;  %703 = vmatmul.bf16.gmra.mxu3 %v1273_v23 }
  0xa9   : > { %v629_v26 = vpop.f32.mrf.mxu0  ;;  %v649_v27 = vpop.f32.mrf.mxu1 }
  0xaa   : > { %v812_v28 = vmul.f32 %v1459_v24, %v629_v26  ;;  %v820_v29 = vmul.f32 %v1459_v24, %v649_v27 }
  0xac   : > { %v848_v32 = vadd.f32 %v1469_v25, %v812_v28  ;;  %v856_v33 = vadd.f32 %v1469_v25, %v820_v29 }
  0xae   : > { %v912_v34 = vadd.f32 %v880_v30, %v848_v32  ;;  %v920_v35 = vadd.f32 %v888_v31, %v856_v33  ;;  %v898_v30 = vld [vmem:[%s1464_s26 + $0x90] sm:$0xff] }
  0xaf   : > { %v906_v31 = vld [vmem:[%s1464_s26 + $0xd0] sm:$0xff] }
  0xb0   : > { %v944_v36 = vmax.f32 %v912_v34, 0.0  ;;  %v952_v37 = vmax.f32 %v920_v35, 0.0  ;;  %v669_v38 = vpop.f32.mrf.mxu2  ;;  %v689_v39 = vpop.f32.mrf.mxu3 }
  0xb1   : > { %v828_v40 = vmul.f32 %v1459_v24, %v669_v38  ;;  %v836_v41 = vmul.f32 %v1459_v24, %v689_v39  ;;  %v631_v42 = vpop.f32.mrf.mxu0  ;;  %v651_v43 = vpop.f32.mrf.mxu1 }
  0xb2   : > { %976 = vst [vmem:[%s1480_s6] sm:$0xff] %v944_v36  ;;  %v813_v46 = vmul.f32 %v1459_v24, %v631_v42  ;;  %v821_v47 = vmul.f32 %v1459_v24, %v651_v43  ;;  %v883_v36 = vld [vmem:[%s1464_s26 + $0x18] sm:$0xff] }
  0xb3   : > { %984 = vst [vmem:[%s1480_s6 + $0x40] sm:$0xff] %v952_v37  ;;  %v864_v48 = vadd.f32 %v1469_v25, %v828_v40  ;;  %v872_v49 = vadd.f32 %v1469_v25, %v836_v41  ;;  %v891_v37 = vld [vmem:[%s1464_s26 + $0x58] sm:$0xff] }
  0xb4   : > { %v849_v52 = vadd.f32 %v1469_v25, %v813_v46  ;;  %v857_v53 = vadd.f32 %v1469_v25, %v821_v47 }
  0xb5   : > { %v928_v54 = vadd.f32 %v896_v44, %v864_v48  ;;  %v936_v55 = vadd.f32 %v904_v45, %v872_v49 }
  0xb6   : > { %v913_v56 = vadd.f32 %v881_v50, %v849_v52  ;;  %v921_v57 = vadd.f32 %v889_v51, %v857_v53 }
  0xb7   : > { %v960_v58 = vmax.f32 %v928_v54, 0.0  ;;  %v968_v59 = vmax.f32 %v936_v55, 0.0  ;;  %v899_v54 = vld [vmem:[%s1464_s26 + $0x98] sm:$0xff] }
  0xb8   : > { %v945_v60 = vmax.f32 %v913_v56, 0.0  ;;  %v953_v61 = vmax.f32 %v921_v57, 0.0  ;;  %v671_v62 = vpop.f32.mrf.mxu2  ;;  %v691_v63 = vpop.f32.mrf.mxu3  ;;  %v907_v55 = vld [vmem:[%s1464_s26 + $0xd8] sm:$0xff] }
  0xb9   : > { %992 = vst [vmem:[%s1480_s6 + $0x80] sm:$0xff] %v960_v58  ;;  %v829_v0 = vmul.f32 %v1459_v24, %v671_v62  ;;  %v837_v1 = vmul.f32 %v1459_v24, %v691_v63  ;;  %v634_v2 = vpop.f32.mrf.mxu0  ;;  %v654_v3 = vpop.f32.mrf.mxu1 }
  0xba   : > { %1000 = vst [vmem:[%s1480_s6 + $0xc0] sm:$0xff] %v968_v59  ;;  %v814_v6 = vmul.f32 %v1459_v24, %v634_v2  ;;  %v822_v7 = vmul.f32 %v1459_v24, %v654_v3 }
  0xbb   : > { %977 = vst [vmem:[%s1480_s6 + $0x8] sm:$0xff] %v945_v60  ;;  %v865_v8 = vadd.f32 %v1469_v25, %v829_v0  ;;  %v873_v9 = vadd.f32 %v1469_v25, %v837_v1  ;;  %v884_v60 = vld [vmem:[%s1464_s26 + $0x20] sm:$0xff] }
  0xbc   : > { %985 = vst [vmem:[%s1480_s6 + $0x48] sm:$0xff] %v953_v61  ;;  %v850_v12 = vadd.f32 %v1469_v25, %v814_v6  ;;  %v858_v13 = vadd.f32 %v1469_v25, %v822_v7  ;;  %v892_v61 = vld [vmem:[%s1464_s26 + $0x60] sm:$0xff] }
  0xbd   : > { %v929_v14 = vadd.f32 %v897_v4, %v865_v8  ;;  %v937_v15 = vadd.f32 %v905_v5, %v873_v9 }
  0xbe   : > { %v914_v16 = vadd.f32 %v882_v10, %v850_v12  ;;  %v922_v17 = vadd.f32 %v890_v11, %v858_v13 }
  0xbf   : > { %v961_v18 = vmax.f32 %v929_v14, 0.0  ;;  %v969_v19 = vmax.f32 %v937_v15, 0.0  ;;  %v900_v14 = vld [vmem:[%s1464_s26 + $0xa0] sm:$0xff] }
  0xc0   : > { %v946_v20 = vmax.f32 %v914_v16, 0.0  ;;  %v954_v21 = vmax.f32 %v922_v17, 0.0  ;;  %v674_v22 = vpop.f32.mrf.mxu2  ;;  %v694_v23 = vpop.f32.mrf.mxu3  ;;  %v908_v15 = vld [vmem:[%s1464_s26 + $0xe0] sm:$0xff] }
  0xc1   : > { %993 = vst [vmem:[%s1480_s6 + $0x88] sm:$0xff] %v961_v18  ;;  %v830_v26 = vmul.f32 %v1459_v24, %v674_v22  ;;  %v838_v27 = vmul.f32 %v1459_v24, %v694_v23  ;;  %v636_v28 = vpop.f32.mrf.mxu0  ;;  %v656_v29 = vpop.f32.mrf.mxu1 }
  0xc2   : > { %1001 = vst [vmem:[%s1480_s6 + $0xc8] sm:$0xff] %v969_v19  ;;  %v815_v32 = vmul.f32 %v1459_v24, %v636_v28  ;;  %v823_v33 = vmul.f32 %v1459_v24, %v656_v29 }
  0xc3   : > { %978 = vst [vmem:[%s1480_s6 + $0x10] sm:$0xff] %v946_v20  ;;  %v866_v34 = vadd.f32 %v1469_v25, %v830_v26  ;;  %v874_v35 = vadd.f32 %v1469_v25, %v838_v27  ;;  %v885_v20 = vld [vmem:[%s1464_s26 + $0x28] sm:$0xff] }
  0xc4   : > { %986 = vst [vmem:[%s1480_s6 + $0x50] sm:$0xff] %v954_v21  ;;  %v851_v38 = vadd.f32 %v1469_v25, %v815_v32  ;;  %v859_v39 = vadd.f32 %v1469_v25, %v823_v33  ;;  %v893_v21 = vld [vmem:[%s1464_s26 + $0x68] sm:$0xff] }
  0xc5   : > { %v930_v40 = vadd.f32 %v898_v30, %v866_v34  ;;  %v938_v41 = vadd.f32 %v906_v31, %v874_v35 }
  0xc6   : > { %v915_v42 = vadd.f32 %v883_v36, %v851_v38  ;;  %v923_v43 = vadd.f32 %v891_v37, %v859_v39 }
  0xc7   : > { %v962_v44 = vmax.f32 %v930_v40, 0.0  ;;  %v970_v45 = vmax.f32 %v938_v41, 0.0  ;;  %v901_v40 = vld [vmem:[%s1464_s26 + $0xa8] sm:$0xff] }
  0xc8   : > { %v947_v46 = vmax.f32 %v915_v42, 0.0  ;;  %v955_v47 = vmax.f32 %v923_v43, 0.0  ;;  %v676_v48 = vpop.f32.mrf.mxu2  ;;  %v696_v49 = vpop.f32.mrf.mxu3  ;;  %v909_v41 = vld [vmem:[%s1464_s26 + $0xe8] sm:$0xff] }
  0xc9   : > { %994 = vst [vmem:[%s1480_s6 + $0x90] sm:$0xff] %v962_v44  ;;  %v831_v50 = vmul.f32 %v1459_v24, %v676_v48  ;;  %v839_v51 = vmul.f32 %v1459_v24, %v696_v49  ;;  %v639_v52 = vpop.f32.mrf.mxu0  ;;  %v659_v53 = vpop.f32.mrf.mxu1 }
  0xca   : > { %1002 = vst [vmem:[%s1480_s6 + $0xd0] sm:$0xff] %v970_v45  ;;  %v816_v56 = vmul.f32 %v1459_v24, %v639_v52  ;;  %v824_v57 = vmul.f32 %v1459_v24, %v659_v53 }
  0xcb   : > { %979 = vst [vmem:[%s1480_s6 + $0x18] sm:$0xff] %v947_v46  ;;  %v867_v58 = vadd.f32 %v1469_v25, %v831_v50  ;;  %v875_v59 = vadd.f32 %v1469_v25, %v839_v51  ;;  %v886_v46 = vld [vmem:[%s1464_s26 + $0x30] sm:$0xff] }
  0xcc   : > { %987 = vst [vmem:[%s1480_s6 + $0x58] sm:$0xff] %v955_v47  ;;  %v852_v62 = vadd.f32 %v1469_v25, %v816_v56  ;;  %v860_v63 = vadd.f32 %v1469_v25, %v824_v57  ;;  %v894_v47 = vld [vmem:[%s1464_s26 + $0x70] sm:$0xff] }
  0xcd   : > { %v931_v0 = vadd.f32 %v899_v54, %v867_v58  ;;  %v939_v1 = vadd.f32 %v907_v55, %v875_v59 }
  0xce   : > { %v916_v2 = vadd.f32 %v884_v60, %v852_v62  ;;  %v924_v3 = vadd.f32 %v892_v61, %v860_v63 }
  0xcf   : > { %v963_v4 = vmax.f32 %v931_v0, 0.0  ;;  %v971_v5 = vmax.f32 %v939_v1, 0.0  ;;  %v902_v0 = vld [vmem:[%s1464_s26 + $0xb0] sm:$0xff] }
  0xd0   : > { %v948_v6 = vmax.f32 %v916_v2, 0.0  ;;  %v956_v7 = vmax.f32 %v924_v3, 0.0  ;;  %v679_v8 = vpop.f32.mrf.mxu2  ;;  %v699_v9 = vpop.f32.mrf.mxu3  ;;  %v910_v1 = vld [vmem:[%s1464_s26 + $0xf0] sm:$0xff] }
  0xd1   : > { %995 = vst [vmem:[%s1480_s6 + $0x98] sm:$0xff] %v963_v4  ;;  %v832_v10 = vmul.f32 %v1459_v24, %v679_v8  ;;  %v840_v11 = vmul.f32 %v1459_v24, %v699_v9  ;;  %v641_v12 = vpop.f32.mrf.mxu0  ;;  %v661_v13 = vpop.f32.mrf.mxu1 }
  0xd2   : > { %1003 = vst [vmem:[%s1480_s6 + $0xd8] sm:$0xff] %v971_v5  ;;  %v817_v16 = vmul.f32 %v1459_v24, %v641_v12  ;;  %v825_v17 = vmul.f32 %v1459_v24, %v661_v13 }
  0xd3   : > { %980 = vst [vmem:[%s1480_s6 + $0x20] sm:$0xff] %v948_v6  ;;  %v868_v18 = vadd.f32 %v1469_v25, %v832_v10  ;;  %v876_v19 = vadd.f32 %v1469_v25, %v840_v11  ;;  %v887_v6 = vld [vmem:[%s1464_s26 + $0x38] sm:$0xff] }
  0xd4   : > { %988 = vst [vmem:[%s1480_s6 + $0x60] sm:$0xff] %v956_v7  ;;  %v853_v22 = vadd.f32 %v1469_v25, %v817_v16  ;;  %v861_v23 = vadd.f32 %v1469_v25, %v825_v17  ;;  %v895_v7 = vld [vmem:[%s1464_s26 + $0x78] sm:$0xff] }
  0xd5   : > { %v932_v26 = vadd.f32 %v900_v14, %v868_v18  ;;  %v940_v27 = vadd.f32 %v908_v15, %v876_v19 }
  0xd6   : > { %v917_v28 = vadd.f32 %v885_v20, %v853_v22  ;;  %v925_v29 = vadd.f32 %v893_v21, %v861_v23  ;;  %v903_v22 = vld [vmem:[%s1464_s26 + $0xb8] sm:$0xff] }
  0xd7   : > { %v964_v30 = vmax.f32 %v932_v26, 0.0  ;;  %v972_v31 = vmax.f32 %v940_v27, 0.0  ;;  %v911_v23 = vld [vmem:[%s1464_s26 + $0xf8] sm:$0xff] }
  0xd8   : > { %v949_v32 = vmax.f32 %v917_v28, 0.0  ;;  %v957_v33 = vmax.f32 %v925_v29, 0.0  ;;  %v681_v34 = vpop.f32.mrf.mxu2  ;;  %v701_v35 = vpop.f32.mrf.mxu3 }
  0xd9   : > { %996 = vst [vmem:[%s1480_s6 + $0xa0] sm:$0xff] %v964_v30  ;;  %v833_v36 = vmul.f32 %v1459_v24, %v681_v34  ;;  %v841_v37 = vmul.f32 %v1459_v24, %v701_v35  ;;  %v644_v38 = vpop.f32.mrf.mxu0  ;;  %v664_v39 = vpop.f32.mrf.mxu1 }
  0xda   : > { %1004 = vst [vmem:[%s1480_s6 + $0xe0] sm:$0xff] %v972_v31  ;;  %v818_v42 = vmul.f32 %v1459_v24, %v644_v38  ;;  %v826_v43 = vmul.f32 %v1459_v24, %v664_v39 }
  0xdb   : > { %981 = vst [vmem:[%s1480_s6 + $0x28] sm:$0xff] %v949_v32  ;;  %v869_v44 = vadd.f32 %v1469_v25, %v833_v36  ;;  %v877_v45 = vadd.f32 %v1469_v25, %v841_v37 }
  0xdc   : > { %989 = vst [vmem:[%s1480_s6 + $0x68] sm:$0xff] %v957_v33  ;;  %v854_v48 = vadd.f32 %v1469_v25, %v818_v42  ;;  %v862_v49 = vadd.f32 %v1469_v25, %v826_v43 }
  0xdd   : > { %v933_v50 = vadd.f32 %v901_v40, %v869_v44  ;;  %v941_v51 = vadd.f32 %v909_v41, %v877_v45 }
  0xde   : > { %v918_v52 = vadd.f32 %v886_v46, %v854_v48  ;;  %v926_v53 = vadd.f32 %v894_v47, %v862_v49 }
  0xdf   : > { %v965_v54 = vmax.f32 %v933_v50, 0.0  ;;  %v973_v55 = vmax.f32 %v941_v51, 0.0 }
  0xe0   : > { %v950_v56 = vmax.f32 %v918_v52, 0.0  ;;  %v958_v57 = vmax.f32 %v926_v53, 0.0  ;;  %v684_v58 = vpop.f32.mrf.mxu2  ;;  %v704_v59 = vpop.f32.mrf.mxu3 }
  0xe1   : > { %997 = vst [vmem:[%s1480_s6 + $0xa8] sm:$0xff] %v965_v54  ;;  %v834_v60 = vmul.f32 %v1459_v24, %v684_v58  ;;  %v842_v61 = vmul.f32 %v1459_v24, %v704_v59  ;;  %v646_v62 = vpop.f32.mrf.mxu0  ;;  %v666_v63 = vpop.f32.mrf.mxu1 }
  0xe2   : > { %1005 = vst [vmem:[%s1480_s6 + $0xe8] sm:$0xff] %v973_v55  ;;  %v819_v2 = vmul.f32 %v1459_v24, %v646_v62  ;;  %v827_v3 = vmul.f32 %v1459_v24, %v666_v63 }
  0xe3   : > { %982 = vst [vmem:[%s1480_s6 + $0x30] sm:$0xff] %v950_v56  ;;  %v870_v4 = vadd.f32 %v1469_v25, %v834_v60  ;;  %v878_v5 = vadd.f32 %v1469_v25, %v842_v61 }
  0xe4   : > { %990 = vst [vmem:[%s1480_s6 + $0x70] sm:$0xff] %v958_v57  ;;  %v855_v8 = vadd.f32 %v1469_v25, %v819_v2  ;;  %v863_v9 = vadd.f32 %v1469_v25, %v827_v3 }
  0xe5   : > { %v934_v10 = vadd.f32 %v902_v0, %v870_v4  ;;  %v942_v11 = vadd.f32 %v910_v1, %v878_v5 }
  0xe6   : > { %v919_v12 = vadd.f32 %v887_v6, %v855_v8  ;;  %v927_v13 = vadd.f32 %v895_v7, %v863_v9 }
  0xe7   : > { %v966_v14 = vmax.f32 %v934_v10, 0.0  ;;  %v974_v15 = vmax.f32 %v942_v11, 0.0 }
  0xe8   : > { %v951_v16 = vmax.f32 %v919_v12, 0.0  ;;  %v959_v17 = vmax.f32 %v927_v13, 0.0  ;;  %v686_v18 = vpop.f32.mrf.mxu2  ;;  %v706_v19 = vpop.f32.mrf.mxu3 }
  0xe9   : > { %998 = vst [vmem:[%s1480_s6 + $0xb0] sm:$0xff] %v966_v14  ;;  %v835_v20 = vmul.f32 %v1459_v24, %v686_v18  ;;  %v843_v21 = vmul.f32 %v1459_v24, %v706_v19 }
  0xea   : > { %1006 = vst [vmem:[%s1480_s6 + $0xf0] sm:$0xff] %v974_v15 }
  0xeb   : > { %983 = vst [vmem:[%s1480_s6 + $0x38] sm:$0xff] %v951_v16  ;;  %v871_v26 = vadd.f32 %v1469_v25, %v835_v20  ;;  %v879_v27 = vadd.f32 %v1469_v25, %v843_v21 }
  0xec   : > { %991 = vst [vmem:[%s1480_s6 + $0x78] sm:$0xff] %v959_v17 }
  0xed   : > { %v935_v28 = vadd.f32 %v903_v22, %v871_v26  ;;  %v943_v29 = vadd.f32 %v911_v23, %v879_v27 }
  0xef   : > { %v967_v30 = vmax.f32 %v935_v28, 0.0  ;;  %v975_v31 = vmax.f32 %v943_v29, 0.0 }
  0xf1   : > { %999 = vst [vmem:[%s1480_s6 + $0xb8] sm:$0xff] %v967_v30 }
  0xf2   : > { %1007 = vst [vmem:[%s1480_s6 + $0xf8] sm:$0xff] %v975_v31 }
  0xf3 PF: > { %s15_s20 = sadd.s32 1, %s1354_s20   ;;  %s1619_s18 = smov %s1350_s19 }
  0xf4   : > { %p12_p5 = scmp.ge.s32.totalorder %s15_s20, 4   ;;  %s1620_s19 = smov %s1622_s21 }
  0xf6   :  { %14 = sbr.rel (!%p12_p5) target bundleno = 2 (0x2), region = 90 }

// kernel: swav_resnet_forward.41
= control target key start
LH: loop header
LB: loop body
LE: loop exit
PB: predicated region body
PF: predicated region fallthrough
CT: control target
= control target key end

     0   :  { %s1332_s1 = inlined_call_operand.vmem [shape: bf16[384,128], index: 1, kind: input, shape index: {}]   ;;  %s1333_s0 = inlined_call_operand.vmem [shape: bf16[128,384], index: 0, kind: input, shape index: {}]   ;;  %s1334_s2 = inlined_call_operand.vmem [shape: f32[1,128], index: 2, kind: input, shape index: {}]   ;;  %s1335_s3 = inlined_call_operand.vmem [shape: f32[1,128], index: 3, kind: input, shape index: {}]   ;;  %s1336_s4 = inlined_call_operand.vmem [shape: f32[128,128], index: 4, kind: output, shape index: {}]  }
   0x1   :  { %v902_v0 = vld [vmem:[%s1332_s1 + $0x38] sm:$0xff]  ;;  %v901_v3 = vld [vmem:[%s1332_s1 + $0x30] sm:$0xff]  ;;  %v900_v6 = vld [vmem:[%s1332_s1 + $0x28] sm:$0xff] }
   0x2   :  { %v976_v1 = vld [vmem:[%s1332_s1 + $0x78] sm:$0xff]  ;;  %405 = vmatpush.bf16.msra.mxu0 %v902_v0  ;;  %919 = vmatpush.bf16.msra.mxu3 %v902_v0  ;;  %v991_v4 = vld [vmem:[%s1332_s1 + $0x70] sm:$0xff]  ;;  %v908_v7 = vld [vmem:[%s1332_s1 + $0x68] sm:$0xff] }
   0x3   :  { %v981_v2 = vld [vmem:[%s1332_s1 + $0xb8] sm:$0xff]  ;;  %454 = vmatpush.bf16.msra.mxu1 %v976_v1  ;;  %v996_v5 = vld [vmem:[%s1332_s1 + $0xb0] sm:$0xff]  ;;  %v1009_v8 = vld [vmem:[%s1332_s1 + $0xa8] sm:$0xff] }
   0x4   :  { %503 = vmatpush.bf16.msra.mxu2 %v981_v2  ;;  %v899_v9 = vld [vmem:[%s1332_s1 + $0x20] sm:$0xff]  ;;  %v898_v12 = vld [vmem:[%s1332_s1 + $0x18] sm:$0xff]  ;;  %v897_v15 = vld [vmem:[%s1332_s1 + $0x10] sm:$0xff] }
   0x5   :  { %v1018_v10 = vld [vmem:[%s1332_s1 + $0x60] sm:$0xff]  ;;  %v906_v13 = vld [vmem:[%s1332_s1 + $0x58] sm:$0xff]  ;;  %v905_v16 = vld [vmem:[%s1332_s1 + $0x50] sm:$0xff] }
   0x6   :  { %406 = vmatpush.bf16.msra.mxu0 %v901_v3  ;;  %920 = vmatpush.bf16.msra.mxu3 %v901_v3  ;;  %v1023_v11 = vld [vmem:[%s1332_s1 + $0xa0] sm:$0xff]  ;;  %v1036_v14 = vld [vmem:[%s1332_s1 + $0x98] sm:$0xff]  ;;  %v1048_v17 = vld [vmem:[%s1332_s1 + $0x90] sm:$0xff] }
   0x7   :  { %455 = vmatpush.bf16.msra.mxu1 %v991_v4  ;;  %v896_v18 = vld [vmem:[%s1332_s1 + $0x8] sm:$0xff]  ;;  %v895_v21 = vld [vmem:[%s1332_s1] sm:$0xff]  ;;  %v753_v26 = vld [vmem:[%s1333_s0 + $0x90] sm:$0xf] }
   0x8   :  { %504 = vmatpush.bf16.msra.mxu2 %v996_v5  ;;  %v904_v19 = vld [vmem:[%s1332_s1 + $0x48] sm:$0xff]  ;;  %v903_v22 = vld [vmem:[%s1332_s1 + $0x40] sm:$0xff]  ;;  %v890_v27 = vld [vmem:[%s1333_s0 + $0x98] sm:$0xf0] }
   0x9   :  { %v1060_v20 = vld [vmem:[%s1332_s1 + $0x88] sm:$0xff]  ;;  %v1071_v23 = vld [vmem:[%s1332_s1 + $0x80] sm:$0xff]  ;;  %v683_v29 = vld [vmem:[%s1333_s0 + $0xc] sm:$0xf0]  ;;  %v754_v33 = vor.u32 %v890_v27, %v753_v26 }
   0xa   :  { %407 = vmatpush.bf16.msra.mxu0 %v900_v6  ;;  %921 = vmatpush.bf16.msra.mxu3 %v900_v6  ;;  %v681_v24 = vld [vmem:[%s1333_s0] sm:$0xf]  ;;  %v872_v25 = vld [vmem:[%s1333_s0 + $0x8] sm:$0xf0]  ;;  %v871_v28 = vld [vmem:[%s1333_s0 + $0x4] sm:$0xf] }
   0xb   :  { %456 = vmatpush.bf16.msra.mxu1 %v908_v7  ;;  %v689_v30 = vld [vmem:[%s1333_s0 + $0x8] sm:$0xf]  ;;  %v873_v31 = vld [vmem:[%s1333_s0 + $0x10] sm:$0xf0]  ;;  %v682_v32 = vor.u32 %v872_v25, %v681_v24  ;;  %v686_v34 = vor.u32 %v871_v28, %v683_v29  ;;  %v693_v36 = vld [vmem:[%s1333_s0 + $0x18] sm:$0xf] }
   0xc   :  { %505 = vmatpush.bf16.msra.mxu2 %v1009_v8  ;;  %v690_v35 = vor.u32 %v873_v31, %v689_v30  ;;  %v875_v37 = vld [vmem:[%s1333_s0 + $0x20] sm:$0xf0]  ;;  %v765_v38 = vld [vmem:[%s1333_s0 + $0xa8] sm:$0xf]  ;;  %v893_v39 = vld [vmem:[%s1333_s0 + $0xb0] sm:$0xf0] }
   0xd   :  { %v874_v40 = vld [vmem:[%s1333_s0 + $0x1c] sm:$0xf]  ;;  %v695_v41 = vld [vmem:[%s1333_s0 + $0x24] sm:$0xf0]  ;;  %v701_v42 = vld [vmem:[%s1333_s0 + $0x20] sm:$0xf]  ;;  %v694_v44 = vor.u32 %v875_v37, %v693_v36  ;;  %v766_v45 = vor.u32 %v893_v39, %v765_v38 }
   0xe   :  { %408 = vmatpush.bf16.msra.mxu0 %v899_v9  ;;  %922 = vmatpush.bf16.msra.mxu3 %v899_v9  ;;  %v876_v43 = vld [vmem:[%s1333_s0 + $0x28] sm:$0xf0]  ;;  %v698_v46 = vor.u32 %v874_v40, %v695_v41  ;;  %v705_v48 = vld [vmem:[%s1333_s0 + $0x30] sm:$0xf]  ;;  %v878_v49 = vld [vmem:[%s1333_s0 + $0x38] sm:$0xf0] }
   0xf   :  { %457 = vmatpush.bf16.msra.mxu1 %v1018_v10  ;;  %v702_v47 = vor.u32 %v876_v43, %v701_v42  ;;  %v877_v50 = vld [vmem:[%s1333_s0 + $0x34] sm:$0xf]  ;;  %v755_v52 = vld [vmem:[%s1333_s0 + $0x9c] sm:$0xf0]  ;;  %v713_v54 = vld [vmem:[%s1333_s0 + $0x38] sm:$0xf]  ;;  %v706_v56 = vor.u32 %v878_v49, %v705_v48 }
  0x10   :  { %506 = vmatpush.bf16.msra.mxu2 %v1023_v11  ;;  %v889_v51 = vld [vmem:[%s1333_s0 + $0x94] sm:$0xf]  ;;  %v707_v53 = vld [vmem:[%s1333_s0 + $0x3c] sm:$0xf0]  ;;  %v879_v55 = vld [vmem:[%s1333_s0 + $0x40] sm:$0xf0] }
  0x11   :  { %v758_v57 = vor.u32 %v889_v51, %v755_v52  ;;  %v710_v58 = vor.u32 %v877_v50, %v707_v53  ;;  %v714_v59 = vor.u32 %v879_v55, %v713_v54  ;;  %v717_v60 = vld [vmem:[%s1333_s0 + $0x48] sm:$0xf]  ;;  %v881_v61 = vld [vmem:[%s1333_s0 + $0x50] sm:$0xf0]  ;;  %v880_v62 = vld [vmem:[%s1333_s0 + $0x4c] sm:$0xf] }
  0x12   :  { %409 = vmatpush.bf16.msra.mxu0 %v898_v12  ;;  %923 = vmatpush.bf16.msra.mxu3 %v898_v12  ;;  %v892_v63 = vld [vmem:[%s1333_s0 + $0xac] sm:$0xf]  ;;  %v767_v0 = vld [vmem:[%s1333_s0 + $0xb4] sm:$0xf0]  ;;  %v882_v3 = vld [vmem:[%s1333_s0 + $0x58] sm:$0xf0] }
  0x13   :  { %458 = vmatpush.bf16.msra.mxu1 %v906_v13  ;;  %v884_v9 = vld [vmem:[%s1333_s0 + $0x68] sm:$0xf0]  ;;  %v891_v12 = vld [vmem:[%s1333_s0 + $0xa0] sm:$0xf0]  ;;  %v894_v24 = vld [vmem:[%s1333_s0 + $0xb8] sm:$0xf0] }
  0x14   :  { %507 = vmatpush.bf16.msra.mxu2 %v1036_v14  ;;  %v743_v25 = vld [vmem:[%s1333_s0 + $0x84] sm:$0xf0]  ;;  %v749_v26 = vld [vmem:[%s1333_s0 + $0x80] sm:$0xf]  ;;  %v888_v27 = vld [vmem:[%s1333_s0 + $0x88] sm:$0xf0] }
  0x15   :  { %v750_v31 = vor.u32 %v888_v27, %v749_v26  ;;  %v1235_v36 = vld [vmem:[%s1334_s2] ss:$0 sm:$0xff] }
  0x16   :  { %410 = vmatpush.bf16.msra.mxu0 %v897_v15  ;;  %924 = vmatpush.bf16.msra.mxu3 %v897_v15  ;;  %v885_v15 = vld [vmem:[%s1333_s0 + $0x70] sm:$0xf0]  ;;  %v1240_v39 = vld [vmem:[%s1335_s3] ss:$0 sm:$0xff] }
  0x17   :  { %459 = vmatpush.bf16.msra.mxu1 %v905_v16 }
  0x18   :  { %508 = vmatpush.bf16.msra.mxu2 %v1048_v17 }
  0x1a   :  { %411 = vmatpush.bf16.msra.mxu0 %v896_v18  ;;  %925 = vmatpush.bf16.msra.mxu3 %v896_v18 }
  0x1b   :  { %460 = vmatpush.bf16.msra.mxu1 %v904_v19 }
  0x1c   :  { %509 = vmatpush.bf16.msra.mxu2 %v1060_v20 }
  0x1e   :  { %412 = vmatpush.bf16.msra.mxu0 %v895_v21  ;;  %926 = vmatpush.bf16.msra.mxu3 %v895_v21  ;;  %v887_v21 = vld [vmem:[%s1333_s0 + $0x80] sm:$0xf0] }
  0x1f   :  { %461 = vmatpush.bf16.msra.mxu1 %v903_v22 }
  0x20   :  { %510 = vmatpush.bf16.msra.mxu2 %v1071_v23 }
  0x21   :  { %413 = vmatmul.bf16.vlgmr.msra.gmra.mxu0 %v682_v32  ;;  %443 = vmatmul.bf16.vlgmr.msra.gmra.mxu3 %v754_v33 }
  0x22   :  { %927 = vmatpush.bf16.msrb.mxu3 %v976_v1  ;;  %462 = vmatmul.bf16.vlgmr.msra.gmra.mxu1 %v686_v34  ;;  %v719_v1 = vld [vmem:[%s1333_s0 + $0x54] sm:$0xf0] }
  0x23   :  { %511 = vmatmul.bf16.vlgmr.msra.gmra.mxu2 %v690_v35  ;;  %v722_v6 = vor.u32 %v880_v62, %v719_v1 }
  0x26   :  { %928 = vmatpush.bf16.msrb.mxu3 %v991_v4  ;;  %v718_v4 = vor.u32 %v881_v61, %v717_v60 }
  0x2a   :  { %929 = vmatpush.bf16.msrb.mxu3 %v908_v7 }
  0x2e   :  { %930 = vmatpush.bf16.msrb.mxu3 %v1018_v10  ;;  %v883_v10 = vld [vmem:[%s1333_s0 + $0x64] sm:$0xf] }
  0x31   :  { %418 = vmatmul.bf16.gmra.mxu0 %v694_v44  ;;  %448 = vmatmul.bf16.gmra.mxu3 %v766_v45 }
  0x32   :  { %931 = vmatpush.bf16.msrb.mxu3 %v906_v13  ;;  %467 = vmatmul.bf16.gmra.mxu1 %v698_v46  ;;  %v731_v13 = vld [vmem:[%s1333_s0 + $0x6c] sm:$0xf0] }
  0x33   :  { %516 = vmatmul.bf16.gmra.mxu2 %v702_v47  ;;  %v734_v18 = vor.u32 %v883_v10, %v731_v13 }
  0x36   :  { %932 = vmatpush.bf16.msrb.mxu3 %v905_v16 }
  0x3a   :  { %933 = vmatpush.bf16.msrb.mxu3 %v904_v19 }
  0x3e   :  { %934 = vmatpush.bf16.msrb.mxu3 %v903_v22  ;;  %v886_v22 = vld [vmem:[%s1333_s0 + $0x7c] sm:$0xf] }
  0x3f   :  { %v746_v30 = vor.u32 %v886_v22, %v743_v25 }
  0x41   :  { %423 = vmatmul.bf16.gmra.mxu0 %v706_v56  ;;  %492 = vmatmul.bf16.vlgmr.msrb.gmra.mxu3 %v758_v57 }
  0x42   :  { %935 = vmatpush.bf16.msra.mxu3 %v981_v2  ;;  %472 = vmatmul.bf16.gmra.mxu1 %v710_v58  ;;  %v725_v2 = vld [vmem:[%s1333_s0 + $0x50] sm:$0xf] }
  0x43   :  { %521 = vmatmul.bf16.gmra.mxu2 %v714_v59  ;;  %v726_v7 = vor.u32 %v882_v3, %v725_v2 }
  0x46   :  { %936 = vmatpush.bf16.msra.mxu3 %v996_v5  ;;  %v770_v5 = vor.u32 %v892_v63, %v767_v0 }
  0x4a   :  { %937 = vmatpush.bf16.msra.mxu3 %v1009_v8  ;;  %v729_v8 = vld [vmem:[%s1333_s0 + $0x60] sm:$0xf] }
  0x4b   :  { %v730_v16 = vor.u32 %v884_v9, %v729_v8 }
  0x4e   :  { %938 = vmatpush.bf16.msra.mxu3 %v1023_v11  ;;  %v761_v11 = vld [vmem:[%s1333_s0 + $0x98] sm:$0xf] }
  0x51   :  { %428 = vmatmul.bf16.gmra.mxu0 %v718_v4  ;;  %497 = vmatmul.bf16.gmra.mxu3 %v770_v5 }
  0x52   :  { %939 = vmatpush.bf16.msra.mxu3 %v1036_v14  ;;  %477 = vmatmul.bf16.gmra.mxu1 %v722_v6  ;;  %v737_v14 = vld [vmem:[%s1333_s0 + $0x68] sm:$0xf] }
  0x53   :  { %526 = vmatmul.bf16.gmra.mxu2 %v726_v7  ;;  %v738_v19 = vor.u32 %v885_v15, %v737_v14 }
  0x56   :  { %940 = vmatpush.bf16.msra.mxu3 %v1048_v17  ;;  %v762_v17 = vor.u32 %v891_v12, %v761_v11 }
  0x5a   :  { %941 = vmatpush.bf16.msra.mxu3 %v1060_v20  ;;  %v741_v20 = vld [vmem:[%s1333_s0 + $0x78] sm:$0xf] }
  0x5b   :  { %v742_v28 = vor.u32 %v887_v21, %v741_v20 }
  0x5e   :  { %942 = vmatpush.bf16.msra.mxu3 %v1071_v23  ;;  %v773_v23 = vld [vmem:[%s1333_s0 + $0xb0] sm:$0xf] }
  0x5f   :  { %v774_v29 = vor.u32 %v894_v24, %v773_v23 }
  0x61   :  { %433 = vmatmul.bf16.gmra.mxu0 %v730_v16  ;;  %541 = vmatmul.bf16.vlgmr.msra.gmra.mxu3 %v762_v17 }
  0x62   :  { %482 = vmatmul.bf16.gmra.mxu1 %v734_v18 }
  0x63   :  { %531 = vmatmul.bf16.gmra.mxu2 %v738_v19 }
  0x71   :  { %438 = vmatmul.bf16.gmra.mxu0 %v742_v28  ;;  %546 = vmatmul.bf16.gmra.mxu3 %v774_v29 }
  0x72   :  { %487 = vmatmul.bf16.gmra.mxu1 %v746_v30 }
  0x73   :  { %536 = vmatmul.bf16.gmra.mxu2 %v750_v31 }
  0x9e   :  { %v414_v32 = vpop.f32.mrf.mxu0 }
  0x9f   :  { %v463_v33 = vpop.f32.mrf.mxu1 }
  0xa0   :  { %v464_v34 = vadd.f32 %v463_v33, %v414_v32 }
  0xa4   :  { %v1230_v35 = vpop.f32.mrf.mxu3 }
  0xa6   :  { %v512_v37 = vpop.f32.mrf.mxu2  ;;  %v416_v40 = vpop.f32.mrf.mxu0 }
  0xa7   :  { %v513_v38 = vadd.f32 %v512_v37, %v464_v34  ;;  %v465_v41 = vpop.f32.mrf.mxu1 }
  0xa8   :  { %v466_v45 = vadd.f32 %v465_v41, %v416_v40 }
  0xa9   :  { %v607_v42 = vmul.f32 %v1235_v36, %v513_v38 }
  0xab   :  { %v627_v43 = vadd.f32 %v1240_v39, %v607_v42 }
  0xac   :  { %v1244_v46 = vpop.f32.mrf.mxu3 }
  0xad   :  { %v643_v44 = vmax.f32 %v627_v43, 0.0 }
  0xae   :  { %v514_v47 = vpop.f32.mrf.mxu2  ;;  %v419_v49 = vpop.f32.mrf.mxu0 }
  0xaf   :  { %659 = vst [vmem:[%s1336_s4] sm:$0xff] %v643_v44  ;;  %v515_v48 = vadd.f32 %v514_v47, %v466_v45  ;;  %v468_v50 = vpop.f32.mrf.mxu1 }
  0xb0   :  { %v469_v53 = vadd.f32 %v468_v50, %v419_v49 }
  0xb1   :  { %v608_v51 = vmul.f32 %v1235_v36, %v515_v48 }
  0xb3   :  { %v628_v52 = vadd.f32 %v1240_v39, %v608_v51 }
  0xb4   :  { %v1251_v55 = vpop.f32.mrf.mxu3 }
  0xb5   :  { %v644_v54 = vmax.f32 %v628_v52, 0.0 }
  0xb6   :  { %v517_v56 = vpop.f32.mrf.mxu2  ;;  %v421_v58 = vpop.f32.mrf.mxu0 }
  0xb7   :  { %660 = vst [vmem:[%s1336_s4 + $0x8] sm:$0xff] %v644_v54  ;;  %v518_v57 = vadd.f32 %v517_v56, %v469_v53  ;;  %v470_v59 = vpop.f32.mrf.mxu1 }
  0xb8   :  { %v471_v63 = vadd.f32 %v470_v59, %v421_v58 }
  0xb9   :  { %v609_v60 = vmul.f32 %v1235_v36, %v518_v57 }
  0xbb   :  { %v629_v61 = vadd.f32 %v1240_v39, %v609_v60 }
  0xbc   :  { %v1258_v0 = vpop.f32.mrf.mxu3 }
  0xbd   :  { %v645_v62 = vmax.f32 %v629_v61, 0.0 }
  0xbe   :  { %v519_v1 = vpop.f32.mrf.mxu2  ;;  %v424_v3 = vpop.f32.mrf.mxu0 }
  0xbf   :  { %661 = vst [vmem:[%s1336_s4 + $0x10] sm:$0xff] %v645_v62  ;;  %v520_v2 = vadd.f32 %v519_v1, %v471_v63  ;;  %v473_v4 = vpop.f32.mrf.mxu1 }
  0xc0   :  { %v474_v7 = vadd.f32 %v473_v4, %v424_v3 }
  0xc1   :  { %v610_v5 = vmul.f32 %v1235_v36, %v520_v2 }
  0xc3   :  { %v630_v6 = vadd.f32 %v1240_v39, %v610_v5 }
  0xc4   :  { %v493_v9 = vpop.f32.mrf.mxu3 }
  0xc5   :  { %v646_v8 = vmax.f32 %v630_v6, 0.0  ;;  %v494_v48 = vadd.f32 %v493_v9, %v1230_v35 }
  0xc6   :  { %v522_v10 = vpop.f32.mrf.mxu2  ;;  %v426_v12 = vpop.f32.mrf.mxu0 }
  0xc7   :  { %662 = vst [vmem:[%s1336_s4 + $0x18] sm:$0xff] %v646_v8  ;;  %v523_v11 = vadd.f32 %v522_v10, %v474_v7  ;;  %v475_v13 = vpop.f32.mrf.mxu1 }
  0xc8   :  { %v476_v17 = vadd.f32 %v475_v13, %v426_v12 }
  0xc9   :  { %v611_v14 = vmul.f32 %v1235_v36, %v523_v11 }
  0xcb   :  { %v631_v15 = vadd.f32 %v1240_v39, %v611_v14 }
  0xcc   :  { %v495_v18 = vpop.f32.mrf.mxu3 }
  0xcd   :  { %v647_v16 = vmax.f32 %v631_v15, 0.0  ;;  %v496_v35 = vadd.f32 %v495_v18, %v1244_v46 }
  0xce   :  { %v524_v19 = vpop.f32.mrf.mxu2  ;;  %v429_v21 = vpop.f32.mrf.mxu0 }
  0xcf   :  { %663 = vst [vmem:[%s1336_s4 + $0x20] sm:$0xff] %v647_v16  ;;  %v525_v20 = vadd.f32 %v524_v19, %v476_v17  ;;  %v478_v22 = vpop.f32.mrf.mxu1 }
  0xd0   :  { %v479_v25 = vadd.f32 %v478_v22, %v429_v21 }
  0xd1   :  { %v612_v23 = vmul.f32 %v1235_v36, %v525_v20 }
  0xd3   :  { %v632_v24 = vadd.f32 %v1240_v39, %v612_v23 }
  0xd4   :  { %v498_v27 = vpop.f32.mrf.mxu3 }
  0xd5   :  { %v648_v26 = vmax.f32 %v632_v24, 0.0  ;;  %v499_v11 = vadd.f32 %v498_v27, %v1251_v55 }
  0xd6   :  { %v527_v28 = vpop.f32.mrf.mxu2  ;;  %v431_v30 = vpop.f32.mrf.mxu0 }
  0xd7   :  { %664 = vst [vmem:[%s1336_s4 + $0x28] sm:$0xff] %v648_v26  ;;  %v528_v29 = vadd.f32 %v527_v28, %v479_v25  ;;  %v480_v31 = vpop.f32.mrf.mxu1 }
  0xd8   :  { %v481_v37 = vadd.f32 %v480_v31, %v431_v30 }
  0xd9   :  { %v613_v32 = vmul.f32 %v1235_v36, %v528_v29 }
  0xdb   :  { %v633_v33 = vadd.f32 %v1240_v39, %v613_v32 }
  0xdc   :  { %v500_v38 = vpop.f32.mrf.mxu3 }
  0xdd   :  { %v649_v34 = vmax.f32 %v633_v33, 0.0  ;;  %v501_v23 = vadd.f32 %v500_v38, %v1258_v0 }
  0xde   :  { %v529_v40 = vpop.f32.mrf.mxu2  ;;  %v434_v42 = vpop.f32.mrf.mxu0 }
  0xdf   :  { %665 = vst [vmem:[%s1336_s4 + $0x30] sm:$0xff] %v649_v34  ;;  %v530_v41 = vadd.f32 %v529_v40, %v481_v37  ;;  %v483_v43 = vpop.f32.mrf.mxu1 }
  0xe0   :  { %v484_v47 = vadd.f32 %v483_v43, %v434_v42 }
  0xe1   :  { %v614_v44 = vmul.f32 %v1235_v36, %v530_v41 }
  0xe3   :  { %v634_v45 = vadd.f32 %v1240_v39, %v614_v44 }
  0xe4   :  { %v542_v50 = vpop.f32.mrf.mxu3 }
  0xe5   :  { %v650_v49 = vmax.f32 %v634_v45, 0.0  ;;  %v543_v52 = vadd.f32 %v542_v50, %v494_v48 }
  0xe6   :  { %v532_v51 = vpop.f32.mrf.mxu2  ;;  %v436_v54 = vpop.f32.mrf.mxu0 }
  0xe7   :  { %666 = vst [vmem:[%s1336_s4 + $0x38] sm:$0xff] %v650_v49  ;;  %v533_v53 = vadd.f32 %v532_v51, %v484_v47  ;;  %v619_v56 = vmul.f32 %v1235_v36, %v543_v52  ;;  %v485_v57 = vpop.f32.mrf.mxu1 }
  0xe8   :  { %v486_v63 = vadd.f32 %v485_v57, %v436_v54 }
  0xe9   :  { %v615_v58 = vmul.f32 %v1235_v36, %v533_v53  ;;  %v639_v59 = vadd.f32 %v1240_v39, %v619_v56 }
  0xeb   :  { %v635_v60 = vadd.f32 %v1240_v39, %v615_v58  ;;  %v655_v61 = vmax.f32 %v639_v59, 0.0 }
  0xec   :  { %v544_v1 = vpop.f32.mrf.mxu3 }
  0xed   :  { %v651_v62 = vmax.f32 %v635_v60, 0.0  ;;  %671 = vst [vmem:[%s1336_s4 + $0x60] sm:$0xff] %v655_v61  ;;  %v545_v3 = vadd.f32 %v544_v1, %v496_v35 }
  0xee   :  { %v534_v2 = vpop.f32.mrf.mxu2  ;;  %v439_v6 = vpop.f32.mrf.mxu0 }
  0xef   :  { %667 = vst [vmem:[%s1336_s4 + $0x40] sm:$0xff] %v651_v62  ;;  %v535_v4 = vadd.f32 %v534_v2, %v486_v63  ;;  %v620_v5 = vmul.f32 %v1235_v36, %v545_v3  ;;  %v488_v7 = vpop.f32.mrf.mxu1 }
  0xf0   :  { %v489_v10 = vadd.f32 %v488_v7, %v439_v6 }
  0xf1   :  { %v616_v46 = vmul.f32 %v1235_v36, %v535_v4  ;;  %v640_v8 = vadd.f32 %v1240_v39, %v620_v5 }
  0xf3   :  { %v636_v9 = vadd.f32 %v1240_v39, %v616_v46  ;;  %v656_v12 = vmax.f32 %v640_v8, 0.0 }
  0xf4   :  { %v547_v14 = vpop.f32.mrf.mxu3 }
  0xf5   :  { %v652_v13 = vmax.f32 %v636_v9, 0.0  ;;  %672 = vst [vmem:[%s1336_s4 + $0x68] sm:$0xff] %v656_v12  ;;  %v548_v16 = vadd.f32 %v547_v14, %v499_v11 }
  0xf6   :  { %v537_v15 = vpop.f32.mrf.mxu2  ;;  %v441_v20 = vpop.f32.mrf.mxu0 }
  0xf7   :  { %668 = vst [vmem:[%s1336_s4 + $0x48] sm:$0xff] %v652_v13  ;;  %v538_v17 = vadd.f32 %v537_v15, %v489_v10  ;;  %v621_v18 = vmul.f32 %v1235_v36, %v548_v16  ;;  %v490_v21 = vpop.f32.mrf.mxu1 }
  0xf8   :  { %v491_v26 = vadd.f32 %v490_v21, %v441_v20 }
  0xf9   :  { %v617_v19 = vmul.f32 %v1235_v36, %v538_v17  ;;  %v641_v55 = vadd.f32 %v1240_v39, %v621_v18 }
  0xfb   :  { %v637_v22 = vadd.f32 %v1240_v39, %v617_v19  ;;  %v657_v24 = vmax.f32 %v641_v55, 0.0 }
  0xfc   :  { %v549_v27 = vpop.f32.mrf.mxu3 }
  0xfd   :  { %v653_v25 = vmax.f32 %v637_v22, 0.0  ;;  %673 = vst [vmem:[%s1336_s4 + $0x70] sm:$0xff] %v657_v24  ;;  %v550_v29 = vadd.f32 %v549_v27, %v501_v23 }
  0xfe   :  { %v539_v28 = vpop.f32.mrf.mxu2 }
  0xff   :  { %669 = vst [vmem:[%s1336_s4 + $0x50] sm:$0xff] %v653_v25  ;;  %v540_v30 = vadd.f32 %v539_v28, %v491_v26  ;;  %v622_v31 = vmul.f32 %v1235_v36, %v550_v29 }
 0x101   :  { %v618_v32 = vmul.f32 %v1235_v36, %v540_v30  ;;  %v642_v0 = vadd.f32 %v1240_v39, %v622_v31 }
 0x103   :  { %v638_v33 = vadd.f32 %v1240_v39, %v618_v32  ;;  %v658_v34 = vmax.f32 %v642_v0, 0.0 }
 0x105   :  { %v654_v37 = vmax.f32 %v638_v33, 0.0  ;;  %674 = vst [vmem:[%s1336_s4 + $0x78] sm:$0xff] %v658_v34 }
 0x107   :  { %670 = vst [vmem:[%s1336_s4 + $0x58] sm:$0xff] %v654_v37 }

// kernel: swav_resnet_forward.42
= control target key start
LH: loop header
LB: loop body
LE: loop exit
PB: predicated region body
PF: predicated region fallthrough
CT: control target
= control target key end

     0   :  { %s592_s1 = inlined_call_operand.vmem [shape: bf16[128,128], index: 1, kind: input, shape index: {}]   ;;  %s593_s2 = inlined_call_operand.vmem [shape: f32[1,128], index: 2, kind: input, shape index: {}]   ;;  %s594_s3 = inlined_call_operand.vmem [shape: f32[1,128], index: 3, kind: input, shape index: {}]   ;;  %s595_s0 = inlined_call_operand.vmem [shape: bf16[128,128], index: 0, kind: input, shape index: {}]   ;;  %s596_s4 = inlined_call_operand.vmem [shape: f32[128,128], index: 4, kind: output, shape index: {}]  }
   0x1   :  { %v420_v0 = vld [vmem:[%s592_s1 + $0x38] sm:$0xff]  ;;  %v419_v1 = vld [vmem:[%s592_s1 + $0x30] sm:$0xff]  ;;  %v418_v2 = vld [vmem:[%s592_s1 + $0x28] sm:$0xff] }
   0x2   :  { %181 = vmatpush.bf16.msra.mxu0 %v420_v0  ;;  %421 = vmatpush.bf16.msra.mxu1 %v420_v0  ;;  %v417_v3 = vld [vmem:[%s592_s1 + $0x20] sm:$0xff]  ;;  %v416_v4 = vld [vmem:[%s592_s1 + $0x18] sm:$0xff]  ;;  %v415_v5 = vld [vmem:[%s592_s1 + $0x10] sm:$0xff] }
   0x3   :  { %422 = vmatpush.bf16.msra.mxu2 %v420_v0  ;;  %423 = vmatpush.bf16.msra.mxu3 %v420_v0  ;;  %v414_v6 = vld [vmem:[%s592_s1 + $0x8] sm:$0xff]  ;;  %v413_v7 = vld [vmem:[%s592_s1] sm:$0xff]  ;;  %v407_v9 = vld [vmem:[%s595_s0 + $0x10] sm:$0xff] }
   0x4   :  { %v405_v8 = vld [vmem:[%s595_s0] sm:$0xff]  ;;  %v411_v11 = vld [vmem:[%s595_s0 + $0x30] sm:$0xff]  ;;  %v406_v12 = vld [vmem:[%s595_s0 + $0x8] sm:$0xff] }
   0x5   :  { %v409_v10 = vld [vmem:[%s595_s0 + $0x20] sm:$0xff]  ;;  %v408_v13 = vld [vmem:[%s595_s0 + $0x18] sm:$0xff]  ;;  %v410_v14 = vld [vmem:[%s595_s0 + $0x28] sm:$0xff] }
   0x6   :  { %182 = vmatpush.bf16.msra.mxu0 %v419_v1  ;;  %424 = vmatpush.bf16.msra.mxu1 %v419_v1  ;;  %v412_v15 = vld [vmem:[%s595_s0 + $0x38] sm:$0xff]  ;;  %v445_v16 = vld [vmem:[%s593_s2] ss:$0 sm:$0xff] }
   0x7   :  { %425 = vmatpush.bf16.msra.mxu2 %v419_v1  ;;  %426 = vmatpush.bf16.msra.mxu3 %v419_v1  ;;  %v526_v17 = vld [vmem:[%s594_s3] ss:$0 sm:$0xff] }
   0xa   :  { %183 = vmatpush.bf16.msra.mxu0 %v418_v2  ;;  %427 = vmatpush.bf16.msra.mxu1 %v418_v2 }
   0xb   :  { %428 = vmatpush.bf16.msra.mxu2 %v418_v2  ;;  %429 = vmatpush.bf16.msra.mxu3 %v418_v2 }
   0xe   :  { %184 = vmatpush.bf16.msra.mxu0 %v417_v3  ;;  %430 = vmatpush.bf16.msra.mxu1 %v417_v3 }
   0xf   :  { %431 = vmatpush.bf16.msra.mxu2 %v417_v3  ;;  %432 = vmatpush.bf16.msra.mxu3 %v417_v3 }
  0x12   :  { %185 = vmatpush.bf16.msra.mxu0 %v416_v4  ;;  %433 = vmatpush.bf16.msra.mxu1 %v416_v4 }
  0x13   :  { %434 = vmatpush.bf16.msra.mxu2 %v416_v4  ;;  %435 = vmatpush.bf16.msra.mxu3 %v416_v4 }
  0x16   :  { %186 = vmatpush.bf16.msra.mxu0 %v415_v5  ;;  %436 = vmatpush.bf16.msra.mxu1 %v415_v5 }
  0x17   :  { %437 = vmatpush.bf16.msra.mxu2 %v415_v5  ;;  %438 = vmatpush.bf16.msra.mxu3 %v415_v5 }
  0x1a   :  { %187 = vmatpush.bf16.msra.mxu0 %v414_v6  ;;  %439 = vmatpush.bf16.msra.mxu1 %v414_v6 }
  0x1b   :  { %440 = vmatpush.bf16.msra.mxu2 %v414_v6  ;;  %441 = vmatpush.bf16.msra.mxu3 %v414_v6 }
  0x1e   :  { %188 = vmatpush.bf16.msra.mxu0 %v413_v7  ;;  %442 = vmatpush.bf16.msra.mxu1 %v413_v7 }
  0x1f   :  { %443 = vmatpush.bf16.msra.mxu2 %v413_v7  ;;  %444 = vmatpush.bf16.msra.mxu3 %v413_v7 }
  0x21   :  { %189 = vmatmul.bf16.vlgmr.msra.gmra.mxu0 %v405_v8  ;;  %199 = vmatmul.bf16.vlgmr.msra.gmra.mxu1 %v407_v9 }
  0x22   :  { %209 = vmatmul.bf16.vlgmr.msra.gmra.mxu2 %v409_v10  ;;  %219 = vmatmul.bf16.vlgmr.msra.gmra.mxu3 %v411_v11 }
  0x31   :  { %194 = vmatmul.bf16.gmra.mxu0 %v406_v12  ;;  %204 = vmatmul.bf16.gmra.mxu1 %v408_v13 }
  0x32   :  { %214 = vmatmul.bf16.gmra.mxu2 %v410_v14  ;;  %224 = vmatmul.bf16.gmra.mxu3 %v412_v15 }
  0x9e   :  { %v190_v18 = vpop.f32.mrf.mxu0  ;;  %v200_v19 = vpop.f32.mrf.mxu1 }
  0x9f   :  { %v285_v20 = vmul.f32 %v445_v16, %v190_v18  ;;  %v289_v21 = vmul.f32 %v445_v16, %v200_v19 }
  0xa1   :  { %v305_v22 = vadd.f32 %v526_v17, %v285_v20  ;;  %v309_v23 = vadd.f32 %v526_v17, %v289_v21 }
  0xa3   :  { %321 = vst [vmem:[%s596_s4] sm:$0xff] %v305_v22 }
  0xa4   :  { %325 = vst [vmem:[%s596_s4 + $0x20] sm:$0xff] %v309_v23 }
  0xa5   :  { %v210_v24 = vpop.f32.mrf.mxu2  ;;  %v220_v25 = vpop.f32.mrf.mxu3 }
  0xa6   :  { %v293_v26 = vmul.f32 %v445_v16, %v210_v24  ;;  %v297_v27 = vmul.f32 %v445_v16, %v220_v25  ;;  %v192_v28 = vpop.f32.mrf.mxu0  ;;  %v202_v29 = vpop.f32.mrf.mxu1 }
  0xa7   :  { %v286_v30 = vmul.f32 %v445_v16, %v192_v28  ;;  %v290_v31 = vmul.f32 %v445_v16, %v202_v29 }
  0xa8   :  { %v313_v32 = vadd.f32 %v526_v17, %v293_v26  ;;  %v317_v33 = vadd.f32 %v526_v17, %v297_v27 }
  0xa9   :  { %v306_v34 = vadd.f32 %v526_v17, %v286_v30  ;;  %v310_v35 = vadd.f32 %v526_v17, %v290_v31 }
  0xaa   :  { %329 = vst [vmem:[%s596_s4 + $0x40] sm:$0xff] %v313_v32 }
  0xab   :  { %333 = vst [vmem:[%s596_s4 + $0x60] sm:$0xff] %v317_v33 }
  0xac   :  { %322 = vst [vmem:[%s596_s4 + $0x8] sm:$0xff] %v306_v34 }
  0xad   :  { %326 = vst [vmem:[%s596_s4 + $0x28] sm:$0xff] %v310_v35  ;;  %v212_v36 = vpop.f32.mrf.mxu2  ;;  %v222_v37 = vpop.f32.mrf.mxu3 }
  0xae   :  { %v294_v38 = vmul.f32 %v445_v16, %v212_v36  ;;  %v298_v39 = vmul.f32 %v445_v16, %v222_v37  ;;  %v195_v40 = vpop.f32.mrf.mxu0  ;;  %v205_v41 = vpop.f32.mrf.mxu1 }
  0xaf   :  { %v287_v42 = vmul.f32 %v445_v16, %v195_v40  ;;  %v291_v43 = vmul.f32 %v445_v16, %v205_v41 }
  0xb0   :  { %v314_v44 = vadd.f32 %v526_v17, %v294_v38  ;;  %v318_v45 = vadd.f32 %v526_v17, %v298_v39 }
  0xb1   :  { %v307_v46 = vadd.f32 %v526_v17, %v287_v42  ;;  %v311_v47 = vadd.f32 %v526_v17, %v291_v43 }
  0xb2   :  { %330 = vst [vmem:[%s596_s4 + $0x48] sm:$0xff] %v314_v44 }
  0xb3   :  { %334 = vst [vmem:[%s596_s4 + $0x68] sm:$0xff] %v318_v45 }
  0xb4   :  { %323 = vst [vmem:[%s596_s4 + $0x10] sm:$0xff] %v307_v46 }
  0xb5   :  { %327 = vst [vmem:[%s596_s4 + $0x30] sm:$0xff] %v311_v47  ;;  %v215_v48 = vpop.f32.mrf.mxu2  ;;  %v225_v49 = vpop.f32.mrf.mxu3 }
  0xb6   :  { %v295_v50 = vmul.f32 %v445_v16, %v215_v48  ;;  %v299_v51 = vmul.f32 %v445_v16, %v225_v49  ;;  %v197_v52 = vpop.f32.mrf.mxu0  ;;  %v207_v53 = vpop.f32.mrf.mxu1 }
  0xb7   :  { %v288_v54 = vmul.f32 %v445_v16, %v197_v52  ;;  %v292_v55 = vmul.f32 %v445_v16, %v207_v53 }
  0xb8   :  { %v315_v56 = vadd.f32 %v526_v17, %v295_v50  ;;  %v319_v57 = vadd.f32 %v526_v17, %v299_v51 }
  0xb9   :  { %v308_v58 = vadd.f32 %v526_v17, %v288_v54  ;;  %v312_v59 = vadd.f32 %v526_v17, %v292_v55 }
  0xba   :  { %331 = vst [vmem:[%s596_s4 + $0x50] sm:$0xff] %v315_v56 }
  0xbb   :  { %335 = vst [vmem:[%s596_s4 + $0x70] sm:$0xff] %v319_v57 }
  0xbc   :  { %324 = vst [vmem:[%s596_s4 + $0x18] sm:$0xff] %v308_v58 }
  0xbd   :  { %328 = vst [vmem:[%s596_s4 + $0x38] sm:$0xff] %v312_v59  ;;  %v217_v60 = vpop.f32.mrf.mxu2  ;;  %v227_v61 = vpop.f32.mrf.mxu3 }
  0xbe   :  { %v296_v62 = vmul.f32 %v445_v16, %v217_v60  ;;  %v300_v63 = vmul.f32 %v445_v16, %v227_v61 }
  0xc0   :  { %v316_v0 = vadd.f32 %v526_v17, %v296_v62  ;;  %v320_v1 = vadd.f32 %v526_v17, %v300_v63 }
  0xc2   :  { %332 = vst [vmem:[%s596_s4 + $0x58] sm:$0xff] %v316_v0 }
  0xc3   :  { %336 = vst [vmem:[%s596_s4 + $0x78] sm:$0xff] %v320_v1 }

// kernel: swav_resnet_forward.43
= control target key start
LH: loop header
LB: loop body
LE: loop exit
PB: predicated region body
PF: predicated region fallthrough
CT: control target
= control target key end

     0   :  { %s714_s1 = inlined_call_operand.vmem [shape: bf16[128,128], index: 1, kind: input, shape index: {}]   ;;  %s715_s2 = inlined_call_operand.vmem [shape: f32[1,128], index: 2, kind: input, shape index: {}]   ;;  %s716_s3 = inlined_call_operand.vmem [shape: f32[1,128], index: 3, kind: input, shape index: {}]   ;;  %s717_s0 = inlined_call_operand.vmem [shape: bf16[128,128], index: 0, kind: input, shape index: {}]   ;;  %s718_s4 = inlined_call_operand.vmem [shape: f32[128,128], index: 4, kind: input, shape index: {}]   ;;  %s719_s5 = inlined_call_operand.vmem [shape: f32[128,128], index: 5, kind: output, shape index: {}]  }
   0x1   :  { %v471_v0 = vld [vmem:[%s714_s1 + $0x38] sm:$0xff]  ;;  %v470_v1 = vld [vmem:[%s714_s1 + $0x30] sm:$0xff]  ;;  %v469_v2 = vld [vmem:[%s714_s1 + $0x28] sm:$0xff] }
   0x2   :  { %184 = vmatpush.bf16.msra.mxu0 %v471_v0  ;;  %472 = vmatpush.bf16.msra.mxu1 %v471_v0  ;;  %v468_v3 = vld [vmem:[%s714_s1 + $0x20] sm:$0xff]  ;;  %v467_v4 = vld [vmem:[%s714_s1 + $0x18] sm:$0xff]  ;;  %v466_v5 = vld [vmem:[%s714_s1 + $0x10] sm:$0xff] }
   0x3   :  { %473 = vmatpush.bf16.msra.mxu2 %v471_v0  ;;  %474 = vmatpush.bf16.msra.mxu3 %v471_v0  ;;  %v465_v6 = vld [vmem:[%s714_s1 + $0x8] sm:$0xff]  ;;  %v464_v7 = vld [vmem:[%s714_s1] sm:$0xff]  ;;  %v458_v9 = vld [vmem:[%s717_s0 + $0x10] sm:$0xff] }
   0x4   :  { %v456_v8 = vld [vmem:[%s717_s0] sm:$0xff]  ;;  %v462_v11 = vld [vmem:[%s717_s0 + $0x30] sm:$0xff]  ;;  %v457_v12 = vld [vmem:[%s717_s0 + $0x8] sm:$0xff] }
   0x5   :  { %v460_v10 = vld [vmem:[%s717_s0 + $0x20] sm:$0xff]  ;;  %v459_v13 = vld [vmem:[%s717_s0 + $0x18] sm:$0xff]  ;;  %v461_v14 = vld [vmem:[%s717_s0 + $0x28] sm:$0xff] }
   0x6   :  { %185 = vmatpush.bf16.msra.mxu0 %v470_v1  ;;  %475 = vmatpush.bf16.msra.mxu1 %v470_v1  ;;  %v463_v15 = vld [vmem:[%s717_s0 + $0x38] sm:$0xff]  ;;  %v579_v16 = vld [vmem:[%s715_s2] ss:$0 sm:$0xff]  ;;  %v325_v42 = vld [vmem:[%s718_s4 + $0x8] sm:$0xff] }
   0x7   :  { %476 = vmatpush.bf16.msra.mxu2 %v470_v1  ;;  %477 = vmatpush.bf16.msra.mxu3 %v470_v1  ;;  %v584_v17 = vld [vmem:[%s716_s3] ss:$0 sm:$0xff]  ;;  %v329_v43 = vld [vmem:[%s718_s4 + $0x28] sm:$0xff] }
   0x8   :  { %v324_v22 = vld [vmem:[%s718_s4] sm:$0xff]  ;;  %v333_v60 = vld [vmem:[%s718_s4 + $0x48] sm:$0xff] }
   0x9   :  { %v328_v23 = vld [vmem:[%s718_s4 + $0x20] sm:$0xff]  ;;  %v337_v61 = vld [vmem:[%s718_s4 + $0x68] sm:$0xff] }
   0xa   :  { %186 = vmatpush.bf16.msra.mxu0 %v469_v2  ;;  %478 = vmatpush.bf16.msra.mxu1 %v469_v2  ;;  %v332_v36 = vld [vmem:[%s718_s4 + $0x40] sm:$0xff] }
   0xb   :  { %479 = vmatpush.bf16.msra.mxu2 %v469_v2  ;;  %480 = vmatpush.bf16.msra.mxu3 %v469_v2  ;;  %v336_v37 = vld [vmem:[%s718_s4 + $0x60] sm:$0xff]  ;;  %v326_v2 = vld [vmem:[%s718_s4 + $0x10] sm:$0xff] }
   0xe   :  { %187 = vmatpush.bf16.msra.mxu0 %v468_v3  ;;  %481 = vmatpush.bf16.msra.mxu1 %v468_v3 }
   0xf   :  { %482 = vmatpush.bf16.msra.mxu2 %v468_v3  ;;  %483 = vmatpush.bf16.msra.mxu3 %v468_v3  ;;  %v330_v3 = vld [vmem:[%s718_s4 + $0x30] sm:$0xff] }
  0x12   :  { %188 = vmatpush.bf16.msra.mxu0 %v467_v4  ;;  %484 = vmatpush.bf16.msra.mxu1 %v467_v4 }
  0x13   :  { %485 = vmatpush.bf16.msra.mxu2 %v467_v4  ;;  %486 = vmatpush.bf16.msra.mxu3 %v467_v4 }
  0x16   :  { %189 = vmatpush.bf16.msra.mxu0 %v466_v5  ;;  %487 = vmatpush.bf16.msra.mxu1 %v466_v5 }
  0x17   :  { %488 = vmatpush.bf16.msra.mxu2 %v466_v5  ;;  %489 = vmatpush.bf16.msra.mxu3 %v466_v5 }
  0x1a   :  { %190 = vmatpush.bf16.msra.mxu0 %v465_v6  ;;  %490 = vmatpush.bf16.msra.mxu1 %v465_v6 }
  0x1b   :  { %491 = vmatpush.bf16.msra.mxu2 %v465_v6  ;;  %492 = vmatpush.bf16.msra.mxu3 %v465_v6 }
  0x1e   :  { %191 = vmatpush.bf16.msra.mxu0 %v464_v7  ;;  %493 = vmatpush.bf16.msra.mxu1 %v464_v7 }
  0x1f   :  { %494 = vmatpush.bf16.msra.mxu2 %v464_v7  ;;  %495 = vmatpush.bf16.msra.mxu3 %v464_v7 }
  0x21   :  { %192 = vmatmul.bf16.vlgmr.msra.gmra.mxu0 %v456_v8  ;;  %202 = vmatmul.bf16.vlgmr.msra.gmra.mxu1 %v458_v9 }
  0x22   :  { %212 = vmatmul.bf16.vlgmr.msra.gmra.mxu2 %v460_v10  ;;  %222 = vmatmul.bf16.vlgmr.msra.gmra.mxu3 %v462_v11 }
  0x31   :  { %197 = vmatmul.bf16.gmra.mxu0 %v457_v12  ;;  %207 = vmatmul.bf16.gmra.mxu1 %v459_v13 }
  0x32   :  { %217 = vmatmul.bf16.gmra.mxu2 %v461_v14  ;;  %227 = vmatmul.bf16.gmra.mxu3 %v463_v15 }
  0x9e   :  { %v193_v18 = vpop.f32.mrf.mxu0  ;;  %v203_v19 = vpop.f32.mrf.mxu1 }
  0x9f   :  { %v288_v20 = vmul.f32 %v579_v16, %v193_v18  ;;  %v292_v21 = vmul.f32 %v579_v16, %v203_v19 }
  0xa1   :  { %v308_v24 = vadd.f32 %v584_v17, %v288_v20  ;;  %v312_v25 = vadd.f32 %v584_v17, %v292_v21 }
  0xa3   :  { %v340_v26 = vadd.f32 %v324_v22, %v308_v24  ;;  %v344_v27 = vadd.f32 %v328_v23, %v312_v25  ;;  %v334_v22 = vld [vmem:[%s718_s4 + $0x50] sm:$0xff] }
  0xa4   :  { %v338_v23 = vld [vmem:[%s718_s4 + $0x70] sm:$0xff] }
  0xa5   :  { %v356_v28 = vmax.f32 %v340_v26, 0.0  ;;  %v360_v29 = vmax.f32 %v344_v27, 0.0  ;;  %v213_v30 = vpop.f32.mrf.mxu2  ;;  %v223_v31 = vpop.f32.mrf.mxu3 }
  0xa6   :  { %v296_v32 = vmul.f32 %v579_v16, %v213_v30  ;;  %v300_v33 = vmul.f32 %v579_v16, %v223_v31  ;;  %v195_v34 = vpop.f32.mrf.mxu0  ;;  %v205_v35 = vpop.f32.mrf.mxu1 }
  0xa7   :  { %372 = vst [vmem:[%s719_s5] sm:$0xff] %v356_v28  ;;  %v289_v38 = vmul.f32 %v579_v16, %v195_v34  ;;  %v293_v39 = vmul.f32 %v579_v16, %v205_v35  ;;  %v327_v28 = vld [vmem:[%s718_s4 + $0x18] sm:$0xff] }
  0xa8   :  { %376 = vst [vmem:[%s719_s5 + $0x20] sm:$0xff] %v360_v29  ;;  %v316_v40 = vadd.f32 %v584_v17, %v296_v32  ;;  %v320_v41 = vadd.f32 %v584_v17, %v300_v33  ;;  %v331_v29 = vld [vmem:[%s718_s4 + $0x38] sm:$0xff] }
  0xa9   :  { %v309_v44 = vadd.f32 %v584_v17, %v289_v38  ;;  %v313_v45 = vadd.f32 %v584_v17, %v293_v39 }
  0xaa   :  { %v348_v46 = vadd.f32 %v332_v36, %v316_v40  ;;  %v352_v47 = vadd.f32 %v336_v37, %v320_v41 }
  0xab   :  { %v341_v48 = vadd.f32 %v325_v42, %v309_v44  ;;  %v345_v49 = vadd.f32 %v329_v43, %v313_v45  ;;  %v335_v44 = vld [vmem:[%s718_s4 + $0x58] sm:$0xff] }
  0xac   :  { %v364_v50 = vmax.f32 %v348_v46, 0.0  ;;  %v368_v51 = vmax.f32 %v352_v47, 0.0  ;;  %v339_v45 = vld [vmem:[%s718_s4 + $0x78] sm:$0xff] }
  0xad   :  { %v357_v52 = vmax.f32 %v341_v48, 0.0  ;;  %v361_v53 = vmax.f32 %v345_v49, 0.0  ;;  %v215_v54 = vpop.f32.mrf.mxu2  ;;  %v225_v55 = vpop.f32.mrf.mxu3 }
  0xae   :  { %380 = vst [vmem:[%s719_s5 + $0x40] sm:$0xff] %v364_v50  ;;  %v297_v56 = vmul.f32 %v579_v16, %v215_v54  ;;  %v301_v57 = vmul.f32 %v579_v16, %v225_v55  ;;  %v198_v58 = vpop.f32.mrf.mxu0  ;;  %v208_v59 = vpop.f32.mrf.mxu1 }
  0xaf   :  { %384 = vst [vmem:[%s719_s5 + $0x60] sm:$0xff] %v368_v51  ;;  %v290_v62 = vmul.f32 %v579_v16, %v198_v58  ;;  %v294_v63 = vmul.f32 %v579_v16, %v208_v59 }
  0xb0   :  { %373 = vst [vmem:[%s719_s5 + $0x8] sm:$0xff] %v357_v52  ;;  %v317_v0 = vadd.f32 %v584_v17, %v297_v56  ;;  %v321_v1 = vadd.f32 %v584_v17, %v301_v57 }
  0xb1   :  { %377 = vst [vmem:[%s719_s5 + $0x28] sm:$0xff] %v361_v53  ;;  %v310_v4 = vadd.f32 %v584_v17, %v290_v62  ;;  %v314_v5 = vadd.f32 %v584_v17, %v294_v63 }
  0xb2   :  { %v349_v6 = vadd.f32 %v333_v60, %v317_v0  ;;  %v353_v7 = vadd.f32 %v337_v61, %v321_v1 }
  0xb3   :  { %v342_v8 = vadd.f32 %v326_v2, %v310_v4  ;;  %v346_v9 = vadd.f32 %v330_v3, %v314_v5 }
  0xb4   :  { %v365_v10 = vmax.f32 %v349_v6, 0.0  ;;  %v369_v11 = vmax.f32 %v353_v7, 0.0 }
  0xb5   :  { %v358_v12 = vmax.f32 %v342_v8, 0.0  ;;  %v362_v13 = vmax.f32 %v346_v9, 0.0  ;;  %v218_v14 = vpop.f32.mrf.mxu2  ;;  %v228_v15 = vpop.f32.mrf.mxu3 }
  0xb6   :  { %381 = vst [vmem:[%s719_s5 + $0x48] sm:$0xff] %v365_v10  ;;  %v298_v18 = vmul.f32 %v579_v16, %v218_v14  ;;  %v302_v19 = vmul.f32 %v579_v16, %v228_v15  ;;  %v200_v20 = vpop.f32.mrf.mxu0  ;;  %v210_v21 = vpop.f32.mrf.mxu1 }
  0xb7   :  { %385 = vst [vmem:[%s719_s5 + $0x68] sm:$0xff] %v369_v11  ;;  %v291_v24 = vmul.f32 %v579_v16, %v200_v20  ;;  %v295_v25 = vmul.f32 %v579_v16, %v210_v21 }
  0xb8   :  { %374 = vst [vmem:[%s719_s5 + $0x10] sm:$0xff] %v358_v12  ;;  %v318_v26 = vadd.f32 %v584_v17, %v298_v18  ;;  %v322_v27 = vadd.f32 %v584_v17, %v302_v19 }
  0xb9   :  { %378 = vst [vmem:[%s719_s5 + $0x30] sm:$0xff] %v362_v13  ;;  %v311_v30 = vadd.f32 %v584_v17, %v291_v24  ;;  %v315_v31 = vadd.f32 %v584_v17, %v295_v25 }
  0xba   :  { %v350_v32 = vadd.f32 %v334_v22, %v318_v26  ;;  %v354_v33 = vadd.f32 %v338_v23, %v322_v27 }
  0xbb   :  { %v343_v34 = vadd.f32 %v327_v28, %v311_v30  ;;  %v347_v35 = vadd.f32 %v331_v29, %v315_v31 }
  0xbc   :  { %v366_v36 = vmax.f32 %v350_v32, 0.0  ;;  %v370_v37 = vmax.f32 %v354_v33, 0.0 }
  0xbd   :  { %v359_v38 = vmax.f32 %v343_v34, 0.0  ;;  %v363_v39 = vmax.f32 %v347_v35, 0.0  ;;  %v220_v40 = vpop.f32.mrf.mxu2  ;;  %v230_v41 = vpop.f32.mrf.mxu3 }
  0xbe   :  { %382 = vst [vmem:[%s719_s5 + $0x50] sm:$0xff] %v366_v36  ;;  %v299_v42 = vmul.f32 %v579_v16, %v220_v40  ;;  %v303_v43 = vmul.f32 %v579_v16, %v230_v41 }
  0xbf   :  { %386 = vst [vmem:[%s719_s5 + $0x70] sm:$0xff] %v370_v37 }
  0xc0   :  { %375 = vst [vmem:[%s719_s5 + $0x18] sm:$0xff] %v359_v38  ;;  %v319_v46 = vadd.f32 %v584_v17, %v299_v42  ;;  %v323_v16 = vadd.f32 %v584_v17, %v303_v43 }
  0xc1   :  { %379 = vst [vmem:[%s719_s5 + $0x38] sm:$0xff] %v363_v39 }
  0xc2   :  { %v351_v47 = vadd.f32 %v335_v44, %v319_v46  ;;  %v355_v48 = vadd.f32 %v339_v45, %v323_v16 }
  0xc4   :  { %v367_v49 = vmax.f32 %v351_v47, 0.0  ;;  %v371_v50 = vmax.f32 %v355_v48, 0.0 }
  0xc6   :  { %383 = vst [vmem:[%s719_s5 + $0x58] sm:$0xff] %v367_v49 }
  0xc7   :  { %387 = vst [vmem:[%s719_s5 + $0x78] sm:$0xff] %v371_v50 }

// kernel: swav_resnet_forward.44
= control target key start
LH: loop header
LB: loop body
LE: loop exit
PB: predicated region body
PF: predicated region fallthrough
CT: control target
= control target key end

     0   :  { %s626_s1 = inlined_call_operand.vmem [shape: bf16[128,128], index: 1, kind: input, shape index: {}]   ;;  %s627_s2 = inlined_call_operand.vmem [shape: f32[1,128], index: 2, kind: input, shape index: {}]   ;;  %s628_s3 = inlined_call_operand.vmem [shape: f32[1,128], index: 3, kind: input, shape index: {}]   ;;  %s629_s0 = inlined_call_operand.vmem [shape: bf16[128,128], index: 0, kind: input, shape index: {}]   ;;  %s630_s4 = inlined_call_operand.vmem [shape: f32[128,128], index: 4, kind: output, shape index: {}]  }
   0x1   :  { %v436_v0 = vld [vmem:[%s626_s1 + $0x38] sm:$0xff]  ;;  %v435_v1 = vld [vmem:[%s626_s1 + $0x30] sm:$0xff]  ;;  %v434_v2 = vld [vmem:[%s626_s1 + $0x28] sm:$0xff] }
   0x2   :  { %181 = vmatpush.bf16.msra.mxu0 %v436_v0  ;;  %437 = vmatpush.bf16.msra.mxu1 %v436_v0  ;;  %v433_v3 = vld [vmem:[%s626_s1 + $0x20] sm:$0xff]  ;;  %v432_v4 = vld [vmem:[%s626_s1 + $0x18] sm:$0xff]  ;;  %v431_v5 = vld [vmem:[%s626_s1 + $0x10] sm:$0xff] }
   0x3   :  { %438 = vmatpush.bf16.msra.mxu2 %v436_v0  ;;  %439 = vmatpush.bf16.msra.mxu3 %v436_v0  ;;  %v430_v6 = vld [vmem:[%s626_s1 + $0x8] sm:$0xff]  ;;  %v429_v7 = vld [vmem:[%s626_s1] sm:$0xff]  ;;  %v423_v9 = vld [vmem:[%s629_s0 + $0x10] sm:$0xff] }
   0x4   :  { %v421_v8 = vld [vmem:[%s629_s0] sm:$0xff]  ;;  %v427_v11 = vld [vmem:[%s629_s0 + $0x30] sm:$0xff]  ;;  %v422_v12 = vld [vmem:[%s629_s0 + $0x8] sm:$0xff] }
   0x5   :  { %v425_v10 = vld [vmem:[%s629_s0 + $0x20] sm:$0xff]  ;;  %v424_v13 = vld [vmem:[%s629_s0 + $0x18] sm:$0xff]  ;;  %v426_v14 = vld [vmem:[%s629_s0 + $0x28] sm:$0xff] }
   0x6   :  { %182 = vmatpush.bf16.msra.mxu0 %v435_v1  ;;  %440 = vmatpush.bf16.msra.mxu1 %v435_v1  ;;  %v428_v15 = vld [vmem:[%s629_s0 + $0x38] sm:$0xff]  ;;  %v539_v16 = vld [vmem:[%s627_s2] ss:$0 sm:$0xff] }
   0x7   :  { %441 = vmatpush.bf16.msra.mxu2 %v435_v1  ;;  %442 = vmatpush.bf16.msra.mxu3 %v435_v1  ;;  %v544_v17 = vld [vmem:[%s628_s3] ss:$0 sm:$0xff] }
   0xa   :  { %183 = vmatpush.bf16.msra.mxu0 %v434_v2  ;;  %443 = vmatpush.bf16.msra.mxu1 %v434_v2 }
   0xb   :  { %444 = vmatpush.bf16.msra.mxu2 %v434_v2  ;;  %445 = vmatpush.bf16.msra.mxu3 %v434_v2 }
   0xe   :  { %184 = vmatpush.bf16.msra.mxu0 %v433_v3  ;;  %446 = vmatpush.bf16.msra.mxu1 %v433_v3 }
   0xf   :  { %447 = vmatpush.bf16.msra.mxu2 %v433_v3  ;;  %448 = vmatpush.bf16.msra.mxu3 %v433_v3 }
  0x12   :  { %185 = vmatpush.bf16.msra.mxu0 %v432_v4  ;;  %449 = vmatpush.bf16.msra.mxu1 %v432_v4 }
  0x13   :  { %450 = vmatpush.bf16.msra.mxu2 %v432_v4  ;;  %451 = vmatpush.bf16.msra.mxu3 %v432_v4 }
  0x16   :  { %186 = vmatpush.bf16.msra.mxu0 %v431_v5  ;;  %452 = vmatpush.bf16.msra.mxu1 %v431_v5 }
  0x17   :  { %453 = vmatpush.bf16.msra.mxu2 %v431_v5  ;;  %454 = vmatpush.bf16.msra.mxu3 %v431_v5 }
  0x1a   :  { %187 = vmatpush.bf16.msra.mxu0 %v430_v6  ;;  %455 = vmatpush.bf16.msra.mxu1 %v430_v6 }
  0x1b   :  { %456 = vmatpush.bf16.msra.mxu2 %v430_v6  ;;  %457 = vmatpush.bf16.msra.mxu3 %v430_v6 }
  0x1e   :  { %188 = vmatpush.bf16.msra.mxu0 %v429_v7  ;;  %458 = vmatpush.bf16.msra.mxu1 %v429_v7 }
  0x1f   :  { %459 = vmatpush.bf16.msra.mxu2 %v429_v7  ;;  %460 = vmatpush.bf16.msra.mxu3 %v429_v7 }
  0x21   :  { %189 = vmatmul.bf16.vlgmr.msra.gmra.mxu0 %v421_v8  ;;  %199 = vmatmul.bf16.vlgmr.msra.gmra.mxu1 %v423_v9 }
  0x22   :  { %209 = vmatmul.bf16.vlgmr.msra.gmra.mxu2 %v425_v10  ;;  %219 = vmatmul.bf16.vlgmr.msra.gmra.mxu3 %v427_v11 }
  0x31   :  { %194 = vmatmul.bf16.gmra.mxu0 %v422_v12  ;;  %204 = vmatmul.bf16.gmra.mxu1 %v424_v13 }
  0x32   :  { %214 = vmatmul.bf16.gmra.mxu2 %v426_v14  ;;  %224 = vmatmul.bf16.gmra.mxu3 %v428_v15 }
  0x9e   :  { %v190_v18 = vpop.f32.mrf.mxu0  ;;  %v200_v19 = vpop.f32.mrf.mxu1 }
  0x9f   :  { %v285_v20 = vmul.f32 %v539_v16, %v190_v18  ;;  %v289_v21 = vmul.f32 %v539_v16, %v200_v19 }
  0xa1   :  { %v305_v22 = vadd.f32 %v544_v17, %v285_v20  ;;  %v309_v23 = vadd.f32 %v544_v17, %v289_v21 }
  0xa3   :  { %v321_v24 = vmax.f32 %v305_v22, 0.0  ;;  %v325_v25 = vmax.f32 %v309_v23, 0.0 }
  0xa5   :  { %337 = vst [vmem:[%s630_s4] sm:$0xff] %v321_v24  ;;  %v210_v26 = vpop.f32.mrf.mxu2  ;;  %v220_v27 = vpop.f32.mrf.mxu3 }
  0xa6   :  { %341 = vst [vmem:[%s630_s4 + $0x20] sm:$0xff] %v325_v25  ;;  %v293_v28 = vmul.f32 %v539_v16, %v210_v26  ;;  %v297_v29 = vmul.f32 %v539_v16, %v220_v27  ;;  %v192_v30 = vpop.f32.mrf.mxu0  ;;  %v202_v31 = vpop.f32.mrf.mxu1 }
  0xa7   :  { %v286_v32 = vmul.f32 %v539_v16, %v192_v30  ;;  %v290_v33 = vmul.f32 %v539_v16, %v202_v31 }
  0xa8   :  { %v313_v34 = vadd.f32 %v544_v17, %v293_v28  ;;  %v317_v35 = vadd.f32 %v544_v17, %v297_v29 }
  0xa9   :  { %v306_v36 = vadd.f32 %v544_v17, %v286_v32  ;;  %v310_v37 = vadd.f32 %v544_v17, %v290_v33 }
  0xaa   :  { %v329_v38 = vmax.f32 %v313_v34, 0.0  ;;  %v333_v39 = vmax.f32 %v317_v35, 0.0 }
  0xab   :  { %v322_v40 = vmax.f32 %v306_v36, 0.0  ;;  %v326_v41 = vmax.f32 %v310_v37, 0.0 }
  0xac   :  { %345 = vst [vmem:[%s630_s4 + $0x40] sm:$0xff] %v329_v38 }
  0xad   :  { %349 = vst [vmem:[%s630_s4 + $0x60] sm:$0xff] %v333_v39  ;;  %v212_v42 = vpop.f32.mrf.mxu2  ;;  %v222_v43 = vpop.f32.mrf.mxu3 }
  0xae   :  { %338 = vst [vmem:[%s630_s4 + $0x8] sm:$0xff] %v322_v40  ;;  %v294_v44 = vmul.f32 %v539_v16, %v212_v42  ;;  %v298_v45 = vmul.f32 %v539_v16, %v222_v43  ;;  %v195_v46 = vpop.f32.mrf.mxu0  ;;  %v205_v47 = vpop.f32.mrf.mxu1 }
  0xaf   :  { %342 = vst [vmem:[%s630_s4 + $0x28] sm:$0xff] %v326_v41  ;;  %v287_v48 = vmul.f32 %v539_v16, %v195_v46  ;;  %v291_v49 = vmul.f32 %v539_v16, %v205_v47 }
  0xb0   :  { %v314_v50 = vadd.f32 %v544_v17, %v294_v44  ;;  %v318_v51 = vadd.f32 %v544_v17, %v298_v45 }
  0xb1   :  { %v307_v52 = vadd.f32 %v544_v17, %v287_v48  ;;  %v311_v53 = vadd.f32 %v544_v17, %v291_v49 }
  0xb2   :  { %v330_v54 = vmax.f32 %v314_v50, 0.0  ;;  %v334_v55 = vmax.f32 %v318_v51, 0.0 }
  0xb3   :  { %v323_v56 = vmax.f32 %v307_v52, 0.0  ;;  %v327_v57 = vmax.f32 %v311_v53, 0.0 }
  0xb4   :  { %346 = vst [vmem:[%s630_s4 + $0x48] sm:$0xff] %v330_v54 }
  0xb5   :  { %350 = vst [vmem:[%s630_s4 + $0x68] sm:$0xff] %v334_v55  ;;  %v215_v58 = vpop.f32.mrf.mxu2  ;;  %v225_v59 = vpop.f32.mrf.mxu3 }
  0xb6   :  { %339 = vst [vmem:[%s630_s4 + $0x10] sm:$0xff] %v323_v56  ;;  %v295_v60 = vmul.f32 %v539_v16, %v215_v58  ;;  %v299_v61 = vmul.f32 %v539_v16, %v225_v59  ;;  %v197_v62 = vpop.f32.mrf.mxu0  ;;  %v207_v63 = vpop.f32.mrf.mxu1 }
  0xb7   :  { %343 = vst [vmem:[%s630_s4 + $0x30] sm:$0xff] %v327_v57  ;;  %v288_v0 = vmul.f32 %v539_v16, %v197_v62  ;;  %v292_v1 = vmul.f32 %v539_v16, %v207_v63 }
  0xb8   :  { %v315_v2 = vadd.f32 %v544_v17, %v295_v60  ;;  %v319_v3 = vadd.f32 %v544_v17, %v299_v61 }
  0xb9   :  { %v308_v4 = vadd.f32 %v544_v17, %v288_v0  ;;  %v312_v5 = vadd.f32 %v544_v17, %v292_v1 }
  0xba   :  { %v331_v6 = vmax.f32 %v315_v2, 0.0  ;;  %v335_v7 = vmax.f32 %v319_v3, 0.0 }
  0xbb   :  { %v324_v8 = vmax.f32 %v308_v4, 0.0  ;;  %v328_v9 = vmax.f32 %v312_v5, 0.0 }
  0xbc   :  { %347 = vst [vmem:[%s630_s4 + $0x50] sm:$0xff] %v331_v6 }
  0xbd   :  { %351 = vst [vmem:[%s630_s4 + $0x70] sm:$0xff] %v335_v7  ;;  %v217_v10 = vpop.f32.mrf.mxu2  ;;  %v227_v11 = vpop.f32.mrf.mxu3 }
  0xbe   :  { %340 = vst [vmem:[%s630_s4 + $0x18] sm:$0xff] %v324_v8  ;;  %v296_v12 = vmul.f32 %v539_v16, %v217_v10  ;;  %v300_v13 = vmul.f32 %v539_v16, %v227_v11 }
  0xbf   :  { %344 = vst [vmem:[%s630_s4 + $0x38] sm:$0xff] %v328_v9 }
  0xc0   :  { %v316_v14 = vadd.f32 %v544_v17, %v296_v12  ;;  %v320_v15 = vadd.f32 %v544_v17, %v300_v13 }
  0xc2   :  { %v332_v18 = vmax.f32 %v316_v14, 0.0  ;;  %v336_v19 = vmax.f32 %v320_v15, 0.0 }
  0xc4   :  { %348 = vst [vmem:[%s630_s4 + $0x58] sm:$0xff] %v332_v18 }
  0xc5   :  { %352 = vst [vmem:[%s630_s4 + $0x78] sm:$0xff] %v336_v19 }

// kernel: swav_resnet_forward.48
= control target key start
LH: loop header
LB: loop body
LE: loop exit
PB: predicated region body
PF: predicated region fallthrough
CT: control target
= control target key end

     0   :  { %s1211_s15 = smov 0   ;;  %s1213_s16 = smov 0   ;;  %s1348_s0 = inlined_call_operand.vmem [shape: bf16[32,1024], index: 0, kind: input, shape index: {}]   ;;  %s1349_s1 = inlined_call_operand.vmem [shape: bf16[1024,128], index: 1, kind: input, shape index: {}]   ;;  %s1350_s2 = inlined_call_operand.vmem [shape: f32[1,128], index: 2, kind: input, shape index: {}]   ;;  %s1351_s3 = inlined_call_operand.vmem [shape: f32[1,128], index: 3, kind: input, shape index: {}]   ;;  %s1352_s4 = inlined_call_operand.vmem [shape: f32[32,128], index: 4, kind: output, shape index: {}]  }
   0x1   :  { %s1215_s17 = smov 0   ;;  %s1217_s18 = smov 0  }
   0x2   :  { %s1219_s19 = smov 0  }
   0x3 LB: > { %s26_s20 = sadd.s32 1, %s1179_s18  ;;  %p49_p1 = scmp.ne.s32.totalorder %s1171_s16, %s1167_s15  ;;  %s1183_s19 = sphi %s1219_s19, %s14_s19   ;;  %s1179_s18 = sphi %s1217_s18, %s1356_s18   ;;  %s1175_s17 = sphi %s1215_s17, %s1355_s17   ;;  %s1171_s16 = sphi %s1213_s16, %s1354_s16   ;;  %s1167_s15 = sphi %s1211_s15, %s1353_s15  }
   0x4   : > { %p27_p0 = scmp.ge.s32.totalorder %s26_s20, 2  ;;  %p50_p2 = scmp.eq.s32.totalorder %s1183_s19, 0 }
   0x5   : > { %s42_s22 = sadd.s32 1, %s1171_s16  ;;  %p887_p5 = scmp.ge.s32.totalorder %s1183_s19, 2 }
   0x6   : > { %s1358_s20 = smov (%p27_p0, %s26_s20), 0  ;;  %p51_p3 = por %p50_p2, %p49_p1 }
   0x7   : > { %s38_s21 = ssub.s32 %s1179_s18, %s1358_s20  ;;  %195 = sbr.rel (%p887_p5) target bundleno = 24 (0x18), region = 24 }
   0x8   : > { %p40_p4 = scmp.eq.s32.totalorder %s38_s21, 0 }
   0xa   : > { %s1246_s23 = scalar_select %p40_p4, %s1171_s16, %s42_s22  }
   0xc   : > { %198 = sbr.rel (!%p51_p3) target bundleno = 24 (0x18), region = 28  ;;  %s200_s24 = sand.u32 (%p51_p3), 1, %s1171_s16  }
   0xd   : > { %s1061_s25 = sshll.u32 (%p51_p3), %s1179_s18, 4  ;;  %s888_s26 = sshll.u32 (%p51_p3), %s200_s24, 6 }
   0xe   : > { %s208_s29 = scalar_lea.vmem (%p51_p3), %s1348_s0, %s1061_s25  ;;  %s202_s30 = scalar_lea.vmem (%p51_p3), [#allocation3], %s888_s26 }
   0xf   : > { %v221_v0 = vld [vmem:[%s208_s29] sm:$0xff] (%p51_p3)  ;;  %v223_v1 = vld [vmem:[%s208_s29 + $0x8] sm:$0xff] (%p51_p3) }
  0x10   : > { %v225_v2 = vld [vmem:[%s208_s29 + $0x20] sm:$0xff] (%p51_p3)  ;;  %222 = vst [vmem:[%s202_s30] sm:$0xff] (%p51_p3), %v221_v0  ;;  %v227_v3 = vld [vmem:[%s208_s29 + $0x28] sm:$0xff] (%p51_p3) }
  0x11   : > { %224 = vst [vmem:[%s202_s30 + $0x8] sm:$0xff] %v223_v1  ;;  %v229_v4 = vld [vmem:[%s208_s29 + $0x40] sm:$0xff]  ;;  %v231_v5 = vld [vmem:[%s208_s29 + $0x48] sm:$0xff] }
  0x12   : > { %226 = vst [vmem:[%s202_s30 + $0x10] sm:$0xff] %v225_v2  ;;  %v233_v6 = vld [vmem:[%s208_s29 + $0x60] sm:$0xff]  ;;  %v235_v7 = vld [vmem:[%s208_s29 + $0x68] sm:$0xff] }
  0x13   : > { %228 = vst [vmem:[%s202_s30 + $0x18] sm:$0xff] %v227_v3 }
  0x14   : > { %230 = vst [vmem:[%s202_s30 + $0x20] sm:$0xff] %v229_v4 }
  0x15   : > { %232 = vst [vmem:[%s202_s30 + $0x28] sm:$0xff] %v231_v5 }
  0x16   : > { %234 = vst [vmem:[%s202_s30 + $0x30] sm:$0xff] %v233_v6 }
  0x17   : > { %236 = vst [vmem:[%s202_s30 + $0x38] sm:$0xff] %v235_v7 }
  0x18 PF: > { %p891_p6 = scmp.ge.s32.totalorder %s1183_s19, 1  ;;  %p253_p7 = scmp.lt.s32.totalorder %s1183_s19, 3 }
  0x1a   : > { %p254_p8 = pnand %p891_p6, %p253_p7 }
  0x1b   : > { %s260_s5 = sand.u32 (!%p254_p8), 1, %s1167_s15   ;;  %s893_s6 = sshll.u32 (!%p254_p8), %s1175_s17, 6 }
  0x1c   : > { %257 = sbr.rel (%p254_p8) target bundleno = 254 (0xfe), region = 55  ;;  %s892_s7 = sshll.u32 (!%p254_p8), %s260_s5, 6 }
  0x1d   : > { %p305_p9 = scmp.lt.s32.totalorder (!%p254_p8), %s893_s6, 127  ;;  %s1263_s12 = scalar_lea.vmem (!%p254_p8), [#allocation3], %s892_s7 }
  0x1e   : > { %p895_p10 = scmp.ne.s32.totalorder (!%p254_p8), %s1175_s17, 0 }
  0x21   : > { %s1360_s6 = smov (!%p305_p9, %s893_s6), 127  ;;  %331 = sbr.rel (%p895_p10) target bundleno = 43 (0x2b), region = 63 }
  0x22   : > { %s894_s8 = sshll.u32 %s1360_s6, 2 }
  0x23   : > { %s1261_s11 = scalar_lea.vmem %s1349_s1, %s894_s8 }
  0x26   : > { %v1185_v8 = vmov 0.0  }
  0x27   : > { %332 = vst [vmem:[#allocation2 + $0x10] sm:$0xff] %v1185_v8 }
  0x28   : > { %333 = vst [vmem:[#allocation2] sm:$0xff] %v1185_v8 }
  0x29   : > { %334 = vst [vmem:[#allocation2 + $0x18] sm:$0xff] %v1185_v8 }
  0x2a   : > { %335 = vst [vmem:[#allocation2 + $0x8] sm:$0xff] %v1185_v8 }
  0x2b PF: > { %v1077_v9 = vld [vmem:[%s1261_s11 + $0x38] sm:$0xff]  ;;  %v1076_v13 = vld [vmem:[%s1261_s11 + $0x30] sm:$0xff]  ;;  %v1075_v17 = vld [vmem:[%s1261_s11 + $0x28] sm:$0xff]  ;;  %p1056_p11 = scmp.ne.s32.totalorder %s1175_s17, 1 }
  0x2c   : > { %v1085_v10 = vld [vmem:[%s1261_s11 + $0x78] sm:$0xff]  ;;  %644 = vmatpush.bf16.msra.mxu0 %v1077_v9  ;;  %v1084_v14 = vld [vmem:[%s1261_s11 + $0x70] sm:$0xff]  ;;  %v1083_v18 = vld [vmem:[%s1261_s11 + $0x68] sm:$0xff] }
  0x2d   : > { %v1093_v11 = vld [vmem:[%s1261_s11 + $0xb8] sm:$0xff]  ;;  %663 = vmatpush.bf16.msra.mxu1 %v1085_v10  ;;  %v1092_v15 = vld [vmem:[%s1261_s11 + $0xb0] sm:$0xff]  ;;  %v1091_v19 = vld [vmem:[%s1261_s11 + $0xa8] sm:$0xff] }
  0x2e   : > { %v1101_v12 = vld [vmem:[%s1261_s11 + $0xf8] sm:$0xff]  ;;  %682 = vmatpush.bf16.msra.mxu2 %v1093_v11  ;;  %v1100_v16 = vld [vmem:[%s1261_s11 + $0xf0] sm:$0xff]  ;;  %v1099_v20 = vld [vmem:[%s1261_s11 + $0xe8] sm:$0xff] }
  0x2f   : > { %701 = vmatpush.bf16.msra.mxu3 %v1101_v12  ;;  %v1074_v21 = vld [vmem:[%s1261_s11 + $0x20] sm:$0xff]  ;;  %v1073_v25 = vld [vmem:[%s1261_s11 + $0x18] sm:$0xff]  ;;  %v1072_v29 = vld [vmem:[%s1261_s11 + $0x10] sm:$0xff] }
  0x30   : > { %645 = vmatpush.bf16.msra.mxu0 %v1076_v13  ;;  %v1082_v22 = vld [vmem:[%s1261_s11 + $0x60] sm:$0xff]  ;;  %v1081_v26 = vld [vmem:[%s1261_s11 + $0x58] sm:$0xff]  ;;  %v1080_v30 = vld [vmem:[%s1261_s11 + $0x50] sm:$0xff] }
  0x31   : > { %664 = vmatpush.bf16.msra.mxu1 %v1084_v14  ;;  %v1090_v23 = vld [vmem:[%s1261_s11 + $0xa0] sm:$0xff]  ;;  %v1089_v27 = vld [vmem:[%s1261_s11 + $0x98] sm:$0xff]  ;;  %v1088_v31 = vld [vmem:[%s1261_s11 + $0x90] sm:$0xff] }
  0x32   : > { %683 = vmatpush.bf16.msra.mxu2 %v1092_v15  ;;  %v1098_v24 = vld [vmem:[%s1261_s11 + $0xe0] sm:$0xff]  ;;  %v1097_v28 = vld [vmem:[%s1261_s11 + $0xd8] sm:$0xff]  ;;  %v1096_v32 = vld [vmem:[%s1261_s11 + $0xd0] sm:$0xff] }
  0x33   : > { %702 = vmatpush.bf16.msra.mxu3 %v1100_v16  ;;  %v1071_v33 = vld [vmem:[%s1261_s11 + $0x8] sm:$0xff]  ;;  %v1070_v37 = vld [vmem:[%s1261_s11] sm:$0xff]  ;;  %v1064_v42 = vld [vmem:[%s1263_s12 + $0xc] sm:$0xf0] }
  0x34   : > { %646 = vmatpush.bf16.msra.mxu0 %v1075_v17  ;;  %v1079_v34 = vld [vmem:[%s1261_s11 + $0x48] sm:$0xff]  ;;  %v1078_v38 = vld [vmem:[%s1261_s11 + $0x40] sm:$0xff]  ;;  %v900_v44 = vld [vmem:[%s1263_s12 + $0x10] sm:$0xf0] }
  0x35   : > { %665 = vmatpush.bf16.msra.mxu1 %v1083_v18  ;;  %v1087_v35 = vld [vmem:[%s1261_s11 + $0x88] sm:$0xff]  ;;  %v1086_v39 = vld [vmem:[%s1261_s11 + $0x80] sm:$0xff]  ;;  %v1065_v46 = vld [vmem:[%s1263_s12 + $0x14] sm:$0xf0] }
  0x36   : > { %684 = vmatpush.bf16.msra.mxu2 %v1091_v19  ;;  %v1095_v36 = vld [vmem:[%s1261_s11 + $0xc8] sm:$0xff]  ;;  %v1094_v40 = vld [vmem:[%s1261_s11 + $0xc0] sm:$0xff]  ;;  %v908_v48 = vld [vmem:[%s1263_s12 + $0x18] sm:$0xf0] }
  0x37   : > { %703 = vmatpush.bf16.msra.mxu3 %v1099_v20  ;;  %v898_v41 = vld [vmem:[%s1263_s12] sm:$0xf]  ;;  %v1062_v43 = vld [vmem:[%s1263_s12 + $0x4] sm:$0xf]  ;;  %v906_v45 = vld [vmem:[%s1263_s12 + $0x8] sm:$0xf] }
  0x38   : > { %647 = vmatpush.bf16.msra.mxu0 %v1074_v21  ;;  %v1063_v47 = vld [vmem:[%s1263_s12 + $0xc] sm:$0xf]  ;;  %v899_v49 = vor.u32 %v1064_v42, %v898_v41  ;;  %v903_v50 = vor.u32 %v1062_v43, %v900_v44  ;;  %v907_v51 = vor.u32 %v1065_v46, %v906_v45  ;;  %v914_v53 = vld [vmem:[%s1263_s12 + $0x20] sm:$0xf]  ;;  %v1068_v54 = vld [vmem:[%s1263_s12 + $0x2c] sm:$0xf0] }
  0x39   : > { %666 = vmatpush.bf16.msra.mxu1 %v1082_v22  ;;  %v911_v52 = vor.u32 %v1063_v47, %v908_v48  ;;  %v1066_v55 = vld [vmem:[%s1263_s12 + $0x24] sm:$0xf]  ;;  %v916_v56 = vld [vmem:[%s1263_s12 + $0x30] sm:$0xf0]  ;;  %v922_v57 = vld [vmem:[%s1263_s12 + $0x28] sm:$0xf]  ;;  %v915_v61 = vor.u32 %v1068_v54, %v914_v53 }
  0x3a   : > { %685 = vmatpush.bf16.msra.mxu2 %v1090_v23  ;;  %v1069_v58 = vld [vmem:[%s1263_s12 + $0x34] sm:$0xf0]  ;;  %v1067_v59 = vld [vmem:[%s1263_s12 + $0x2c] sm:$0xf]  ;;  %v924_v60 = vld [vmem:[%s1263_s12 + $0x38] sm:$0xf0]  ;;  %v919_v62 = vor.u32 %v1066_v55, %v916_v56 }
  0x3b   : > { %704 = vmatpush.bf16.msra.mxu3 %v1098_v24  ;;  %v923_v63 = vor.u32 %v1069_v58, %v922_v57  ;;  %v927_v0 = vor.u32 %v1067_v59, %v924_v60  ;;  %v336_v9 = vld [vmem:[#allocation2 + $0x10] sm:$0xff]  ;;  %v337_v16 = vld [vmem:[#allocation2] sm:$0xff] }
  0x3c   : > { %648 = vmatpush.bf16.msra.mxu0 %v1073_v25  ;;  %v338_v25 = vld [vmem:[#allocation2 + $0x18] sm:$0xff] }
  0x3d   : > { %667 = vmatpush.bf16.msra.mxu1 %v1081_v26 }
  0x3e   : > { %686 = vmatpush.bf16.msra.mxu2 %v1089_v27 }
  0x3f   : > { %705 = vmatpush.bf16.msra.mxu3 %v1097_v28 }
  0x40   : > { %649 = vmatpush.bf16.msra.mxu0 %v1072_v29 }
  0x41   : > { %668 = vmatpush.bf16.msra.mxu1 %v1080_v30 }
  0x42   : > { %687 = vmatpush.bf16.msra.mxu2 %v1088_v31 }
  0x43   : > { %706 = vmatpush.bf16.msra.mxu3 %v1096_v32 }
  0x44   : > { %650 = vmatpush.bf16.msra.mxu0 %v1071_v33  ;;  %v339_v33 = vld [vmem:[#allocation2 + $0x8] sm:$0xff] }
  0x45   : > { %669 = vmatpush.bf16.msra.mxu1 %v1079_v34 }
  0x46   : > { %688 = vmatpush.bf16.msra.mxu2 %v1087_v35 }
  0x47   : > { %707 = vmatpush.bf16.msra.mxu3 %v1095_v36 }
  0x48   : > { %651 = vmatpush.bf16.msra.mxu0 %v1070_v37 }
  0x49   : > { %670 = vmatpush.bf16.msra.mxu1 %v1078_v38 }
  0x4a   : > { %689 = vmatpush.bf16.msra.mxu2 %v1086_v39 }
  0x4b   : > { %708 = vmatpush.bf16.msra.mxu3 %v1094_v40  ;;  %652 = vmatmul.bf16.vlgmr.msra.gmra.mxu0 %v899_v49 }
  0x4c   : > { %671 = vmatmul.bf16.vlgmr.msra.gmra.mxu1 %v903_v50 }
  0x4d   : > { %690 = vmatmul.bf16.vlgmr.msra.gmra.mxu2 %v907_v51 }
  0x4e   : > { %709 = vmatmul.bf16.vlgmr.msra.gmra.mxu3 %v911_v52 }
  0x5b   : > { %657 = vmatmul.bf16.gmra.mxu0 %v915_v61 }
  0x5c   : > { %676 = vmatmul.bf16.gmra.mxu1 %v919_v62 }
  0x5d   : > { %695 = vmatmul.bf16.gmra.mxu2 %v923_v63 }
  0x5e   : > { %714 = vmatmul.bf16.gmra.mxu3 %v927_v0 }
  0xc8   : > { %v653_v1 = vpop.f32.mrf.mxu0 }
  0xc9   : > { %v672_v2 = vpop.f32.mrf.mxu1 }
  0xca   : > { %v673_v3 = vadd.f32 %v672_v2, %v653_v1 }
  0xd0   : > { %v691_v4 = vpop.f32.mrf.mxu2  ;;  %v655_v7 = vpop.f32.mrf.mxu0 }
  0xd1   : > { %v710_v5 = vpop.f32.mrf.mxu3  ;;  %v692_v6 = vadd.f32 %v691_v4, %v673_v3  ;;  %v674_v8 = vpop.f32.mrf.mxu1 }
  0xd2   : > { %v675_v12 = vadd.f32 %v674_v8, %v655_v7 }
  0xd3   : > { %v711_v10 = vadd.f32 %v710_v5, %v692_v6 }
  0xd5   : > { %v720_v11 = vadd.f32 %v711_v10, %v336_v9 }
  0xd7   : > { %724 = vst [vmem:[#allocation2 + $0x10] sm:$0xff] %v720_v11 }
  0xd8   : > { %v693_v13 = vpop.f32.mrf.mxu2  ;;  %v658_v17 = vpop.f32.mrf.mxu0 }
  0xd9   : > { %v712_v14 = vpop.f32.mrf.mxu3  ;;  %v694_v15 = vadd.f32 %v693_v13, %v675_v12  ;;  %v677_v18 = vpop.f32.mrf.mxu1 }
  0xda   : > { %v678_v21 = vadd.f32 %v677_v18, %v658_v17 }
  0xdb   : > { %v713_v19 = vadd.f32 %v712_v14, %v694_v15 }
  0xdd   : > { %v721_v20 = vadd.f32 %v713_v19, %v337_v16 }
  0xdf   : > { %725 = vst [vmem:[#allocation2] sm:$0xff] %v721_v20 }
  0xe0   : > { %v696_v22 = vpop.f32.mrf.mxu2  ;;  %v660_v27 = vpop.f32.mrf.mxu0 }
  0xe1   : > { %v715_v23 = vpop.f32.mrf.mxu3  ;;  %v697_v24 = vadd.f32 %v696_v22, %v678_v21  ;;  %v679_v28 = vpop.f32.mrf.mxu1 }
  0xe2   : > { %v680_v30 = vadd.f32 %v679_v28, %v660_v27 }
  0xe3   : > { %v716_v26 = vadd.f32 %v715_v23, %v697_v24 }
  0xe5   : > { %v722_v29 = vadd.f32 %v716_v26, %v338_v25 }
  0xe7   : > { %726 = vst [vmem:[#allocation2 + $0x18] sm:$0xff] %v722_v29 }
  0xe8   : > { %v698_v31 = vpop.f32.mrf.mxu2 }
  0xe9   : > { %v699_v32 = vadd.f32 %v698_v31, %v680_v30  ;;  %v717_v34 = vpop.f32.mrf.mxu3 }
  0xeb   : > { %v718_v35 = vadd.f32 %v717_v34, %v699_v32  ;;  %731 = sbr.rel (%p1056_p11) target bundleno = 254 (0xfe), region = 67 }
  0xed   : > { %v723_v36 = vadd.f32 %v718_v35, %v339_v33 }
  0xef   : > { %727 = vst [vmem:[#allocation2 + $0x8] sm:$0xff] %v723_v36 }
  0xf0   : > { %v732_v37 = vld [vmem:[#allocation2 + $0x10] sm:$0xff]  ;;  %v1143_v38 = vld [vmem:[%s1350_s2] ss:$0 sm:$0xff]  ;;  %v734_v43 = vld [vmem:[#allocation2 + $0x18] sm:$0xff] }
  0xf1   : > { %v1144_v39 = vld [vmem:[%s1351_s3] ss:$0 sm:$0xff]  ;;  %v740_v41 = vmul.f32 %v1143_v38, %v732_v37  ;;  %v742_v45 = vmul.f32 %v1143_v38, %v734_v43 }
  0xf2   : > { %v733_v40 = vld [vmem:[#allocation2] sm:$0xff] }
  0xf3   : > { %v741_v42 = vmul.f32 %v1143_v38, %v733_v40  ;;  %v748_v47 = vadd.f32 %v1144_v39, %v740_v41  ;;  %v750_v49 = vadd.f32 %v1144_v39, %v742_v45 }
  0xf5   : > { %v749_v48 = vadd.f32 %v1144_v39, %v741_v42  ;;  %v752_v51 = vmax.f32 %v748_v47, 0.0  ;;  %v754_v53 = vmax.f32 %v750_v49, 0.0 }
  0xf6   : > { %v735_v44 = vld [vmem:[#allocation2 + $0x8] sm:$0xff] }
  0xf7   : > { %v743_v46 = vmul.f32 %v1143_v38, %v735_v44  ;;  %v753_v52 = vmax.f32 %v749_v48, 0.0  ;;  %756 = vst [vmem:[%s1352_s4] sm:$0xff] %v752_v51 }
  0xf8   : > { %758 = vst [vmem:[%s1352_s4 + $0x10] sm:$0xff] %v754_v53 }
  0xf9   : > { %v751_v50 = vadd.f32 %v1144_v39, %v743_v46  ;;  %757 = vst [vmem:[%s1352_s4 + $0x8] sm:$0xff] %v753_v52 }
  0xfb   : > { %v755_v54 = vmax.f32 %v751_v50, 0.0 }
  0xfd   : > { %759 = vst [vmem:[%s1352_s4 + $0x18] sm:$0xff] %v755_v54 }
  0xfe PF: > { %s14_s19 = sadd.s32 1, %s1183_s19   ;;  %s1353_s15 = smov %s1171_s16 }
  0xff   : > { %p11_p12 = scmp.ge.s32.totalorder %s14_s19, 4   ;;  %s1354_s16 = smov %s1246_s23 }
 0x100   : > { %s1355_s17 = smov %s1179_s18  ;;  %s1356_s18 = smov %s1358_s20 }
 0x101   :  { %13 = sbr.rel (!%p11_p12) target bundleno = 3 (0x3), region = 111 }

// kernel: swav_resnet_forward.49
= control target key start
LH: loop header
LB: loop body
LE: loop exit
PB: predicated region body
PF: predicated region fallthrough
CT: control target
= control target key end

     0   :  { %s517_s1 = inlined_call_operand.vmem [shape: bf16[128,256], index: 1, kind: input, shape index: {}]   ;;  %s518_s0 = inlined_call_operand.vmem [shape: bf16[32,128], index: 0, kind: input, shape index: {}]   ;;  %s519_s2 = inlined_call_operand.vmem [shape: f32[1,256], index: 2, kind: input, shape index: {}]   ;;  %s520_s3 = inlined_call_operand.vmem [shape: f32[1,256], index: 3, kind: input, shape index: {}]   ;;  %s521_s4 = inlined_call_operand.vmem [shape: f32[32,256], index: 4, kind: output, shape index: {}]  }
   0x1   :  { %v320_v0 = vld [vmem:[%s517_s1 + $0x70] sm:$0xf]  ;;  %v343_v1 = vld [vmem:[%s517_s1 + $0x74] sm:$0xf0]  ;;  %v342_v2 = vld [vmem:[%s517_s1 + $0x74] sm:$0xf] }
   0x2   :  { %v321_v3 = vor.u32 %v343_v1, %v320_v0  ;;  %v322_v4 = vld [vmem:[%s517_s1 + $0x78] sm:$0xf0]  ;;  %v312_v5 = vld [vmem:[%s517_s1 + $0x60] sm:$0xf]  ;;  %v341_v6 = vld [vmem:[%s517_s1 + $0x64] sm:$0xf0] }
   0x3   :  { %v325_v7 = vor.u32 %v342_v2, %v322_v4  ;;  %v340_v8 = vld [vmem:[%s517_s1 + $0x64] sm:$0xf]  ;;  %v314_v9 = vld [vmem:[%s517_s1 + $0x68] sm:$0xf0]  ;;  %v313_v10 = vor.u32 %v341_v6, %v312_v5  ;;  %v304_v12 = vld [vmem:[%s517_s1 + $0x50] sm:$0xf] }
   0x4   :  { %149 = vmatpush.bf16.msra.mxu0 %v321_v3  ;;  %344 = vmatpush.bf16.msra.mxu2 %v321_v3  ;;  %v317_v11 = vor.u32 %v340_v8, %v314_v9  ;;  %v339_v13 = vld [vmem:[%s517_s1 + $0x54] sm:$0xf0]  ;;  %v338_v14 = vld [vmem:[%s517_s1 + $0x54] sm:$0xf]  ;;  %v306_v15 = vld [vmem:[%s517_s1 + $0x58] sm:$0xf0] }
   0x5   :  { %168 = vmatpush.bf16.msra.mxu1 %v325_v7  ;;  %352 = vmatpush.bf16.msra.mxu3 %v325_v7  ;;  %v305_v16 = vor.u32 %v339_v13, %v304_v12  ;;  %v309_v17 = vor.u32 %v338_v14, %v306_v15  ;;  %v296_v18 = vld [vmem:[%s517_s1 + $0x40] sm:$0xf]  ;;  %v337_v19 = vld [vmem:[%s517_s1 + $0x44] sm:$0xf0]  ;;  %v336_v20 = vld [vmem:[%s517_s1 + $0x44] sm:$0xf] }
   0x6   :  { %v298_v21 = vld [vmem:[%s517_s1 + $0x48] sm:$0xf0]  ;;  %v297_v22 = vor.u32 %v337_v19, %v296_v18  ;;  %v288_v24 = vld [vmem:[%s517_s1 + $0x30] sm:$0xf]  ;;  %v335_v25 = vld [vmem:[%s517_s1 + $0x34] sm:$0xf0] }
   0x7   :  { %v301_v23 = vor.u32 %v336_v20, %v298_v21  ;;  %v334_v26 = vld [vmem:[%s517_s1 + $0x34] sm:$0xf]  ;;  %v290_v27 = vld [vmem:[%s517_s1 + $0x38] sm:$0xf0]  ;;  %v289_v28 = vor.u32 %v335_v25, %v288_v24  ;;  %v280_v30 = vld [vmem:[%s517_s1 + $0x20] sm:$0xf] }
   0x8   :  { %150 = vmatpush.bf16.msra.mxu0 %v313_v10  ;;  %345 = vmatpush.bf16.msra.mxu2 %v313_v10  ;;  %v293_v29 = vor.u32 %v334_v26, %v290_v27  ;;  %v333_v31 = vld [vmem:[%s517_s1 + $0x24] sm:$0xf0]  ;;  %v332_v32 = vld [vmem:[%s517_s1 + $0x24] sm:$0xf]  ;;  %v282_v33 = vld [vmem:[%s517_s1 + $0x28] sm:$0xf0] }
   0x9   :  { %169 = vmatpush.bf16.msra.mxu1 %v317_v11  ;;  %353 = vmatpush.bf16.msra.mxu3 %v317_v11  ;;  %v281_v34 = vor.u32 %v333_v31, %v280_v30  ;;  %v285_v35 = vor.u32 %v332_v32, %v282_v33  ;;  %v272_v36 = vld [vmem:[%s517_s1 + $0x10] sm:$0xf]  ;;  %v331_v37 = vld [vmem:[%s517_s1 + $0x14] sm:$0xf0]  ;;  %v330_v38 = vld [vmem:[%s517_s1 + $0x14] sm:$0xf] }
   0xa   :  { %v274_v39 = vld [vmem:[%s517_s1 + $0x18] sm:$0xf0]  ;;  %v273_v40 = vor.u32 %v331_v37, %v272_v36  ;;  %v264_v42 = vld [vmem:[%s517_s1] sm:$0xf]  ;;  %v329_v43 = vld [vmem:[%s517_s1 + $0x4] sm:$0xf0] }
   0xb   :  { %v277_v41 = vor.u32 %v330_v38, %v274_v39  ;;  %v328_v44 = vld [vmem:[%s517_s1 + $0x4] sm:$0xf]  ;;  %v266_v45 = vld [vmem:[%s517_s1 + $0x8] sm:$0xf0]  ;;  %v265_v46 = vor.u32 %v329_v43, %v264_v42  ;;  %v214_v50 = vld [vmem:[%s519_s2] sm:$0x3] }
   0xc   :  { %151 = vmatpush.bf16.msra.mxu0 %v305_v16  ;;  %346 = vmatpush.bf16.msra.mxu2 %v305_v16  ;;  %v269_v47 = vor.u32 %v328_v44, %v266_v45  ;;  %v326_v48 = vld [vmem:[%s518_s0] sm:$0xff]  ;;  %v327_v49 = vld [vmem:[%s518_s0 + $0x8] sm:$0xff]  ;;  %v216_v52 = vperm.slane %v214_v50, 0  ;;  %v217_v53 = vperm.slane %v214_v50, 1 }
   0xd   :  { %170 = vmatpush.bf16.msra.mxu1 %v309_v17  ;;  %354 = vmatpush.bf16.msra.mxu3 %v309_v17  ;;  %v228_v51 = vld [vmem:[%s520_s3] sm:$0x3] }
   0xe   :  { %v230_v54 = vperm.slane %v228_v51, 0  ;;  %v231_v56 = vperm.slane %v228_v51, 1 }
  0x10   :  { %152 = vmatpush.bf16.msra.mxu0 %v297_v22  ;;  %347 = vmatpush.bf16.msra.mxu2 %v297_v22 }
  0x11   :  { %171 = vmatpush.bf16.msra.mxu1 %v301_v23  ;;  %355 = vmatpush.bf16.msra.mxu3 %v301_v23 }
  0x14   :  { %153 = vmatpush.bf16.msra.mxu0 %v289_v28  ;;  %348 = vmatpush.bf16.msra.mxu2 %v289_v28 }
  0x15   :  { %172 = vmatpush.bf16.msra.mxu1 %v293_v29  ;;  %356 = vmatpush.bf16.msra.mxu3 %v293_v29 }
  0x18   :  { %154 = vmatpush.bf16.msra.mxu0 %v281_v34  ;;  %349 = vmatpush.bf16.msra.mxu2 %v281_v34 }
  0x19   :  { %173 = vmatpush.bf16.msra.mxu1 %v285_v35  ;;  %357 = vmatpush.bf16.msra.mxu3 %v285_v35 }
  0x1c   :  { %155 = vmatpush.bf16.msra.mxu0 %v273_v40  ;;  %350 = vmatpush.bf16.msra.mxu2 %v273_v40 }
  0x1d   :  { %174 = vmatpush.bf16.msra.mxu1 %v277_v41  ;;  %358 = vmatpush.bf16.msra.mxu3 %v277_v41 }
  0x20   :  { %156 = vmatpush.bf16.msra.mxu0 %v265_v46  ;;  %351 = vmatpush.bf16.msra.mxu2 %v265_v46 }
  0x21   :  { %175 = vmatpush.bf16.msra.mxu1 %v269_v47  ;;  %359 = vmatpush.bf16.msra.mxu3 %v269_v47 }
  0x23   :  { %157 = vmatmul.bf16.vlgmr.msra.gmra.mxu0 %v326_v48  ;;  %162 = vmatmul.bf16.vlgmr.msra.gmra.mxu2 %v327_v49 }
  0x24   :  { %176 = vmatmul.bf16.vlgmr.msra.gmra.mxu1 %v326_v48  ;;  %181 = vmatmul.bf16.vlgmr.msra.gmra.mxu3 %v327_v49 }
  0xa0   :  { %v158_v55 = vpop.f32.mrf.mxu0 }
  0xa1   :  { %v220_v57 = vmul.f32 %v216_v52, %v158_v55  ;;  %v177_v58 = vpop.f32.mrf.mxu1 }
  0xa2   :  { %v221_v59 = vmul.f32 %v217_v53, %v177_v58 }
  0xa3   :  { %v234_v60 = vadd.f32 %v230_v54, %v220_v57 }
  0xa4   :  { %v235_v61 = vadd.f32 %v231_v56, %v221_v59 }
  0xa5   :  { %242 = vst [vmem:[%s521_s4] sm:$0xff] %v234_v60 }
  0xa6   :  { %243 = vst [vmem:[%s521_s4 + $0x8] sm:$0xff] %v235_v61  ;;  %v163_v62 = vpop.f32.mrf.mxu2 }
  0xa7   :  { %v224_v63 = vmul.f32 %v216_v52, %v163_v62  ;;  %v182_v0 = vpop.f32.mrf.mxu3 }
  0xa8   :  { %v225_v1 = vmul.f32 %v217_v53, %v182_v0  ;;  %v160_v2 = vpop.f32.mrf.mxu0 }
  0xa9   :  { %v238_v3 = vadd.f32 %v230_v54, %v224_v63  ;;  %v222_v4 = vmul.f32 %v216_v52, %v160_v2  ;;  %v179_v5 = vpop.f32.mrf.mxu1 }
  0xaa   :  { %v239_v6 = vadd.f32 %v231_v56, %v225_v1  ;;  %v223_v7 = vmul.f32 %v217_v53, %v179_v5 }
  0xab   :  { %246 = vst [vmem:[%s521_s4 + $0x20] sm:$0xff] %v238_v3  ;;  %v236_v8 = vadd.f32 %v230_v54, %v222_v4 }
  0xac   :  { %247 = vst [vmem:[%s521_s4 + $0x28] sm:$0xff] %v239_v6  ;;  %v237_v9 = vadd.f32 %v231_v56, %v223_v7 }
  0xad   :  { %244 = vst [vmem:[%s521_s4 + $0x10] sm:$0xff] %v236_v8 }
  0xae   :  { %245 = vst [vmem:[%s521_s4 + $0x18] sm:$0xff] %v237_v9  ;;  %v165_v10 = vpop.f32.mrf.mxu2 }
  0xaf   :  { %v226_v11 = vmul.f32 %v216_v52, %v165_v10  ;;  %v184_v12 = vpop.f32.mrf.mxu3 }
  0xb0   :  { %v227_v13 = vmul.f32 %v217_v53, %v184_v12 }
  0xb1   :  { %v240_v14 = vadd.f32 %v230_v54, %v226_v11 }
  0xb2   :  { %v241_v15 = vadd.f32 %v231_v56, %v227_v13 }
  0xb3   :  { %248 = vst [vmem:[%s521_s4 + $0x30] sm:$0xff] %v240_v14 }
  0xb4   :  { %249 = vst [vmem:[%s521_s4 + $0x38] sm:$0xff] %v241_v15 }

// kernel: swav_resnet_forward.50
= control target key start
LH: loop header
LB: loop body
LE: loop exit
PB: predicated region body
PF: predicated region fallthrough
CT: control target
= control target key end

     0   :  { %s573_s1 = inlined_call_operand.vmem [shape: bf16[128,256], index: 1, kind: input, shape index: {}]   ;;  %s574_s0 = inlined_call_operand.vmem [shape: bf16[32,128], index: 0, kind: input, shape index: {}]   ;;  %s575_s2 = inlined_call_operand.vmem [shape: f32[1,256], index: 2, kind: input, shape index: {}]   ;;  %s576_s3 = inlined_call_operand.vmem [shape: f32[1,256], index: 3, kind: input, shape index: {}]   ;;  %s577_s4 = inlined_call_operand.vmem [shape: f32[32,256], index: 4, kind: input, shape index: {}]   ;;  %s578_s5 = inlined_call_operand.vmem [shape: f32[32,256], index: 5, kind: output, shape index: {}]  }
   0x1   :  { %v347_v0 = vld [vmem:[%s573_s1 + $0x70] sm:$0xf]  ;;  %v370_v1 = vld [vmem:[%s573_s1 + $0x74] sm:$0xf0]  ;;  %v369_v2 = vld [vmem:[%s573_s1 + $0x74] sm:$0xf] }
   0x2   :  { %v348_v3 = vor.u32 %v370_v1, %v347_v0  ;;  %v349_v4 = vld [vmem:[%s573_s1 + $0x78] sm:$0xf0]  ;;  %v339_v5 = vld [vmem:[%s573_s1 + $0x60] sm:$0xf]  ;;  %v368_v6 = vld [vmem:[%s573_s1 + $0x64] sm:$0xf0] }
   0x3   :  { %v352_v7 = vor.u32 %v369_v2, %v349_v4  ;;  %v367_v8 = vld [vmem:[%s573_s1 + $0x64] sm:$0xf]  ;;  %v341_v9 = vld [vmem:[%s573_s1 + $0x68] sm:$0xf0]  ;;  %v340_v10 = vor.u32 %v368_v6, %v339_v5  ;;  %v331_v12 = vld [vmem:[%s573_s1 + $0x50] sm:$0xf] }
   0x4   :  { %152 = vmatpush.bf16.msra.mxu0 %v348_v3  ;;  %371 = vmatpush.bf16.msra.mxu2 %v348_v3  ;;  %v344_v11 = vor.u32 %v367_v8, %v341_v9  ;;  %v366_v13 = vld [vmem:[%s573_s1 + $0x54] sm:$0xf0]  ;;  %v365_v14 = vld [vmem:[%s573_s1 + $0x54] sm:$0xf]  ;;  %v333_v15 = vld [vmem:[%s573_s1 + $0x58] sm:$0xf0] }
   0x5   :  { %171 = vmatpush.bf16.msra.mxu1 %v352_v7  ;;  %379 = vmatpush.bf16.msra.mxu3 %v352_v7  ;;  %v332_v16 = vor.u32 %v366_v13, %v331_v12  ;;  %v336_v17 = vor.u32 %v365_v14, %v333_v15  ;;  %v323_v18 = vld [vmem:[%s573_s1 + $0x40] sm:$0xf]  ;;  %v364_v19 = vld [vmem:[%s573_s1 + $0x44] sm:$0xf0]  ;;  %v363_v20 = vld [vmem:[%s573_s1 + $0x44] sm:$0xf] }
   0x6   :  { %v325_v21 = vld [vmem:[%s573_s1 + $0x48] sm:$0xf0]  ;;  %v324_v22 = vor.u32 %v364_v19, %v323_v18  ;;  %v315_v24 = vld [vmem:[%s573_s1 + $0x30] sm:$0xf]  ;;  %v362_v25 = vld [vmem:[%s573_s1 + $0x34] sm:$0xf0] }
   0x7   :  { %v328_v23 = vor.u32 %v363_v20, %v325_v21  ;;  %v361_v26 = vld [vmem:[%s573_s1 + $0x34] sm:$0xf]  ;;  %v317_v27 = vld [vmem:[%s573_s1 + $0x38] sm:$0xf0]  ;;  %v316_v28 = vor.u32 %v362_v25, %v315_v24  ;;  %v307_v30 = vld [vmem:[%s573_s1 + $0x20] sm:$0xf] }
   0x8   :  { %153 = vmatpush.bf16.msra.mxu0 %v340_v10  ;;  %372 = vmatpush.bf16.msra.mxu2 %v340_v10  ;;  %v320_v29 = vor.u32 %v361_v26, %v317_v27  ;;  %v360_v31 = vld [vmem:[%s573_s1 + $0x24] sm:$0xf0]  ;;  %v359_v32 = vld [vmem:[%s573_s1 + $0x24] sm:$0xf]  ;;  %v309_v33 = vld [vmem:[%s573_s1 + $0x28] sm:$0xf0] }
   0x9   :  { %172 = vmatpush.bf16.msra.mxu1 %v344_v11  ;;  %380 = vmatpush.bf16.msra.mxu3 %v344_v11  ;;  %v308_v34 = vor.u32 %v360_v31, %v307_v30  ;;  %v312_v35 = vor.u32 %v359_v32, %v309_v33  ;;  %v299_v36 = vld [vmem:[%s573_s1 + $0x10] sm:$0xf]  ;;  %v358_v37 = vld [vmem:[%s573_s1 + $0x14] sm:$0xf0]  ;;  %v357_v38 = vld [vmem:[%s573_s1 + $0x14] sm:$0xf] }
   0xa   :  { %v301_v39 = vld [vmem:[%s573_s1 + $0x18] sm:$0xf0]  ;;  %v300_v40 = vor.u32 %v358_v37, %v299_v36  ;;  %v291_v42 = vld [vmem:[%s573_s1] sm:$0xf]  ;;  %v356_v43 = vld [vmem:[%s573_s1 + $0x4] sm:$0xf0] }
   0xb   :  { %v304_v41 = vor.u32 %v357_v38, %v301_v39  ;;  %v355_v44 = vld [vmem:[%s573_s1 + $0x4] sm:$0xf]  ;;  %v293_v45 = vld [vmem:[%s573_s1 + $0x8] sm:$0xf0]  ;;  %v292_v46 = vor.u32 %v356_v43, %v291_v42  ;;  %v217_v50 = vld [vmem:[%s575_s2] sm:$0x3] }
   0xc   :  { %154 = vmatpush.bf16.msra.mxu0 %v332_v16  ;;  %373 = vmatpush.bf16.msra.mxu2 %v332_v16  ;;  %v296_v47 = vor.u32 %v355_v44, %v293_v45  ;;  %v353_v48 = vld [vmem:[%s574_s0] sm:$0xff]  ;;  %v354_v49 = vld [vmem:[%s574_s0 + $0x8] sm:$0xff]  ;;  %v219_v52 = vperm.slane %v217_v50, 0  ;;  %v220_v53 = vperm.slane %v217_v50, 1  ;;  %v247_v15 = vld [vmem:[%s577_s4 + $0x10] sm:$0xff] }
   0xd   :  { %173 = vmatpush.bf16.msra.mxu1 %v336_v17  ;;  %381 = vmatpush.bf16.msra.mxu3 %v336_v17  ;;  %v231_v51 = vld [vmem:[%s576_s3] sm:$0x3]  ;;  %v246_v62 = vld [vmem:[%s577_s4 + $0x8] sm:$0xff]  ;;  %v248_v19 = vld [vmem:[%s577_s4 + $0x18] sm:$0xff] }
   0xe   :  { %v233_v54 = vperm.slane %v231_v51, 0  ;;  %v234_v56 = vperm.slane %v231_v51, 1  ;;  %v245_v59 = vld [vmem:[%s577_s4] sm:$0xff]  ;;  %v250_v11 = vld [vmem:[%s577_s4 + $0x28] sm:$0xff]  ;;  %v251_v31 = vld [vmem:[%s577_s4 + $0x30] sm:$0xff] }
   0xf   :  { %v249_v7 = vld [vmem:[%s577_s4 + $0x20] sm:$0xff] }
  0x10   :  { %155 = vmatpush.bf16.msra.mxu0 %v324_v22  ;;  %374 = vmatpush.bf16.msra.mxu2 %v324_v22 }
  0x11   :  { %174 = vmatpush.bf16.msra.mxu1 %v328_v23  ;;  %382 = vmatpush.bf16.msra.mxu3 %v328_v23 }
  0x14   :  { %156 = vmatpush.bf16.msra.mxu0 %v316_v28  ;;  %375 = vmatpush.bf16.msra.mxu2 %v316_v28 }
  0x15   :  { %175 = vmatpush.bf16.msra.mxu1 %v320_v29  ;;  %383 = vmatpush.bf16.msra.mxu3 %v320_v29 }
  0x18   :  { %157 = vmatpush.bf16.msra.mxu0 %v308_v34  ;;  %376 = vmatpush.bf16.msra.mxu2 %v308_v34  ;;  %v252_v34 = vld [vmem:[%s577_s4 + $0x38] sm:$0xff] }
  0x19   :  { %176 = vmatpush.bf16.msra.mxu1 %v312_v35  ;;  %384 = vmatpush.bf16.msra.mxu3 %v312_v35 }
  0x1c   :  { %158 = vmatpush.bf16.msra.mxu0 %v300_v40  ;;  %377 = vmatpush.bf16.msra.mxu2 %v300_v40 }
  0x1d   :  { %177 = vmatpush.bf16.msra.mxu1 %v304_v41  ;;  %385 = vmatpush.bf16.msra.mxu3 %v304_v41 }
  0x20   :  { %159 = vmatpush.bf16.msra.mxu0 %v292_v46  ;;  %378 = vmatpush.bf16.msra.mxu2 %v292_v46 }
  0x21   :  { %178 = vmatpush.bf16.msra.mxu1 %v296_v47  ;;  %386 = vmatpush.bf16.msra.mxu3 %v296_v47 }
  0x23   :  { %160 = vmatmul.bf16.vlgmr.msra.gmra.mxu0 %v353_v48  ;;  %165 = vmatmul.bf16.vlgmr.msra.gmra.mxu2 %v354_v49 }
  0x24   :  { %179 = vmatmul.bf16.vlgmr.msra.gmra.mxu1 %v353_v48  ;;  %184 = vmatmul.bf16.vlgmr.msra.gmra.mxu3 %v354_v49 }
  0xa0   :  { %v161_v55 = vpop.f32.mrf.mxu0 }
  0xa1   :  { %v223_v57 = vmul.f32 %v219_v52, %v161_v55  ;;  %v180_v58 = vpop.f32.mrf.mxu1 }
  0xa2   :  { %v224_v60 = vmul.f32 %v220_v53, %v180_v58 }
  0xa3   :  { %v237_v61 = vadd.f32 %v233_v54, %v223_v57 }
  0xa4   :  { %v238_v63 = vadd.f32 %v234_v56, %v224_v60 }
  0xa5   :  { %v253_v0 = vadd.f32 %v245_v59, %v237_v61 }
  0xa6   :  { %v254_v1 = vadd.f32 %v246_v62, %v238_v63  ;;  %v166_v2 = vpop.f32.mrf.mxu2 }
  0xa7   :  { %v261_v3 = vmax.f32 %v253_v0, 0.0  ;;  %v227_v4 = vmul.f32 %v219_v52, %v166_v2  ;;  %v185_v5 = vpop.f32.mrf.mxu3 }
  0xa8   :  { %v262_v6 = vmax.f32 %v254_v1, 0.0  ;;  %v228_v8 = vmul.f32 %v220_v53, %v185_v5  ;;  %v163_v9 = vpop.f32.mrf.mxu0 }
  0xa9   :  { %269 = vst [vmem:[%s578_s5] sm:$0xff] %v261_v3  ;;  %v241_v10 = vadd.f32 %v233_v54, %v227_v4  ;;  %v225_v12 = vmul.f32 %v219_v52, %v163_v9  ;;  %v182_v13 = vpop.f32.mrf.mxu1 }
  0xaa   :  { %270 = vst [vmem:[%s578_s5 + $0x8] sm:$0xff] %v262_v6  ;;  %v242_v14 = vadd.f32 %v234_v56, %v228_v8  ;;  %v226_v16 = vmul.f32 %v220_v53, %v182_v13 }
  0xab   :  { %v257_v17 = vadd.f32 %v249_v7, %v241_v10  ;;  %v239_v18 = vadd.f32 %v233_v54, %v225_v12 }
  0xac   :  { %v258_v20 = vadd.f32 %v250_v11, %v242_v14  ;;  %v240_v21 = vadd.f32 %v234_v56, %v226_v16 }
  0xad   :  { %v265_v22 = vmax.f32 %v257_v17, 0.0  ;;  %v255_v23 = vadd.f32 %v247_v15, %v239_v18 }
  0xae   :  { %v266_v24 = vmax.f32 %v258_v20, 0.0  ;;  %v256_v25 = vadd.f32 %v248_v19, %v240_v21  ;;  %v168_v26 = vpop.f32.mrf.mxu2 }
  0xaf   :  { %273 = vst [vmem:[%s578_s5 + $0x20] sm:$0xff] %v265_v22  ;;  %v263_v27 = vmax.f32 %v255_v23, 0.0  ;;  %v229_v28 = vmul.f32 %v219_v52, %v168_v26  ;;  %v187_v29 = vpop.f32.mrf.mxu3 }
  0xb0   :  { %274 = vst [vmem:[%s578_s5 + $0x28] sm:$0xff] %v266_v24  ;;  %v264_v30 = vmax.f32 %v256_v25, 0.0  ;;  %v230_v32 = vmul.f32 %v220_v53, %v187_v29 }
  0xb1   :  { %271 = vst [vmem:[%s578_s5 + $0x10] sm:$0xff] %v263_v27  ;;  %v243_v33 = vadd.f32 %v233_v54, %v229_v28 }
  0xb2   :  { %272 = vst [vmem:[%s578_s5 + $0x18] sm:$0xff] %v264_v30  ;;  %v244_v35 = vadd.f32 %v234_v56, %v230_v32 }
  0xb3   :  { %v259_v36 = vadd.f32 %v251_v31, %v243_v33 }
  0xb4   :  { %v260_v37 = vadd.f32 %v252_v34, %v244_v35 }
  0xb5   :  { %v267_v38 = vmax.f32 %v259_v36, 0.0 }
  0xb6   :  { %v268_v39 = vmax.f32 %v260_v37, 0.0 }
  0xb7   :  { %275 = vst [vmem:[%s578_s5 + $0x30] sm:$0xff] %v267_v38 }
  0xb8   :  { %276 = vst [vmem:[%s578_s5 + $0x38] sm:$0xff] %v268_v39 }

// kernel: swav_resnet_forward.51
= control target key start
LH: loop header
LB: loop body
LE: loop exit
PB: predicated region body
PF: predicated region fallthrough
CT: control target
= control target key end

     0   :  { %s495_s1 = inlined_call_operand.vmem [shape: bf16[256,128], index: 1, kind: input, shape index: {}]   ;;  %s496_s0 = inlined_call_operand.vmem [shape: bf16[32,256], index: 0, kind: input, shape index: {}]   ;;  %s497_s2 = inlined_call_operand.vmem [shape: f32[1,128], index: 2, kind: input, shape index: {}]   ;;  %s498_s3 = inlined_call_operand.vmem [shape: f32[1,128], index: 3, kind: input, shape index: {}]   ;;  %s499_s4 = inlined_call_operand.vmem [shape: f32[32,128], index: 4, kind: output, shape index: {}]  }
   0x1   :  { %v353_v0 = vld [vmem:[%s495_s1 + $0x38] sm:$0xff]  ;;  %v352_v2 = vld [vmem:[%s495_s1 + $0x30] sm:$0xff]  ;;  %v351_v4 = vld [vmem:[%s495_s1 + $0x28] sm:$0xff] }
   0x2   :  { %v361_v1 = vld [vmem:[%s495_s1 + $0x78] sm:$0xff]  ;;  %181 = vmatpush.bf16.msra.mxu0 %v353_v0  ;;  %362 = vmatpush.bf16.msra.mxu2 %v353_v0  ;;  %v360_v3 = vld [vmem:[%s495_s1 + $0x70] sm:$0xff]  ;;  %v359_v5 = vld [vmem:[%s495_s1 + $0x68] sm:$0xff] }
   0x3   :  { %200 = vmatpush.bf16.msra.mxu1 %v361_v1  ;;  %370 = vmatpush.bf16.msra.mxu3 %v361_v1  ;;  %v350_v6 = vld [vmem:[%s495_s1 + $0x20] sm:$0xff]  ;;  %v349_v8 = vld [vmem:[%s495_s1 + $0x18] sm:$0xff]  ;;  %v348_v10 = vld [vmem:[%s495_s1 + $0x10] sm:$0xff] }
   0x4   :  { %v358_v7 = vld [vmem:[%s495_s1 + $0x60] sm:$0xff]  ;;  %v357_v9 = vld [vmem:[%s495_s1 + $0x58] sm:$0xff]  ;;  %v356_v11 = vld [vmem:[%s495_s1 + $0x50] sm:$0xff] }
   0x5   :  { %v347_v12 = vld [vmem:[%s495_s1 + $0x8] sm:$0xff]  ;;  %v346_v14 = vld [vmem:[%s495_s1] sm:$0xff]  ;;  %v272_v18 = vld [vmem:[%s496_s0 + $0x10] sm:$0xf] }
   0x6   :  { %182 = vmatpush.bf16.msra.mxu0 %v352_v2  ;;  %363 = vmatpush.bf16.msra.mxu2 %v352_v2  ;;  %v355_v13 = vld [vmem:[%s495_s1 + $0x48] sm:$0xff]  ;;  %v354_v15 = vld [vmem:[%s495_s1 + $0x40] sm:$0xff]  ;;  %v345_v19 = vld [vmem:[%s496_s0 + $0x14] sm:$0xf0] }
   0x7   :  { %201 = vmatpush.bf16.msra.mxu1 %v360_v3  ;;  %371 = vmatpush.bf16.msra.mxu3 %v360_v3  ;;  %v264_v16 = vld [vmem:[%s496_s0] sm:$0xf]  ;;  %v343_v17 = vld [vmem:[%s496_s0 + $0x4] sm:$0xf0]  ;;  %v342_v20 = vld [vmem:[%s496_s0 + $0x4] sm:$0xf]  ;;  %v273_v25 = vor.u32 %v345_v19, %v272_v18 }
   0x8   :  { %v266_v21 = vld [vmem:[%s496_s0 + $0x8] sm:$0xf0]  ;;  %v344_v22 = vld [vmem:[%s496_s0 + $0x14] sm:$0xf]  ;;  %v274_v23 = vld [vmem:[%s496_s0 + $0x18] sm:$0xf0]  ;;  %v265_v24 = vor.u32 %v343_v17, %v264_v16 }
   0x9   :  { %v269_v26 = vor.u32 %v342_v20, %v266_v21  ;;  %v277_v27 = vor.u32 %v344_v22, %v274_v23  ;;  %v378_v29 = vld [vmem:[%s497_s2] ss:$0 sm:$0xff] }
   0xa   :  { %183 = vmatpush.bf16.msra.mxu0 %v351_v4  ;;  %364 = vmatpush.bf16.msra.mxu2 %v351_v4  ;;  %v379_v32 = vld [vmem:[%s498_s3] ss:$0 sm:$0xff] }
   0xb   :  { %202 = vmatpush.bf16.msra.mxu1 %v359_v5  ;;  %372 = vmatpush.bf16.msra.mxu3 %v359_v5 }
   0xe   :  { %184 = vmatpush.bf16.msra.mxu0 %v350_v6  ;;  %365 = vmatpush.bf16.msra.mxu2 %v350_v6 }
   0xf   :  { %203 = vmatpush.bf16.msra.mxu1 %v358_v7  ;;  %373 = vmatpush.bf16.msra.mxu3 %v358_v7 }
  0x12   :  { %185 = vmatpush.bf16.msra.mxu0 %v349_v8  ;;  %366 = vmatpush.bf16.msra.mxu2 %v349_v8 }
  0x13   :  { %204 = vmatpush.bf16.msra.mxu1 %v357_v9  ;;  %374 = vmatpush.bf16.msra.mxu3 %v357_v9 }
  0x16   :  { %186 = vmatpush.bf16.msra.mxu0 %v348_v10  ;;  %367 = vmatpush.bf16.msra.mxu2 %v348_v10 }
  0x17   :  { %205 = vmatpush.bf16.msra.mxu1 %v356_v11  ;;  %375 = vmatpush.bf16.msra.mxu3 %v356_v11 }
  0x1a   :  { %187 = vmatpush.bf16.msra.mxu0 %v347_v12  ;;  %368 = vmatpush.bf16.msra.mxu2 %v347_v12 }
  0x1b   :  { %206 = vmatpush.bf16.msra.mxu1 %v355_v13  ;;  %376 = vmatpush.bf16.msra.mxu3 %v355_v13 }
  0x1e   :  { %188 = vmatpush.bf16.msra.mxu0 %v346_v14  ;;  %369 = vmatpush.bf16.msra.mxu2 %v346_v14 }
  0x1f   :  { %207 = vmatpush.bf16.msra.mxu1 %v354_v15  ;;  %377 = vmatpush.bf16.msra.mxu3 %v354_v15 }
  0x21   :  { %189 = vmatmul.bf16.vlgmr.msra.gmra.mxu0 %v265_v24  ;;  %194 = vmatmul.bf16.vlgmr.msra.gmra.mxu2 %v273_v25 }
  0x22   :  { %208 = vmatmul.bf16.vlgmr.msra.gmra.mxu1 %v269_v26  ;;  %213 = vmatmul.bf16.vlgmr.msra.gmra.mxu3 %v277_v27 }
  0x9e   :  { %v190_v28 = vpop.f32.mrf.mxu0 }
  0x9f   :  { %v209_v30 = vpop.f32.mrf.mxu1 }
  0xa0   :  { %v210_v31 = vadd.f32 %v209_v30, %v190_v28 }
  0xa2   :  { %v238_v33 = vmul.f32 %v378_v29, %v210_v31 }
  0xa4   :  { %v246_v34 = vadd.f32 %v379_v32, %v238_v33  ;;  %v195_v35 = vpop.f32.mrf.mxu2 }
  0xa5   :  { %v214_v36 = vpop.f32.mrf.mxu3 }
  0xa6   :  { %v250_v37 = vmax.f32 %v246_v34, 0.0  ;;  %v215_v38 = vadd.f32 %v214_v36, %v195_v35  ;;  %v192_v39 = vpop.f32.mrf.mxu0 }
  0xa7   :  { %v211_v40 = vpop.f32.mrf.mxu1 }
  0xa8   :  { %254 = vst [vmem:[%s499_s4] sm:$0xff] %v250_v37  ;;  %v240_v41 = vmul.f32 %v378_v29, %v215_v38  ;;  %v212_v42 = vadd.f32 %v211_v40, %v192_v39 }
  0xaa   :  { %v248_v43 = vadd.f32 %v379_v32, %v240_v41  ;;  %v239_v44 = vmul.f32 %v378_v29, %v212_v42 }
  0xac   :  { %v252_v45 = vmax.f32 %v248_v43, 0.0  ;;  %v247_v46 = vadd.f32 %v379_v32, %v239_v44  ;;  %v197_v47 = vpop.f32.mrf.mxu2 }
  0xad   :  { %v216_v48 = vpop.f32.mrf.mxu3 }
  0xae   :  { %256 = vst [vmem:[%s499_s4 + $0x10] sm:$0xff] %v252_v45  ;;  %v251_v49 = vmax.f32 %v247_v46, 0.0  ;;  %v217_v50 = vadd.f32 %v216_v48, %v197_v47 }
  0xb0   :  { %255 = vst [vmem:[%s499_s4 + $0x8] sm:$0xff] %v251_v49  ;;  %v241_v51 = vmul.f32 %v378_v29, %v217_v50 }
  0xb2   :  { %v249_v52 = vadd.f32 %v379_v32, %v241_v51 }
  0xb4   :  { %v253_v53 = vmax.f32 %v249_v52, 0.0 }
  0xb6   :  { %257 = vst [vmem:[%s499_s4 + $0x18] sm:$0xff] %v253_v53 }

// kernel: swav_resnet_forward.55
= control target key start
LH: loop header
LB: loop body
LE: loop exit
PB: predicated region body
PF: predicated region fallthrough
CT: control target
= control target key end

     0   :  { %s1018_s15 = smov 0   ;;  %s1020_s16 = smov 0   ;;  %s1104_s0 = inlined_call_operand.vmem [shape: bf16[8,1536], index: 0, kind: input, shape index: {}]   ;;  %s1105_s1 = inlined_call_operand.vmem [shape: bf16[1536,128], index: 1, kind: input, shape index: {}]   ;;  %s1106_s2 = inlined_call_operand.vmem [shape: f32[1,128], index: 2, kind: input, shape index: {}]   ;;  %s1107_s3 = inlined_call_operand.vmem [shape: f32[1,128], index: 3, kind: input, shape index: {}]   ;;  %s1108_s4 = inlined_call_operand.vmem [shape: f32[8,128], index: 4, kind: output, shape index: {}]  }
   0x1   :  { %s1022_s17 = smov 0  }
   0x2 LB: > { %s26_s18 = sadd.s32 1, %s986_s16  ;;  %p771_p0 = scmp.ge.s32.totalorder %s990_s17, 1  ;;  %s990_s17 = sphi %s1022_s17, %s14_s17   ;;  %s986_s16 = sphi %s1020_s16, %s1110_s16   ;;  %s982_s15 = sphi %s1018_s15, %s1109_s15  }
   0x3   : > { %p27_p1 = scmp.ge.s32.totalorder %s26_s18, 3  ;;  %p222_p2 = scmp.lt.s32.totalorder %s990_s17, 4 }
   0x5   : > { %s1112_s18 = smov (%p27_p1, %s26_s18), 0  ;;  %p223_p3 = pnand %p771_p0, %p222_p2 }
   0x6   : > { %s772_s19 = sshll.u32 (!%p223_p3), %s982_s15, 2  ;;  %s774_s20 = sshll.u32 (!%p223_p3), %s982_s15, 6 }
   0x7   : > { %226 = sbr.rel (%p223_p3) target bundleno = 209 (0xd1), region = 36  ;;  %p271_p4 = scmp.lt.s32.totalorder (!%p223_p3), %s772_s19, 11 }
   0x8   : > { %p279_p5 = scmp.lt.s32.totalorder (!%p223_p3), %s774_s20, 191  ;;  %p776_p6 = scmp.ne.s32.totalorder (!%p223_p3), %s982_s15, 0 }
   0xc   : > { %s1114_s19 = smov (!%p271_p4, %s772_s19), 11  ;;  %s1116_s20 = smov (!%p279_p5, %s774_s20), 191 }
   0xd   : > { %s773_s21 = sshll.u32 %s1114_s19, 2  ;;  %s775_s25 = sshll.u32 %s1116_s20, 2 }
   0xe   : > { %s1043_s24 = scalar_lea.vmem %s1104_s0, %s773_s21  ;;  %s1048_s28 = scalar_lea.vmem %s1105_s1, %s775_s25 }
   0xf   : > { %303 = sbr.rel (%p776_p6) target bundleno = 22 (0x16), region = 40 }
  0x14   : > { %v992_v0 = vmov 0.0  }
  0x15   : > { %304 = vst [vmem:[#allocation2] sm:$0xff] %v992_v0 }
  0x16 PF: > { %v916_v1 = vld [vmem:[%s1048_s28 + $0x38] sm:$0xff]  ;;  %v915_v5 = vld [vmem:[%s1048_s28 + $0x30] sm:$0xff]  ;;  %v914_v9 = vld [vmem:[%s1048_s28 + $0x28] sm:$0xff]  ;;  %p905_p7 = scmp.ne.s32.totalorder %s982_s15, 2 }
  0x17   : > { %v924_v2 = vld [vmem:[%s1048_s28 + $0x78] sm:$0xff]  ;;  %578 = vmatpush.bf16.msra.mxu0 %v916_v1  ;;  %v923_v6 = vld [vmem:[%s1048_s28 + $0x70] sm:$0xff]  ;;  %v922_v10 = vld [vmem:[%s1048_s28 + $0x68] sm:$0xff] }
  0x18   : > { %v932_v3 = vld [vmem:[%s1048_s28 + $0xb8] sm:$0xff]  ;;  %591 = vmatpush.bf16.msra.mxu1 %v924_v2  ;;  %v931_v7 = vld [vmem:[%s1048_s28 + $0xb0] sm:$0xff]  ;;  %v930_v11 = vld [vmem:[%s1048_s28 + $0xa8] sm:$0xff] }
  0x19   : > { %v940_v4 = vld [vmem:[%s1048_s28 + $0xf8] sm:$0xff]  ;;  %604 = vmatpush.bf16.msra.mxu2 %v932_v3  ;;  %v939_v8 = vld [vmem:[%s1048_s28 + $0xf0] sm:$0xff]  ;;  %v938_v12 = vld [vmem:[%s1048_s28 + $0xe8] sm:$0xff] }
  0x1a   : > { %617 = vmatpush.bf16.msra.mxu3 %v940_v4  ;;  %v913_v13 = vld [vmem:[%s1048_s28 + $0x20] sm:$0xff]  ;;  %v912_v17 = vld [vmem:[%s1048_s28 + $0x18] sm:$0xff]  ;;  %v911_v21 = vld [vmem:[%s1048_s28 + $0x10] sm:$0xff] }
  0x1b   : > { %579 = vmatpush.bf16.msra.mxu0 %v915_v5  ;;  %v921_v14 = vld [vmem:[%s1048_s28 + $0x60] sm:$0xff]  ;;  %v920_v18 = vld [vmem:[%s1048_s28 + $0x58] sm:$0xff]  ;;  %v919_v22 = vld [vmem:[%s1048_s28 + $0x50] sm:$0xff] }
  0x1c   : > { %592 = vmatpush.bf16.msra.mxu1 %v923_v6  ;;  %v929_v15 = vld [vmem:[%s1048_s28 + $0xa0] sm:$0xff]  ;;  %v928_v19 = vld [vmem:[%s1048_s28 + $0x98] sm:$0xff]  ;;  %v927_v23 = vld [vmem:[%s1048_s28 + $0x90] sm:$0xff] }
  0x1d   : > { %605 = vmatpush.bf16.msra.mxu2 %v931_v7  ;;  %v937_v16 = vld [vmem:[%s1048_s28 + $0xe0] sm:$0xff]  ;;  %v936_v20 = vld [vmem:[%s1048_s28 + $0xd8] sm:$0xff]  ;;  %v935_v24 = vld [vmem:[%s1048_s28 + $0xd0] sm:$0xff] }
  0x1e   : > { %618 = vmatpush.bf16.msra.mxu3 %v939_v8  ;;  %v910_v25 = vld [vmem:[%s1048_s28 + $0x8] sm:$0xff]  ;;  %v306_v27 = vld [vmem:[%s1043_s24] sm:$0xff] }
  0x1f   : > { %580 = vmatpush.bf16.msra.mxu0 %v914_v9  ;;  %v918_v26 = vld [vmem:[%s1048_s28 + $0x48] sm:$0xff]  ;;  %v374_v31 = vunpack.c.l.b16 %v306_v27  ;;  %v375_v32 = vunpack.c.h.b16 %v306_v27  ;;  %v909_v33 = vld [vmem:[%s1048_s28] sm:$0xff] }
  0x20   : > { %593 = vmatpush.bf16.msra.mxu1 %v922_v10  ;;  %v926_v28 = vld [vmem:[%s1048_s28 + $0x88] sm:$0xff]  ;;  %v917_v34 = vld [vmem:[%s1048_s28 + $0x40] sm:$0xff] }
  0x21   : > { %606 = vmatpush.bf16.msra.mxu2 %v930_v11  ;;  %v934_v29 = vld [vmem:[%s1048_s28 + $0xc8] sm:$0xff]  ;;  %v925_v37 = vld [vmem:[%s1048_s28 + $0x80] sm:$0xff]  ;;  %v378_v39 = vpack.c.b16 %v374_v31, %v374_v31  ;;  %v379_v40 = vpack.c.b16 %v375_v32, %v375_v32 }
  0x22   : > { %619 = vmatpush.bf16.msra.mxu3 %v938_v12  ;;  %v307_v30 = vld [vmem:[%s1043_s24 + $0x8] sm:$0xff]  ;;  %v933_v38 = vld [vmem:[%s1048_s28 + $0xc0] sm:$0xff] }
  0x23   : > { %581 = vmatpush.bf16.msra.mxu0 %v913_v13  ;;  %v376_v35 = vunpack.c.l.b16 %v307_v30  ;;  %v377_v36 = vunpack.c.h.b16 %v307_v30  ;;  %v305_v51 = vld [vmem:[#allocation2] sm:$0xff] }
  0x24   : > { %594 = vmatpush.bf16.msra.mxu1 %v921_v14 }
  0x25   : > { %607 = vmatpush.bf16.msra.mxu2 %v929_v15  ;;  %v380_v41 = vpack.c.b16 %v376_v35, %v376_v35  ;;  %v381_v42 = vpack.c.b16 %v377_v36, %v377_v36 }
  0x26   : > { %620 = vmatpush.bf16.msra.mxu3 %v937_v16 }
  0x27   : > { %582 = vmatpush.bf16.msra.mxu0 %v912_v17 }
  0x28   : > { %595 = vmatpush.bf16.msra.mxu1 %v920_v18 }
  0x29   : > { %608 = vmatpush.bf16.msra.mxu2 %v928_v19 }
  0x2a   : > { %621 = vmatpush.bf16.msra.mxu3 %v936_v20 }
  0x2b   : > { %583 = vmatpush.bf16.msra.mxu0 %v911_v21 }
  0x2c   : > { %596 = vmatpush.bf16.msra.mxu1 %v919_v22 }
  0x2d   : > { %609 = vmatpush.bf16.msra.mxu2 %v927_v23 }
  0x2e   : > { %622 = vmatpush.bf16.msra.mxu3 %v935_v24 }
  0x2f   : > { %584 = vmatpush.bf16.msra.mxu0 %v910_v25 }
  0x30   : > { %597 = vmatpush.bf16.msra.mxu1 %v918_v26 }
  0x31   : > { %610 = vmatpush.bf16.msra.mxu2 %v926_v28 }
  0x32   : > { %623 = vmatpush.bf16.msra.mxu3 %v934_v29 }
  0x33   : > { %585 = vmatpush.bf16.msra.mxu0 %v909_v33 }
  0x34   : > { %598 = vmatpush.bf16.msra.mxu1 %v917_v34 }
  0x35   : > { %611 = vmatpush.bf16.msra.mxu2 %v925_v37 }
  0x36   : > { %624 = vmatpush.bf16.msra.mxu3 %v933_v38  ;;  %586 = vmatmul.bf16.vlgmr.msra.gmra.mxu0 %v378_v39 }
  0x37   : > { %599 = vmatmul.bf16.vlgmr.msra.gmra.mxu1 %v379_v40 }
  0x38   : > { %612 = vmatmul.bf16.vlgmr.msra.gmra.mxu2 %v380_v41 }
  0x39   : > { %625 = vmatmul.bf16.vlgmr.msra.gmra.mxu3 %v381_v42 }
  0xb3   : > { %v587_v43 = vpop.f32.mrf.mxu0 }
  0xb4   : > { %v600_v44 = vpop.f32.mrf.mxu1 }
  0xb5   : > { %v601_v45 = vadd.f32 %v600_v44, %v587_v43 }
  0xbb   : > { %v613_v46 = vpop.f32.mrf.mxu2  ;;  %v589_v49 = vpop.f32.mrf.mxu0 }
  0xbc   : > { %v626_v47 = vpop.f32.mrf.mxu3  ;;  %v614_v48 = vadd.f32 %v613_v46, %v601_v45  ;;  %v602_v50 = vpop.f32.mrf.mxu1 }
  0xbe   : > { %v627_v52 = vadd.f32 %v626_v47, %v614_v48 }
  0xc0   : > { %v630_v53 = vadd.f32 %v627_v52, %v305_v51  ;;  %635 = sbr.rel (%p905_p7) target bundleno = 209 (0xd1), region = 44 }
  0xc2   : > { %631 = vst [vmem:[#allocation2] sm:$0xff] %v630_v53 }
  0xc3   : > { %v615_v54 = vpop.f32.mrf.mxu2 }
  0xc4   : > { %v628_v55 = vpop.f32.mrf.mxu3 }
  0xc5   : > { %v966_v57 = vld [vmem:[%s1106_s2] ss:$0 sm:$0xff] }
  0xc6   : > { %v967_v58 = vld [vmem:[%s1107_s3] ss:$0 sm:$0xff] }
  0xc9   : > { %v636_v56 = vld [vmem:[#allocation2] sm:$0xff] }
  0xca   : > { %v641_v59 = vmul.f32 %v966_v57, %v636_v56 }
  0xcc   : > { %v646_v60 = vadd.f32 %v967_v58, %v641_v59 }
  0xce   : > { %v647_v61 = vmax.f32 %v646_v60, 0.0 }
  0xd0   : > { %648 = vst [vmem:[%s1108_s4] sm:$0xff] %v647_v61 }
  0xd1 PF: > { %s14_s17 = sadd.s32 1, %s990_s17   ;;  %s1109_s15 = smov %s986_s16 }
  0xd2   : > { %p11_p8 = scmp.ge.s32.totalorder %s14_s17, 5   ;;  %s1110_s16 = smov %s1112_s18 }
  0xd4   :  { %13 = sbr.rel (!%p11_p8) target bundleno = 2 (0x2), region = 83 }

// kernel: swav_resnet_forward.56
= control target key start
LH: loop header
LB: loop body
LE: loop exit
PB: predicated region body
PF: predicated region fallthrough
CT: control target
= control target key end

     0   :  { %s1170_s15 = smov 0   ;;  %s1172_s16 = smov 0   ;;  %s1378_s0 = inlined_call_operand.vmem [shape: bf16[8,256], index: 0, kind: input, shape index: {}]   ;;  %s1379_s1 = inlined_call_operand.vmem [shape: bf16[256,512], index: 1, kind: input, shape index: {}]   ;;  %s1380_s2 = inlined_call_operand.vmem [shape: f32[1,512], index: 2, kind: input, shape index: {}]   ;;  %s1381_s3 = inlined_call_operand.vmem [shape: f32[1,512], index: 3, kind: input, shape index: {}]   ;;  %s1382_s4 = inlined_call_operand.vmem [shape: f32[8,512], index: 4, kind: output, shape index: {}]  }
   0x1   :  { %s1174_s17 = smov 0   ;;  %s1176_s18 = smov 0  }
   0x2   :  { %s1178_s19 = smov 0  }
   0x3 LB: > { %s29_s20 = sadd.s32 1, %s1139_s18  ;;  %p77_p1 = scmp.ne.s32.totalorder %s1131_s16, %s1127_s15  ;;  %s1143_s19 = sphi %s1178_s19, %s14_s19   ;;  %s1139_s18 = sphi %s1176_s18, %s1386_s18   ;;  %s1135_s17 = sphi %s1174_s17, %s1385_s17   ;;  %s1131_s16 = sphi %s1172_s16, %s1384_s16   ;;  %s1127_s15 = sphi %s1170_s15, %s1383_s15  }
   0x4   : > { %p31_p0 = scmp.ge.s32.totalorder %s29_s20, 2  ;;  %p78_p2 = scmp.eq.s32.totalorder %s1143_s19, 0 }
   0x5   : > { %s70_s22 = sadd.s32 1, %s1131_s16  ;;  %p892_p5 = scmp.ge.s32.totalorder %s1143_s19, 2 }
   0x6   : > { %s1388_s20 = smov (%p31_p0, %s29_s20), 0  ;;  %p79_p3 = por %p78_p2, %p77_p1 }
   0x7   : > { %s66_s21 = ssub.s32 %s1139_s18, %s1388_s20  ;;  %196 = sbr.rel (%p892_p5) target bundleno = 48 (0x30), region = 20 }
   0x8   : > { %p68_p4 = scmp.eq.s32.totalorder %s66_s21, 0 }
   0xa   : > { %s1205_s23 = scalar_select %p68_p4, %s1131_s16, %s70_s22  }
   0xc   : > { %199 = sbr.rel (!%p79_p3) target bundleno = 48 (0x30), region = 24  ;;  %s201_s24 = sand.u32 (%p79_p3), 1, %s1131_s16  }
   0xd   : > { %s1032_s25 = sshll.u32 (%p79_p3), %s1139_s18, 3  ;;  %s893_s26 = sshll.u32 (%p79_p3), %s201_s24, 8 }
   0xe   : > { %s1213_s29 = scalar_lea.vmem (%p79_p3), %s1379_s1, %s1032_s25  ;;  %s1218_s30 = scalar_lea.vmem (%p79_p3), [#allocation3], %s893_s26 }
   0xf   : > { %v300_v0 = vld [vmem:[%s1213_s29] sm:$0xff] (%p79_p3)  ;;  %v302_v1 = vld [vmem:[%s1213_s29 + $0x10] sm:$0xff] (%p79_p3) }
  0x10   : > { %v304_v2 = vld [vmem:[%s1213_s29 + $0x20] sm:$0xff] (%p79_p3)  ;;  %301 = vst [vmem:[%s1218_s30] sm:$0xff] (%p79_p3), %v300_v0  ;;  %v306_v3 = vld [vmem:[%s1213_s29 + $0x30] sm:$0xff] (%p79_p3) }
  0x11   : > { %303 = vst [vmem:[%s1218_s30 + $0x8] sm:$0xff] %v302_v1  ;;  %v308_v4 = vld [vmem:[%s1213_s29 + $0x40] sm:$0xff]  ;;  %v310_v5 = vld [vmem:[%s1213_s29 + $0x50] sm:$0xff] }
  0x12   : > { %305 = vst [vmem:[%s1218_s30 + $0x10] sm:$0xff] %v304_v2  ;;  %v312_v6 = vld [vmem:[%s1213_s29 + $0x60] sm:$0xff]  ;;  %v314_v7 = vld [vmem:[%s1213_s29 + $0x70] sm:$0xff] }
  0x13   : > { %307 = vst [vmem:[%s1218_s30 + $0x18] sm:$0xff] %v306_v3  ;;  %v316_v8 = vld [vmem:[%s1213_s29 + $0x80] sm:$0xff]  ;;  %v318_v9 = vld [vmem:[%s1213_s29 + $0x90] sm:$0xff] }
  0x14   : > { %309 = vst [vmem:[%s1218_s30 + $0x20] sm:$0xff] %v308_v4  ;;  %v320_v10 = vld [vmem:[%s1213_s29 + $0xa0] sm:$0xff]  ;;  %v322_v11 = vld [vmem:[%s1213_s29 + $0xb0] sm:$0xff] }
  0x15   : > { %311 = vst [vmem:[%s1218_s30 + $0x28] sm:$0xff] %v310_v5  ;;  %v324_v12 = vld [vmem:[%s1213_s29 + $0xc0] sm:$0xff]  ;;  %v326_v13 = vld [vmem:[%s1213_s29 + $0xd0] sm:$0xff] }
  0x16   : > { %313 = vst [vmem:[%s1218_s30 + $0x30] sm:$0xff] %v312_v6  ;;  %v328_v14 = vld [vmem:[%s1213_s29 + $0xe0] sm:$0xff]  ;;  %v330_v15 = vld [vmem:[%s1213_s29 + $0xf0] sm:$0xff] }
  0x17   : > { %315 = vst [vmem:[%s1218_s30 + $0x38] sm:$0xff] %v314_v7  ;;  %v332_v16 = vld [vmem:[%s1213_s29 + $0x100] sm:$0xff]  ;;  %v334_v17 = vld [vmem:[%s1213_s29 + $0x110] sm:$0xff] }
  0x18   : > { %317 = vst [vmem:[%s1218_s30 + $0x40] sm:$0xff] %v316_v8  ;;  %v336_v18 = vld [vmem:[%s1213_s29 + $0x120] sm:$0xff]  ;;  %v338_v19 = vld [vmem:[%s1213_s29 + $0x130] sm:$0xff] }
  0x19   : > { %319 = vst [vmem:[%s1218_s30 + $0x48] sm:$0xff] %v318_v9  ;;  %v340_v20 = vld [vmem:[%s1213_s29 + $0x140] sm:$0xff]  ;;  %v342_v21 = vld [vmem:[%s1213_s29 + $0x150] sm:$0xff] }
  0x1a   : > { %321 = vst [vmem:[%s1218_s30 + $0x50] sm:$0xff] %v320_v10  ;;  %v344_v22 = vld [vmem:[%s1213_s29 + $0x160] sm:$0xff]  ;;  %v346_v23 = vld [vmem:[%s1213_s29 + $0x170] sm:$0xff] }
  0x1b   : > { %323 = vst [vmem:[%s1218_s30 + $0x58] sm:$0xff] %v322_v11  ;;  %v348_v24 = vld [vmem:[%s1213_s29 + $0x180] sm:$0xff]  ;;  %v350_v25 = vld [vmem:[%s1213_s29 + $0x190] sm:$0xff] }
  0x1c   : > { %325 = vst [vmem:[%s1218_s30 + $0x60] sm:$0xff] %v324_v12  ;;  %v352_v26 = vld [vmem:[%s1213_s29 + $0x1a0] sm:$0xff]  ;;  %v354_v27 = vld [vmem:[%s1213_s29 + $0x1b0] sm:$0xff] }
  0x1d   : > { %327 = vst [vmem:[%s1218_s30 + $0x68] sm:$0xff] %v326_v13  ;;  %v356_v28 = vld [vmem:[%s1213_s29 + $0x1c0] sm:$0xff]  ;;  %v358_v29 = vld [vmem:[%s1213_s29 + $0x1d0] sm:$0xff] }
  0x1e   : > { %329 = vst [vmem:[%s1218_s30 + $0x70] sm:$0xff] %v328_v14  ;;  %v360_v30 = vld [vmem:[%s1213_s29 + $0x1e0] sm:$0xff]  ;;  %v362_v31 = vld [vmem:[%s1213_s29 + $0x1f0] sm:$0xff] }
  0x1f   : > { %331 = vst [vmem:[%s1218_s30 + $0x78] sm:$0xff] %v330_v15 }
  0x20   : > { %333 = vst [vmem:[%s1218_s30 + $0x80] sm:$0xff] %v332_v16 }
  0x21   : > { %335 = vst [vmem:[%s1218_s30 + $0x88] sm:$0xff] %v334_v17 }
  0x22   : > { %337 = vst [vmem:[%s1218_s30 + $0x90] sm:$0xff] %v336_v18 }
  0x23   : > { %339 = vst [vmem:[%s1218_s30 + $0x98] sm:$0xff] %v338_v19 }
  0x24   : > { %341 = vst [vmem:[%s1218_s30 + $0xa0] sm:$0xff] %v340_v20 }
  0x25   : > { %343 = vst [vmem:[%s1218_s30 + $0xa8] sm:$0xff] %v342_v21 }
  0x26   : > { %345 = vst [vmem:[%s1218_s30 + $0xb0] sm:$0xff] %v344_v22 }
  0x27   : > { %347 = vst [vmem:[%s1218_s30 + $0xb8] sm:$0xff] %v346_v23 }
  0x28   : > { %349 = vst [vmem:[%s1218_s30 + $0xc0] sm:$0xff] %v348_v24 }
  0x29   : > { %351 = vst [vmem:[%s1218_s30 + $0xc8] sm:$0xff] %v350_v25 }
  0x2a   : > { %353 = vst [vmem:[%s1218_s30 + $0xd0] sm:$0xff] %v352_v26 }
  0x2b   : > { %355 = vst [vmem:[%s1218_s30 + $0xd8] sm:$0xff] %v354_v27 }
  0x2c   : > { %357 = vst [vmem:[%s1218_s30 + $0xe0] sm:$0xff] %v356_v28 }
  0x2d   : > { %359 = vst [vmem:[%s1218_s30 + $0xe8] sm:$0xff] %v358_v29 }
  0x2e   : > { %361 = vst [vmem:[%s1218_s30 + $0xf0] sm:$0xff] %v360_v30 }
  0x2f   : > { %363 = vst [vmem:[%s1218_s30 + $0xf8] sm:$0xff] %v362_v31 }
  0x30 PF: > { %p896_p6 = scmp.ge.s32.totalorder %s1143_s19, 1  ;;  %p384_p7 = scmp.lt.s32.totalorder %s1143_s19, 3 }
  0x32   : > { %p385_p8 = pnand %p896_p6, %p384_p7 }
  0x33   : > { %s391_s5 = sand.u32 (!%p385_p8), 1, %s1127_s15   ;;  %s898_s10 = sshll.u32 (!%p385_p8), %s1135_s17, 1 }
  0x34   : > { %388 = sbr.rel (%p385_p8) target bundleno = 233 (0xe9), region = 70  ;;  %s897_s6 = sshll.u32 (!%p385_p8), %s391_s5, 8 }
  0x35   : > { %s1284_s7 = scalar_lea.vmem (!%p385_p8), [#allocation3], %s897_s6  ;;  %p450_p9 = scmp.lt.s32.totalorder (!%p385_p8), %s898_s10, 3 }
  0x39   : > { %v960_v32 = vld [vmem:[%s1284_s7 + $0x70] sm:$0xf]  ;;  %v1048_v33 = vld [vmem:[%s1284_s7 + $0x74] sm:$0xf0]  ;;  %v1047_v37 = vld [vmem:[%s1284_s7 + $0x74] sm:$0xf] }
  0x3a   : > { %v1024_v34 = vld [vmem:[%s1284_s7 + $0xf0] sm:$0xf]  ;;  %v961_v35 = vor.u32 %v1048_v33, %v960_v32  ;;  %v1064_v36 = vld [vmem:[%s1284_s7 + $0xf4] sm:$0xf0]  ;;  %v962_v38 = vld [vmem:[%s1284_s7 + $0x78] sm:$0xf0] }
  0x3b   : > { %v1025_v39 = vor.u32 %v1064_v36, %v1024_v34  ;;  %v965_v40 = vor.u32 %v1047_v37, %v962_v38  ;;  %v1063_v41 = vld [vmem:[%s1284_s7 + $0xf4] sm:$0xf]  ;;  %v1026_v42 = vld [vmem:[%s1284_s7 + $0xf8] sm:$0xf0]  ;;  %v952_v43 = vld [vmem:[%s1284_s7 + $0x60] sm:$0xf] }
  0x3c   : > { %677 = vmatpush.bf16.msra.mxu0 %v961_v35  ;;  %v1029_v44 = vor.u32 %v1063_v41, %v1026_v42  ;;  %v1046_v45 = vld [vmem:[%s1284_s7 + $0x64] sm:$0xf0]  ;;  %v1016_v46 = vld [vmem:[%s1284_s7 + $0xe0] sm:$0xf]  ;;  %v1045_v50 = vld [vmem:[%s1284_s7 + $0x64] sm:$0xf] }
  0x3d   : > { %v1062_v47 = vld [vmem:[%s1284_s7 + $0xe4] sm:$0xf0]  ;;  %690 = vmatpush.bf16.msra.mxu1 %v1025_v39  ;;  %703 = vmatpush.bf16.msra.mxu2 %v965_v40  ;;  %v953_v48 = vor.u32 %v1046_v45, %v952_v43  ;;  %v954_v51 = vld [vmem:[%s1284_s7 + $0x68] sm:$0xf0]  ;;  %v1061_v52 = vld [vmem:[%s1284_s7 + $0xe4] sm:$0xf] }
  0x3e   : > { %v1017_v49 = vor.u32 %v1062_v47, %v1016_v46  ;;  %716 = vmatpush.bf16.msra.mxu3 %v1029_v44  ;;  %v957_v53 = vor.u32 %v1045_v50, %v954_v51  ;;  %v1018_v54 = vld [vmem:[%s1284_s7 + $0xe8] sm:$0xf0]  ;;  %v944_v55 = vld [vmem:[%s1284_s7 + $0x50] sm:$0xf]  ;;  %v1044_v56 = vld [vmem:[%s1284_s7 + $0x54] sm:$0xf0] }
  0x3f   : > { %v1021_v57 = vor.u32 %v1061_v52, %v1018_v54  ;;  %v1008_v58 = vld [vmem:[%s1284_s7 + $0xd0] sm:$0xf]  ;;  %v1060_v59 = vld [vmem:[%s1284_s7 + $0xd4] sm:$0xf0]  ;;  %v1043_v60 = vld [vmem:[%s1284_s7 + $0x54] sm:$0xf]  ;;  %v945_v61 = vor.u32 %v1044_v56, %v944_v55 }
  0x40   : > { %678 = vmatpush.bf16.msra.mxu0 %v953_v48  ;;  %v946_v62 = vld [vmem:[%s1284_s7 + $0x58] sm:$0xf0]  ;;  %v1059_v63 = vld [vmem:[%s1284_s7 + $0xd4] sm:$0xf]  ;;  %v1009_v1 = vor.u32 %v1060_v59, %v1008_v58  ;;  %v936_v3 = vld [vmem:[%s1284_s7 + $0x40] sm:$0xf] }
  0x41   : > { %v1010_v0 = vld [vmem:[%s1284_s7 + $0xd8] sm:$0xf0]  ;;  %691 = vmatpush.bf16.msra.mxu1 %v1017_v49  ;;  %704 = vmatpush.bf16.msra.mxu2 %v957_v53  ;;  %v949_v2 = vor.u32 %v1043_v60, %v946_v62  ;;  %v1042_v4 = vld [vmem:[%s1284_s7 + $0x44] sm:$0xf0]  ;;  %v1000_v5 = vld [vmem:[%s1284_s7 + $0xc0] sm:$0xf] }
  0x42   : > { %717 = vmatpush.bf16.msra.mxu3 %v1021_v57  ;;  %v1013_v6 = vor.u32 %v1059_v63, %v1010_v0  ;;  %v1058_v7 = vld [vmem:[%s1284_s7 + $0xc4] sm:$0xf0]  ;;  %v1041_v8 = vld [vmem:[%s1284_s7 + $0x44] sm:$0xf]  ;;  %v938_v9 = vld [vmem:[%s1284_s7 + $0x48] sm:$0xf0]  ;;  %v937_v12 = vor.u32 %v1042_v4, %v936_v3 }
  0x43   : > { %v1057_v10 = vld [vmem:[%s1284_s7 + $0xc4] sm:$0xf]  ;;  %v1002_v11 = vld [vmem:[%s1284_s7 + $0xc8] sm:$0xf0]  ;;  %v1001_v13 = vor.u32 %v1058_v7, %v1000_v5  ;;  %v941_v14 = vor.u32 %v1041_v8, %v938_v9  ;;  %v928_v15 = vld [vmem:[%s1284_s7 + $0x30] sm:$0xf] }
  0x44   : > { %679 = vmatpush.bf16.msra.mxu0 %v945_v61  ;;  %v1040_v16 = vld [vmem:[%s1284_s7 + $0x34] sm:$0xf0]  ;;  %v992_v17 = vld [vmem:[%s1284_s7 + $0xb0] sm:$0xf]  ;;  %v1005_v18 = vor.u32 %v1057_v10, %v1002_v11  ;;  %v1039_v20 = vld [vmem:[%s1284_s7 + $0x34] sm:$0xf] }
  0x45   : > { %692 = vmatpush.bf16.msra.mxu1 %v1009_v1  ;;  %705 = vmatpush.bf16.msra.mxu2 %v949_v2  ;;  %v1056_v19 = vld [vmem:[%s1284_s7 + $0xb4] sm:$0xf0]  ;;  %v930_v21 = vld [vmem:[%s1284_s7 + $0x38] sm:$0xf0]  ;;  %v1055_v22 = vld [vmem:[%s1284_s7 + $0xb4] sm:$0xf]  ;;  %v929_v24 = vor.u32 %v1040_v16, %v928_v15 }
  0x46   : > { %718 = vmatpush.bf16.msra.mxu3 %v1013_v6  ;;  %v994_v23 = vld [vmem:[%s1284_s7 + $0xb8] sm:$0xf0]  ;;  %v993_v25 = vor.u32 %v1056_v19, %v992_v17  ;;  %v933_v26 = vor.u32 %v1039_v20, %v930_v21  ;;  %v920_v27 = vld [vmem:[%s1284_s7 + $0x20] sm:$0xf]  ;;  %v1038_v28 = vld [vmem:[%s1284_s7 + $0x24] sm:$0xf0] }
  0x47   : > { %v984_v29 = vld [vmem:[%s1284_s7 + $0xa0] sm:$0xf]  ;;  %v997_v30 = vor.u32 %v1055_v22, %v994_v23  ;;  %v1054_v31 = vld [vmem:[%s1284_s7 + $0xa4] sm:$0xf0]  ;;  %v1037_v32 = vld [vmem:[%s1284_s7 + $0x24] sm:$0xf]  ;;  %v921_v36 = vor.u32 %v1038_v28, %v920_v27 }
  0x48   : > { %680 = vmatpush.bf16.msra.mxu0 %v937_v12  ;;  %v922_v33 = vld [vmem:[%s1284_s7 + $0x28] sm:$0xf0]  ;;  %v1053_v34 = vld [vmem:[%s1284_s7 + $0xa4] sm:$0xf]  ;;  %v985_v37 = vor.u32 %v1054_v31, %v984_v29  ;;  %v912_v39 = vld [vmem:[%s1284_s7 + $0x10] sm:$0xf] }
  0x49   : > { %693 = vmatpush.bf16.msra.mxu1 %v1001_v13  ;;  %706 = vmatpush.bf16.msra.mxu2 %v941_v14  ;;  %v986_v35 = vld [vmem:[%s1284_s7 + $0xa8] sm:$0xf0]  ;;  %v925_v38 = vor.u32 %v1037_v32, %v922_v33  ;;  %v1036_v40 = vld [vmem:[%s1284_s7 + $0x14] sm:$0xf0]  ;;  %v976_v41 = vld [vmem:[%s1284_s7 + $0x90] sm:$0xf] }
  0x4a   : > { %719 = vmatpush.bf16.msra.mxu3 %v1005_v18  ;;  %v989_v42 = vor.u32 %v1053_v34, %v986_v35  ;;  %v1052_v43 = vld [vmem:[%s1284_s7 + $0x94] sm:$0xf0]  ;;  %v1035_v44 = vld [vmem:[%s1284_s7 + $0x14] sm:$0xf]  ;;  %v914_v45 = vld [vmem:[%s1284_s7 + $0x18] sm:$0xf0]  ;;  %v913_v48 = vor.u32 %v1036_v40, %v912_v39 }
  0x4b   : > { %v1051_v46 = vld [vmem:[%s1284_s7 + $0x94] sm:$0xf]  ;;  %v978_v47 = vld [vmem:[%s1284_s7 + $0x98] sm:$0xf0]  ;;  %v477_v49 = vld [vmem:[%s1378_s0] sm:$0xff]  ;;  %v977_v50 = vor.u32 %v1052_v43, %v976_v41  ;;  %v917_v51 = vor.u32 %v1035_v44, %v914_v45  ;;  %s1390_s10 = smov (!%p450_p9, %s898_s10), 3 }
  0x4c   : > { %681 = vmatpush.bf16.msra.mxu0 %v929_v24  ;;  %v904_v52 = vld [vmem:[%s1284_s7] sm:$0xf]  ;;  %v1034_v53 = vld [vmem:[%s1284_s7 + $0x4] sm:$0xf0]  ;;  %v981_v55 = vor.u32 %v1051_v46, %v978_v47  ;;  %v1033_v57 = vld [vmem:[%s1284_s7 + $0x4] sm:$0xf]  ;;  %v511_v61 = vunpack.c.l.b16 %v477_v49  ;;  %v512_v63 = vunpack.c.h.b16 %v477_v49  ;;  %s452_s13 = scalar_lea.vmem %s1380_s2, %s1390_s10  ;;  %s457_s21 = scalar_lea.vmem %s1381_s3, %s1390_s10 }
  0x4d   : > { %694 = vmatpush.bf16.msra.mxu1 %v993_v25  ;;  %707 = vmatpush.bf16.msra.mxu2 %v933_v26  ;;  %v968_v54 = vld [vmem:[%s1284_s7 + $0x80] sm:$0xf]  ;;  %v1050_v56 = vld [vmem:[%s1284_s7 + $0x84] sm:$0xf0]  ;;  %v906_v58 = vld [vmem:[%s1284_s7 + $0x8] sm:$0xf0]  ;;  %v905_v62 = vor.u32 %v1034_v53, %v904_v52 }
  0x4e   : > { %720 = vmatpush.bf16.msra.mxu3 %v997_v30  ;;  %v1049_v59 = vld [vmem:[%s1284_s7 + $0x84] sm:$0xf]  ;;  %v970_v60 = vld [vmem:[%s1284_s7 + $0x88] sm:$0xf0]  ;;  %v969_v0 = vor.u32 %v1050_v56, %v968_v54  ;;  %v909_v1 = vor.u32 %v1033_v57, %v906_v58  ;;  %v513_v3 = vpack.c.b16 %v511_v61, %v511_v61  ;;  %v514_v4 = vpack.c.b16 %v512_v63, %v512_v63  ;;  %v738_v5 = vld [vmem:[%s452_s13] sm:$0x3] }
  0x4f   : > { %v973_v2 = vor.u32 %v1049_v59, %v970_v60  ;;  %v746_v6 = vld [vmem:[%s457_s21] sm:$0x3]  ;;  %v740_v8 = vperm.slane %v738_v5, 0  ;;  %s901_s22 = sshll.u32 %s1390_s10, 3  ;;  %v741_v15 = vperm.slane %v738_v5, 1 }
  0x50   : > { %682 = vmatpush.bf16.msra.mxu0 %v921_v36  ;;  %v748_v11 = vperm.slane %v746_v6, 0  ;;  %s467_s25 = scalar_lea.vmem %s1382_s4, %s901_s22  ;;  %v749_v19 = vperm.slane %v746_v6, 1 }
  0x51   : > { %695 = vmatpush.bf16.msra.mxu1 %v985_v37  ;;  %708 = vmatpush.bf16.msra.mxu2 %v925_v38 }
  0x52   : > { %721 = vmatpush.bf16.msra.mxu3 %v989_v42 }
  0x54   : > { %683 = vmatpush.bf16.msra.mxu0 %v913_v48 }
  0x55   : > { %696 = vmatpush.bf16.msra.mxu1 %v977_v50  ;;  %709 = vmatpush.bf16.msra.mxu2 %v917_v51 }
  0x56   : > { %722 = vmatpush.bf16.msra.mxu3 %v981_v55 }
  0x58   : > { %684 = vmatpush.bf16.msra.mxu0 %v905_v62 }
  0x59   : > { %697 = vmatpush.bf16.msra.mxu1 %v969_v0  ;;  %710 = vmatpush.bf16.msra.mxu2 %v909_v1 }
  0x5a   : > { %723 = vmatpush.bf16.msra.mxu3 %v973_v2 }
  0x5b   : > { %685 = vmatmul.bf16.vlgmr.msra.gmra.mxu0 %v513_v3 }
  0x5c   : > { %698 = vmatmul.bf16.vlgmr.msra.gmra.mxu1 %v514_v4  ;;  %711 = vmatmul.bf16.vlgmr.msra.gmra.mxu2 %v513_v3 }
  0x5d   : > { %724 = vmatmul.bf16.vlgmr.msra.gmra.mxu3 %v514_v4 }
  0xd8   : > { %v686_v7 = vpop.f32.mrf.mxu0 }
  0xd9   : > { %v699_v9 = vpop.f32.mrf.mxu1 }
  0xda   : > { %v700_v10 = vadd.f32 %v699_v9, %v686_v7 }
  0xdc   : > { %v744_v12 = vmul.f32 %v740_v8, %v700_v10 }
  0xde   : > { %v752_v13 = vadd.f32 %v748_v11, %v744_v12 }
  0xdf   : > { %v712_v14 = vpop.f32.mrf.mxu2 }
  0xe0   : > { %754 = vst [vmem:[%s467_s25] sm:$0xff] %v752_v13  ;;  %v725_v16 = vpop.f32.mrf.mxu3  ;;  %v688_v17 = vpop.f32.mrf.mxu0 }
  0xe1   : > { %v726_v18 = vadd.f32 %v725_v16, %v712_v14  ;;  %v701_v20 = vpop.f32.mrf.mxu1 }
  0xe3   : > { %v745_v21 = vmul.f32 %v741_v15, %v726_v18 }
  0xe5   : > { %v753_v22 = vadd.f32 %v749_v19, %v745_v21 }
  0xe7   : > { %755 = vst [vmem:[%s467_s25 + $0x8] sm:$0xff] %v753_v22  ;;  %v714_v23 = vpop.f32.mrf.mxu2 }
  0xe8   : > { %v727_v24 = vpop.f32.mrf.mxu3 }
  0xe9 PF: > { %s14_s19 = sadd.s32 1, %s1143_s19   ;;  %s1383_s15 = smov %s1131_s16 }
  0xea   : > { %p11_p10 = scmp.ge.s32.totalorder %s14_s19, 4   ;;  %s1384_s16 = smov %s1205_s23 }
  0xeb   : > { %s1385_s17 = smov %s1139_s18  ;;  %s1386_s18 = smov %s1388_s20 }
  0xec   :  { %13 = sbr.rel (!%p11_p10) target bundleno = 3 (0x3), region = 126 }

// kernel: swav_resnet_forward.57
= control target key start
LH: loop header
LB: loop body
LE: loop exit
PB: predicated region body
PF: predicated region fallthrough
CT: control target
= control target key end

     0   :  { %s980_s18 = smov 0   ;;  %s982_s19 = smov 0   ;;  %s1109_s0 = inlined_call_operand.vmem [shape: bf16[8,128], index: 0, kind: input, shape index: {}]   ;;  %s1110_s1 = inlined_call_operand.vmem [shape: bf16[128,512], index: 1, kind: input, shape index: {}]   ;;  %s1111_s2 = inlined_call_operand.vmem [shape: f32[1,512], index: 2, kind: input, shape index: {}]   ;;  %s1112_s3 = inlined_call_operand.vmem [shape: f32[1,512], index: 3, kind: input, shape index: {}]   ;;  %s1113_s4 = inlined_call_operand.vmem [shape: f32[8,512], index: 4, kind: input, shape index: {}]   ;;  %s1114_s5 = inlined_call_operand.vmem [shape: f32[8,512], index: 5, kind: output, shape index: {}]  }
   0x1   :  { %s984_s20 = smov 0   ;;  %s986_s21 = smov 0  }
   0x2   :  { %s988_s22 = smov 0  }
   0x3 LB: > { %s30_s23 = sadd.s32 1, %s944_s21  ;;  %p78_p1 = scmp.ne.s32.totalorder %s936_s19, %s932_s18  ;;  %s948_s22 = sphi %s988_s22, %s15_s22   ;;  %s944_s21 = sphi %s986_s21, %s1118_s21   ;;  %s940_s20 = sphi %s984_s20, %s1117_s20   ;;  %s936_s19 = sphi %s982_s19, %s1116_s19   ;;  %s932_s18 = sphi %s980_s18, %s1115_s18  }
   0x4   : > { %p32_p0 = scmp.ge.s32.totalorder %s30_s23, 2  ;;  %p79_p2 = scmp.eq.s32.totalorder %s948_s22, 0 }
   0x5   : > { %s71_s25 = sadd.s32 1, %s936_s19  ;;  %p775_p5 = scmp.ge.s32.totalorder %s948_s22, 2 }
   0x6   : > { %s1120_s23 = smov (%p32_p0, %s30_s23), 0  ;;  %p80_p3 = por %p79_p2, %p78_p1 }
   0x7   : > { %s67_s24 = ssub.s32 %s944_s21, %s1120_s23  ;;  %222 = sbr.rel (%p775_p5) target bundleno = 32 (0x20), region = 20 }
   0x8   : > { %p69_p4 = scmp.eq.s32.totalorder %s67_s24, 0 }
   0xa   : > { %s1015_s26 = scalar_select %p69_p4, %s936_s19, %s71_s25  }
   0xc   : > { %225 = sbr.rel (!%p80_p3) target bundleno = 32 (0x20), region = 24  ;;  %s227_s27 = sand.u32 (%p80_p3), 1, %s936_s19  }
   0xd   : > { %s853_s28 = sshll.u32 (%p80_p3), %s944_s21, 3  ;;  %s776_s29 = sshll.u32 (%p80_p3), %s227_s27, 7 }
   0xe   : > { %s1023_s7 = scalar_lea.vmem (%p80_p3), %s1110_s1, %s853_s28  ;;  %s229_s8 = scalar_lea.vmem (%p80_p3), [#allocation3], %s776_s29 }
   0xf   : > { %v294_v0 = vld [vmem:[%s1023_s7] sm:$0xff] (%p80_p3)  ;;  %v296_v1 = vld [vmem:[%s1023_s7 + $0x10] sm:$0xff] (%p80_p3) }
  0x10   : > { %v298_v2 = vld [vmem:[%s1023_s7 + $0x20] sm:$0xff] (%p80_p3)  ;;  %295 = vst [vmem:[%s229_s8] sm:$0xff] (%p80_p3), %v294_v0  ;;  %v300_v3 = vld [vmem:[%s1023_s7 + $0x30] sm:$0xff] (%p80_p3) }
  0x11   : > { %297 = vst [vmem:[%s229_s8 + $0x8] sm:$0xff] %v296_v1  ;;  %v302_v4 = vld [vmem:[%s1023_s7 + $0x40] sm:$0xff]  ;;  %v304_v5 = vld [vmem:[%s1023_s7 + $0x50] sm:$0xff] }
  0x12   : > { %299 = vst [vmem:[%s229_s8 + $0x10] sm:$0xff] %v298_v2  ;;  %v306_v6 = vld [vmem:[%s1023_s7 + $0x60] sm:$0xff]  ;;  %v308_v7 = vld [vmem:[%s1023_s7 + $0x70] sm:$0xff] }
  0x13   : > { %301 = vst [vmem:[%s229_s8 + $0x18] sm:$0xff] %v300_v3  ;;  %v310_v8 = vld [vmem:[%s1023_s7 + $0x80] sm:$0xff]  ;;  %v312_v9 = vld [vmem:[%s1023_s7 + $0x90] sm:$0xff] }
  0x14   : > { %303 = vst [vmem:[%s229_s8 + $0x20] sm:$0xff] %v302_v4  ;;  %v314_v10 = vld [vmem:[%s1023_s7 + $0xa0] sm:$0xff]  ;;  %v316_v11 = vld [vmem:[%s1023_s7 + $0xb0] sm:$0xff] }
  0x15   : > { %305 = vst [vmem:[%s229_s8 + $0x28] sm:$0xff] %v304_v5  ;;  %v318_v12 = vld [vmem:[%s1023_s7 + $0xc0] sm:$0xff]  ;;  %v320_v13 = vld [vmem:[%s1023_s7 + $0xd0] sm:$0xff] }
  0x16   : > { %307 = vst [vmem:[%s229_s8 + $0x30] sm:$0xff] %v306_v6  ;;  %v322_v14 = vld [vmem:[%s1023_s7 + $0xe0] sm:$0xff]  ;;  %v324_v15 = vld [vmem:[%s1023_s7 + $0xf0] sm:$0xff] }
  0x17   : > { %309 = vst [vmem:[%s229_s8 + $0x38] sm:$0xff] %v308_v7 }
  0x18   : > { %311 = vst [vmem:[%s229_s8 + $0x40] sm:$0xff] %v310_v8 }
  0x19   : > { %313 = vst [vmem:[%s229_s8 + $0x48] sm:$0xff] %v312_v9 }
  0x1a   : > { %315 = vst [vmem:[%s229_s8 + $0x50] sm:$0xff] %v314_v10 }
  0x1b   : > { %317 = vst [vmem:[%s229_s8 + $0x58] sm:$0xff] %v316_v11 }
  0x1c   : > { %319 = vst [vmem:[%s229_s8 + $0x60] sm:$0xff] %v318_v12 }
  0x1d   : > { %321 = vst [vmem:[%s229_s8 + $0x68] sm:$0xff] %v320_v13 }
  0x1e   : > { %323 = vst [vmem:[%s229_s8 + $0x70] sm:$0xff] %v322_v14 }
  0x1f   : > { %325 = vst [vmem:[%s229_s8 + $0x78] sm:$0xff] %v324_v15 }
  0x20 PF: > { %p779_p6 = scmp.ge.s32.totalorder %s948_s22, 1  ;;  %p359_p7 = scmp.lt.s32.totalorder %s948_s22, 3 }
  0x22   : > { %p360_p8 = pnand %p779_p6, %p359_p7 }
  0x23   : > { %s366_s9 = sand.u32 (!%p360_p8), 1, %s932_s18   ;;  %s781_s14 = sshll.u32 (!%p360_p8), %s940_s20, 1 }
  0x24   : > { %363 = sbr.rel (%p360_p8) target bundleno = 211 (0xd3), region = 74  ;;  %s780_s10 = sshll.u32 (!%p360_p8), %s366_s9, 7 }
  0x25   : > { %s1044_s11 = scalar_lea.vmem (!%p360_p8), [#allocation3], %s780_s10  ;;  %p431_p9 = scmp.lt.s32.totalorder (!%p360_p8), %s781_s14, 3 }
  0x29   : > { %v845_v16 = vld [vmem:[%s1044_s11 + $0x70] sm:$0xf]  ;;  %v869_v17 = vld [vmem:[%s1044_s11 + $0x74] sm:$0xf0]  ;;  %v868_v18 = vld [vmem:[%s1044_s11 + $0x74] sm:$0xf] }
  0x2a   : > { %v846_v19 = vor.u32 %v869_v17, %v845_v16  ;;  %v847_v20 = vld [vmem:[%s1044_s11 + $0x78] sm:$0xf0]  ;;  %v837_v21 = vld [vmem:[%s1044_s11 + $0x60] sm:$0xf]  ;;  %v867_v22 = vld [vmem:[%s1044_s11 + $0x64] sm:$0xf0] }
  0x2b   : > { %v850_v23 = vor.u32 %v868_v18, %v847_v20  ;;  %v866_v24 = vld [vmem:[%s1044_s11 + $0x64] sm:$0xf]  ;;  %v839_v25 = vld [vmem:[%s1044_s11 + $0x68] sm:$0xf0]  ;;  %v838_v26 = vor.u32 %v867_v22, %v837_v21  ;;  %v829_v28 = vld [vmem:[%s1044_s11 + $0x50] sm:$0xf] }
  0x2c   : > { %565 = vmatpush.bf16.msra.mxu0 %v846_v19  ;;  %v842_v27 = vor.u32 %v866_v24, %v839_v25  ;;  %v865_v29 = vld [vmem:[%s1044_s11 + $0x54] sm:$0xf0]  ;;  %v864_v30 = vld [vmem:[%s1044_s11 + $0x54] sm:$0xf]  ;;  %v831_v31 = vld [vmem:[%s1044_s11 + $0x58] sm:$0xf0] }
  0x2d   : > { %578 = vmatpush.bf16.msra.mxu1 %v850_v23  ;;  %v830_v32 = vor.u32 %v865_v29, %v829_v28  ;;  %v834_v33 = vor.u32 %v864_v30, %v831_v31  ;;  %v821_v34 = vld [vmem:[%s1044_s11 + $0x40] sm:$0xf]  ;;  %v863_v35 = vld [vmem:[%s1044_s11 + $0x44] sm:$0xf0]  ;;  %v862_v36 = vld [vmem:[%s1044_s11 + $0x44] sm:$0xf] }
  0x2e   : > { %v823_v37 = vld [vmem:[%s1044_s11 + $0x48] sm:$0xf0]  ;;  %v822_v38 = vor.u32 %v863_v35, %v821_v34  ;;  %v813_v40 = vld [vmem:[%s1044_s11 + $0x30] sm:$0xf]  ;;  %v861_v41 = vld [vmem:[%s1044_s11 + $0x34] sm:$0xf0] }
  0x2f   : > { %v826_v39 = vor.u32 %v862_v36, %v823_v37  ;;  %v860_v42 = vld [vmem:[%s1044_s11 + $0x34] sm:$0xf]  ;;  %v815_v43 = vld [vmem:[%s1044_s11 + $0x38] sm:$0xf0]  ;;  %v814_v44 = vor.u32 %v861_v41, %v813_v40  ;;  %v805_v46 = vld [vmem:[%s1044_s11 + $0x20] sm:$0xf] }
  0x30   : > { %566 = vmatpush.bf16.msra.mxu0 %v838_v26  ;;  %v818_v45 = vor.u32 %v860_v42, %v815_v43  ;;  %v859_v47 = vld [vmem:[%s1044_s11 + $0x24] sm:$0xf0]  ;;  %v858_v48 = vld [vmem:[%s1044_s11 + $0x24] sm:$0xf]  ;;  %v807_v49 = vld [vmem:[%s1044_s11 + $0x28] sm:$0xf0] }
  0x31   : > { %579 = vmatpush.bf16.msra.mxu1 %v842_v27  ;;  %v806_v50 = vor.u32 %v859_v47, %v805_v46  ;;  %v810_v51 = vor.u32 %v858_v48, %v807_v49  ;;  %v797_v52 = vld [vmem:[%s1044_s11 + $0x10] sm:$0xf]  ;;  %v857_v53 = vld [vmem:[%s1044_s11 + $0x14] sm:$0xf0]  ;;  %v856_v54 = vld [vmem:[%s1044_s11 + $0x14] sm:$0xf] }
  0x32   : > { %v799_v55 = vld [vmem:[%s1044_s11 + $0x18] sm:$0xf0]  ;;  %v798_v56 = vor.u32 %v857_v53, %v797_v52  ;;  %v789_v58 = vld [vmem:[%s1044_s11] sm:$0xf]  ;;  %v855_v59 = vld [vmem:[%s1044_s11 + $0x4] sm:$0xf0] }
  0x33   : > { %v802_v57 = vor.u32 %v856_v54, %v799_v55  ;;  %v854_v60 = vld [vmem:[%s1044_s11 + $0x4] sm:$0xf]  ;;  %v791_v61 = vld [vmem:[%s1044_s11 + $0x8] sm:$0xf0]  ;;  %v790_v62 = vor.u32 %v855_v59, %v789_v58  ;;  %v468_v0 = vld [vmem:[%s1109_s0] sm:$0xf] }
  0x34   : > { %567 = vmatpush.bf16.msra.mxu0 %v830_v32  ;;  %v794_v63 = vor.u32 %v854_v60, %v791_v61  ;;  %s1122_s14 = smov (!%p431_p9, %s781_s14), 3 }
  0x35   : > { %580 = vmatpush.bf16.msra.mxu1 %v834_v33  ;;  %s433_s17 = scalar_lea.vmem %s1111_s2, %s1122_s14  ;;  %s438_s25 = scalar_lea.vmem %s1112_s3, %s1122_s14 }
  0x36   : > { %v600_v1 = vld [vmem:[%s433_s17] sm:$0x3]  ;;  %s784_s27 = sshll.u32 %s1122_s14, 3 }
  0x37   : > { %v608_v2 = vld [vmem:[%s438_s25] sm:$0x3]  ;;  %v602_v3 = vperm.slane %v600_v1, 0  ;;  %v603_v4 = vperm.slane %v600_v1, 1  ;;  %s448_s30 = scalar_lea.vmem %s1113_s4, %s784_s27  ;;  %s458_s7 = scalar_lea.vmem %s1114_s5, %s784_s27 }
  0x38   : > { %568 = vmatpush.bf16.msra.mxu0 %v822_v38  ;;  %v610_v5 = vperm.slane %v608_v2, 0  ;;  %v611_v7 = vperm.slane %v608_v2, 1  ;;  %v616_v10 = vld [vmem:[%s448_s30] sm:$0xff]  ;;  %v617_v13 = vld [vmem:[%s448_s30 + $0x8] sm:$0xff] }
  0x39   : > { %581 = vmatpush.bf16.msra.mxu1 %v826_v39 }
  0x3c   : > { %569 = vmatpush.bf16.msra.mxu0 %v814_v44 }
  0x3d   : > { %582 = vmatpush.bf16.msra.mxu1 %v818_v45 }
  0x40   : > { %570 = vmatpush.bf16.msra.mxu0 %v806_v50 }
  0x41   : > { %583 = vmatpush.bf16.msra.mxu1 %v810_v51 }
  0x44   : > { %571 = vmatpush.bf16.msra.mxu0 %v798_v56 }
  0x45   : > { %584 = vmatpush.bf16.msra.mxu1 %v802_v57 }
  0x48   : > { %572 = vmatpush.bf16.msra.mxu0 %v790_v62 }
  0x49   : > { %585 = vmatpush.bf16.msra.mxu1 %v794_v63 }
  0x4b   : > { %573 = vmatmul.bf16.vlgmr.msra.gmra.mxu0 %v468_v0 }
  0x4c   : > { %586 = vmatmul.bf16.vlgmr.msra.gmra.mxu1 %v468_v0 }
  0xc8   : > { %v574_v6 = vpop.f32.mrf.mxu0 }
  0xc9   : > { %v606_v8 = vmul.f32 %v602_v3, %v574_v6  ;;  %v587_v9 = vpop.f32.mrf.mxu1 }
  0xca   : > { %v607_v11 = vmul.f32 %v603_v4, %v587_v9 }
  0xcb   : > { %v614_v12 = vadd.f32 %v610_v5, %v606_v8 }
  0xcc   : > { %v615_v14 = vadd.f32 %v611_v7, %v607_v11 }
  0xcd   : > { %v618_v15 = vadd.f32 %v616_v10, %v614_v12 }
  0xce   : > { %v619_v16 = vadd.f32 %v617_v13, %v615_v14 }
  0xcf   : > { %v620_v17 = vmax.f32 %v618_v15, 0.0 }
  0xd0   : > { %v621_v18 = vmax.f32 %v619_v16, 0.0  ;;  %v576_v19 = vpop.f32.mrf.mxu0 }
  0xd1   : > { %622 = vst [vmem:[%s458_s7] sm:$0xff] %v620_v17  ;;  %v589_v20 = vpop.f32.mrf.mxu1 }
  0xd2   : > { %623 = vst [vmem:[%s458_s7 + $0x8] sm:$0xff] %v621_v18 }
  0xd3 PF: > { %s15_s22 = sadd.s32 1, %s948_s22   ;;  %s1115_s18 = smov %s936_s19 }
  0xd4   : > { %p12_p10 = scmp.ge.s32.totalorder %s15_s22, 4   ;;  %s1116_s19 = smov %s1015_s26 }
  0xd5   : > { %s1117_s20 = smov %s944_s21  ;;  %s1118_s21 = smov %s1120_s23 }
  0xd6   :  { %14 = sbr.rel (!%p12_p10) target bundleno = 3 (0x3), region = 133 }

// kernel: swav_resnet_forward.58
= control target key start
LH: loop header
LB: loop body
LE: loop exit
PB: predicated region body
PF: predicated region fallthrough
CT: control target
= control target key end

     0   :  { %s667_s1 = inlined_call_operand.vmem [shape: bf16[512,128], index: 1, kind: input, shape index: {}]   ;;  %s668_s0 = inlined_call_operand.vmem [shape: bf16[8,512], index: 0, kind: input, shape index: {}]   ;;  %s669_s2 = inlined_call_operand.vmem [shape: f32[1,128], index: 2, kind: input, shape index: {}]   ;;  %s670_s3 = inlined_call_operand.vmem [shape: f32[1,128], index: 3, kind: input, shape index: {}]   ;;  %s671_s4 = inlined_call_operand.vmem [shape: f32[8,128], index: 4, kind: output, shape index: {}]  }
   0x1   :  { %v504_v0 = vld [vmem:[%s667_s1 + $0x38] sm:$0xff]  ;;  %v503_v4 = vld [vmem:[%s667_s1 + $0x30] sm:$0xff]  ;;  %v502_v8 = vld [vmem:[%s667_s1 + $0x28] sm:$0xff] }
   0x2   :  { %v512_v1 = vld [vmem:[%s667_s1 + $0x78] sm:$0xff]  ;;  %295 = vmatpush.bf16.msra.mxu0 %v504_v0  ;;  %v511_v5 = vld [vmem:[%s667_s1 + $0x70] sm:$0xff]  ;;  %v510_v9 = vld [vmem:[%s667_s1 + $0x68] sm:$0xff] }
   0x3   :  { %v520_v2 = vld [vmem:[%s667_s1 + $0xb8] sm:$0xff]  ;;  %308 = vmatpush.bf16.msra.mxu1 %v512_v1  ;;  %v519_v6 = vld [vmem:[%s667_s1 + $0xb0] sm:$0xff]  ;;  %v518_v10 = vld [vmem:[%s667_s1 + $0xa8] sm:$0xff] }
   0x4   :  { %v528_v3 = vld [vmem:[%s667_s1 + $0xf8] sm:$0xff]  ;;  %321 = vmatpush.bf16.msra.mxu2 %v520_v2  ;;  %v527_v7 = vld [vmem:[%s667_s1 + $0xf0] sm:$0xff]  ;;  %v526_v11 = vld [vmem:[%s667_s1 + $0xe8] sm:$0xff] }
   0x5   :  { %334 = vmatpush.bf16.msra.mxu3 %v528_v3  ;;  %v501_v12 = vld [vmem:[%s667_s1 + $0x20] sm:$0xff]  ;;  %v500_v16 = vld [vmem:[%s667_s1 + $0x18] sm:$0xff]  ;;  %v499_v20 = vld [vmem:[%s667_s1 + $0x10] sm:$0xff] }
   0x6   :  { %296 = vmatpush.bf16.msra.mxu0 %v503_v4  ;;  %v509_v13 = vld [vmem:[%s667_s1 + $0x60] sm:$0xff]  ;;  %v508_v17 = vld [vmem:[%s667_s1 + $0x58] sm:$0xff]  ;;  %v507_v21 = vld [vmem:[%s667_s1 + $0x50] sm:$0xff] }
   0x7   :  { %309 = vmatpush.bf16.msra.mxu1 %v511_v5  ;;  %v517_v14 = vld [vmem:[%s667_s1 + $0xa0] sm:$0xff]  ;;  %v516_v18 = vld [vmem:[%s667_s1 + $0x98] sm:$0xff]  ;;  %v515_v22 = vld [vmem:[%s667_s1 + $0x90] sm:$0xff] }
   0x8   :  { %322 = vmatpush.bf16.msra.mxu2 %v519_v6  ;;  %v525_v15 = vld [vmem:[%s667_s1 + $0xe0] sm:$0xff]  ;;  %v524_v19 = vld [vmem:[%s667_s1 + $0xd8] sm:$0xff]  ;;  %v523_v23 = vld [vmem:[%s667_s1 + $0xd0] sm:$0xff] }
   0x9   :  { %335 = vmatpush.bf16.msra.mxu3 %v527_v7  ;;  %v498_v24 = vld [vmem:[%s667_s1 + $0x8] sm:$0xff]  ;;  %v23_v26 = vld [vmem:[%s668_s0] sm:$0xff] }
   0xa   :  { %297 = vmatpush.bf16.msra.mxu0 %v502_v8  ;;  %v506_v25 = vld [vmem:[%s667_s1 + $0x48] sm:$0xff]  ;;  %v91_v30 = vunpack.c.l.b16 %v23_v26  ;;  %v92_v31 = vunpack.c.h.b16 %v23_v26  ;;  %v497_v32 = vld [vmem:[%s667_s1] sm:$0xff] }
   0xb   :  { %310 = vmatpush.bf16.msra.mxu1 %v510_v9  ;;  %v514_v27 = vld [vmem:[%s667_s1 + $0x88] sm:$0xff]  ;;  %v505_v33 = vld [vmem:[%s667_s1 + $0x40] sm:$0xff] }
   0xc   :  { %323 = vmatpush.bf16.msra.mxu2 %v518_v10  ;;  %v522_v28 = vld [vmem:[%s667_s1 + $0xc8] sm:$0xff]  ;;  %v513_v36 = vld [vmem:[%s667_s1 + $0x80] sm:$0xff]  ;;  %v95_v38 = vpack.c.b16 %v91_v30, %v91_v30  ;;  %v96_v39 = vpack.c.b16 %v92_v31, %v92_v31 }
   0xd   :  { %336 = vmatpush.bf16.msra.mxu3 %v526_v11  ;;  %v24_v29 = vld [vmem:[%s668_s0 + $0x8] sm:$0xff]  ;;  %v521_v37 = vld [vmem:[%s667_s1 + $0xc0] sm:$0xff] }
   0xe   :  { %298 = vmatpush.bf16.msra.mxu0 %v501_v12  ;;  %v93_v34 = vunpack.c.l.b16 %v24_v29  ;;  %v94_v35 = vunpack.c.h.b16 %v24_v29  ;;  %v529_v48 = vld [vmem:[%s669_s2] ss:$0 sm:$0xff] }
   0xf   :  { %311 = vmatpush.bf16.msra.mxu1 %v509_v13  ;;  %v530_v52 = vld [vmem:[%s670_s3] ss:$0 sm:$0xff] }
  0x10   :  { %324 = vmatpush.bf16.msra.mxu2 %v517_v14  ;;  %v97_v40 = vpack.c.b16 %v93_v34, %v93_v34  ;;  %v98_v41 = vpack.c.b16 %v94_v35, %v94_v35 }
  0x11   :  { %337 = vmatpush.bf16.msra.mxu3 %v525_v15 }
  0x12   :  { %299 = vmatpush.bf16.msra.mxu0 %v500_v16 }
  0x13   :  { %312 = vmatpush.bf16.msra.mxu1 %v508_v17 }
  0x14   :  { %325 = vmatpush.bf16.msra.mxu2 %v516_v18 }
  0x15   :  { %338 = vmatpush.bf16.msra.mxu3 %v524_v19 }
  0x16   :  { %300 = vmatpush.bf16.msra.mxu0 %v499_v20 }
  0x17   :  { %313 = vmatpush.bf16.msra.mxu1 %v507_v21 }
  0x18   :  { %326 = vmatpush.bf16.msra.mxu2 %v515_v22 }
  0x19   :  { %339 = vmatpush.bf16.msra.mxu3 %v523_v23 }
  0x1a   :  { %301 = vmatpush.bf16.msra.mxu0 %v498_v24 }
  0x1b   :  { %314 = vmatpush.bf16.msra.mxu1 %v506_v25 }
  0x1c   :  { %327 = vmatpush.bf16.msra.mxu2 %v514_v27 }
  0x1d   :  { %340 = vmatpush.bf16.msra.mxu3 %v522_v28 }
  0x1e   :  { %302 = vmatpush.bf16.msra.mxu0 %v497_v32 }
  0x1f   :  { %315 = vmatpush.bf16.msra.mxu1 %v505_v33 }
  0x20   :  { %328 = vmatpush.bf16.msra.mxu2 %v513_v36 }
  0x21   :  { %341 = vmatpush.bf16.msra.mxu3 %v521_v37  ;;  %303 = vmatmul.bf16.vlgmr.msra.gmra.mxu0 %v95_v38 }
  0x22   :  { %316 = vmatmul.bf16.vlgmr.msra.gmra.mxu1 %v96_v39 }
  0x23   :  { %329 = vmatmul.bf16.vlgmr.msra.gmra.mxu2 %v97_v40 }
  0x24   :  { %342 = vmatmul.bf16.vlgmr.msra.gmra.mxu3 %v98_v41 }
  0x9e   :  { %v304_v42 = vpop.f32.mrf.mxu0 }
  0x9f   :  { %v317_v43 = vpop.f32.mrf.mxu1 }
  0xa0   :  { %v318_v44 = vadd.f32 %v317_v43, %v304_v42 }
  0xa6   :  { %v330_v45 = vpop.f32.mrf.mxu2  ;;  %v306_v49 = vpop.f32.mrf.mxu0 }
  0xa7   :  { %v343_v46 = vpop.f32.mrf.mxu3  ;;  %v331_v47 = vadd.f32 %v330_v45, %v318_v44  ;;  %v319_v50 = vpop.f32.mrf.mxu1 }
  0xa9   :  { %v344_v51 = vadd.f32 %v343_v46, %v331_v47 }
  0xab   :  { %v357_v53 = vmul.f32 %v529_v48, %v344_v51 }
  0xad   :  { %v362_v54 = vadd.f32 %v530_v52, %v357_v53 }
  0xae   :  { %v332_v55 = vpop.f32.mrf.mxu2 }
  0xaf   :  { %v345_v56 = vpop.f32.mrf.mxu3  ;;  %v363_v57 = vmax.f32 %v362_v54, 0.0 }
  0xb1   :  { %364 = vst [vmem:[%s671_s4] sm:$0xff] %v363_v57 }

// kernel: swav_resnet_forward.61
= control target key start
LH: loop header
LB: loop body
LE: loop exit
PB: predicated region body
PF: predicated region fallthrough
CT: control target
= control target key end

     0   :  { %s232_s0 = inlined_call_operand.vmem [shape: f32[2,4,512], index: 0, kind: input, shape index: {}]   ;;  %s233_s1 = inlined_call_operand.hbm [shape: f32[2,512], index: 1, kind: output, shape index: {}]  }
   0x1   :  { %v9_v0 = vld [vmem:[%s232_s0] sm:$0xff]  ;;  %v10_v1 = vld [vmem:[%s232_s0 + $0x8] sm:$0xff]  ;;  %v11_v2 = vld [vmem:[%s232_s0 + $0x10] sm:$0xff] }
   0x2   :  { %17 = vst [vmem:[#allocation1] ss:$2 sm:$0xff] %v9_v0  ;;  %v12_v3 = vld [vmem:[%s232_s0 + $0x18] sm:$0xff] }
   0x3   :  { %6 = vsyncpa [#allocation3], 0  ;;  %19 = vst [vmem:[#allocation1 + $0x10] ss:$2 sm:$0xff] %v10_v1  ;;  %vm40_vm0 = vcmask 1043456   ;;  %v195_v12 = vmov 4.0  }
   0x4   :  { %25 = vst [vmem:[#allocation1 + $0x20] ss:$2 sm:$0xff] %v11_v2  ;;  %167 = vrcp.f32 %v195_v12  ;;  %vm126_vm2 = vcmask 1041408   ;;  %vm128_vm3 = vcmask 1045508   ;;  %vm139_vm4 = vcmask 1041409   ;;  %s196_s0 = smov [#allocation2]  }
   0x5   :  { %27 = vst [vmem:[#allocation1 + $0x30] ss:$2 sm:$0xff] %v12_v3  ;;  %vm141_vm5 = vcmask 1043459   ;;  %vm143_vm6 = vcmask 1045509   ;;  %s154_s14 = sshll.u32 %s196_s0, 4  ;;  %s156_s17 = sshll.u32 %s233_s1, 4  ;;  %s155_s14 = int_to_ptr.vmem [resolvable:$true] %s154_s14  ;;  %s157_s17 = int_to_ptr.hbm [resolvable:$true] %s156_s17 }
   0x6   :  { %vm145_vm7 = vcmask 1047559  }
   0x9   :  { %v20_v4 = vld.sshfl [vmem:[#allocation1] sm:$0xff pattern:$0x75316420]  ;;  %v21_v5 = vld.sshfl [vmem:[#allocation1 + $0x8] sm:$0xff pattern:$0x75316420] }
   0xa   :  { %v22_v6 = vld.sshfl [vmem:[#allocation1 + $0x10] sm:$0xff pattern:$0x75316420]  ;;  %v23_v7 = vld.sshfl [vmem:[#allocation1 + $0x18] sm:$0xff pattern:$0x75316420]  ;;  %v168_v33 = vpop.eup %167 }
   0xb   :  { %v28_v8 = vld.sshfl [vmem:[#allocation1 + $0x20] sm:$0xff pattern:$0x75316420]  ;;  %v29_v9 = vld.sshfl [vmem:[#allocation1 + $0x28] sm:$0xff pattern:$0x75316420]  ;;  %vm102_vm1 = vweird.f32 %v168_v33 }
   0xc   :  { %v30_v10 = vld.sshfl [vmem:[#allocation1 + $0x30] sm:$0xff pattern:$0x75316420]  ;;  %v31_v11 = vld.sshfl [vmem:[#allocation1 + $0x38] sm:$0xff pattern:$0x75316420] }
   0xd   :  { %v41_v13 = vsel %vm40_vm0, %v20_v4, 0.0  ;;  %v48_v14 = vsel %vm40_vm0, %v21_v5, 0.0  ;;  %v55_v15 = vsel %vm40_vm0, %v22_v6, 0.0  ;;  %v62_v16 = vsel %vm40_vm0, %v23_v7, 0.0 }
   0xe   :  { %v42_v17 = vrot.slane %v41_v13, 4  ;;  %v49_v18 = vrot.slane %v48_v14, 4  ;;  %v56_v19 = vrot.slane %v55_v15, 4  ;;  %v63_v20 = vrot.slane %v62_v16, 4 }
   0xf   :  { %v69_v21 = vsel %vm40_vm0, %v28_v8, 0.0  ;;  %v76_v22 = vsel %vm40_vm0, %v29_v9, 0.0  ;;  %v83_v23 = vsel %vm40_vm0, %v30_v10, 0.0  ;;  %v90_v24 = vsel %vm40_vm0, %v31_v11, 0.0 }
  0x10   :  { %v43_v25 = vadd.f32 %v42_v17, %v41_v13  ;;  %v50_v26 = vadd.f32 %v49_v18, %v48_v14  ;;  %v57_v27 = vadd.f32 %v56_v19, %v55_v15  ;;  %v64_v28 = vadd.f32 %v63_v20, %v62_v16 }
  0x11   :  { %v70_v29 = vrot.slane %v69_v21, 4  ;;  %v77_v30 = vrot.slane %v76_v22, 4  ;;  %v84_v31 = vrot.slane %v83_v23, 4  ;;  %v91_v32 = vrot.slane %v90_v24, 4 }
  0x12   :  { %v51_v34 = vrot.slane %v50_v26, 2  ;;  %v58_v35 = vrot.slane %v57_v27, 2  ;;  %v65_v36 = vrot.slane %v64_v28, 2  ;;  %v44_v41 = vrot.slane %v43_v25, 2 }
  0x13   :  { %v71_v37 = vadd.f32 %v70_v29, %v69_v21  ;;  %v78_v38 = vadd.f32 %v77_v30, %v76_v22  ;;  %v85_v39 = vadd.f32 %v84_v31, %v83_v23  ;;  %v92_v40 = vadd.f32 %v91_v32, %v90_v24 }
  0x14   :  { %v52_v46 = vadd.f32 %v51_v34, %v50_v26  ;;  %v59_v47 = vadd.f32 %v58_v35, %v57_v27  ;;  %v66_v48 = vadd.f32 %v65_v36, %v64_v28  ;;  %v45_v52 = vadd.f32 %v44_v41, %v43_v25 }
  0x15   :  { %v79_v42 = vrot.slane %v78_v38, 2  ;;  %v86_v43 = vrot.slane %v85_v39, 2  ;;  %v93_v44 = vrot.slane %v92_v40, 2  ;;  %v72_v45 = vrot.slane %v71_v37, 2 }
  0x16   :  { %v98_v54 = vmul.f32 4.0, %v168_v33  ;;  %v53_v55 = vrot.slane %v52_v46, 1  ;;  %v60_v56 = vrot.slane %v59_v47, 1  ;;  %v67_v57 = vrot.slane %v66_v48, 1 }
  0x17   :  { %v80_v49 = vadd.f32 %v79_v42, %v78_v38  ;;  %v87_v50 = vadd.f32 %v86_v43, %v85_v39  ;;  %v94_v51 = vadd.f32 %v93_v44, %v92_v40  ;;  %v73_v53 = vadd.f32 %v72_v45, %v71_v37 }
  0x18   :  { %v99_v61 = vsub.f32 1.0, %v98_v54  ;;  %v46_v62 = vrot.slane %v45_v52, 1  ;;  %v54_v1 = vadd.f32 %v53_v55, %v52_v46  ;;  %v61_v2 = vadd.f32 %v60_v56, %v59_v47 }
  0x19   :  { %v81_v58 = vrot.slane %v80_v49, 1  ;;  %v88_v59 = vrot.slane %v87_v50, 1  ;;  %v95_v60 = vrot.slane %v94_v51, 1  ;;  %v74_v63 = vrot.slane %v73_v53, 1 }
  0x1a   :  { %v100_v0 = vmul.f32 %v168_v33, %v99_v61  ;;  %v68_v3 = vadd.f32 %v67_v57, %v66_v48  ;;  %v47_v8 = vadd.f32 %v46_v62, %v45_v52 }
  0x1b   :  { %v82_v4 = vadd.f32 %v81_v58, %v80_v49  ;;  %v89_v5 = vadd.f32 %v88_v59, %v87_v50  ;;  %v96_v6 = vadd.f32 %v95_v60, %v94_v51  ;;  %v75_v9 = vadd.f32 %v74_v63, %v73_v53 }
  0x1c   :  { %v101_v7 = vadd.f32 %v168_v33, %v100_v0 }
  0x1e   :  { %v103_v10 = vsel %vm102_vm1, %v168_v33, %v101_v7 }
  0x1f   :  { %v105_v11 = vmul.f32 %v103_v10, %v54_v1  ;;  %v106_v12 = vmul.f32 %v103_v10, %v61_v2  ;;  %v107_v13 = vmul.f32 %v103_v10, %v68_v3  ;;  %v109_v14 = vmul.f32 %v103_v10, %v82_v4 }
  0x20   :  { %v110_v15 = vmul.f32 %v103_v10, %v89_v5  ;;  %v111_v16 = vmul.f32 %v103_v10, %v96_v6  ;;  %v104_v17 = vmul.f32 %v103_v10, %v47_v8  ;;  %v108_v21 = vmul.f32 %v103_v10, %v75_v9 }
  0x21   :  { %v120_v18 = vrot.slane %v105_v11, 6  ;;  %v121_v19 = vrot.slane %v106_v12, 4  ;;  %v122_v20 = vrot.slane %v107_v13, 2  ;;  %v123_v22 = vrot.slane %v109_v14, 6 }
  0x22   :  { %v124_v23 = vrot.slane %v110_v15, 4  ;;  %v125_v24 = vrot.slane %v111_v16, 2 }
  0x23   :  { %v127_v25 = vsel %vm126_vm2, %v104_v17, %v120_v18  ;;  %v129_v26 = vsel %vm128_vm3, %v121_v19, %v122_v20  ;;  %v131_v27 = vsel %vm126_vm2, %v108_v21, %v123_v22 }
  0x24   :  { %v132_v28 = vsel %vm128_vm3, %v124_v23, %v125_v24  ;;  %v130_v31 = vsel %vm40_vm0, %v127_v25, %v129_v26 }
  0x25   :  { %v133_v29 = vsel %vm40_vm0, %v131_v27, %v132_v28 }
  0x26   :  { %v138_v30 = vrot.slane %v133_v29, 7 }
  0x28   :  { %v140_v32 = vsel %vm139_vm4, %v138_v30, %v130_v31 }
  0x29   :  { %v142_v33 = vsel %vm141_vm5, %v138_v30, %v140_v32 }
  0x2a   :  { %v144_v34 = vsel %vm143_vm6, %v138_v30, %v142_v33 }
  0x2b   :  { %v146_v35 = vsel %vm145_vm7, %v138_v30, %v144_v34 }
  0x2c   :  { %148 = vst [vmem:[#allocation2] sm:$0xff] %v146_v35 }
  0x2d   :  { %159 = dma.vmem_to_hbm [thread:$0]  %s155_s14, 128, %s157_s17, [#allocation3]  }
  0x2e   :  { %193 = dma.done.wait [#allocation3], 128  }
  0x2f   :  { %194 = vsyncadd [#allocation3], 4294967168 }
  0x30   :  { %164 = vsyncpa [#allocation3], 1 }

</bundles_post_ra>
